<compile_context>
chip_gen: v7x
topology: tpu7x:2x2x1
jax: 0.10.0
libtpu: 0.0.40
codegen_flags: <defaults>
</compile_context>

<pallas_src>
import numpy as np

import jax
import jax.numpy as jnp
from jax.experimental import pallas as pl
from jax.experimental.pallas import tpu as pltpu


# ----------------------------------------------------------------------------
# Fused whole-network kernel
# ----------------------------------------------------------------------------
def _net_kernel(x1_ref,
                r1_ref, m1a_ref, m1b_ref, m1c_ref, b1_ref,
                r2_ref, m2a_ref, m2b_ref, m2c_ref, b2_ref,
                r3_ref, m3a_ref, m3b_ref, m3c_ref, b3_ref,
                sfc_ref, w1_ref, bfc1_ref, w2_ref, bfc2_ref,
                out_ref):
    def conv_block(x, r_ref, m_refs, b_ref):
        # out[b*Ho+ho, wo*Cout+co] = sum_kh (R_kh @ x) @ M_kh   (then bias+relu)
        acc = jnp.zeros((r_ref.shape[1], m_refs[0].shape[1]), jnp.float32)
        for kh in range(3):
            y = jnp.dot(r_ref[kh], x, preferred_element_type=jnp.float32)
            acc = acc + jnp.dot(y, m_refs[kh][...],
                                preferred_element_type=jnp.float32)
        return jnp.maximum(acc + b_ref[...], 0.0)

    a1 = conv_block(x1_ref[...], r1_ref, (m1a_ref, m1b_ref, m1c_ref), b1_ref)  # [B*16, 512]
    a2 = conv_block(a1, r2_ref, (m2a_ref, m2b_ref, m2c_ref), b2_ref)           # [B*8, 512]
    a3 = conv_block(a2, r3_ref, (m3a_ref, m3b_ref, m3c_ref), b3_ref)           # [B*4, 512]

    # fc1: torch.flatten order handled by the row-permuted fc1 weight (w1_ref).
    # out_fc1[b] = sum_h (S_h @ a3) @ W1p[h*512:(h+1)*512]
    bsz = sfc_ref.shape[1]
    chunk = w1_ref.shape[0] // 4
    fc1 = jnp.zeros((bsz, w1_ref.shape[1]), jnp.float32)
    for h in range(4):
        t = jnp.dot(sfc_ref[h], a3, preferred_element_type=jnp.float32)        # [B, 512]
        fc1 = fc1 + jnp.dot(t, w1_ref[pl.ds(h * chunk, chunk), :],
                            preferred_element_type=jnp.float32)                # [B, 128]
    fc1 = jnp.maximum(fc1 + bfc1_ref[...], 0.0)

    # fc2 + numerically stable log_softmax
    logits = jnp.dot(fc1, w2_ref[...], preferred_element_type=jnp.float32) + bfc2_ref[...]
    m = jnp.max(logits, axis=-1, keepdims=True)
    s = logits - m
    lse = jnp.log(jnp.sum(jnp.exp(s), axis=-1, keepdims=True))
    out_ref[...] = (s - lse).astype(out_ref.dtype)


def _full_block_spec(a):
    nd = a.ndim
    return pl.BlockSpec(tuple(a.shape), lambda *_: (0,) * nd)


# ----------------------------------------------------------------------------
# One-time parameter re-packing (done at init, NOT per forward call)
# ----------------------------------------------------------------------------
def prepare_params(params, batch):
    B = batch

    def sel_rows(H, Ho):
        # R_kh[b*Ho+ho, b*H+h] = 1 iff h == 2*ho + kh - 1 (in range)
        R = np.zeros((3, B * Ho, B * H), np.float32)
        for kh in range(3):
            for b in range(B):
                for ho in range(Ho):
                    h = 2 * ho + kh - 1
                    if 0 <= h < H:
                        R[kh, b * Ho + ho, b * H + h] = 1.0
        return jnp.asarray(R)

    def sel_cols_weights(w_conv, W, Wo):
        # M_kh[w*Cin+ci, wo*Cout+co] = conv_w[co, ci, kh, kw] with w == 2*wo+kw-1
        w = np.asarray(w_conv)                      # [Cout, Cin, 3, 3]
        Cout, Cin = w.shape[0], w.shape[1]
        Ms = []
        for kh in range(3):
            M = np.zeros((W * Cin, Wo * Cout), np.float32)
            for wo in range(Wo):
                for kw in range(3):
                    wc = 2 * wo + kw - 1
                    if 0 <= wc < W:
                        M[wc * Cin:(wc + 1) * Cin, wo * Cout:(wo + 1) * Cout] = w[:, :, kh, kw].T
            Ms.append(jnp.asarray(M))
        return Ms

    def bias_row(b, Wo):
        b = np.asarray(b).reshape(1, -1)
        return jnp.asarray(np.tile(b, (1, Wo)))     # [1, Wo*Cout], idx = wo*Cout+co

    r1 = sel_rows(32, 16)
    m1 = sel_cols_weights(params["conv1_w"], 32, 16)
    b1 = bias_row(params["conv1_b"], 16)
    r2 = sel_rows(16, 8)
    m2 = sel_cols_weights(params["conv2_w"], 16, 8)
    b2 = bias_row(params["conv2_b"], 8)
    r3 = sel_rows(8, 4)
    m3 = sel_cols_weights(params["conv3_w"], 8, 4)
    b3 = bias_row(params["conv3_b"], 4)

    # fc1 row selection over h (conv3 output rows are (b, h)):
    S = np.zeros((4, B, B * 4), np.float32)
    for h in range(4):
        for b in range(B):
            S[h, b, b * 4 + h] = 1.0
    sfc = jnp.asarray(S)

    # Permute fc1 weight rows from torch flatten order f = c*16 + h*4 + w
    # to the kernel's activation order g = h*512 + w*128 + c.
    g = np.arange(2048)
    perm = (g % 128) * 16 + (g // 512) * 4 + ((g // 128) % 4)
    w1p = jnp.asarray(np.asarray(params["fc1_w"])[perm, :])
    bfc1 = jnp.asarray(np.asarray(params["fc1_b"]).reshape(1, -1))
    w2 = params["fc2_w"]
    bfc2 = params["fc2_b"].reshape(1, -1)

    return (r1, *m1, b1, r2, *m2, b2, r3, *m3, b3, sfc, w1p, bfc1, w2, bfc2)


# ----------------------------------------------------------------------------
# Forward pass: ONE fused pallas_call
# ----------------------------------------------------------------------------
def net_forward(x, prep):
    B = x.shape[0]
    # NCHW with Cin=1: rows=(b,h), lanes=w.  Free reshape, no transpose.
    x1 = x.reshape(B * 32, 32)
    args = (x1,) + tuple(prep)

    flops = 2 * (
        3 * ((B * 16) * (B * 32) * 32 + (B * 16) * 32 * 512)      # conv1
        + 3 * ((B * 8) * (B * 16) * 512 + (B * 8) * 512 * 512)    # conv2
        + 3 * ((B * 4) * (B * 8) * 512 + (B * 4) * 512 * 512)     # conv3
        + 4 * (B * (B * 4) * 512 + B * 512 * 128)                 # fc1
        + B * 128 * 10)                                           # fc2
    bytes_accessed = sum(int(np.prod(a.shape)) * 4 for a in args) + B * 10 * 4

    return pl.pallas_call(
        _net_kernel,
        out_shape=jax.ShapeDtypeStruct((B, 10), jnp.float32),
        in_specs=[_full_block_spec(a) for a in args],
        out_specs=pl.BlockSpec((B, 10), lambda *_: (0, 0)),
        compiler_params=pltpu.CompilerParams(vmem_limit_bytes=32 * 1024 * 1024),
        cost_estimate=pl.CostEstimate(flops=flops, transcendentals=B * 16,
                                      bytes_accessed=bytes_accessed),
    )(*args)


# ----------------------------------------------------------------------------
# Pure-jnp reference (same math, no Pallas) for the correctness check.
# ----------------------------------------------------------------------------
def _im2col(x, k=3, s=2, p=1):
    B, C, H, W = x.shape
    xp = jnp.pad(x, ((0, 0), (0, 0), (p, p), (p, p)))
    Ho = (H + 2 * p - k) // s + 1
    Wo = (W + 2 * p - k) // s + 1
    cols = []
    for i in range(k):
        for j in range(k):
            cols.append(xp[:, :, i:i + s * Ho:s, j:j + s * Wo:s])  # [B,C,Ho,Wo]
    patches = jnp.stack(cols, axis=2)                 # [B, C, k*k, Ho, Wo]
    patches = patches.transpose(0, 3, 4, 1, 2)        # [B, Ho, Wo, C, k*k]
    patches = patches.reshape(B * Ho * Wo, C * k * k)
    return patches, Ho, Wo


def net_forward_ref(x, params):
    def conv_ref(x, w, b):
        B, Cin, H, W = x.shape
        Cout = w.shape[0]
        patches, Ho, Wo = _im2col(x)
        out = patches @ w.reshape(Cout, Cin * 9).T + b[None, :]
        out = jnp.maximum(out, 0.0)
        return out.reshape(B, Ho, Wo, Cout).transpose(0, 3, 1, 2)

    x = conv_ref(x, params["conv1_w"], params["conv1_b"])
    x = conv_ref(x, params["conv2_w"], params["conv2_b"])
    x = conv_ref(x, params["conv3_w"], params["conv3_b"])
    x = x.reshape(x.shape[0], -1)
    x = jnp.maximum(x @ params["fc1_w"] + params["fc1_b"], 0.0)
    logits = x @ params["fc2_w"] + params["fc2_b"]
    return jax.nn.log_softmax(logits, axis=1)


def init_params(key):
    ks = jax.random.split(key, 10)
    scale = 0.05
    return {
        "conv1_w": scale * jax.random.normal(ks[0], (32, 1, 3, 3), jnp.float32),
        "conv1_b": scale * jax.random.normal(ks[1], (32,), jnp.float32),
        "conv2_w": scale * jax.random.normal(ks[2], (64, 32, 3, 3), jnp.float32),
        "conv2_b": scale * jax.random.normal(ks[3], (64,), jnp.float32),
        "conv3_w": scale * jax.random.normal(ks[4], (128, 64, 3, 3), jnp.float32),
        "conv3_b": scale * jax.random.normal(ks[5], (128,), jnp.float32),
        # fc weights stored as [in, out] (transposed vs. torch's [out, in])
        "fc1_w": scale * jax.random.normal(ks[6], (2048, 128), jnp.float32),
        "fc1_b": scale * jax.random.normal(ks[7], (128,), jnp.float32),
        "fc2_w": scale * jax.random.normal(ks[8], (128, 10), jnp.float32),
        "fc2_b": scale * jax.random.normal(ks[9], (10,), jnp.float32),
    }


if __name__ == "__main__":
    key = jax.random.PRNGKey(0)
    kx, kp = jax.random.split(key)
    params = init_params(kp)

    # Input: [B, C, H, W] = [2, 1, 32, 32]  (fc1's 2048 = 128*4*4 implies 32x32)
    x = jax.random.normal(kx, (2, 1, 32, 32), jnp.float32)

    prep = prepare_params(params, batch=2)   # one-time init-side repacking

    fwd = jax.jit(net_forward)
    out = jax.block_until_ready(fwd(x, prep))

    ref = net_forward_ref(x, params)
    assert out.shape == (2, 10)
    assert bool(jnp.all(jnp.isfinite(out)))
    assert jnp.allclose(out, ref, atol=1e-4, rtol=1e-4), float(jnp.max(jnp.abs(out - ref)))

    print("KERNEL_OK")
</pallas_src>

<mosaic_0001>
module attributes {stable_mosaic.version = 11 : i64} {
  func.func @_net_kernel(%arg0: memref<64x32xf32, #tpu.memory_space<vmem>>, %arg1: memref<3x32x64xf32, #tpu.memory_space<vmem>>, %arg2: memref<32x512xf32, #tpu.memory_space<vmem>>, %arg3: memref<32x512xf32, #tpu.memory_space<vmem>>, %arg4: memref<32x512xf32, #tpu.memory_space<vmem>>, %arg5: memref<1x512xf32, #tpu.memory_space<vmem>>, %arg6: memref<3x16x32xf32, #tpu.memory_space<vmem>>, %arg7: memref<512x512xf32, #tpu.memory_space<vmem>>, %arg8: memref<512x512xf32, #tpu.memory_space<vmem>>, %arg9: memref<512x512xf32, #tpu.memory_space<vmem>>, %arg10: memref<1x512xf32, #tpu.memory_space<vmem>>, %arg11: memref<3x8x16xf32, #tpu.memory_space<vmem>>, %arg12: memref<512x512xf32, #tpu.memory_space<vmem>>, %arg13: memref<512x512xf32, #tpu.memory_space<vmem>>, %arg14: memref<512x512xf32, #tpu.memory_space<vmem>>, %arg15: memref<1x512xf32, #tpu.memory_space<vmem>>, %arg16: memref<4x2x8xf32, #tpu.memory_space<vmem>>, %arg17: memref<2048x128xf32, #tpu.memory_space<vmem>>, %arg18: memref<1x128xf32, #tpu.memory_space<vmem>>, %arg19: memref<128x10xf32, #tpu.memory_space<vmem>>, %arg20: memref<1x10xf32, #tpu.memory_space<vmem>>, %arg21: memref<2x10xf32, #tpu.memory_space<vmem>>) attributes {dimension_semantics = [], scalar_prefetch = 0 : i64, scratch_operands = 0 : i64, tpu.core_type = #tpu.core_type<tc>} {
    %c0 = arith.constant 0 : index
    %c0_0 = arith.constant 0 : index
    %0 = vector.load %arg0[%c0, %c0_0] : memref<64x32xf32, #tpu.memory_space<vmem>>, vector<64x32xf32>
    %cst = arith.constant 0.000000e+00 : f32
    %1 = vector.broadcast %cst : f32 to vector<32x512xf32>
    %c0_1 = arith.constant 0 : index
    %c0_2 = arith.constant 0 : index
    %c0_3 = arith.constant 0 : index
    %2 = vector.load %arg1[%c0_1, %c0_2, %c0_3] : memref<3x32x64xf32, #tpu.memory_space<vmem>>, vector<1x32x64xf32>
    %3 = vector.shape_cast %2 : vector<1x32x64xf32> to vector<32x64xf32>
    %cst_4 = arith.constant dense<0.000000e+00> : vector<32x32xf32>
    %4 = tpu.matmul %3, %0, %cst_4 {dimension_numbers = #tpu.dot_dimension_numbers<[1], [0], [0], [1], [0, 0, 1, 1], [], []>} : vector<32x64xf32>, vector<64x32xf32>, vector<32x32xf32> -> vector<32x32xf32>
    %c0_5 = arith.constant 0 : index
    %c0_6 = arith.constant 0 : index
    %5 = vector.load %arg2[%c0_5, %c0_6] : memref<32x512xf32, #tpu.memory_space<vmem>>, vector<32x512xf32>
    %cst_7 = arith.constant dense<0.000000e+00> : vector<32x512xf32>
    %6 = tpu.matmul %4, %5, %cst_7 {dimension_numbers = #tpu.dot_dimension_numbers<[1], [0], [0], [1], [0, 0, 1, 1], [], []>} : vector<32x32xf32>, vector<32x512xf32>, vector<32x512xf32> -> vector<32x512xf32>
    %7 = arith.addf %1, %6 : vector<32x512xf32>
    %c1 = arith.constant 1 : index
    %c0_8 = arith.constant 0 : index
    %c0_9 = arith.constant 0 : index
    %8 = vector.load %arg1[%c1, %c0_8, %c0_9] : memref<3x32x64xf32, #tpu.memory_space<vmem>>, vector<1x32x64xf32>
    %9 = vector.shape_cast %8 : vector<1x32x64xf32> to vector<32x64xf32>
    %cst_10 = arith.constant dense<0.000000e+00> : vector<32x32xf32>
    %10 = tpu.matmul %9, %0, %cst_10 {dimension_numbers = #tpu.dot_dimension_numbers<[1], [0], [0], [1], [0, 0, 1, 1], [], []>} : vector<32x64xf32>, vector<64x32xf32>, vector<32x32xf32> -> vector<32x32xf32>
    %c0_11 = arith.constant 0 : index
    %c0_12 = arith.constant 0 : index
    %11 = vector.load %arg3[%c0_11, %c0_12] : memref<32x512xf32, #tpu.memory_space<vmem>>, vector<32x512xf32>
    %cst_13 = arith.constant dense<0.000000e+00> : vector<32x512xf32>
    %12 = tpu.matmul %10, %11, %cst_13 {dimension_numbers = #tpu.dot_dimension_numbers<[1], [0], [0], [1], [0, 0, 1, 1], [], []>} : vector<32x32xf32>, vector<32x512xf32>, vector<32x512xf32> -> vector<32x512xf32>
    %13 = arith.addf %7, %12 : vector<32x512xf32>
    %c2 = arith.constant 2 : index
    %c0_14 = arith.constant 0 : index
    %c0_15 = arith.constant 0 : index
    %14 = vector.load %arg1[%c2, %c0_14, %c0_15] : memref<3x32x64xf32, #tpu.memory_space<vmem>>, vector<1x32x64xf32>
    %15 = vector.shape_cast %14 : vector<1x32x64xf32> to vector<32x64xf32>
    %cst_16 = arith.constant dense<0.000000e+00> : vector<32x32xf32>
    %16 = tpu.matmul %15, %0, %cst_16 {dimension_numbers = #tpu.dot_dimension_numbers<[1], [0], [0], [1], [0, 0, 1, 1], [], []>} : vector<32x64xf32>, vector<64x32xf32>, vector<32x32xf32> -> vector<32x32xf32>
    %c0_17 = arith.constant 0 : index
    %c0_18 = arith.constant 0 : index
    %17 = vector.load %arg4[%c0_17, %c0_18] : memref<32x512xf32, #tpu.memory_space<vmem>>, vector<32x512xf32>
    %cst_19 = arith.constant dense<0.000000e+00> : vector<32x512xf32>
    %18 = tpu.matmul %16, %17, %cst_19 {dimension_numbers = #tpu.dot_dimension_numbers<[1], [0], [0], [1], [0, 0, 1, 1], [], []>} : vector<32x32xf32>, vector<32x512xf32>, vector<32x512xf32> -> vector<32x512xf32>
    %19 = arith.addf %13, %18 : vector<32x512xf32>
    %c0_20 = arith.constant 0 : index
    %c0_21 = arith.constant 0 : index
    %20 = vector.load %arg5[%c0_20, %c0_21] : memref<1x512xf32, #tpu.memory_space<vmem>>, vector<1x512xf32>
    %21 = vector.broadcast %20 : vector<1x512xf32> to vector<32x512xf32>
    %22 = arith.addf %19, %21 : vector<32x512xf32>
    %cst_22 = arith.constant 0.000000e+00 : f32
    %23 = vector.broadcast %cst_22 : f32 to vector<32x512xf32>
    %24 = arith.maximumf %22, %23 : vector<32x512xf32>
    %cst_23 = arith.constant 0.000000e+00 : f32
    %25 = vector.broadcast %cst_23 : f32 to vector<16x512xf32>
    %c0_24 = arith.constant 0 : index
    %c0_25 = arith.constant 0 : index
    %c0_26 = arith.constant 0 : index
    %26 = vector.load %arg6[%c0_24, %c0_25, %c0_26] : memref<3x16x32xf32, #tpu.memory_space<vmem>>, vector<1x16x32xf32>
    %27 = vector.shape_cast %26 : vector<1x16x32xf32> to vector<16x32xf32>
    %cst_27 = arith.constant dense<0.000000e+00> : vector<16x512xf32>
    %28 = tpu.matmul %27, %24, %cst_27 {dimension_numbers = #tpu.dot_dimension_numbers<[1], [0], [0], [1], [0, 0, 1, 1], [], []>} : vector<16x32xf32>, vector<32x512xf32>, vector<16x512xf32> -> vector<16x512xf32>
    %c0_28 = arith.constant 0 : index
    %c0_29 = arith.constant 0 : index
    %29 = vector.load %arg7[%c0_28, %c0_29] : memref<512x512xf32, #tpu.memory_space<vmem>>, vector<512x512xf32>
    %cst_30 = arith.constant dense<0.000000e+00> : vector<16x512xf32>
    %30 = tpu.matmul %28, %29, %cst_30 {dimension_numbers = #tpu.dot_dimension_numbers<[1], [0], [0], [1], [0, 0, 1, 1], [], []>} : vector<16x512xf32>, vector<512x512xf32>, vector<16x512xf32> -> vector<16x512xf32>
    %31 = arith.addf %25, %30 : vector<16x512xf32>
    %c1_31 = arith.constant 1 : index
    %c0_32 = arith.constant 0 : index
    %c0_33 = arith.constant 0 : index
    %32 = vector.load %arg6[%c1_31, %c0_32, %c0_33] : memref<3x16x32xf32, #tpu.memory_space<vmem>>, vector<1x16x32xf32>
    %33 = vector.shape_cast %32 : vector<1x16x32xf32> to vector<16x32xf32>
    %cst_34 = arith.constant dense<0.000000e+00> : vector<16x512xf32>
    %34 = tpu.matmul %33, %24, %cst_34 {dimension_numbers = #tpu.dot_dimension_numbers<[1], [0], [0], [1], [0, 0, 1, 1], [], []>} : vector<16x32xf32>, vector<32x512xf32>, vector<16x512xf32> -> vector<16x512xf32>
    %c0_35 = arith.constant 0 : index
    %c0_36 = arith.constant 0 : index
    %35 = vector.load %arg8[%c0_35, %c0_36] : memref<512x512xf32, #tpu.memory_space<vmem>>, vector<512x512xf32>
    %cst_37 = arith.constant dense<0.000000e+00> : vector<16x512xf32>
    %36 = tpu.matmul %34, %35, %cst_37 {dimension_numbers = #tpu.dot_dimension_numbers<[1], [0], [0], [1], [0, 0, 1, 1], [], []>} : vector<16x512xf32>, vector<512x512xf32>, vector<16x512xf32> -> vector<16x512xf32>
    %37 = arith.addf %31, %36 : vector<16x512xf32>
    %c2_38 = arith.constant 2 : index
    %c0_39 = arith.constant 0 : index
    %c0_40 = arith.constant 0 : index
    %38 = vector.load %arg6[%c2_38, %c0_39, %c0_40] : memref<3x16x32xf32, #tpu.memory_space<vmem>>, vector<1x16x32xf32>
    %39 = vector.shape_cast %38 : vector<1x16x32xf32> to vector<16x32xf32>
    %cst_41 = arith.constant dense<0.000000e+00> : vector<16x512xf32>
    %40 = tpu.matmul %39, %24, %cst_41 {dimension_numbers = #tpu.dot_dimension_numbers<[1], [0], [0], [1], [0, 0, 1, 1], [], []>} : vector<16x32xf32>, vector<32x512xf32>, vector<16x512xf32> -> vector<16x512xf32>
    %c0_42 = arith.constant 0 : index
    %c0_43 = arith.constant 0 : index
    %41 = vector.load %arg9[%c0_42, %c0_43] : memref<512x512xf32, #tpu.memory_space<vmem>>, vector<512x512xf32>
    %cst_44 = arith.constant dense<0.000000e+00> : vector<16x512xf32>
    %42 = tpu.matmul %40, %41, %cst_44 {dimension_numbers = #tpu.dot_dimension_numbers<[1], [0], [0], [1], [0, 0, 1, 1], [], []>} : vector<16x512xf32>, vector<512x512xf32>, vector<16x512xf32> -> vector<16x512xf32>
    %43 = arith.addf %37, %42 : vector<16x512xf32>
    %c0_45 = arith.constant 0 : index
    %c0_46 = arith.constant 0 : index
    %44 = vector.load %arg10[%c0_45, %c0_46] : memref<1x512xf32, #tpu.memory_space<vmem>>, vector<1x512xf32>
    %45 = vector.broadcast %44 : vector<1x512xf32> to vector<16x512xf32>
    %46 = arith.addf %43, %45 : vector<16x512xf32>
    %cst_47 = arith.constant 0.000000e+00 : f32
    %47 = vector.broadcast %cst_47 : f32 to vector<16x512xf32>
    %48 = arith.maximumf %46, %47 : vector<16x512xf32>
    %cst_48 = arith.constant 0.000000e+00 : f32
    %49 = vector.broadcast %cst_48 : f32 to vector<8x512xf32>
    %c0_49 = arith.constant 0 : index
    %c0_50 = arith.constant 0 : index
    %c0_51 = arith.constant 0 : index
    %50 = vector.load %arg11[%c0_49, %c0_50, %c0_51] : memref<3x8x16xf32, #tpu.memory_space<vmem>>, vector<1x8x16xf32>
    %51 = vector.shape_cast %50 : vector<1x8x16xf32> to vector<8x16xf32>
    %cst_52 = arith.constant dense<0.000000e+00> : vector<8x512xf32>
    %52 = tpu.matmul %51, %48, %cst_52 {dimension_numbers = #tpu.dot_dimension_numbers<[1], [0], [0], [1], [0, 0, 1, 1], [], []>} : vector<8x16xf32>, vector<16x512xf32>, vector<8x512xf32> -> vector<8x512xf32>
    %c0_53 = arith.constant 0 : index
    %c0_54 = arith.constant 0 : index
    %53 = vector.load %arg12[%c0_53, %c0_54] : memref<512x512xf32, #tpu.memory_space<vmem>>, vector<512x512xf32>
    %cst_55 = arith.constant dense<0.000000e+00> : vector<8x512xf32>
    %54 = tpu.matmul %52, %53, %cst_55 {dimension_numbers = #tpu.dot_dimension_numbers<[1], [0], [0], [1], [0, 0, 1, 1], [], []>} : vector<8x512xf32>, vector<512x512xf32>, vector<8x512xf32> -> vector<8x512xf32>
    %55 = arith.addf %49, %54 : vector<8x512xf32>
    %c1_56 = arith.constant 1 : index
    %c0_57 = arith.constant 0 : index
    %c0_58 = arith.constant 0 : index
    %56 = vector.load %arg11[%c1_56, %c0_57, %c0_58] : memref<3x8x16xf32, #tpu.memory_space<vmem>>, vector<1x8x16xf32>
    %57 = vector.shape_cast %56 : vector<1x8x16xf32> to vector<8x16xf32>
    %cst_59 = arith.constant dense<0.000000e+00> : vector<8x512xf32>
    %58 = tpu.matmul %57, %48, %cst_59 {dimension_numbers = #tpu.dot_dimension_numbers<[1], [0], [0], [1], [0, 0, 1, 1], [], []>} : vector<8x16xf32>, vector<16x512xf32>, vector<8x512xf32> -> vector<8x512xf32>
    %c0_60 = arith.constant 0 : index
    %c0_61 = arith.constant 0 : index
    %59 = vector.load %arg13[%c0_60, %c0_61] : memref<512x512xf32, #tpu.memory_space<vmem>>, vector<512x512xf32>
    %cst_62 = arith.constant dense<0.000000e+00> : vector<8x512xf32>
    %60 = tpu.matmul %58, %59, %cst_62 {dimension_numbers = #tpu.dot_dimension_numbers<[1], [0], [0], [1], [0, 0, 1, 1], [], []>} : vector<8x512xf32>, vector<512x512xf32>, vector<8x512xf32> -> vector<8x512xf32>
    %61 = arith.addf %55, %60 : vector<8x512xf32>
    %c2_63 = arith.constant 2 : index
    %c0_64 = arith.constant 0 : index
    %c0_65 = arith.constant 0 : index
    %62 = vector.load %arg11[%c2_63, %c0_64, %c0_65] : memref<3x8x16xf32, #tpu.memory_space<vmem>>, vector<1x8x16xf32>
    %63 = vector.shape_cast %62 : vector<1x8x16xf32> to vector<8x16xf32>
    %cst_66 = arith.constant dense<0.000000e+00> : vector<8x512xf32>
    %64 = tpu.matmul %63, %48, %cst_66 {dimension_numbers = #tpu.dot_dimension_numbers<[1], [0], [0], [1], [0, 0, 1, 1], [], []>} : vector<8x16xf32>, vector<16x512xf32>, vector<8x512xf32> -> vector<8x512xf32>
    %c0_67 = arith.constant 0 : index
    %c0_68 = arith.constant 0 : index
    %65 = vector.load %arg14[%c0_67, %c0_68] : memref<512x512xf32, #tpu.memory_space<vmem>>, vector<512x512xf32>
    %cst_69 = arith.constant dense<0.000000e+00> : vector<8x512xf32>
    %66 = tpu.matmul %64, %65, %cst_69 {dimension_numbers = #tpu.dot_dimension_numbers<[1], [0], [0], [1], [0, 0, 1, 1], [], []>} : vector<8x512xf32>, vector<512x512xf32>, vector<8x512xf32> -> vector<8x512xf32>
    %67 = arith.addf %61, %66 : vector<8x512xf32>
    %c0_70 = arith.constant 0 : index
    %c0_71 = arith.constant 0 : index
    %68 = vector.load %arg15[%c0_70, %c0_71] : memref<1x512xf32, #tpu.memory_space<vmem>>, vector<1x512xf32>
    %69 = vector.broadcast %68 : vector<1x512xf32> to vector<8x512xf32>
    %70 = arith.addf %67, %69 : vector<8x512xf32>
    %cst_72 = arith.constant 0.000000e+00 : f32
    %71 = vector.broadcast %cst_72 : f32 to vector<8x512xf32>
    %72 = arith.maximumf %70, %71 : vector<8x512xf32>
    %cst_73 = arith.constant 0.000000e+00 : f32
    %73 = vector.broadcast %cst_73 : f32 to vector<2x128xf32>
    %c0_74 = arith.constant 0 : index
    %c0_75 = arith.constant 0 : index
    %c0_76 = arith.constant 0 : index
    %74 = vector.load %arg16[%c0_74, %c0_75, %c0_76] : memref<4x2x8xf32, #tpu.memory_space<vmem>>, vector<1x2x8xf32>
    %75 = vector.shape_cast %74 : vector<1x2x8xf32> to vector<2x8xf32>
    %cst_77 = arith.constant dense<0.000000e+00> : vector<2x512xf32>
    %76 = tpu.matmul %75, %72, %cst_77 {dimension_numbers = #tpu.dot_dimension_numbers<[1], [0], [0], [1], [0, 0, 1, 1], [], []>} : vector<2x8xf32>, vector<8x512xf32>, vector<2x512xf32> -> vector<2x512xf32>
    %c0_78 = arith.constant 0 : index
    %c0_79 = arith.constant 0 : index
    %77 = vector.load %arg17[%c0_78, %c0_79] : memref<2048x128xf32, #tpu.memory_space<vmem>>, vector<512x128xf32>
    %cst_80 = arith.constant dense<0.000000e+00> : vector<2x128xf32>
    %78 = tpu.matmul %76, %77, %cst_80 {dimension_numbers = #tpu.dot_dimension_numbers<[1], [0], [0], [1], [0, 0, 1, 1], [], []>} : vector<2x512xf32>, vector<512x128xf32>, vector<2x128xf32> -> vector<2x128xf32>
    %79 = arith.addf %73, %78 : vector<2x128xf32>
    %c1_81 = arith.constant 1 : index
    %c0_82 = arith.constant 0 : index
    %c0_83 = arith.constant 0 : index
    %80 = vector.load %arg16[%c1_81, %c0_82, %c0_83] : memref<4x2x8xf32, #tpu.memory_space<vmem>>, vector<1x2x8xf32>
    %81 = vector.shape_cast %80 : vector<1x2x8xf32> to vector<2x8xf32>
    %cst_84 = arith.constant dense<0.000000e+00> : vector<2x512xf32>
    %82 = tpu.matmul %81, %72, %cst_84 {dimension_numbers = #tpu.dot_dimension_numbers<[1], [0], [0], [1], [0, 0, 1, 1], [], []>} : vector<2x8xf32>, vector<8x512xf32>, vector<2x512xf32> -> vector<2x512xf32>
    %c512 = arith.constant 512 : index
    %c0_85 = arith.constant 0 : index
    %83 = vector.load %arg17[%c512, %c0_85] : memref<2048x128xf32, #tpu.memory_space<vmem>>, vector<512x128xf32>
    %cst_86 = arith.constant dense<0.000000e+00> : vector<2x128xf32>
    %84 = tpu.matmul %82, %83, %cst_86 {dimension_numbers = #tpu.dot_dimension_numbers<[1], [0], [0], [1], [0, 0, 1, 1], [], []>} : vector<2x512xf32>, vector<512x128xf32>, vector<2x128xf32> -> vector<2x128xf32>
    %85 = arith.addf %79, %84 : vector<2x128xf32>
    %c2_87 = arith.constant 2 : index
    %c0_88 = arith.constant 0 : index
    %c0_89 = arith.constant 0 : index
    %86 = vector.load %arg16[%c2_87, %c0_88, %c0_89] : memref<4x2x8xf32, #tpu.memory_space<vmem>>, vector<1x2x8xf32>
    %87 = vector.shape_cast %86 : vector<1x2x8xf32> to vector<2x8xf32>
    %cst_90 = arith.constant dense<0.000000e+00> : vector<2x512xf32>
    %88 = tpu.matmul %87, %72, %cst_90 {dimension_numbers = #tpu.dot_dimension_numbers<[1], [0], [0], [1], [0, 0, 1, 1], [], []>} : vector<2x8xf32>, vector<8x512xf32>, vector<2x512xf32> -> vector<2x512xf32>
    %c1024 = arith.constant 1024 : index
    %c0_91 = arith.constant 0 : index
    %89 = vector.load %arg17[%c1024, %c0_91] : memref<2048x128xf32, #tpu.memory_space<vmem>>, vector<512x128xf32>
    %cst_92 = arith.constant dense<0.000000e+00> : vector<2x128xf32>
    %90 = tpu.matmul %88, %89, %cst_92 {dimension_numbers = #tpu.dot_dimension_numbers<[1], [0], [0], [1], [0, 0, 1, 1], [], []>} : vector<2x512xf32>, vector<512x128xf32>, vector<2x128xf32> -> vector<2x128xf32>
    %91 = arith.addf %85, %90 : vector<2x128xf32>
    %c3 = arith.constant 3 : index
    %c0_93 = arith.constant 0 : index
    %c0_94 = arith.constant 0 : index
    %92 = vector.load %arg16[%c3, %c0_93, %c0_94] : memref<4x2x8xf32, #tpu.memory_space<vmem>>, vector<1x2x8xf32>
    %93 = vector.shape_cast %92 : vector<1x2x8xf32> to vector<2x8xf32>
    %cst_95 = arith.constant dense<0.000000e+00> : vector<2x512xf32>
    %94 = tpu.matmul %93, %72, %cst_95 {dimension_numbers = #tpu.dot_dimension_numbers<[1], [0], [0], [1], [0, 0, 1, 1], [], []>} : vector<2x8xf32>, vector<8x512xf32>, vector<2x512xf32> -> vector<2x512xf32>
    %c1536 = arith.constant 1536 : index
    %c0_96 = arith.constant 0 : index
    %95 = vector.load %arg17[%c1536, %c0_96] : memref<2048x128xf32, #tpu.memory_space<vmem>>, vector<512x128xf32>
    %cst_97 = arith.constant dense<0.000000e+00> : vector<2x128xf32>
    %96 = tpu.matmul %94, %95, %cst_97 {dimension_numbers = #tpu.dot_dimension_numbers<[1], [0], [0], [1], [0, 0, 1, 1], [], []>} : vector<2x512xf32>, vector<512x128xf32>, vector<2x128xf32> -> vector<2x128xf32>
    %97 = arith.addf %91, %96 : vector<2x128xf32>
    %c0_98 = arith.constant 0 : index
    %c0_99 = arith.constant 0 : index
    %98 = vector.load %arg18[%c0_98, %c0_99] : memref<1x128xf32, #tpu.memory_space<vmem>>, vector<1x128xf32>
    %99 = vector.broadcast %98 : vector<1x128xf32> to vector<2x128xf32>
    %100 = arith.addf %97, %99 : vector<2x128xf32>
    %cst_100 = arith.constant 0.000000e+00 : f32
    %101 = vector.broadcast %cst_100 : f32 to vector<2x128xf32>
    %102 = arith.maximumf %100, %101 : vector<2x128xf32>
    %c0_101 = arith.constant 0 : index
    %c0_102 = arith.constant 0 : index
    %103 = vector.load %arg19[%c0_101, %c0_102] : memref<128x10xf32, #tpu.memory_space<vmem>>, vector<128x10xf32>
    %cst_103 = arith.constant dense<0.000000e+00> : vector<2x10xf32>
    %104 = tpu.matmul %102, %103, %cst_103 {dimension_numbers = #tpu.dot_dimension_numbers<[1], [0], [0], [1], [0, 0, 1, 1], [], []>} : vector<2x128xf32>, vector<128x10xf32>, vector<2x10xf32> -> vector<2x10xf32>
    %c0_104 = arith.constant 0 : index
    %c0_105 = arith.constant 0 : index
    %105 = vector.load %arg20[%c0_104, %c0_105] : memref<1x10xf32, #tpu.memory_space<vmem>>, vector<1x10xf32>
    %106 = vector.broadcast %105 : vector<1x10xf32> to vector<2x10xf32>
    %107 = arith.addf %104, %106 : vector<2x10xf32>
    %cst_106 = arith.constant dense<0xFF800000> : vector<2xf32>
    %108 = vector.multi_reduction <maximumf>, %107, %cst_106 [1] : vector<2x10xf32> to vector<2xf32>
    %109 = vector.shape_cast %108 : vector<2xf32> to vector<2x1xf32>
    %110 = vector.broadcast %109 : vector<2x1xf32> to vector<2x10xf32>
    %111 = arith.subf %107, %110 : vector<2x10xf32>
    %112 = math.exp %111 : vector<2x10xf32>
    %cst_107 = arith.constant dense<0.000000e+00> : vector<2xf32>
    %113 = vector.multi_reduction <add>, %112, %cst_107 [1] : vector<2x10xf32> to vector<2xf32>
    %114 = vector.shape_cast %113 : vector<2xf32> to vector<2x1xf32>
    %115 = math.log %114 : vector<2x1xf32>
    %116 = vector.broadcast %115 : vector<2x1xf32> to vector<2x10xf32>
    %117 = arith.subf %111, %116 : vector<2x10xf32>
    %c0_108 = arith.constant 0 : index
    %c0_109 = arith.constant 0 : index
    %118 = vector.load %arg21[%c0_108, %c0_109] : memref<2x10xf32, #tpu.memory_space<vmem>>, vector<2x10xf32>
    tpu.vector_store %arg21[%c0_108, %c0_109], %117 {strides = array<i32>} : memref<2x10xf32, #tpu.memory_space<vmem>>, vector<2x10xf32>,
    return
  }
}

</mosaic_0001>

<bundles_post_ra>
// kernel: net_forward.1
= control target key start
LH: loop header
LB: loop body
LE: loop exit
PB: predicated region body
PF: predicated region fallthrough
CT: control target
= control target key end

     0   :  { %s10855_s0 = inlined_call_operand.hbm [shape: f32[64,32], index: 0, kind: input, shape index: {}]   ;;  %s10856_s1 = inlined_call_operand.hbm [shape: f32[3,32,64], index: 1, kind: input, shape index: {}]   ;;  %s10857_s2 = inlined_call_operand.vmem [shape: f32[32,512], index: 2, kind: input, shape index: {}]   ;;  %s10858_s3 = inlined_call_operand.hbm [shape: f32[32,512], index: 3, kind: input, shape index: {}]   ;;  %s10859_s4 = inlined_call_operand.hbm [shape: f32[32,512], index: 4, kind: input, shape index: {}]   ;;  %s10860_s5 = inlined_call_operand.hbm [shape: f32[1,512], index: 5, kind: input, shape index: {}]   ;;  %s10861_s6 = inlined_call_operand.hbm [shape: f32[3,16,32], index: 6, kind: input, shape index: {}]   ;;  %s10862_s7 = inlined_call_operand.hbm [shape: f32[512,512], index: 7, kind: input, shape index: {}]   ;;  %s10863_s8 = inlined_call_operand.hbm [shape: f32[512,512], index: 8, kind: input, shape index: {}]   ;;  %s10864_s9 = inlined_call_operand.hbm [shape: f32[512,512], index: 9, kind: input, shape index: {}]   ;;  %s10865_s10 = inlined_call_operand.vmem [shape: f32[1,512], index: 10, kind: input, shape index: {}]   ;;  %s10866_s11 = inlined_call_operand.vmem [shape: f32[3,8,16], index: 11, kind: input, shape index: {}]   ;;  %s10867_s12 = inlined_call_operand.hbm [shape: f32[512,512], index: 12, kind: input, shape index: {}]   ;;  %s10868_s13 = inlined_call_operand.hbm [shape: f32[512,512], index: 13, kind: input, shape index: {}]   ;;  %s10869_s14 = inlined_call_operand.hbm [shape: f32[512,512], index: 14, kind: input, shape index: {}]   ;;  %s10870_s15 = inlined_call_operand.vmem [shape: f32[1,512], index: 15, kind: input, shape index: {}]   ;;  %s10871_s16 = inlined_call_operand.vmem [shape: f32[4,2,8], index: 16, kind: input, shape index: {}]   ;;  %s10872_s17 = inlined_call_operand.hbm [shape: f32[2048,128], index: 17, kind: input, shape index: {}]   ;;  %s10873_s18 = inlined_call_operand.vmem [shape: f32[1,128], index: 18, kind: input, shape index: {}]   ;;  %s10874_s19 = inlined_call_operand.vmem [shape: f32[128,10], index: 19, kind: input, shape index: {}]   ;;  %s10875_s20 = inlined_call_operand.vmem [shape: f32[1,10], index: 20, kind: input, shape index: {}]   ;;  %s10876_s21 = inlined_call_operand.hbm [shape: f32[2,10], index: 21, kind: output, shape index: {}]  }
   0x1   :  { %10884 = sst [smem:[#allocation32_spill]] %s10855_s0 }
   0x2   :  { %10885 = sst [smem:[#allocation33_spill]] %s10856_s1 }
   0x3   :  { %10886 = sst [smem:[#allocation34_spill]] %s10857_s2 }
   0x4   :  { %10887 = sst [smem:[#allocation35_spill]] %s10858_s3 }
   0x5   :  { %10888 = sst [smem:[#allocation36_spill]] %s10859_s4 }
   0x6   :  { %10889 = sst [smem:[#allocation37_spill]] %s10860_s5 }
   0x7   :  { %10890 = sst [smem:[#allocation38_spill]] %s10873_s18 }
   0x8   :  { %10891 = sst [smem:[#allocation39_spill]] %s10875_s20 }
   0x9   :  { %10892 = sst [smem:[#allocation40_spill]] %s10876_s21 }
   0xa   :  { %26 = vsyncpa [#allocation3], 0 }
   0xb   :  { %27 = vsyncpa [#allocation6], 0 }
   0xc   :  { %28 = vsyncpa [#allocation9], 0 }
   0xd   :  { %29 = vsyncpa [#allocation12], 0 }
   0xe   :  { %30 = vsyncpa [#allocation15], 0 }
   0xf   :  { %31 = vsyncpa [#allocation18], 0 }
  0x10   :  { %32 = vsyncpa [#allocation21], 0 }
  0x11   :  { %33 = vsyncpa [#allocation4], 0  ;;  %s10038_s2 = smov [#allocation5]   ;;  %s10893_s3 = sld [smem:[#allocation33_spill]] }
  0x12   :  { %s51_s25 = sshll.u32 %s10038_s2, 4  ;;  %s52_s25 = int_to_ptr.vmem [resolvable:$true] %s51_s25 }
  0x17   :  { %s9714_s28 = scalar_lea.hbm %s10893_s3, 1536 }
  0x18   :  { %p9715_p0 = scmp.ne.s32.totalorder %s10893_s3, %s9714_s28  ;;  %p9718_p1 = scmp.lt.u32.totalorder %s9714_s28, %s10893_s3 }
  0x1a   :  { %p9720_p2 = pnand %p9718_p1, %p9715_p0 }
  0x1c   :  { %9723 = shalt.err (!%p9720_p2)
}
  0x1d   :  { %s9724_s5 = scalar_lea.vmem %s52_s25, 1536  ;;  %p9729_p4 = scmp.lt.s32.totalorder %s52_s25, %s52_s25 }
  0x1e   :  { %p9725_p3 = scmp.ne.s32.totalorder %s52_s25, %s9724_s5  ;;  %p9730_p5 = scmp.lt.s32.totalorder %s9724_s5, %s9724_s5 }
  0x20   :  { %p9731_p6 = por %p9730_p5, %p9729_p4 }
  0x22   :  { %p9732_p7 = pnand %p9731_p6, %p9725_p3 }
  0x24   :  { %9735 = shalt.err (!%p9732_p7)
}
  0x25   :  { %s10039_s22 = smov 128   ;;  %s10040_s23 = smov 8  }
  0x26   :  { %57 = dma.hbm_to_vmem [thread:$0]  %s10893_s3, 1536, %s52_s25, [#allocation6], %s10039_s22, %s10039_s22, %s10040_s23  }
  0x27   :  { %s10041_s2 = smov [#allocation8]   ;;  %s10042_s27 = smov [#allocation11]  }
  0x28   :  { %s77_s26 = sshll.u32 %s10041_s2, 4  ;;  %s99_s28 = sshll.u32 %s10042_s27, 4  ;;  %s78_s26 = int_to_ptr.vmem [resolvable:$true] %s77_s26  ;;  %s100_s28 = int_to_ptr.vmem [resolvable:$true] %s99_s28 }
  0x29   :  { %s10894_s4 = sld [smem:[#allocation36_spill]] }
  0x2f   :  { %s9736_s30 = scalar_lea.hbm %s10894_s4, 2048 }
  0x30   :  { %p9737_p8 = scmp.ne.s32.totalorder %s10894_s4, %s9736_s30  ;;  %p9740_p9 = scmp.lt.u32.totalorder %s9736_s30, %s10894_s4 }
  0x32   :  { %p9742_p10 = pnand %p9740_p9, %p9737_p8 }
  0x34   :  { %9745 = shalt.err (!%p9742_p10)
}
  0x35   :  { %s9746_s25 = scalar_lea.vmem %s78_s26, 2048  ;;  %p9751_p12 = scmp.lt.s32.totalorder %s78_s26, %s78_s26 }
  0x36   :  { %p9747_p11 = scmp.ne.s32.totalorder %s78_s26, %s9746_s25  ;;  %p9752_p13 = scmp.lt.s32.totalorder %s9746_s25, %s9746_s25 }
  0x38   :  { %p9753_p0 = por %p9752_p13, %p9751_p12 }
  0x3a   :  { %p9754_p1 = pnand %p9753_p0, %p9747_p11 }
  0x3c   :  { %9757 = shalt.err (!%p9754_p1)
}
  0x3d   :  { %s10043_s3 = smov 512   ;;  %s10044_s1 = smov 32  }
  0x3e   :  { %83 = dma.hbm_to_vmem [thread:$0]  %s10894_s4, 2048, %s78_s26, [#allocation9], %s10043_s3, %s10043_s3, %s10044_s1  }
  0x3f   :  { %s9758_s2 = scalar_lea.hbm %s10861_s6, 768 }
  0x40   :  { %p9759_p2 = scmp.ne.s32.totalorder %s10861_s6, %s9758_s2  ;;  %p9762_p3 = scmp.lt.u32.totalorder %s9758_s2, %s10861_s6 }
  0x42   :  { %p9764_p4 = pnand %p9762_p3, %p9759_p2 }
  0x44   :  { %9767 = shalt.err (!%p9764_p4)
}
  0x45   :  { %s9768_s5 = scalar_lea.vmem %s100_s28, 768  ;;  %p9773_p6 = scmp.lt.s32.totalorder %s100_s28, %s100_s28 }
  0x46   :  { %p9769_p5 = scmp.ne.s32.totalorder %s100_s28, %s9768_s5  ;;  %p9774_p7 = scmp.lt.s32.totalorder %s9768_s5, %s9768_s5 }
  0x48   :  { %p9775_p8 = por %p9774_p7, %p9773_p6 }
  0x4a   :  { %p9776_p9 = pnand %p9775_p8, %p9769_p5 }
  0x4c   :  { %9779 = shalt.err (!%p9776_p9)
}
  0x4d   :  { %105 = dma.hbm_to_vmem [thread:$0]  %s10861_s6, 768, %s100_s28, [#allocation12], %s10039_s22, %s10039_s22, %s10040_s23  }
  0x4e   :  { %s10045_s25 = smov [#allocation14]   ;;  %s10046_s24 = smov [#allocation17]  }
  0x4f   :  { %s123_s21 = sshll.u32 %s10045_s25, 4  ;;  %s151_s18 = sshll.u32 %s10046_s24, 4  ;;  %s124_s21 = int_to_ptr.vmem [resolvable:$true] %s123_s21  ;;  %s152_s18 = int_to_ptr.vmem [resolvable:$true] %s151_s18 }
  0x50   :  { %s9780_s27 = scalar_lea.hbm %s10863_s8, 32768 }
  0x51   :  { %p9781_p10 = scmp.ne.s32.totalorder %s10863_s8, %s9780_s27  ;;  %p9784_p11 = scmp.lt.u32.totalorder %s9780_s27, %s10863_s8 }
  0x53   :  { %p9786_p12 = pnand %p9784_p11, %p9781_p10 }
  0x55   :  { %9789 = shalt.err (!%p9786_p12)
}
  0x56   :  { %s9790_s6 = scalar_lea.vmem %s124_s21, 32768  ;;  %p9795_p0 = scmp.lt.s32.totalorder %s124_s21, %s124_s21 }
  0x57   :  { %p9791_p13 = scmp.ne.s32.totalorder %s124_s21, %s9790_s6  ;;  %p9796_p1 = scmp.lt.s32.totalorder %s9790_s6, %s9790_s6 }
  0x59   :  { %p9797_p2 = por %p9796_p1, %p9795_p0 }
  0x5b   :  { %p9798_p3 = pnand %p9797_p2, %p9791_p13 }
  0x5d   :  { %9801 = shalt.err (!%p9798_p3)
}
  0x5e   :  { %129 = dma.hbm_to_vmem [thread:$0]  %s10863_s8, 32768, %s124_s21, [#allocation15], %s10043_s3, %s10043_s3, %s10044_s1  }
  0x5f   :  { %s9802_s24 = scalar_lea.hbm %s10867_s12, 32768 }
  0x60   :  { %p9803_p4 = scmp.ne.s32.totalorder %s10867_s12, %s9802_s24  ;;  %p9806_p5 = scmp.lt.u32.totalorder %s9802_s24, %s10867_s12 }
  0x62   :  { %p9808_p6 = pnand %p9806_p5, %p9803_p4 }
  0x64   :  { %9811 = shalt.err (!%p9808_p6)
}
  0x65   :  { %s9812_s0 = scalar_lea.vmem %s152_s18, 32768  ;;  %p9817_p8 = scmp.lt.s32.totalorder %s152_s18, %s152_s18 }
  0x66   :  { %p9813_p7 = scmp.ne.s32.totalorder %s152_s18, %s9812_s0  ;;  %p9818_p9 = scmp.lt.s32.totalorder %s9812_s0, %s9812_s0 }
  0x68   :  { %p9819_p10 = por %p9818_p9, %p9817_p8 }
  0x6a   :  { %p9820_p11 = pnand %p9819_p10, %p9813_p7 }
  0x6c   :  { %9823 = shalt.err (!%p9820_p11)
}
  0x6d   :  { %157 = dma.hbm_to_vmem [thread:$0]  %s10867_s12, 32768, %s152_s18, [#allocation18], %s10043_s3, %s10043_s3, %s10044_s1  }
  0x6e   :  { %s10047_s30 = smov [#allocation20]   ;;  %s10048_s6 = smov [#allocation2]  }
  0x6f   :  { %s175_s5 = sshll.u32 %s10047_s30, 4  ;;  %s39_s28 = sshll.u32 %s10048_s6, 4  ;;  %s176_s5 = int_to_ptr.vmem [resolvable:$true] %s175_s5  ;;  %s40_s28 = int_to_ptr.vmem [resolvable:$true] %s39_s28 }
  0x70   :  { %s9824_s25 = scalar_lea.hbm %s10869_s14, 32768 }
  0x71   :  { %p9825_p12 = scmp.ne.s32.totalorder %s10869_s14, %s9824_s25  ;;  %p9828_p13 = scmp.lt.u32.totalorder %s9824_s25, %s10869_s14 }
  0x73   :  { %p9830_p0 = pnand %p9828_p13, %p9825_p12 }
  0x75   :  { %9833 = shalt.err (!%p9830_p0)
}
  0x76   :  { %s9834_s12 = scalar_lea.vmem %s176_s5, 32768  ;;  %p9839_p2 = scmp.lt.s32.totalorder %s176_s5, %s176_s5 }
  0x77   :  { %p9835_p1 = scmp.ne.s32.totalorder %s176_s5, %s9834_s12  ;;  %p9840_p3 = scmp.lt.s32.totalorder %s9834_s12, %s9834_s12 }
  0x79   :  { %p9841_p4 = por %p9840_p3, %p9839_p2 }
  0x7b   :  { %p9842_p5 = pnand %p9841_p4, %p9835_p1 }
  0x7d   :  { %9845 = shalt.err (!%p9842_p5)
}
  0x7e   :  { %181 = dma.hbm_to_vmem [thread:$0]  %s10869_s14, 32768, %s176_s5, [#allocation21], %s10043_s3, %s10043_s3, %s10044_s1  }
  0x7f   :  { %s10895_s21 = sld [smem:[#allocation32_spill]] }
  0x85   :  { %s9846_s30 = scalar_lea.hbm %s10895_s21, 1024 }
  0x86   :  { %p9847_p6 = scmp.ne.s32.totalorder %s10895_s21, %s9846_s30  ;;  %p9850_p7 = scmp.lt.u32.totalorder %s9846_s30, %s10895_s21 }
  0x88   :  { %p9852_p8 = pnand %p9850_p7, %p9847_p6 }
  0x8a   :  { %9855 = shalt.err (!%p9852_p8)
}
  0x8b   :  { %s9856_s24 = scalar_lea.vmem %s40_s28, 1024  ;;  %p9861_p10 = scmp.lt.s32.totalorder %s40_s28, %s40_s28 }
  0x8c   :  { %p9857_p9 = scmp.ne.s32.totalorder %s40_s28, %s9856_s24  ;;  %p9862_p11 = scmp.lt.s32.totalorder %s9856_s24, %s9856_s24 }
  0x8e   :  { %p9863_p12 = por %p9862_p11, %p9861_p10 }
  0x90   :  { %p9864_p13 = pnand %p9863_p12, %p9857_p9 }
  0x92   :  { %9867 = shalt.err (!%p9864_p13)
}
  0x93   :  { %45 = dma.hbm_to_vmem [thread:$0]  %s10895_s21, 1024, %s40_s28, [#allocation3], %s10039_s22, %s10039_s22, %s10040_s23  }
  0x94   :  { %s10049_s20 = smov [#allocation7]   ;;  %s10050_s27 = smov [#allocation10]  }
  0x95   :  { %s65_s2 = sshll.u32 %s10049_s20, 4  ;;  %s90_s12 = sshll.u32 %s10050_s27, 4  ;;  %s66_s2 = int_to_ptr.vmem [resolvable:$true] %s65_s2  ;;  %s91_s12 = int_to_ptr.vmem [resolvable:$true] %s90_s12 }
  0x96   :  { %s10896_s0 = sld [smem:[#allocation35_spill]] }
  0x9c   :  { %s9868_s8 = scalar_lea.hbm %s10896_s0, 2048 }
  0x9d   :  { %p9869_p0 = scmp.ne.s32.totalorder %s10896_s0, %s9868_s8  ;;  %p9872_p1 = scmp.lt.u32.totalorder %s9868_s8, %s10896_s0 }
  0x9f   :  { %p9874_p2 = pnand %p9872_p1, %p9869_p0 }
  0xa1   :  { %9877 = shalt.err (!%p9874_p2)
}
  0xa2   :  { %s9878_s28 = scalar_lea.vmem %s66_s2, 2048  ;;  %p9883_p4 = scmp.lt.s32.totalorder %s66_s2, %s66_s2 }
  0xa3   :  { %p9879_p3 = scmp.ne.s32.totalorder %s66_s2, %s9878_s28  ;;  %p9884_p5 = scmp.lt.s32.totalorder %s9878_s28, %s9878_s28 }
  0xa5   :  { %p9885_p6 = por %p9884_p5, %p9883_p4 }
  0xa7   :  { %p9886_p7 = pnand %p9885_p6, %p9879_p3 }
  0xa9   :  { %9889 = shalt.err (!%p9886_p7)
}
  0xaa   :  { %71 = dma.hbm_to_vmem [thread:$0]  %s10896_s0, 2048, %s66_s2, [#allocation6], %s10043_s3, %s10043_s3, %s10044_s1  }
  0xab   :  { %s10897_s5 = sld [smem:[#allocation37_spill]] }
  0xb1   :  { %s9890_s20 = scalar_lea.hbm %s10897_s5, 64 }
  0xb2   :  { %p9891_p8 = scmp.ne.s32.totalorder %s10897_s5, %s9890_s20  ;;  %p9894_p9 = scmp.lt.u32.totalorder %s9890_s20, %s10897_s5 }
  0xb4   :  { %p9896_p10 = pnand %p9894_p9, %p9891_p8 }
  0xb6   :  { %9899 = shalt.err (!%p9896_p10)
}
  0xb7   :  { %s9900_s30 = scalar_lea.vmem %s91_s12, 64  ;;  %p9905_p12 = scmp.lt.s32.totalorder %s91_s12, %s91_s12 }
  0xb8   :  { %p9901_p11 = scmp.ne.s32.totalorder %s91_s12, %s9900_s30  ;;  %p9906_p13 = scmp.lt.s32.totalorder %s9900_s30, %s9900_s30 }
  0xba   :  { %p9907_p0 = por %p9906_p13, %p9905_p12 }
  0xbc   :  { %p9908_p1 = pnand %p9907_p0, %p9901_p11 }
  0xbe   :  { %9911 = shalt.err (!%p9908_p1)
}
  0xbf   :  { %93 = dma.hbm_to_vmem [thread:$0]  %s10897_s5, 64, %s91_s12, [#allocation9]  }
  0xc0   :  { %s10051_s6 = smov [#allocation13]   ;;  %s10052_s4 = smov [#allocation16]  }
  0xc1   :  { %s111_s26 = sshll.u32 %s10051_s6, 4  ;;  %s135_s28 = sshll.u32 %s10052_s4, 4  ;;  %s112_s26 = int_to_ptr.vmem [resolvable:$true] %s111_s26  ;;  %s136_s28 = int_to_ptr.vmem [resolvable:$true] %s135_s28 }
  0xc2   :  { %s9912_s24 = scalar_lea.hbm %s10862_s7, 32768 }
  0xc3   :  { %p9913_p2 = scmp.ne.s32.totalorder %s10862_s7, %s9912_s24  ;;  %p9916_p3 = scmp.lt.u32.totalorder %s9912_s24, %s10862_s7 }
  0xc5   :  { %p9918_p4 = pnand %p9916_p3, %p9913_p2 }
  0xc7   :  { %9921 = shalt.err (!%p9918_p4)
}
  0xc8   :  { %s9922_s12 = scalar_lea.vmem %s112_s26, 32768  ;;  %p9927_p6 = scmp.lt.s32.totalorder %s112_s26, %s112_s26 }
  0xc9   :  { %p9923_p5 = scmp.ne.s32.totalorder %s112_s26, %s9922_s12  ;;  %p9928_p7 = scmp.lt.s32.totalorder %s9922_s12, %s9922_s12 }
  0xcb   :  { %p9929_p8 = por %p9928_p7, %p9927_p6 }
  0xcd   :  { %p9930_p9 = pnand %p9929_p8, %p9923_p5 }
  0xcf   :  { %9933 = shalt.err (!%p9930_p9)
}
  0xd0   :  { %117 = dma.hbm_to_vmem [thread:$0]  %s10862_s7, 32768, %s112_s26, [#allocation12], %s10043_s3, %s10043_s3, %s10044_s1  }
  0xd1   :  { %s9934_s2 = scalar_lea.hbm %s10864_s9, 32768 }
  0xd2   :  { %p9935_p10 = scmp.ne.s32.totalorder %s10864_s9, %s9934_s2  ;;  %p9938_p11 = scmp.lt.u32.totalorder %s9934_s2, %s10864_s9 }
  0xd4   :  { %p9940_p12 = pnand %p9938_p11, %p9935_p10 }
  0xd6   :  { %9943 = shalt.err (!%p9940_p12)
}
  0xd7   :  { %s9944_s25 = scalar_lea.vmem %s136_s28, 32768  ;;  %p9949_p0 = scmp.lt.s32.totalorder %s136_s28, %s136_s28 }
  0xd8   :  { %p9945_p13 = scmp.ne.s32.totalorder %s136_s28, %s9944_s25  ;;  %p9950_p1 = scmp.lt.s32.totalorder %s9944_s25, %s9944_s25 }
  0xda   :  { %p9951_p2 = por %p9950_p1, %p9949_p0 }
  0xdc   :  { %p9952_p3 = pnand %p9951_p2, %p9945_p13 }
  0xde   :  { %9955 = shalt.err (!%p9952_p3)
}
  0xdf   :  { %141 = dma.hbm_to_vmem [thread:$0]  %s10864_s9, 32768, %s136_s28, [#allocation15], %s10043_s3, %s10043_s3, %s10044_s1  }
  0xe0   :  { %s10053_s24 = smov [#allocation19]   ;;  %s10054_s20 = smov [#allocation22]  }
  0xe1   :  { %s163_s14 = sshll.u32 %s10053_s24, 4  ;;  %s191_s27 = sshll.u32 %s10054_s20, 4  ;;  %s164_s14 = int_to_ptr.vmem [resolvable:$true] %s163_s14  ;;  %s192_s27 = int_to_ptr.vmem [resolvable:$true] %s191_s27 }
  0xe2   :  { %s9956_s5 = scalar_lea.hbm %s10868_s13, 32768 }
  0xe3   :  { %p9957_p4 = scmp.ne.s32.totalorder %s10868_s13, %s9956_s5  ;;  %p9960_p5 = scmp.lt.u32.totalorder %s9956_s5, %s10868_s13 }
  0xe5   :  { %p9962_p6 = pnand %p9960_p5, %p9957_p4 }
  0xe7   :  { %9965 = shalt.err (!%p9962_p6)
}
  0xe8   :  { %s9966_s9 = scalar_lea.vmem %s164_s14, 32768  ;;  %p9971_p8 = scmp.lt.s32.totalorder %s164_s14, %s164_s14 }
  0xe9   :  { %p9967_p7 = scmp.ne.s32.totalorder %s164_s14, %s9966_s9  ;;  %p9972_p9 = scmp.lt.s32.totalorder %s9966_s9, %s9966_s9 }
  0xeb   :  { %p9973_p10 = por %p9972_p9, %p9971_p8 }
  0xed   :  { %p9974_p11 = pnand %p9973_p10, %p9967_p7 }
  0xef   :  { %9977 = shalt.err (!%p9974_p11)
}
  0xf0   :  { %169 = dma.hbm_to_vmem [thread:$0]  %s10868_s13, 32768, %s164_s14, [#allocation18], %s10043_s3, %s10043_s3, %s10044_s1  }
  0xf1   :  { %s9978_s21 = scalar_lea.hbm %s10872_s17, 32768 }
  0xf2   :  { %p9979_p12 = scmp.ne.s32.totalorder %s10872_s17, %s9978_s21  ;;  %p9982_p13 = scmp.lt.u32.totalorder %s9978_s21, %s10872_s17 }
  0xf4   :  { %p9984_p0 = pnand %p9982_p13, %p9979_p12 }
  0xf6   :  { %9987 = shalt.err (!%p9984_p0)
}
  0xf7   :  { %s9988_s20 = scalar_lea.vmem %s192_s27, 32768  ;;  %p9993_p2 = scmp.lt.s32.totalorder %s192_s27, %s192_s27 }
  0xf8   :  { %p9989_p1 = scmp.ne.s32.totalorder %s192_s27, %s9988_s20  ;;  %p9994_p3 = scmp.lt.s32.totalorder %s9988_s20, %s9988_s20 }
  0xfa   :  { %p9995_p4 = por %p9994_p3, %p9993_p2 }
  0xfc   :  { %p9996_p5 = pnand %p9995_p4, %p9989_p1 }
  0xfe   :  { %9999 = shalt.err (!%p9996_p5)
}
  0xff   :  { %197 = dma.hbm_to_vmem [thread:$0]  %s10872_s17, 32768, %s192_s27, [#allocation21], %s10039_s22, %s10039_s22, %s10040_s23  }
 0x100   :  { %10022 = dma.done.wait [#allocation3], 1024  }
 0x101   :  { %10023 = vsyncadd [#allocation3], 4294966272 }
 0x102   :  { %10024 = dma.done.wait [#allocation6], 3584  }
 0x103   :  { %10025 = vsyncadd [#allocation6], 4294963712 }
 0x104   :  { %10026 = dma.done.wait [#allocation9], 2112  }
 0x105   :  { %10027 = vsyncadd [#allocation9], 4294965184 }
 0x106   :  { %10028 = dma.done.wait [#allocation12], 33536  }
 0x107   :  { %10029 = vsyncadd [#allocation12], 4294933760 }
 0x108   :  { %10030 = dma.done.wait [#allocation15], 65536  }
 0x109   :  { %10031 = vsyncadd [#allocation15], 4294901760 }
 0x10a   :  { %10032 = dma.done.wait [#allocation18], 65536  }
 0x10b   :  { %10033 = vsyncadd [#allocation18], 4294901760 }
 0x10c   :  { %10034 = dma.done.wait [#allocation21], 65536  }
 0x10d   :  { %10035 = vsyncadd [#allocation21], 4294901760  ;;  %v243_v0 = vld [vmem:[#allocation2] sm:$0xff]  ;;  %v244_v1 = vld [vmem:[#allocation2 + $0x8] sm:$0xff]  ;;  %vm255_vm0 = vcmask 523264   ;;  %v10055_v44 = vmov 0.0  }
 0x10e   :  { %v245_v2 = vld [vmem:[#allocation2 + $0x10] sm:$0xff]  ;;  %v10361_v3 = vpack.c.bf16 %v244_v1, %v243_v0  ;;  %v246_v4 = vld [vmem:[#allocation2 + $0x18] sm:$0xff]  ;;  %v247_v6 = vld [vmem:[#allocation2 + $0x20] sm:$0xff]  ;;  %564 = vmatprep.mubr.f32.mxu0 %v10055_v44  ;;  %s10898_s23 = sld [smem:[#allocation34_spill]]  ;;  %vm487_vm1 = vcmask 261120   ;;  %vm3473_vm2 = vcmask 130048  }
 0x10f   :  { %v10363_v5 = vpack.c.bf16 %v246_v4, %v245_v2  ;;  %v248_v7 = vld [vmem:[#allocation2 + $0x28] sm:$0xff]  ;;  %v251_v8 = vld [vmem:[#allocation5] sm:$0xff]  ;;  %v249_v10 = vld [vmem:[#allocation2 + $0x30] sm:$0xff]  ;;  %vm5568_vm3 = vcmask 64512   ;;  %vm10057_vm4 = vmmov 0   ;;  %s10899_s3 = sld [smem:[#allocation38_spill]] }
 0x110   :  { %7614 = vmatprep.subr.bf16.mxu1 %v10361_v3  ;;  %7528 = vmatprep.mubr.msk.f32.mxu1 %vm255_vm0, %v251_v8  ;;  %v10369_v9 = vpack.c.bf16 %v248_v7, %v247_v6  ;;  %v250_v11 = vld [vmem:[#allocation2 + $0x38] sm:$0xff]  ;;  %v252_v13 = vld [vmem:[#allocation5 + $0x8] sm:$0xff]  ;;  %v253_v14 = vld [vmem:[#allocation5 + $0x10] sm:$0xff]  ;;  %s10900_s22 = sld [smem:[#allocation39_spill]]  ;;  %vm7075_vm5 = vcmask 74752   ;;  %s10058_s1 = smov [#allocation23]  }
 0x111   :  { %7616 = vmatpush3.bf16.msra.mxu1 %v10361_v3  ;;  %v10373_v12 = vpack.c.bf16 %v250_v11, %v249_v10  ;;  %v254_v15 = vld [vmem:[#allocation5 + $0x18] sm:$0xff]  ;;  %v370_v16 = vld [vmem:[#allocation5 + $0x20] sm:$0xff]  ;;  %v371_v17 = vld [vmem:[#allocation5 + $0x28] sm:$0xff]  ;;  %s7095_s14 = sshll.u32 %s10058_s1, 4  ;;  %s7096_s14 = int_to_ptr.vmem [resolvable:$true] %s7095_s14 }
 0x112   :  { %7618 = vmatprep.subr.bf16.mxu1 %v10363_v5  ;;  %v372_v18 = vld [vmem:[#allocation5 + $0x30] sm:$0xff]  ;;  %v373_v19 = vld [vmem:[#allocation5 + $0x38] sm:$0xff]  ;;  %v472_v20 = vld [vmem:[#allocation7 + $0x8] sm:$0xff]  ;;  %s10000_s27 = scalar_lea.vmem %s7096_s14, 32  ;;  %p10005_p7 = scmp.lt.s32.totalorder %s7096_s14, %s7096_s14 }
 0x113   :  { %v476_v21 = vld [vmem:[#allocation7 + $0x28] sm:$0xff]  ;;  %v474_v22 = vld [vmem:[#allocation7 + $0x18] sm:$0xff]  ;;  %v471_v26 = vld [vmem:[#allocation7] sm:$0xff]  ;;  %p10001_p6 = scmp.ne.s32.totalorder %s7096_s14, %s10000_s27  ;;  %p10006_p8 = scmp.lt.s32.totalorder %s10000_s27, %s10000_s27 }
 0x114   :  { %v7645_v23 = vpack.c.bf16 %v476_v21, %v472_v20  ;;  %v478_v24 = vld [vmem:[#allocation7 + $0x38] sm:$0xff]  ;;  %v475_v27 = vld [vmem:[#allocation7 + $0x20] sm:$0xff]  ;;  %v473_v28 = vld [vmem:[#allocation7 + $0x10] sm:$0xff] }
 0x115   :  { %7620 = vmatpush3.bf16.msra.mxu1 %v10363_v5  ;;  %v7653_v25 = vpack.c.bf16 %v478_v24, %v474_v22  ;;  %v7647_v29 = vpack.c.bf16 %v475_v27, %v471_v26  ;;  %v477_v30 = vld [vmem:[#allocation7 + $0x30] sm:$0xff]  ;;  %v480_v31 = vld [vmem:[#allocation7 + $0x48] sm:$0xff]  ;;  %v482_v35 = vld [vmem:[#allocation7 + $0x58] sm:$0xff]  ;;  %p10007_p9 = por %p10006_p8, %p10005_p7 }
 0x116   :  { %7622 = vmatprep.subr.bf16.mxu1 %v10369_v9  ;;  %7646 = vmatprep.subr.bf16.mxu0 %v7645_v23  ;;  %v484_v32 = vld [vmem:[#allocation7 + $0x68] sm:$0xff]  ;;  %v7655_v33 = vpack.c.bf16 %v477_v30, %v473_v28  ;;  %v486_v36 = vld [vmem:[#allocation7 + $0x78] sm:$0xff]  ;;  %v479_v37 = vld [vmem:[#allocation7 + $0x40] sm:$0xff] }
 0x117   :  { %v7649_v34 = vpack.c.bf16 %v484_v32, %v480_v31  ;;  %7648 = vmatpush1.bf16.msra.mxu0 %v7647_v29  ;;  %v7657_v38 = vpack.c.bf16 %v486_v36, %v482_v35  ;;  %v483_v39 = vld [vmem:[#allocation7 + $0x60] sm:$0xff]  ;;  %v481_v40 = vld [vmem:[#allocation7 + $0x50] sm:$0xff]  ;;  %v354_v45 = vld [vmem:[%s10898_s23 + $0x8] sm:$0xff]  ;;  %p10008_p10 = pnand %p10007_p9, %p10001_p6 }
 0x118   :  { %v485_v41 = vld [vmem:[#allocation7 + $0x70] sm:$0xff]  ;;  %v7651_v42 = vpack.c.bf16 %v483_v39, %v479_v37  ;;  %v358_v46 = vld [vmem:[%s10898_s23 + $0x28] sm:$0xff]  ;;  %v356_v48 = vld [vmem:[%s10898_s23 + $0x18] sm:$0xff] }
 0x119   :  { %7624 = vmatpush3.bf16.msra.mxu1 %v10369_v9  ;;  %7650 = vmatprep.subr.bf16.mxu0 %v7649_v34  ;;  %v7659_v43 = vpack.c.bf16 %v485_v41, %v481_v40  ;;  %v7661_v47 = vpack.c.bf16 %v358_v46, %v354_v45  ;;  %v360_v49 = vld [vmem:[%s10898_s23 + $0x38] sm:$0xff]  ;;  %v353_v55 = vld [vmem:[%s10898_s23] sm:$0xff]  ;;  %v355_v57 = vld [vmem:[%s10898_s23 + $0x10] sm:$0xff]  ;;  %v1194_v46 = vlaneseq }
 0x11a   :  { %7626 = vmatprep.subr.bf16.mxu1 %v10373_v12  ;;  %v7669_v50 = vpack.c.bf16 %v360_v49, %v356_v48  ;;  %v357_v56 = vld [vmem:[%s10898_s23 + $0x20] sm:$0xff]  ;;  %v359_v58 = vld [vmem:[%s10898_s23 + $0x30] sm:$0xff]  ;;  %v362_v59 = vld [vmem:[%s10898_s23 + $0x48] sm:$0xff] }
 0x11b   :  { %7652 = vmatpush1.bf16.msra.mxu0 %v7651_v42  ;;  %v366_v60 = vld [vmem:[%s10898_s23 + $0x68] sm:$0xff]  ;;  %v364_v61 = vld [vmem:[%s10898_s23 + $0x58] sm:$0xff]  ;;  %v7663_v0 = vpack.c.bf16 %v357_v56, %v353_v55  ;;  %v7671_v1 = vpack.c.bf16 %v359_v58, %v355_v57  ;;  %v361_v2 = vld [vmem:[%s10898_s23 + $0x40] sm:$0xff] }
 0x11c   :  { %7662 = vmatprep.subr.bf16.mxu0 %v7661_v47  ;;  %v368_v62 = vld [vmem:[%s10898_s23 + $0x78] sm:$0xff]  ;;  %v7665_v6 = vpack.c.bf16 %v366_v60, %v362_v59  ;;  %v365_v8 = vld [vmem:[%s10898_s23 + $0x60] sm:$0xff]  ;;  %v363_v10 = vld [vmem:[%s10898_s23 + $0x50] sm:$0xff]  ;;  %v1195_v47 = vshrl.u32 %v1194_v46, 7 }
 0x11d   :  { %7628 = vmatpush3.bf16.msra.mxu1 %v10373_v12  ;;  %v7673_v7 = vpack.c.bf16 %v368_v62, %v364_v61  ;;  %v367_v11 = vld [vmem:[%s10898_s23 + $0x70] sm:$0xff]  ;;  %v981_v23 = vld [vmem:[#allocation8 + $0x58] sm:$0xff]  ;;  %v975_v28 = vld [vmem:[#allocation8 + $0x28] sm:$0xff] }
 0x11e   :  { %7630 = vmatprep.subr.bf16.mxu1 %v10361_v3  ;;  %v972_v20 = vld [vmem:[#allocation8 + $0x10] sm:$0xff]  ;;  %v985_v24 = vld [vmem:[#allocation8 + $0x78] sm:$0xff]  ;;  %v970_v31 = vld [vmem:[#allocation8] sm:$0xff]  ;;  %v10515_v48 = vsub.s32 0, %v1195_v47  ;;  %v10517_v49 = vsub.s32 2, %v1195_v47 }
 0x11f   :  { %v976_v21 = vld [vmem:[#allocation8 + $0x30] sm:$0xff]  ;;  %v974_v32 = vld [vmem:[#allocation8 + $0x20] sm:$0xff]  ;;  %v983_v34 = vld [vmem:[#allocation8 + $0x68] sm:$0xff] }
 0x120   :  { %7529 = vmatmul.mubr.msk.f32.vlgmr.msra.gmra.mrb[0].mxu1 %vm255_vm0, %v252_v13  ;;  %v973_v13 = vld [vmem:[#allocation8 + $0x18] sm:$0xff]  ;;  %v7703_v22 = vpack.c.bf16 %v976_v21, %v972_v20  ;;  %v980_v26 = vld [vmem:[#allocation8 + $0x50] sm:$0xff]  ;;  %v7695_v35 = vpack.c.bf16 %v974_v32, %v970_v31  ;;  %v982_v39 = vld [vmem:[#allocation8 + $0x60] sm:$0xff] }
 0x121   :  { %7632 = vmatpush3.bf16.msra.mxu1 %v10361_v3  ;;  %7531 = vmatprep.mubr.msk.f32.mxu1 %vm255_vm0, %v253_v14  ;;  %v977_v14 = vld [vmem:[#allocation8 + $0x38] sm:$0xff]  ;;  %v984_v27 = vld [vmem:[#allocation8 + $0x70] sm:$0xff] }
 0x122   :  { %7634 = vmatprep.subr.bf16.mxu1 %v10363_v5  ;;  %v7707_v29 = vpack.c.bf16 %v984_v27, %v980_v26  ;;  %v871_v36 = vld [vmem:[#allocation5 + $0x50] sm:$0xff]  ;;  %v872_v40 = vld [vmem:[#allocation5 + $0x58] sm:$0xff] }
 0x124   :  { %7532 = vmatmul.mubr.msk.f32.gmra.mrb[2].mxu1 %vm255_vm0, %v254_v15 }
 0x125   :  { %7636 = vmatpush3.bf16.msra.mxu1 %v10363_v5  ;;  %7550 = vmatprep.mubr.msk.f32.mxu1 %vm255_vm0, %v370_v16  ;;  %v7667_v16 = vpack.c.bf16 %v365_v8, %v361_v2 }
 0x126   :  { %7638 = vmatprep.subr.bf16.mxu1 %v10369_v9 }
 0x129   :  { %7640 = vmatpush3.bf16.msra.mxu1 %v10369_v9 }
 0x12a   :  { %7642 = vmatprep.subr.bf16.mxu1 %v10373_v12 }
 0x12d   :  { %7644 = vmatpush3.bf16.msra.mxu1 %v10373_v12 }
 0x12e   :  { %7654 = vmatprep.subr.bf16.mxu1 %v7653_v25  ;;  %v7705_v25 = vpack.c.bf16 %v985_v24, %v981_v23 }
 0x130   :  { %7551 = vmatmul.mubr.msk.f32.vlgmr.msra.gmra.mrb[4].mxu1 %vm255_vm0, %v371_v17  ;;  %v7675_v17 = vpack.c.bf16 %v367_v11, %v363_v10 }
 0x131   :  { %7553 = vmatprep.mubr.msk.f32.mxu1 %vm255_vm0, %v372_v18  ;;  %7656 = vmatpush1.bf16.msra.mxu1 %v7655_v33  ;;  %v979_v33 = vld [vmem:[#allocation8 + $0x48] sm:$0xff] }
 0x132   :  { %7658 = vmatprep.subr.bf16.mxu1 %v7657_v38  ;;  %v7697_v37 = vpack.c.bf16 %v983_v34, %v979_v33  ;;  %v978_v38 = vld [vmem:[#allocation8 + $0x40] sm:$0xff] }
 0x133   :  { %v7699_v41 = vpack.c.bf16 %v982_v39, %v978_v38 }
 0x134   :  { %7554 = vmatmul.mubr.msk.f32.gmra.mrb[6].mxu1 %vm255_vm0, %v373_v19  ;;  %v7701_v19 = vpack.c.bf16 %v977_v14, %v973_v13 }
 0x135   :  { %7660 = vmatpush1.bf16.msra.mxu1 %v7659_v43  ;;  %653 = vmatprep.mubr.f32.mxu1 %v10055_v44 }
 0x136   :  { %7670 = vmatprep.subr.bf16.mxu1 %v7669_v50  ;;  %v1192_v50 = vld [vmem:[#allocation10] sm:$0xf] }
 0x1f3   :  { %v10407_v51 = vpop.f32.mrb[0].mxu1 }
 0x1f4   :  { %v334_v52 = vpop.f32.mrb[1].mxu1 }
 0x1f7   :  { %v10409_v53 = vpop.f32.mrb[2].mxu1 }
 0x1f8   :  { %v10411_v54 = vpop.f32.mrb[3].mxu1 }
 0x203   :  { %v7552_v63 = vpop.f32.mrb[4].mxu1 }
 0x204   :  { %v452_v4 = vpop.f32.mrb[5].mxu1 }
 0x205   :  { %7118 = vmatmul.mubr.msk.f32.vlgmr.msra.gmra.mrb[0].mxu0 %vm487_vm1, %v452_v4  ;;  %7122 = vmatmul.mubr.msk.f32.vlgmr.msra.gmra.mrb[8].mxu1 %vm487_vm1, %v452_v4 }
 0x206   :  { %570 = vmatprep.mubr.f32.mxu0 %v10055_v44  ;;  %659 = vmatprep.mubr.f32.mxu1 %v10055_v44 }
 0x207   :  { %v7555_v15 = vpop.f32.mrb[6].mxu1  ;;  %7664 = vmatpush1.bf16.msra.mxu0 %v7663_v0  ;;  %7672 = vmatpush1.bf16.msra.mxu1 %v7671_v1 }
 0x208   :  { %v462_v18 = vpop.f32.mrb[7].mxu1  ;;  %7666 = vmatprep.subr.bf16.mxu0 %v7665_v6  ;;  %7674 = vmatprep.subr.bf16.mxu1 %v7673_v7 }
 0x209   :  { %7119 = vmatmul.mubr.msk.f32.gmra.mrb[2].mxu0 %vm487_vm1, %v7552_v63  ;;  %7123 = vmatmul.mubr.msk.f32.gmra.mrb[10].mxu1 %vm487_vm1, %v7552_v63 }
 0x20a   :  { %576 = vmatprep.mubr.f32.mxu0 %v10055_v44  ;;  %665 = vmatprep.mubr.f32.mxu1 %v10055_v44 }
 0x20b   :  { %7668 = vmatpush1.bf16.msra.mxu0 %v7667_v16  ;;  %7676 = vmatpush1.bf16.msra.mxu1 %v7675_v17 }
 0x20c   :  { %7678 = vmatprep.subr.bf16.mxu0 %v10361_v3  ;;  %7702 = vmatprep.subr.bf16.mxu1 %v7701_v19 }
 0x20d   :  { %7120 = vmatmul.mubr.msk.f32.gmra.mrb[4].mxu0 %vm487_vm1, %v462_v18  ;;  %7124 = vmatmul.mubr.msk.f32.gmra.mrb[12].mxu1 %vm487_vm1, %v462_v18 }
 0x20e   :  { %582 = vmatprep.mubr.f32.mxu0 %v10055_v44  ;;  %671 = vmatprep.mubr.f32.mxu1 %v10055_v44 }
 0x211   :  { %7121 = vmatmul.mubr.msk.f32.gmra.mrb[6].mxu0 %vm487_vm1, %v7555_v15  ;;  %7125 = vmatmul.mubr.msk.f32.gmra.mrb[14].mxu1 %vm487_vm1, %v7555_v15 }
 0x212   :  { %754 = vmatprep.mubr.f32.mxu0 %v10055_v44  ;;  %843 = vmatprep.mubr.f32.mxu1 %v10055_v44 }
 0x215   :  { %7126 = vmatmul.mubr.msk.f32.vlgmr.msra.gmra.mrb[0].mxu0 %vm487_vm1, %v334_v52  ;;  %7130 = vmatmul.mubr.msk.f32.vlgmr.msra.gmra.mrb[8].mxu1 %vm487_vm1, %v334_v52  ;;  %v10521_v52 = vsub.s32 3, %v1195_v47 }
 0x216   :  { %7680 = vmatpush3.bf16.msra.mxu0 %v10361_v3  ;;  %760 = vmatprep.mubr.f32.mxu0 %v10055_v44  ;;  %v971_v3 = vld [vmem:[#allocation8 + $0x8] sm:$0xff] }
 0x217   :  { %849 = vmatprep.mubr.f32.mxu1 %v10055_v44  ;;  %7682 = vmatprep.subr.bf16.mxu0 %v10363_v5  ;;  %v7693_v30 = vpack.c.bf16 %v975_v28, %v971_v3  ;;  %v1209_v58 = vrot.slane %v1192_v50, %v10521_v52 }
 0x218   :  { %7704 = vmatpush1.bf16.msra.mxu1 %v7703_v22 }
 0x219   :  { %7127 = vmatmul.mubr.msk.f32.gmra.mrb[2].mxu0 %vm487_vm1, %v10407_v51  ;;  %7131 = vmatmul.mubr.msk.f32.gmra.mrb[10].mxu1 %vm487_vm1, %v10407_v51  ;;  %v10519_v51 = vsub.s32 1, %v1195_v47 }
 0x21a   :  { %7684 = vmatpush3.bf16.msra.mxu0 %v10363_v5  ;;  %766 = vmatprep.mubr.f32.mxu0 %v10055_v44  ;;  %v869_v5 = vld [vmem:[#allocation5 + $0x40] sm:$0xff] }
 0x21b   :  { %855 = vmatprep.mubr.f32.mxu1 %v10055_v44  ;;  %7686 = vmatprep.subr.bf16.mxu0 %v10369_v9  ;;  %v1201_v57 = vrot.slane %v1192_v50, %v10519_v51 }
 0x21c   :  { %7706 = vmatprep.subr.bf16.mxu1 %v7705_v25 }
 0x21d   :  { %7128 = vmatmul.mubr.msk.f32.gmra.mrb[4].mxu0 %vm487_vm1, %v10411_v54  ;;  %7132 = vmatmul.mubr.msk.f32.gmra.mrb[12].mxu1 %vm487_vm1, %v10411_v54  ;;  %v1205_v54 = vrot.slane %v1192_v50, %v10517_v49 }
 0x21e   :  { %7688 = vmatpush3.bf16.msra.mxu0 %v10369_v9  ;;  %772 = vmatprep.mubr.f32.mxu0 %v10055_v44  ;;  %v870_v9 = vld [vmem:[#allocation5 + $0x48] sm:$0xff] }
 0x21f   :  { %861 = vmatprep.mubr.f32.mxu1 %v10055_v44  ;;  %7690 = vmatprep.subr.bf16.mxu0 %v10373_v12 }
 0x220   :  { %7708 = vmatpush1.bf16.msra.mxu1 %v7707_v29 }
 0x221   :  { %7129 = vmatmul.mubr.msk.f32.gmra.mrb[6].mxu0 %vm487_vm1, %v10409_v53  ;;  %7133 = vmatmul.mubr.msk.f32.gmra.mrb[14].mxu1 %vm487_vm1, %v10409_v53  ;;  %v1197_v53 = vrot.slane %v1192_v50, %v10515_v48 }
 0x222   :  { %7692 = vmatpush3.bf16.msra.mxu0 %v10373_v12  ;;  %7572 = vmatprep.mubr.msk.f32.mxu0 %vm255_vm0, %v869_v5 }
 0x223   :  { %7694 = vmatprep.subr.bf16.mxu0 %v7693_v30  ;;  %1151 = vmatprep.mubr.f32.mxu1 %v10055_v44 }
 0x225   :  { %7573 = vmatmul.mubr.msk.f32.vlgmr.msra.gmra.mrb[8].mxu0 %vm255_vm0, %v870_v9 }
 0x226   :  { %7575 = vmatprep.mubr.msk.f32.mxu0 %vm255_vm0, %v871_v36  ;;  %7696 = vmatpush1.bf16.msra.mxu0 %v7695_v35 }
 0x227   :  { %7698 = vmatprep.subr.bf16.mxu0 %v7697_v37 }
 0x229   :  { %7576 = vmatmul.mubr.msk.f32.gmra.mrb[10].mxu0 %vm255_vm0, %v872_v40 }
 0x22a   :  { %7700 = vmatpush1.bf16.msra.mxu0 %v7699_v41  ;;  %1062 = vmatprep.mubr.f32.mxu0 %v10055_v44 }
 0x2f8   :  { %v7574_v12 = vpop.f32.mrb[8].mxu0 }
 0x2f9   :  { %v951_v42 = vpop.f32.mrb[9].mxu0 }
 0x2fa   :  { %7138 = vmatmul.mubr.msk.f32.vlgmr.msra.gmra.mrb[0].mxu0 %vm487_vm1, %v951_v42  ;;  %7142 = vmatmul.mubr.msk.f32.vlgmr.msra.gmra.mrb[8].mxu1 %vm487_vm1, %v951_v42 }
 0x2fb   :  { %1068 = vmatprep.mubr.f32.mxu0 %v10055_v44  ;;  %1157 = vmatprep.mubr.f32.mxu1 %v10055_v44 }
 0x2fc   :  { %v7577_v43 = vpop.f32.mrb[10].mxu0 }
 0x2fd   :  { %v961_v45 = vpop.f32.mrb[11].mxu0 }
 0x2fe   :  { %7139 = vmatmul.mubr.msk.f32.gmra.mrb[2].mxu0 %vm487_vm1, %v7574_v12  ;;  %7143 = vmatmul.mubr.msk.f32.gmra.mrb[10].mxu1 %vm487_vm1, %v7574_v12 }
 0x2ff   :  { %1074 = vmatprep.mubr.f32.mxu0 %v10055_v44  ;;  %1163 = vmatprep.mubr.f32.mxu1 %v10055_v44 }
 0x302   :  { %7140 = vmatmul.mubr.msk.f32.gmra.mrb[4].mxu0 %vm487_vm1, %v961_v45  ;;  %7144 = vmatmul.mubr.msk.f32.gmra.mrb[12].mxu1 %vm487_vm1, %v961_v45 }
 0x303   :  { %1080 = vmatprep.mubr.f32.mxu0 %v10055_v44  ;;  %1169 = vmatprep.mubr.f32.mxu1 %v10055_v44 }
 0x306   :  { %7141 = vmatmul.mubr.msk.f32.gmra.mrb[6].mxu0 %vm487_vm1, %v7577_v43  ;;  %7145 = vmatmul.mubr.msk.f32.gmra.mrb[14].mxu1 %vm487_vm1, %v7577_v43 }
 0x307   :  { %1318 = vmatprep.mubr.f32.mxu1 %v10055_v44  ;;  %1395 = vmatprep.mubr.f32.mxu0 %v10055_v44 }
 0x3cd   :  { %v1064_v55 = vpop.f32.mrb[0].mxu0  ;;  %v1153_v56 = vpop.f32.mrb[8].mxu1 }
 0x3ce   :  { %v1066_v59 = vpop.f32.mrb[1].mxu0  ;;  %v1155_v60 = vpop.f32.mrb[9].mxu1  ;;  %v1214_v61 = vadd.f32 %v1197_v53, %v1064_v55  ;;  %v1216_v62 = vadd.f32 %v1205_v54, %v1153_v56  ;;  %v1828_v55 = vld [vmem:[#allocation14 + $0x8] sm:$0xff] }
 0x3cf   :  { %v1215_v63 = vadd.f32 %v1201_v57, %v1066_v59  ;;  %v1217_v0 = vadd.f32 %v1209_v58, %v1155_v60  ;;  %v1832_v56 = vld [vmem:[#allocation14 + $0x28] sm:$0xff]  ;;  %v1247_v59 = vld [vmem:[#allocation11 + $0x8] sm:$0xff]  ;;  %v1827_v60 = vld [vmem:[#allocation14] sm:$0xff] }
 0x3d0   :  { %v1230_v13 = vmax.f32 %v1214_v61, 0.0  ;;  %v1232_v14 = vmax.f32 %v1216_v62, 0.0  ;;  %v1831_v61 = vld [vmem:[#allocation14 + $0x20] sm:$0xff]  ;;  %v7741_v62 = vpack.c.bf16 %v1832_v56, %v1828_v55  ;;  %v1862_v55 = vld [vmem:[#allocation14 + $0x118] sm:$0xff] }
 0x3d1   :  { %v1070_v1 = vpop.f32.mrb[2].mxu0  ;;  %v1159_v2 = vpop.f32.mrb[10].mxu1  ;;  %v1231_v17 = vmax.f32 %v1215_v63, 0.0  ;;  %v1233_v18 = vmax.f32 %v1217_v0, 0.0  ;;  %v1829_v0 = vld [vmem:[#allocation14 + $0x10] sm:$0xff]  ;;  %v1866_v56 = vld [vmem:[#allocation14 + $0x138] sm:$0xff] }
 0x3d2   :  { %v1218_v4 = vadd.f32 %v1197_v53, %v1070_v1  ;;  %v1220_v6 = vadd.f32 %v1205_v54, %v1159_v2  ;;  %v1072_v7 = vpop.f32.mrb[3].mxu0  ;;  %v1161_v8 = vpop.f32.mrb[11].mxu1  ;;  %v1833_v1 = vld [vmem:[#allocation14 + $0x30] sm:$0xff]  ;;  %v1836_v2 = vld [vmem:[#allocation14 + $0x48] sm:$0xff] }
 0x3d3   :  { %v1219_v10 = vadd.f32 %v1201_v57, %v1072_v7  ;;  %v1221_v11 = vadd.f32 %v1209_v58, %v1161_v8  ;;  %v1842_v7 = vld [vmem:[#allocation14 + $0x78] sm:$0xff]  ;;  %v1665_v8 = vld [vmem:[#allocation11 + $0x10] sm:$0xff] }
 0x3d4   :  { %v1234_v15 = vmax.f32 %v1218_v4, 0.0  ;;  %v1236_v16 = vmax.f32 %v1220_v6, 0.0  ;;  %v1840_v4 = vld [vmem:[#allocation14 + $0x68] sm:$0xff]  ;;  %v1838_v6 = vld [vmem:[#allocation14 + $0x58] sm:$0xff] }
 0x3d5   :  { %v1235_v19 = vmax.f32 %v1219_v10, 0.0  ;;  %v1237_v20 = vmax.f32 %v1221_v11, 0.0  ;;  %v1076_v21 = vpop.f32.mrb[4].mxu0  ;;  %v1165_v22 = vpop.f32.mrb[12].mxu1  ;;  %v7743_v10 = vpack.c.bf16 %v1831_v61, %v1827_v60  ;;  %v7871_v11 = vpack.c.bf16 %v1833_v1, %v1829_v0  ;;  %v1863_v60 = vld [vmem:[#allocation14 + $0x120] sm:$0xff]  ;;  %v1865_v0 = vld [vmem:[#allocation14 + $0x130] sm:$0xff] }
 0x3d6   :  { %v10527_v23 = vpack.c.bf16 %v1234_v15, %v1230_v13  ;;  %v10529_v24 = vpack.c.bf16 %v1236_v16, %v1232_v14  ;;  %v1078_v25 = vpop.f32.mrb[5].mxu0  ;;  %v1167_v26 = vpop.f32.mrb[13].mxu1  ;;  %v1222_v28 = vadd.f32 %v1197_v53, %v1076_v21  ;;  %v1224_v29 = vadd.f32 %v1205_v54, %v1165_v22  ;;  %v1835_v13 = vld [vmem:[#allocation14 + $0x40] sm:$0xff]  ;;  %v1846_v21 = vld [vmem:[#allocation14 + $0x98] sm:$0xff]  ;;  %v1868_v1 = vld [vmem:[#allocation14 + $0x148] sm:$0xff] }
 0x3d7   :  { %v10531_v27 = vpack.c.bf16 %v1235_v19, %v1231_v17  ;;  %v10533_v3 = vpack.c.bf16 %v1237_v20, %v1233_v18  ;;  %v1223_v5 = vadd.f32 %v1201_v57, %v1078_v25  ;;  %v1225_v30 = vadd.f32 %v1209_v58, %v1167_v26  ;;  %v1839_v14 = vld [vmem:[#allocation14 + $0x60] sm:$0xff]  ;;  %v1837_v17 = vld [vmem:[#allocation14 + $0x50] sm:$0xff]  ;;  %v1844_v19 = vld [vmem:[#allocation14 + $0x88] sm:$0xff] }
 0x3d8   :  { %v1238_v38 = vmax.f32 %v1222_v28, 0.0  ;;  %v1240_v39 = vmax.f32 %v1224_v29, 0.0  ;;  %v7745_v15 = vpack.c.bf16 %v1840_v4, %v1836_v2  ;;  %v7873_v16 = vpack.c.bf16 %v1842_v7, %v1838_v6  ;;  %v1841_v18 = vld [vmem:[#allocation14 + $0x70] sm:$0xff]  ;;  %v1848_v20 = vld [vmem:[#allocation14 + $0xa8] sm:$0xff]  ;;  %v1850_v22 = vld [vmem:[#allocation14 + $0xb8] sm:$0xff] }
 0x3d9   :  { %v1082_v31 = vpop.f32.mrb[6].mxu0  ;;  %v1171_v32 = vpop.f32.mrb[14].mxu1  ;;  %7710 = vmatprep.subr.bf16.mxu1 %v10531_v27  ;;  %7718 = vmatprep.subr.bf16.mxu0 %v10533_v3  ;;  %v1239_v12 = vmax.f32 %v1223_v5, 0.0  ;;  %v1241_v42 = vmax.f32 %v1225_v30, 0.0  ;;  %v1666_v25 = vld [vmem:[#allocation11 + $0x18] sm:$0xff]  ;;  %v7747_v26 = vpack.c.bf16 %v1839_v14, %v1835_v13  ;;  %v7875_v28 = vpack.c.bf16 %v1841_v18, %v1837_v17  ;;  %v1843_v29 = vld [vmem:[#allocation14 + $0x80] sm:$0xff] }
 0x3da   :  { %v1226_v33 = vadd.f32 %v1197_v53, %v1082_v31  ;;  %v1228_v34 = vadd.f32 %v1205_v54, %v1171_v32  ;;  %v1084_v9 = vpop.f32.mrb[7].mxu0  ;;  %v1173_v35 = vpop.f32.mrb[15].mxu1  ;;  %7712 = vmatpush1.bf16.msra.mxu1 %v10527_v23  ;;  %7720 = vmatpush1.bf16.msra.mxu0 %v10529_v24  ;;  %v1246_v54 = vld [vmem:[#allocation11] sm:$0xff]  ;;  %v1847_v5 = vld [vmem:[#allocation14 + $0xa0] sm:$0xff]  ;;  %v7749_v30 = vpack.c.bf16 %v1848_v20, %v1844_v19  ;;  %v1872_v2 = vld [vmem:[#allocation14 + $0x168] sm:$0xff] }
 0x3db   :  { %v1227_v36 = vadd.f32 %v1201_v57, %v1084_v9  ;;  %v1229_v37 = vadd.f32 %v1209_v58, %v1173_v35  ;;  %v1830_v57 = vld [vmem:[#allocation14 + $0x18] sm:$0xff]  ;;  %v7877_v31 = vpack.c.bf16 %v1850_v22, %v1846_v21  ;;  %v1845_v32 = vld [vmem:[#allocation14 + $0x90] sm:$0xff]  ;;  %v1856_v9 = vld [vmem:[#allocation14 + $0xe8] sm:$0xff]  ;;  %v7761_v13 = vpack.c.bf16 %v1872_v2, %v1868_v1 }
 0x3dc   :  { %v1242_v40 = vmax.f32 %v1226_v33, 0.0  ;;  %v1244_v41 = vmax.f32 %v1228_v34, 0.0  ;;  %v1834_v58 = vld [vmem:[#allocation14 + $0x38] sm:$0xff]  ;;  %v1849_v33 = vld [vmem:[#allocation14 + $0xb0] sm:$0xff]  ;;  %v1852_v34 = vld [vmem:[#allocation14 + $0xc8] sm:$0xff] }
 0x3dd   :  { %v1243_v43 = vmax.f32 %v1227_v36, 0.0  ;;  %v1245_v45 = vmax.f32 %v1229_v37, 0.0  ;;  %v7869_v63 = vpack.c.bf16 %v1834_v58, %v1830_v57  ;;  %v1854_v35 = vld [vmem:[#allocation14 + $0xd8] sm:$0xff]  ;;  %v7751_v37 = vpack.c.bf16 %v1847_v5, %v1843_v29  ;;  %v1876_v17 = vld [vmem:[#allocation14 + $0x188] sm:$0xff]  ;;  %v1877_v5 = vld [vmem:[#allocation14 + $0x190] sm:$0xff] }
 0x3de   :  { %v10539_v46 = vpack.c.bf16 %v1242_v40, %v1238_v38  ;;  %v10541_v47 = vpack.c.bf16 %v1244_v41, %v1240_v39  ;;  %v1858_v36 = vld [vmem:[#allocation14 + $0xf8] sm:$0xff]  ;;  %v7879_v38 = vpack.c.bf16 %v1849_v33, %v1845_v32  ;;  %v1851_v39 = vld [vmem:[#allocation14 + $0xc0] sm:$0xff]  ;;  %v7753_v41 = vpack.c.bf16 %v1856_v9, %v1852_v34  ;;  %v1880_v18 = vld [vmem:[#allocation14 + $0x1a8] sm:$0xff] }
 0x3df   :  { %v10543_v50 = vpack.c.bf16 %v1243_v43, %v1239_v12  ;;  %v10545_v53 = vpack.c.bf16 %v1245_v45, %v1241_v42  ;;  %v1855_v40 = vld [vmem:[#allocation14 + $0xe0] sm:$0xff]  ;;  %v7881_v12 = vpack.c.bf16 %v1858_v36, %v1854_v35  ;;  %v1853_v42 = vld [vmem:[#allocation14 + $0xd0] sm:$0xff]  ;;  %v1860_v45 = vld [vmem:[#allocation14 + $0x108] sm:$0xff] }
 0x3e0   :  { %v1857_v43 = vld [vmem:[#allocation14 + $0xf0] sm:$0xff]  ;;  %v7755_v57 = vpack.c.bf16 %v1855_v40, %v1851_v39  ;;  %v1870_v4 = vld [vmem:[#allocation14 + $0x158] sm:$0xff]  ;;  %v1888_v32 = vld [vmem:[#allocation14 + $0x1e8] sm:$0xff] }
 0x3e1   :  { %7714 = vmatprep.subr.bf16.mxu1 %v10543_v50  ;;  %7722 = vmatprep.subr.bf16.mxu0 %v10545_v53  ;;  %v7883_v58 = vpack.c.bf16 %v1857_v43, %v1853_v42  ;;  %v1874_v6 = vld [vmem:[#allocation14 + $0x178] sm:$0xff]  ;;  %v1883_v36 = vld [vmem:[#allocation14 + $0x1c0] sm:$0xff]  ;;  %v1885_v40 = vld [vmem:[#allocation14 + $0x1d0] sm:$0xff] }
 0x3e2   :  { %7716 = vmatpush1.bf16.msra.mxu1 %v10539_v46  ;;  %7724 = vmatpush1.bf16.msra.mxu0 %v10541_v47  ;;  %v7889_v14 = vpack.c.bf16 %v1874_v6, %v1870_v4  ;;  %v1878_v19 = vld [vmem:[#allocation14 + $0x198] sm:$0xff]  ;;  %v1896_v42 = vld [vmem:[#allocation14 + $0x228] sm:$0xff]  ;;  %v1899_v6 = vld [vmem:[#allocation14 + $0x240] sm:$0xff] }
 0x3e3   :  { %7726 = vmatprep.subr.bf16.mxu1 %v10531_v27  ;;  %7734 = vmatprep.subr.bf16.mxu0 %v10533_v3  ;;  %v1882_v20 = vld [vmem:[#allocation14 + $0x1b8] sm:$0xff] }
 0x3e4   :  { %v7893_v29 = vpack.c.bf16 %v1882_v20, %v1878_v19  ;;  %v1886_v33 = vld [vmem:[#allocation14 + $0x1d8] sm:$0xff]  ;;  %v1907_v20 = vld [vmem:[#allocation14 + $0x280] sm:$0xff] }
 0x3e5   :  { %7146 = vmatmul.mubr.msk.f32.vlgmr.msra.gmra.mrb[16].mxu1 %vm487_vm1, %v1246_v54  ;;  %7148 = vmatmul.mubr.msk.f32.vlgmr.msra.gmra.mrb[12].mxu0 %vm487_vm1, %v1246_v54  ;;  %v1864_v54 = vld [vmem:[#allocation14 + $0x128] sm:$0xff]  ;;  %v1890_v34 = vld [vmem:[#allocation14 + $0x1f8] sm:$0xff] }
 0x3e6   :  { %7728 = vmatpush1.bf16.msra.mxu1 %v10527_v23  ;;  %7736 = vmatpush1.bf16.msra.mxu0 %v10529_v24  ;;  %v7757_v61 = vpack.c.bf16 %v1864_v54, %v1860_v45  ;;  %v7897_v39 = vpack.c.bf16 %v1890_v34, %v1886_v33  ;;  %v1894_v43 = vld [vmem:[#allocation14 + $0x218] sm:$0xff]  ;;  %v1915_v34 = vld [vmem:[#allocation14 + $0x2c0] sm:$0xff] }
 0x3e7   :  { %7730 = vmatprep.subr.bf16.mxu1 %v10543_v50  ;;  %7738 = vmatprep.subr.bf16.mxu0 %v10545_v53  ;;  %v1898_v45 = vld [vmem:[#allocation14 + $0x238] sm:$0xff] }
 0x3e8   :  { %1324 = vmatprep.mubr.f32.mxu1 %v10055_v44  ;;  %1401 = vmatprep.mubr.f32.mxu0 %v10055_v44  ;;  %v1906_v1 = vld [vmem:[#allocation14 + $0x278] sm:$0xff] }
 0x3e9   :  { %7147 = vmatmul.mubr.msk.f32.gmra.mrb[18].mxu1 %vm487_vm1, %v1247_v59  ;;  %7149 = vmatmul.mubr.msk.f32.gmra.mrb[14].mxu0 %vm487_vm1, %v1247_v59  ;;  %v1859_v59 = vld [vmem:[#allocation14 + $0x100] sm:$0xff] }
 0x3ea   :  { %7732 = vmatpush1.bf16.msra.mxu1 %v10539_v46  ;;  %7740 = vmatpush1.bf16.msra.mxu0 %v10541_v47  ;;  %v7759_v7 = vpack.c.bf16 %v1863_v60, %v1859_v59  ;;  %v7901_v59 = vpack.c.bf16 %v1898_v45, %v1894_v43  ;;  %v1893_v60 = vld [vmem:[#allocation14 + $0x210] sm:$0xff]  ;;  %v1923_v45 = vld [vmem:[#allocation14 + $0x300] sm:$0xff] }
 0x3eb   :  { %1737 = vmatprep.mubr.f32.mxu1 %v10055_v44  ;;  %1814 = vmatprep.mubr.f32.mxu0 %v10055_v44 }
 0x3ec   :  { %7742 = vmatprep.subr.bf16.mxu1 %v7741_v62  ;;  %7870 = vmatprep.subr.bf16.mxu0 %v7869_v63  ;;  %v7885_v62 = vpack.c.bf16 %v1866_v56, %v1862_v55  ;;  %v1861_v63 = vld [vmem:[#allocation14 + $0x110] sm:$0xff]  ;;  %v1891_v56 = vld [vmem:[#allocation14 + $0x200] sm:$0xff] }
 0x3ed   :  { %7150 = vmatmul.mubr.msk.f32.vlgmr.msra.gmra.mrb[20].mxu1 %vm487_vm1, %v1665_v8  ;;  %7152 = vmatmul.mubr.msk.f32.vlgmr.msra.gmra.mrb[16].mxu0 %vm487_vm1, %v1665_v8  ;;  %v7887_v8 = vpack.c.bf16 %v1865_v0, %v1861_v63  ;;  %v1904_v63 = vld [vmem:[#allocation14 + $0x268] sm:$0xff]  ;;  %v1902_v0 = vld [vmem:[#allocation14 + $0x258] sm:$0xff] }
 0x3ee   :  { %1743 = vmatprep.mubr.f32.mxu1 %v10055_v44  ;;  %1820 = vmatprep.mubr.f32.mxu0 %v10055_v44 }
 0x3ef   :  { %7744 = vmatpush1.bf16.msra.mxu1 %v7743_v10  ;;  %7872 = vmatpush1.bf16.msra.mxu0 %v7871_v11  ;;  %v1867_v10 = vld [vmem:[#allocation14 + $0x140] sm:$0xff] }
 0x3f0   :  { %7746 = vmatprep.subr.bf16.mxu1 %v7745_v15  ;;  %7874 = vmatprep.subr.bf16.mxu0 %v7873_v16  ;;  %v1871_v11 = vld [vmem:[#allocation14 + $0x160] sm:$0xff]  ;;  %v1869_v15 = vld [vmem:[#allocation14 + $0x150] sm:$0xff] }
 0x3f1   :  { %7151 = vmatmul.mubr.msk.f32.gmra.mrb[22].mxu1 %vm487_vm1, %v1666_v25  ;;  %7153 = vmatmul.mubr.msk.f32.gmra.mrb[18].mxu0 %vm487_vm1, %v1666_v25  ;;  %v1873_v16 = vld [vmem:[#allocation14 + $0x170] sm:$0xff]  ;;  %v7763_v21 = vpack.c.bf16 %v1871_v11, %v1867_v10  ;;  %v1875_v25 = vld [vmem:[#allocation14 + $0x180] sm:$0xff]  ;;  %v7905_v10 = vpack.c.bf16 %v1906_v1, %v1902_v0 }
 0x3f2   :  { %v7891_v22 = vpack.c.bf16 %v1873_v16, %v1869_v15  ;;  %v1901_v11 = vld [vmem:[#allocation14 + $0x250] sm:$0xff]  ;;  %v1912_v15 = vld [vmem:[#allocation14 + $0x2a8] sm:$0xff]  ;;  %v1910_v16 = vld [vmem:[#allocation14 + $0x298] sm:$0xff] }
 0x3f3   :  { %7748 = vmatpush1.bf16.msra.mxu1 %v7747_v26  ;;  %7876 = vmatpush1.bf16.msra.mxu0 %v7875_v28  ;;  %v1879_v26 = vld [vmem:[#allocation14 + $0x1a0] sm:$0xff]  ;;  %v7765_v28 = vpack.c.bf16 %v1880_v18, %v1876_v17  ;;  %v1914_v17 = vld [vmem:[#allocation14 + $0x2b8] sm:$0xff] }
 0x3f4   :  { %7750 = vmatprep.subr.bf16.mxu1 %v7749_v30  ;;  %7878 = vmatprep.subr.bf16.mxu0 %v7877_v31  ;;  %v1881_v30 = vld [vmem:[#allocation14 + $0x1b0] sm:$0xff]  ;;  %v1884_v31 = vld [vmem:[#allocation14 + $0x1c8] sm:$0xff]  ;;  %v7767_v9 = vpack.c.bf16 %v1879_v26, %v1875_v25  ;;  %v7909_v25 = vpack.c.bf16 %v1914_v17, %v1910_v16  ;;  %v1931_v1 = vld [vmem:[#allocation14 + $0x340] sm:$0xff] }
 0x3f5   :  { %v7895_v35 = vpack.c.bf16 %v1881_v30, %v1877_v5  ;;  %v1909_v26 = vld [vmem:[#allocation14 + $0x290] sm:$0xff]  ;;  %v1920_v5 = vld [vmem:[#allocation14 + $0x2e8] sm:$0xff]  ;;  %v1918_v30 = vld [vmem:[#allocation14 + $0x2d8] sm:$0xff] }
 0x3f6   :  { %v1946_v17 = vld [vmem:[#allocation14 + $0x3b8] sm:$0xff] }
 0x3f7   :  { %7752 = vmatpush1.bf16.msra.mxu1 %v7751_v37  ;;  %7880 = vmatpush1.bf16.msra.mxu0 %v7879_v38  ;;  %v1887_v37 = vld [vmem:[#allocation14 + $0x1e0] sm:$0xff]  ;;  %v7769_v38 = vpack.c.bf16 %v1888_v32, %v1884_v31  ;;  %v1922_v31 = vld [vmem:[#allocation14 + $0x2f8] sm:$0xff] }
 0x3f8   :  { %7754 = vmatprep.subr.bf16.mxu1 %v7753_v41  ;;  %7882 = vmatprep.subr.bf16.mxu0 %v7881_v12  ;;  %v1889_v41 = vld [vmem:[#allocation14 + $0x1f0] sm:$0xff]  ;;  %v1892_v12 = vld [vmem:[#allocation14 + $0x208] sm:$0xff]  ;;  %v7771_v54 = vpack.c.bf16 %v1887_v37, %v1883_v36  ;;  %v7913_v36 = vpack.c.bf16 %v1922_v31, %v1918_v30  ;;  %v1954_v31 = vld [vmem:[#allocation14 + $0x3f8] sm:$0xff] }
 0x3f9   :  { %v7899_v55 = vpack.c.bf16 %v1889_v41, %v1885_v40  ;;  %v1917_v37 = vld [vmem:[#allocation14 + $0x2d0] sm:$0xff]  ;;  %v1928_v40 = vld [vmem:[#allocation14 + $0x328] sm:$0xff]  ;;  %v1926_v41 = vld [vmem:[#allocation14 + $0x318] sm:$0xff] }
 0x3fb   :  { %7756 = vmatpush1.bf16.msra.mxu1 %v7755_v57  ;;  %7884 = vmatpush1.bf16.msra.mxu0 %v7883_v58  ;;  %v1895_v57 = vld [vmem:[#allocation14 + $0x220] sm:$0xff]  ;;  %v7773_v58 = vpack.c.bf16 %v1896_v42, %v1892_v12  ;;  %v1930_v12 = vld [vmem:[#allocation14 + $0x338] sm:$0xff] }
 0x3fc   :  { %7758 = vmatprep.subr.bf16.mxu1 %v7757_v61  ;;  %7886 = vmatprep.subr.bf16.mxu0 %v7885_v62  ;;  %v1897_v61 = vld [vmem:[#allocation14 + $0x230] sm:$0xff]  ;;  %v1900_v62 = vld [vmem:[#allocation14 + $0x248] sm:$0xff]  ;;  %v7775_v2 = vpack.c.bf16 %v1895_v57, %v1891_v56  ;;  %v7917_v56 = vpack.c.bf16 %v1930_v12, %v1926_v41  ;;  %v1962_v12 = vld [vmem:[#allocation14 + $0x438] sm:$0xff] }
 0x3fd   :  { %v7903_v4 = vpack.c.bf16 %v1897_v61, %v1893_v60  ;;  %v1925_v57 = vld [vmem:[#allocation14 + $0x310] sm:$0xff]  ;;  %v1936_v60 = vld [vmem:[#allocation14 + $0x368] sm:$0xff]  ;;  %v1934_v61 = vld [vmem:[#allocation14 + $0x358] sm:$0xff] }
 0x3ff   :  { %7760 = vmatpush1.bf16.msra.mxu1 %v7759_v7  ;;  %7888 = vmatpush1.bf16.msra.mxu0 %v7887_v8  ;;  %v1903_v7 = vld [vmem:[#allocation14 + $0x260] sm:$0xff]  ;;  %v7777_v8 = vpack.c.bf16 %v1904_v63, %v1900_v62  ;;  %v1938_v62 = vld [vmem:[#allocation14 + $0x378] sm:$0xff] }
 0x400   :  { %7762 = vmatprep.subr.bf16.mxu1 %v7761_v13  ;;  %7890 = vmatprep.subr.bf16.mxu0 %v7889_v14  ;;  %v1905_v13 = vld [vmem:[#allocation14 + $0x270] sm:$0xff]  ;;  %v1908_v14 = vld [vmem:[#allocation14 + $0x288] sm:$0xff]  ;;  %v7779_v18 = vpack.c.bf16 %v1903_v7, %v1899_v6  ;;  %v1935_v6 = vld [vmem:[#allocation14 + $0x360] sm:$0xff] }
 0x401   :  { %v7907_v19 = vpack.c.bf16 %v1905_v13, %v1901_v11  ;;  %v1933_v7 = vld [vmem:[#allocation14 + $0x350] sm:$0xff]  ;;  %v1940_v13 = vld [vmem:[#allocation14 + $0x388] sm:$0xff] }
 0x403   :  { %7764 = vmatpush1.bf16.msra.mxu1 %v7763_v21  ;;  %7892 = vmatpush1.bf16.msra.mxu0 %v7891_v22  ;;  %v1911_v21 = vld [vmem:[#allocation14 + $0x2a0] sm:$0xff]  ;;  %v7781_v22 = vpack.c.bf16 %v1912_v15, %v1908_v14  ;;  %v1944_v14 = vld [vmem:[#allocation14 + $0x3a8] sm:$0xff]  ;;  %v1942_v15 = vld [vmem:[#allocation14 + $0x398] sm:$0xff] }
 0x404   :  { %7766 = vmatprep.subr.bf16.mxu1 %v7765_v28  ;;  %7894 = vmatprep.subr.bf16.mxu0 %v7893_v29  ;;  %v1913_v28 = vld [vmem:[#allocation14 + $0x2b0] sm:$0xff]  ;;  %v1916_v29 = vld [vmem:[#allocation14 + $0x2c8] sm:$0xff]  ;;  %v7783_v32 = vpack.c.bf16 %v1911_v21, %v1907_v20  ;;  %v7797_v16 = vpack.c.bf16 %v1944_v14, %v1940_v13  ;;  %v7925_v20 = vpack.c.bf16 %v1946_v17, %v1942_v15 }
 0x405   :  { %v7911_v33 = vpack.c.bf16 %v1913_v28, %v1909_v26  ;;  %v1948_v28 = vld [vmem:[#allocation14 + $0x3c8] sm:$0xff]  ;;  %v1965_v17 = vld [vmem:[#allocation14 + $0x450] sm:$0xff] }
 0x407   :  { %7768 = vmatpush1.bf16.msra.mxu1 %v7767_v9  ;;  %7896 = vmatpush1.bf16.msra.mxu0 %v7895_v35  ;;  %v1919_v9 = vld [vmem:[#allocation14 + $0x2e0] sm:$0xff]  ;;  %v7785_v35 = vpack.c.bf16 %v1920_v5, %v1916_v29  ;;  %v1952_v29 = vld [vmem:[#allocation14 + $0x3e8] sm:$0xff]  ;;  %v1950_v5 = vld [vmem:[#allocation14 + $0x3d8] sm:$0xff] }
 0x408   :  { %7770 = vmatprep.subr.bf16.mxu1 %v7769_v38  ;;  %7898 = vmatprep.subr.bf16.mxu0 %v7897_v39  ;;  %v1921_v38 = vld [vmem:[#allocation14 + $0x2f0] sm:$0xff]  ;;  %v1924_v39 = vld [vmem:[#allocation14 + $0x308] sm:$0xff]  ;;  %v7787_v42 = vpack.c.bf16 %v1919_v9, %v1915_v34  ;;  %v7801_v30 = vpack.c.bf16 %v1952_v29, %v1948_v28  ;;  %v7929_v34 = vpack.c.bf16 %v1954_v31, %v1950_v5  ;;  %v1971_v29 = vld [vmem:[#allocation14 + $0x480] sm:$0xff] }
 0x409   :  { %v7915_v43 = vpack.c.bf16 %v1921_v38, %v1917_v37  ;;  %v1956_v38 = vld [vmem:[#allocation14 + $0x408] sm:$0xff]  ;;  %v1975_v5 = vld [vmem:[#allocation14 + $0x4a0] sm:$0xff] }
 0x40b   :  { %7772 = vmatpush1.bf16.msra.mxu1 %v7771_v54  ;;  %7900 = vmatpush1.bf16.msra.mxu0 %v7899_v55  ;;  %v1927_v54 = vld [vmem:[#allocation14 + $0x320] sm:$0xff]  ;;  %v7789_v55 = vpack.c.bf16 %v1928_v40, %v1924_v39  ;;  %v1960_v39 = vld [vmem:[#allocation14 + $0x428] sm:$0xff]  ;;  %v1958_v40 = vld [vmem:[#allocation14 + $0x418] sm:$0xff] }
 0x40c   :  { %7774 = vmatprep.subr.bf16.mxu1 %v7773_v58  ;;  %7902 = vmatprep.subr.bf16.mxu0 %v7901_v59  ;;  %v1929_v58 = vld [vmem:[#allocation14 + $0x330] sm:$0xff]  ;;  %v1932_v59 = vld [vmem:[#allocation14 + $0x348] sm:$0xff]  ;;  %v7791_v63 = vpack.c.bf16 %v1927_v54, %v1923_v45  ;;  %v7805_v41 = vpack.c.bf16 %v1960_v39, %v1956_v38  ;;  %v1982_v39 = vld [vmem:[#allocation14 + $0x4d8] sm:$0xff] }
 0x40d   :  { %v7919_v0 = vpack.c.bf16 %v1929_v58, %v1925_v57  ;;  %v1955_v57 = vld [vmem:[#allocation14 + $0x400] sm:$0xff]  ;;  %v1984_v38 = vld [vmem:[#allocation14 + $0x4e8] sm:$0xff] }
 0x40e   :  { %v1959_v58 = vld [vmem:[#allocation14 + $0x420] sm:$0xff] }
 0x40f   :  { %7776 = vmatpush1.bf16.msra.mxu1 %v7775_v2  ;;  %7904 = vmatpush1.bf16.msra.mxu0 %v7903_v4  ;;  %v7793_v2 = vpack.c.bf16 %v1936_v60, %v1932_v59  ;;  %v7921_v4 = vpack.c.bf16 %v1938_v62, %v1934_v61  ;;  %v1957_v61 = vld [vmem:[#allocation14 + $0x410] sm:$0xff] }
 0x410   :  { %7778 = vmatprep.subr.bf16.mxu1 %v7777_v8  ;;  %7906 = vmatprep.subr.bf16.mxu0 %v7905_v10  ;;  %v1937_v8 = vld [vmem:[#allocation14 + $0x370] sm:$0xff]  ;;  %v7795_v10 = vpack.c.bf16 %v1935_v6, %v1931_v1  ;;  %v1968_v1 = vld [vmem:[#allocation14 + $0x468] sm:$0xff] }
 0x411   :  { %v7923_v11 = vpack.c.bf16 %v1937_v8, %v1933_v7  ;;  %v1961_v62 = vld [vmem:[#allocation14 + $0x430] sm:$0xff]  ;;  %v7807_v7 = vpack.c.bf16 %v1959_v58, %v1955_v57  ;;  %v1983_v57 = vld [vmem:[#allocation14 + $0x4e0] sm:$0xff] }
 0x412   :  { %v7935_v8 = vpack.c.bf16 %v1961_v62, %v1957_v61  ;;  %v1981_v62 = vld [vmem:[#allocation14 + $0x4d0] sm:$0xff] }
 0x413   :  { %7780 = vmatpush1.bf16.msra.mxu1 %v7779_v18  ;;  %7908 = vmatpush1.bf16.msra.mxu0 %v7907_v19  ;;  %v1939_v18 = vld [vmem:[#allocation14 + $0x380] sm:$0xff] }
 0x414   :  { %7782 = vmatprep.subr.bf16.mxu1 %v7781_v22  ;;  %7910 = vmatprep.subr.bf16.mxu0 %v7909_v25  ;;  %v1943_v19 = vld [vmem:[#allocation14 + $0x3a0] sm:$0xff]  ;;  %v1941_v22 = vld [vmem:[#allocation14 + $0x390] sm:$0xff] }
 0x415   :  { %v7799_v21 = vpack.c.bf16 %v1943_v19, %v1939_v18  ;;  %v1945_v25 = vld [vmem:[#allocation14 + $0x3b0] sm:$0xff]  ;;  %v1972_v19 = vld [vmem:[#allocation14 + $0x488] sm:$0xff] }
 0x416   :  { %v7927_v26 = vpack.c.bf16 %v1945_v25, %v1941_v22  ;;  %v1969_v18 = vld [vmem:[#allocation14 + $0x470] sm:$0xff]  ;;  %v1974_v22 = vld [vmem:[#allocation14 + $0x498] sm:$0xff] }
 0x417   :  { %7784 = vmatpush1.bf16.msra.mxu1 %v7783_v32  ;;  %7912 = vmatpush1.bf16.msra.mxu0 %v7911_v33  ;;  %v1947_v32 = vld [vmem:[#allocation14 + $0x3c0] sm:$0xff]  ;;  %v1978_v25 = vld [vmem:[#allocation14 + $0x4b8] sm:$0xff]  ;;  %v7939_v28 = vpack.c.bf16 %v1969_v18, %v1965_v17  ;;  %v1993_v17 = vld [vmem:[#allocation14 + $0x530] sm:$0xff] }
 0x418   :  { %7786 = vmatprep.subr.bf16.mxu1 %v7785_v35  ;;  %7914 = vmatprep.subr.bf16.mxu0 %v7913_v36  ;;  %v1951_v33 = vld [vmem:[#allocation14 + $0x3e0] sm:$0xff]  ;;  %v1949_v35 = vld [vmem:[#allocation14 + $0x3d0] sm:$0xff]  ;;  %v1996_v18 = vld [vmem:[#allocation14 + $0x548] sm:$0xff] }
 0x419   :  { %v7803_v9 = vpack.c.bf16 %v1951_v33, %v1947_v32  ;;  %v1953_v36 = vld [vmem:[#allocation14 + $0x3f0] sm:$0xff]  ;;  %v7941_v33 = vpack.c.bf16 %v1978_v25, %v1974_v22  ;;  %v2002_v22 = vld [vmem:[#allocation14 + $0x578] sm:$0xff] }
 0x41a   :  { %v7931_v37 = vpack.c.bf16 %v1953_v36, %v1949_v35  ;;  %v1980_v35 = vld [vmem:[#allocation14 + $0x4c8] sm:$0xff] }
 0x41b   :  { %7788 = vmatpush1.bf16.msra.mxu1 %v7787_v42  ;;  %7916 = vmatpush1.bf16.msra.mxu0 %v7915_v43  ;;  %v7933_v42 = vpack.c.bf16 %v1962_v12, %v1958_v40  ;;  %v1986_v40 = vld [vmem:[#allocation14 + $0x4f8] sm:$0xff]  ;;  %v7817_v58 = vpack.c.bf16 %v1984_v38, %v1980_v35 }
 0x41c   :  { %7790 = vmatprep.subr.bf16.mxu1 %v7789_v55  ;;  %7918 = vmatprep.subr.bf16.mxu0 %v7917_v56  ;;  %v7945_v61 = vpack.c.bf16 %v1986_v40, %v1982_v39  ;;  %v2010_v35 = vld [vmem:[#allocation14 + $0x5b8] sm:$0xff]  ;;  %v2003_v39 = vld [vmem:[#allocation14 + $0x580] sm:$0xff] }
 0x41d   :  { %v2007_v40 = vld [vmem:[#allocation14 + $0x5a0] sm:$0xff] }
 0x41f   :  { %7792 = vmatpush1.bf16.msra.mxu1 %v7791_v63  ;;  %7920 = vmatpush1.bf16.msra.mxu0 %v7919_v0  ;;  %v1964_v63 = vld [vmem:[#allocation14 + $0x448] sm:$0xff] }
 0x420   :  { %7794 = vmatprep.subr.bf16.mxu1 %v7793_v2  ;;  %7922 = vmatprep.subr.bf16.mxu0 %v7921_v4  ;;  %v1966_v2 = vld [vmem:[#allocation14 + $0x458] sm:$0xff]  ;;  %v7809_v15 = vpack.c.bf16 %v1968_v1, %v1964_v63  ;;  %v1985_v63 = vld [vmem:[#allocation14 + $0x4f0] sm:$0xff]  ;;  %v1988_v1 = vld [vmem:[#allocation14 + $0x508] sm:$0xff] }
 0x421   :  { %v1970_v4 = vld [vmem:[#allocation14 + $0x478] sm:$0xff] }
 0x423   :  { %7796 = vmatpush1.bf16.msra.mxu1 %v7795_v10  ;;  %7924 = vmatpush1.bf16.msra.mxu0 %v7923_v11  ;;  %v1963_v10 = vld [vmem:[#allocation14 + $0x440] sm:$0xff] }
 0x424   :  { %7798 = vmatprep.subr.bf16.mxu1 %v7797_v16  ;;  %7926 = vmatprep.subr.bf16.mxu0 %v7925_v20  ;;  %v1967_v11 = vld [vmem:[#allocation14 + $0x460] sm:$0xff]  ;;  %v7937_v16 = vpack.c.bf16 %v1970_v4, %v1966_v2  ;;  %v1992_v2 = vld [vmem:[#allocation14 + $0x528] sm:$0xff]  ;;  %v1990_v4 = vld [vmem:[#allocation14 + $0x518] sm:$0xff] }
 0x427   :  { %7800 = vmatpush1.bf16.msra.mxu1 %v7799_v21  ;;  %7928 = vmatpush1.bf16.msra.mxu0 %v7927_v26  ;;  %v1976_v21 = vld [vmem:[#allocation14 + $0x4a8] sm:$0xff]  ;;  %v7811_v26 = vpack.c.bf16 %v1967_v11, %v1963_v10  ;;  %v1987_v10 = vld [vmem:[#allocation14 + $0x500] sm:$0xff] }
 0x428   :  { %7802 = vmatprep.subr.bf16.mxu1 %v7801_v30  ;;  %7930 = vmatprep.subr.bf16.mxu0 %v7929_v34  ;;  %v7813_v32 = vpack.c.bf16 %v1976_v21, %v1972_v19  ;;  %v1973_v34 = vld [vmem:[#allocation14 + $0x490] sm:$0xff]  ;;  %v1991_v11 = vld [vmem:[#allocation14 + $0x520] sm:$0xff]  ;;  %v2000_v19 = vld [vmem:[#allocation14 + $0x568] sm:$0xff] }
 0x429   :  { %v1998_v21 = vld [vmem:[#allocation14 + $0x558] sm:$0xff]  ;;  %v7823_v25 = vpack.c.bf16 %v1991_v11, %v1987_v10  ;;  %v2013_v10 = vld [vmem:[#allocation14 + $0x5d0] sm:$0xff] }
 0x42a   :  { %v2017_v11 = vld [vmem:[#allocation14 + $0x5f0] sm:$0xff] }
 0x42b   :  { %7804 = vmatpush1.bf16.msra.mxu1 %v7803_v9  ;;  %7932 = vmatpush1.bf16.msra.mxu0 %v7931_v37  ;;  %v1977_v9 = vld [vmem:[#allocation14 + $0x4b0] sm:$0xff] }
 0x42c   :  { %7806 = vmatprep.subr.bf16.mxu1 %v7805_v41  ;;  %7934 = vmatprep.subr.bf16.mxu0 %v7933_v42  ;;  %v7815_v41 = vpack.c.bf16 %v1975_v5, %v1971_v29  ;;  %v7943_v12 = vpack.c.bf16 %v1977_v9, %v1973_v34  ;;  %v1979_v42 = vld [vmem:[#allocation14 + $0x4c0] sm:$0xff]  ;;  %v7825_v29 = vpack.c.bf16 %v2000_v19, %v1996_v18  ;;  %v2008_v34 = vld [vmem:[#allocation14 + $0x5a8] sm:$0xff]  ;;  %v2006_v9 = vld [vmem:[#allocation14 + $0x598] sm:$0xff] }
 0x42d   :  { %v7953_v5 = vpack.c.bf16 %v2002_v22, %v1998_v21  ;;  %v7963_v19 = vpack.c.bf16 %v2017_v11, %v2013_v10  ;;  %v2019_v21 = vld [vmem:[#allocation14 + $0x600] sm:$0xff]  ;;  %v2046_v10 = vld [vmem:[#allocation14 + $0x6d8] sm:$0xff] }
 0x42e   :  { %v2023_v22 = vld [vmem:[#allocation14 + $0x620] sm:$0xff]  ;;  %v2050_v11 = vld [vmem:[#allocation14 + $0x6f8] sm:$0xff] }
 0x4b8   :  { %v10573_v43 = vpop.f32.mrb[16].mxu1  ;;  %v10575_v45 = vpop.f32.mrb[12].mxu0 }
 0x4b9   :  { %v10577_v54 = vpop.f32.mrb[17].mxu1  ;;  %v10579_v55 = vpop.f32.mrb[13].mxu0 }
 0x4bc   :  { %v10581_v56 = vpop.f32.mrb[18].mxu1  ;;  %v10583_v59 = vpop.f32.mrb[14].mxu0 }
 0x4bd   :  { %v10585_v60 = vpop.f32.mrb[19].mxu1  ;;  %v10587_v0 = vpop.f32.mrb[15].mxu0 }
 0x4c0   :  { %v1739_v6 = vpop.f32.mrb[20].mxu1  ;;  %v10589_v13 = vpop.f32.mrb[16].mxu0 }
 0x4c1   :  { %v1741_v14 = vpop.f32.mrb[21].mxu1  ;;  %v1818_v20 = vpop.f32.mrb[17].mxu0 }
 0x4c2   :  { %2147 = vmatprep.mubr.f32.mxu1 %v1741_v14  ;;  %2301 = vmatprep.mubr.f32.mxu0 %v1741_v14  ;;  %v7821_v14 = vpack.c.bf16 %v1992_v2, %v1988_v1  ;;  %v7831_v1 = vpack.c.bf16 %v2007_v40, %v2003_v39  ;;  %v2029_v39 = vld [vmem:[#allocation14 + $0x650] sm:$0xff] }
 0x4c3   :  { %2148 = vmatmul.mubr.f32.vlgmr.msra.gmra.mrb[24].mxu1 %v1739_v6  ;;  %2302 = vmatmul.mubr.f32.vlgmr.msra.gmra.mrb[20].mxu0 %v1739_v6  ;;  %v1994_v6 = vld [vmem:[#allocation14 + $0x538] sm:$0xff]  ;;  %v2033_v40 = vld [vmem:[#allocation14 + $0x670] sm:$0xff] }
 0x4c4   :  { %7808 = vmatpush1.bf16.msra.mxu1 %v7807_v7  ;;  %7936 = vmatpush1.bf16.msra.mxu0 %v7935_v8  ;;  %v1745_v30 = vpop.f32.mrb[22].mxu1  ;;  %v10591_v31 = vpop.f32.mrb[18].mxu0  ;;  %v7819_v7 = vpack.c.bf16 %v1983_v57, %v1979_v42  ;;  %v7947_v8 = vpack.c.bf16 %v1985_v63, %v1981_v62  ;;  %v2005_v42 = vld [vmem:[#allocation14 + $0x590] sm:$0xff]  ;;  %v2014_v62 = vld [vmem:[#allocation14 + $0x5d8] sm:$0xff] }
 0x4c5   :  { %7810 = vmatprep.subr.bf16.mxu1 %v7809_v15  ;;  %7938 = vmatprep.subr.bf16.mxu0 %v7937_v16  ;;  %v1747_v36 = vpop.f32.mrb[23].mxu1  ;;  %v10593_v37 = vpop.f32.mrb[19].mxu0  ;;  %v7949_v15 = vpack.c.bf16 %v1994_v6, %v1990_v4  ;;  %v1989_v16 = vld [vmem:[#allocation14 + $0x510] sm:$0xff]  ;;  %v2018_v63 = vld [vmem:[#allocation14 + $0x5f8] sm:$0xff]  ;;  %v2011_v4 = vld [vmem:[#allocation14 + $0x5c0] sm:$0xff] }
 0x4c6   :  { %2153 = vmatprep.mubr.f32.mxu1 %v1747_v36  ;;  %2307 = vmatprep.mubr.f32.mxu0 %v1747_v36  ;;  %v2009_v57 = vld [vmem:[#allocation14 + $0x5b0] sm:$0xff]  ;;  %v2015_v6 = vld [vmem:[#allocation14 + $0x5e0] sm:$0xff] }
 0x4c7   :  { %2154 = vmatmul.mubr.f32.gmra.mrb[26].mxu1 %v1745_v30  ;;  %2308 = vmatmul.mubr.f32.gmra.mrb[22].mxu0 %v1745_v30  ;;  %v1997_v30 = vld [vmem:[#allocation14 + $0x550] sm:$0xff]  ;;  %v7959_v2 = vpack.c.bf16 %v2009_v57, %v2005_v42  ;;  %v7835_v18 = vpack.c.bf16 %v2015_v6, %v2011_v4  ;;  %v2038_v42 = vld [vmem:[#allocation14 + $0x698] sm:$0xff] }
 0x4c8   :  { %7812 = vmatpush1.bf16.msra.mxu1 %v7811_v26  ;;  %7940 = vmatpush1.bf16.msra.mxu0 %v7939_v28  ;;  %v1995_v26 = vld [vmem:[#allocation14 + $0x540] sm:$0xff]  ;;  %v2042_v57 = vld [vmem:[#allocation14 + $0x6b8] sm:$0xff]  ;;  %v2037_v4 = vld [vmem:[#allocation14 + $0x690] sm:$0xff] }
 0x4c9   :  { %7814 = vmatprep.subr.bf16.mxu1 %v7813_v32  ;;  %7942 = vmatprep.subr.bf16.mxu0 %v7941_v33  ;;  %v1999_v28 = vld [vmem:[#allocation14 + $0x560] sm:$0xff]  ;;  %v2001_v32 = vld [vmem:[#allocation14 + $0x570] sm:$0xff]  ;;  %v2004_v33 = vld [vmem:[#allocation14 + $0x588] sm:$0xff] }
 0x4ca   :  { %2224 = vmatprep.mubr.f32.mxu1 %v1818_v20  ;;  %2378 = vmatprep.mubr.f32.mxu0 %v1818_v20  ;;  %v7951_v20 = vpack.c.bf16 %v1993_v17, %v1989_v16  ;;  %v7827_v36 = vpack.c.bf16 %v1999_v28, %v1995_v26  ;;  %v7955_v38 = vpack.c.bf16 %v2001_v32, %v1997_v30  ;;  %v2022_v16 = vld [vmem:[#allocation14 + $0x618] sm:$0xff]  ;;  %v2021_v26 = vld [vmem:[#allocation14 + $0x610] sm:$0xff] }
 0x4cb   :  { %v2026_v17 = vld [vmem:[#allocation14 + $0x638] sm:$0xff]  ;;  %v2025_v28 = vld [vmem:[#allocation14 + $0x630] sm:$0xff] }
 0x4cc   :  { %7816 = vmatpush1.bf16.msra.mxu1 %v7815_v41  ;;  %7944 = vmatpush1.bf16.msra.mxu0 %v7943_v12  ;;  %v7829_v41 = vpack.c.bf16 %v2008_v34, %v2004_v33  ;;  %v7957_v12 = vpack.c.bf16 %v2010_v35, %v2006_v9  ;;  %v2030_v30 = vld [vmem:[#allocation14 + $0x658] sm:$0xff]  ;;  %v7839_v33 = vpack.c.bf16 %v2023_v22, %v2019_v21  ;;  %v2027_v9 = vld [vmem:[#allocation14 + $0x640] sm:$0xff]  ;;  %v2041_v6 = vld [vmem:[#allocation14 + $0x6b0] sm:$0xff] }
 0x4cd   :  { %7818 = vmatprep.subr.bf16.mxu1 %v7817_v58  ;;  %7946 = vmatprep.subr.bf16.mxu0 %v7945_v61  ;;  %v2012_v58 = vld [vmem:[#allocation14 + $0x5c8] sm:$0xff]  ;;  %v2034_v32 = vld [vmem:[#allocation14 + $0x678] sm:$0xff]  ;;  %v7967_v34 = vpack.c.bf16 %v2025_v28, %v2021_v26  ;;  %v2031_v35 = vld [vmem:[#allocation14 + $0x660] sm:$0xff] }
 0x4ce   :  { %v2016_v61 = vld [vmem:[#allocation14 + $0x5e8] sm:$0xff]  ;;  %v2045_v21 = vld [vmem:[#allocation14 + $0x6d0] sm:$0xff]  ;;  %v2054_v26 = vld [vmem:[#allocation14 + $0x718] sm:$0xff] }
 0x4cf   :  { %v2049_v22 = vld [vmem:[#allocation14 + $0x6f0] sm:$0xff]  ;;  %v2058_v28 = vld [vmem:[#allocation14 + $0x738] sm:$0xff] }
 0x4d0   :  { %7820 = vmatpush1.bf16.msra.mxu1 %v7819_v7  ;;  %7948 = vmatpush1.bf16.msra.mxu0 %v7947_v8  ;;  %v7833_v7 = vpack.c.bf16 %v2016_v61, %v2012_v58  ;;  %v7961_v8 = vpack.c.bf16 %v2018_v63, %v2014_v62  ;;  %v7843_v58 = vpack.c.bf16 %v2031_v35, %v2027_v9  ;;  %v2035_v62 = vld [vmem:[#allocation14 + $0x680] sm:$0xff]  ;;  %v2053_v9 = vld [vmem:[#allocation14 + $0x710] sm:$0xff] }
 0x4d1   :  { %7822 = vmatprep.subr.bf16.mxu1 %v7821_v14  ;;  %7950 = vmatprep.subr.bf16.mxu0 %v7949_v15  ;;  %v2020_v14 = vld [vmem:[#allocation14 + $0x608] sm:$0xff]  ;;  %v7971_v61 = vpack.c.bf16 %v2033_v40, %v2029_v39  ;;  %v2039_v63 = vld [vmem:[#allocation14 + $0x6a0] sm:$0xff]  ;;  %v2057_v35 = vld [vmem:[#allocation14 + $0x730] sm:$0xff] }
 0x4d2   :  { %v2024_v15 = vld [vmem:[#allocation14 + $0x628] sm:$0xff]  ;;  %v2062_v39 = vld [vmem:[#allocation14 + $0x758] sm:$0xff] }
 0x4d3   :  { %v2066_v40 = vld [vmem:[#allocation14 + $0x778] sm:$0xff] }
 0x4d4   :  { %7824 = vmatpush1.bf16.msra.mxu1 %v7823_v25  ;;  %7952 = vmatpush1.bf16.msra.mxu0 %v7951_v20  ;;  %v7837_v25 = vpack.c.bf16 %v2024_v15, %v2020_v14  ;;  %v7965_v20 = vpack.c.bf16 %v2026_v17, %v2022_v16  ;;  %v7847_v14 = vpack.c.bf16 %v2039_v63, %v2035_v62  ;;  %v2043_v16 = vld [vmem:[#allocation14 + $0x6c0] sm:$0xff]  ;;  %v2061_v62 = vld [vmem:[#allocation14 + $0x750] sm:$0xff] }
 0x4d5   :  { %7826 = vmatprep.subr.bf16.mxu1 %v7825_v29  ;;  %7954 = vmatprep.subr.bf16.mxu0 %v7953_v5  ;;  %v2028_v29 = vld [vmem:[#allocation14 + $0x648] sm:$0xff]  ;;  %v7975_v15 = vpack.c.bf16 %v2041_v6, %v2037_v4  ;;  %v2047_v17 = vld [vmem:[#allocation14 + $0x6e0] sm:$0xff]  ;;  %v2065_v63 = vld [vmem:[#allocation14 + $0x770] sm:$0xff] }
 0x4d6   :  { %v2032_v5 = vld [vmem:[#allocation14 + $0x668] sm:$0xff]  ;;  %v2070_v4 = vld [vmem:[#allocation14 + $0x798] sm:$0xff] }
 0x4d7   :  { %v2074_v6 = vld [vmem:[#allocation14 + $0x7b8] sm:$0xff] }
 0x4d8   :  { %7828 = vmatpush1.bf16.msra.mxu1 %v7827_v36  ;;  %7956 = vmatpush1.bf16.msra.mxu0 %v7955_v38  ;;  %v7841_v36 = vpack.c.bf16 %v2032_v5, %v2028_v29  ;;  %v7969_v38 = vpack.c.bf16 %v2034_v32, %v2030_v30  ;;  %v7851_v29 = vpack.c.bf16 %v2047_v17, %v2043_v16  ;;  %v2051_v30 = vld [vmem:[#allocation14 + $0x700] sm:$0xff]  ;;  %v2069_v16 = vld [vmem:[#allocation14 + $0x790] sm:$0xff] }
 0x4d9   :  { %7830 = vmatprep.subr.bf16.mxu1 %v7829_v41  ;;  %7958 = vmatprep.subr.bf16.mxu0 %v7957_v12  ;;  %v2036_v41 = vld [vmem:[#allocation14 + $0x688] sm:$0xff]  ;;  %v7979_v5 = vpack.c.bf16 %v2049_v22, %v2045_v21  ;;  %v2055_v32 = vld [vmem:[#allocation14 + $0x720] sm:$0xff]  ;;  %v2073_v17 = vld [vmem:[#allocation14 + $0x7b0] sm:$0xff] }
 0x4da   :  { %v2040_v12 = vld [vmem:[#allocation14 + $0x6a8] sm:$0xff]  ;;  %v2078_v21 = vld [vmem:[#allocation14 + $0x7d8] sm:$0xff] }
 0x4db   :  { %v2082_v22 = vld [vmem:[#allocation14 + $0x7f8] sm:$0xff] }
 0x4dc   :  { %7832 = vmatpush1.bf16.msra.mxu1 %v7831_v1  ;;  %7960 = vmatpush1.bf16.msra.mxu0 %v7959_v2  ;;  %v7845_v1 = vpack.c.bf16 %v2040_v12, %v2036_v41  ;;  %v7973_v2 = vpack.c.bf16 %v2042_v57, %v2038_v42  ;;  %v7855_v41 = vpack.c.bf16 %v2055_v32, %v2051_v30  ;;  %v2059_v42 = vld [vmem:[#allocation14 + $0x740] sm:$0xff]  ;;  %v2077_v30 = vld [vmem:[#allocation14 + $0x7d0] sm:$0xff] }
 0x4dd   :  { %7834 = vmatprep.subr.bf16.mxu1 %v7833_v7  ;;  %7962 = vmatprep.subr.bf16.mxu0 %v7961_v8  ;;  %v2044_v7 = vld [vmem:[#allocation14 + $0x6c8] sm:$0xff]  ;;  %v7983_v12 = vpack.c.bf16 %v2057_v35, %v2053_v9  ;;  %v2063_v57 = vld [vmem:[#allocation14 + $0x760] sm:$0xff]  ;;  %v2081_v32 = vld [vmem:[#allocation14 + $0x7f0] sm:$0xff] }
 0x4de   :  { %v2048_v8 = vld [vmem:[#allocation14 + $0x6e8] sm:$0xff]  ;;  %v1411_v9 = vld [vmem:[#allocation13 + $0x18] sm:$0xff] }
 0x4df   :  { %v1415_v35 = vld [vmem:[#allocation13 + $0x38] sm:$0xff] }
 0x4e0   :  { %7836 = vmatpush1.bf16.msra.mxu1 %v7835_v18  ;;  %7964 = vmatpush1.bf16.msra.mxu0 %v7963_v19  ;;  %v7849_v18 = vpack.c.bf16 %v2048_v8, %v2044_v7  ;;  %v7977_v19 = vpack.c.bf16 %v2050_v11, %v2046_v10  ;;  %v7859_v7 = vpack.c.bf16 %v2063_v57, %v2059_v42  ;;  %v2067_v10 = vld [vmem:[#allocation14 + $0x780] sm:$0xff]  ;;  %v1410_v42 = vld [vmem:[#allocation13 + $0x10] sm:$0xff] }
 0x4e1   :  { %7838 = vmatprep.subr.bf16.mxu1 %v7837_v25  ;;  %7966 = vmatprep.subr.bf16.mxu0 %v7965_v20  ;;  %v2052_v25 = vld [vmem:[#allocation14 + $0x708] sm:$0xff]  ;;  %v7987_v8 = vpack.c.bf16 %v2065_v63, %v2061_v62  ;;  %v2071_v11 = vld [vmem:[#allocation14 + $0x7a0] sm:$0xff]  ;;  %v1414_v57 = vld [vmem:[#allocation13 + $0x30] sm:$0xff] }
 0x4e2   :  { %v2056_v20 = vld [vmem:[#allocation14 + $0x728] sm:$0xff]  ;;  %v1419_v62 = vld [vmem:[#allocation13 + $0x58] sm:$0xff] }
 0x4e3   :  { %v1423_v63 = vld [vmem:[#allocation13 + $0x78] sm:$0xff] }
 0x4e4   :  { %7840 = vmatpush1.bf16.msra.mxu1 %v7839_v33  ;;  %7968 = vmatpush1.bf16.msra.mxu0 %v7967_v34  ;;  %v7853_v33 = vpack.c.bf16 %v2056_v20, %v2052_v25  ;;  %v7981_v34 = vpack.c.bf16 %v2058_v28, %v2054_v26  ;;  %v7863_v25 = vpack.c.bf16 %v2071_v11, %v2067_v10  ;;  %v2075_v26 = vld [vmem:[#allocation14 + $0x7c0] sm:$0xff]  ;;  %v1418_v10 = vld [vmem:[#allocation13 + $0x50] sm:$0xff] }
 0x4e5   :  { %7842 = vmatprep.subr.bf16.mxu1 %v7841_v36  ;;  %7970 = vmatprep.subr.bf16.mxu0 %v7969_v38  ;;  %v2060_v36 = vld [vmem:[#allocation14 + $0x748] sm:$0xff]  ;;  %v7991_v20 = vpack.c.bf16 %v2073_v17, %v2069_v16  ;;  %v2079_v28 = vld [vmem:[#allocation14 + $0x7e0] sm:$0xff]  ;;  %v1422_v11 = vld [vmem:[#allocation13 + $0x70] sm:$0xff] }
 0x4e6   :  { %v2064_v38 = vld [vmem:[#allocation14 + $0x768] sm:$0xff]  ;;  %v1427_v16 = vld [vmem:[#allocation13 + $0x98] sm:$0xff] }
 0x4e7   :  { %v1431_v17 = vld [vmem:[#allocation13 + $0xb8] sm:$0xff] }
 0x4e8   :  { %7844 = vmatpush1.bf16.msra.mxu1 %v7843_v58  ;;  %7972 = vmatpush1.bf16.msra.mxu0 %v7971_v61  ;;  %v7857_v58 = vpack.c.bf16 %v2064_v38, %v2060_v36  ;;  %v7985_v61 = vpack.c.bf16 %v2066_v40, %v2062_v39  ;;  %v7867_v36 = vpack.c.bf16 %v2079_v28, %v2075_v26  ;;  %v1408_v39 = vld [vmem:[#allocation13] sm:$0xff]  ;;  %v1430_v28 = vld [vmem:[#allocation13 + $0xb0] sm:$0xff] }
 0x4e9   :  { %7846 = vmatprep.subr.bf16.mxu1 %v7845_v1  ;;  %7974 = vmatprep.subr.bf16.mxu0 %v7973_v2  ;;  %v2068_v1 = vld [vmem:[#allocation14 + $0x788] sm:$0xff]  ;;  %v7995_v38 = vpack.c.bf16 %v2081_v32, %v2077_v30  ;;  %v8133_v26 = vpack.c.bf16 %v1431_v17, %v1427_v16  ;;  %v1439_v30 = vld [vmem:[#allocation13 + $0xf8] sm:$0xff]  ;;  %v1454_v17 = vld [vmem:[#allocation13 + $0x170] sm:$0xff] }
 0x4ea   :  { %v2072_v2 = vld [vmem:[#allocation14 + $0x7a8] sm:$0xff] }
 0x4ec   :  { %7848 = vmatpush1.bf16.msra.mxu1 %v7847_v14  ;;  %7976 = vmatpush1.bf16.msra.mxu0 %v7975_v15  ;;  %v7861_v14 = vpack.c.bf16 %v2072_v2, %v2068_v1  ;;  %v7989_v15 = vpack.c.bf16 %v2074_v6, %v2070_v4  ;;  %v8127_v2 = vpack.c.bf16 %v1414_v57, %v1410_v42  ;;  %v1416_v4 = vld [vmem:[#allocation13 + $0x40] sm:$0xff] }
 0x4ed   :  { %7850 = vmatprep.subr.bf16.mxu1 %v7849_v18  ;;  %7978 = vmatprep.subr.bf16.mxu0 %v7977_v19  ;;  %v2076_v18 = vld [vmem:[#allocation14 + $0x7c8] sm:$0xff]  ;;  %v1420_v6 = vld [vmem:[#allocation13 + $0x60] sm:$0xff] }
 0x4ee   :  { %v2080_v19 = vld [vmem:[#allocation14 + $0x7e8] sm:$0xff] }
 0x4f0   :  { %7852 = vmatpush1.bf16.msra.mxu1 %v7851_v29  ;;  %7980 = vmatpush1.bf16.msra.mxu0 %v7979_v5  ;;  %v7865_v29 = vpack.c.bf16 %v2080_v19, %v2076_v18  ;;  %v7993_v5 = vpack.c.bf16 %v2082_v22, %v2078_v21  ;;  %v8003_v18 = vpack.c.bf16 %v1420_v6, %v1416_v4  ;;  %v1424_v21 = vld [vmem:[#allocation13 + $0x80] sm:$0xff]  ;;  %v1451_v4 = vld [vmem:[#allocation13 + $0x158] sm:$0xff] }
 0x4f1   :  { %7854 = vmatprep.subr.bf16.mxu1 %v7853_v33  ;;  %7982 = vmatprep.subr.bf16.mxu0 %v7981_v34  ;;  %v1409_v33 = vld [vmem:[#allocation13 + $0x8] sm:$0xff]  ;;  %v8131_v19 = vpack.c.bf16 %v1422_v11, %v1418_v10  ;;  %v1428_v22 = vld [vmem:[#allocation13 + $0xa0] sm:$0xff]  ;;  %v1455_v6 = vld [vmem:[#allocation13 + $0x178] sm:$0xff] }
 0x4f2   :  { %v1413_v34 = vld [vmem:[#allocation13 + $0x28] sm:$0xff]  ;;  %v1448_v11 = vld [vmem:[#allocation13 + $0x140] sm:$0xff]  ;;  %v8145_v16 = vpack.c.bf16 %v1455_v6, %v1451_v4  ;;  %v1478_v6 = vld [vmem:[#allocation13 + $0x230] sm:$0xff] }
 0x4f3   :  { %v7997_v40 = vpack.c.bf16 %v1413_v34, %v1409_v33  ;;  %v1432_v34 = vld [vmem:[#allocation13 + $0xc0] sm:$0xff] }
 0x4f4   :  { %7856 = vmatpush1.bf16.msra.mxu1 %v7855_v41  ;;  %7984 = vmatpush1.bf16.msra.mxu0 %v7983_v12  ;;  %v8125_v41 = vpack.c.bf16 %v1415_v35, %v1411_v9  ;;  %v1412_v12 = vld [vmem:[#allocation13 + $0x20] sm:$0xff]  ;;  %v1434_v35 = vld [vmem:[#allocation13 + $0xd0] sm:$0xff] }
 0x4f5   :  { %7858 = vmatprep.subr.bf16.mxu1 %v7857_v58  ;;  %7986 = vmatprep.subr.bf16.mxu0 %v7985_v61  ;;  %v1417_v58 = vld [vmem:[#allocation13 + $0x48] sm:$0xff]  ;;  %v7999_v1 = vpack.c.bf16 %v1412_v12, %v1408_v39  ;;  %v1436_v9 = vld [vmem:[#allocation13 + $0xe0] sm:$0xff] }
 0x4f6   :  { %v1421_v61 = vld [vmem:[#allocation13 + $0x68] sm:$0xff]  ;;  %v8011_v12 = vpack.c.bf16 %v1436_v9, %v1432_v34  ;;  %v1471_v34 = vld [vmem:[#allocation13 + $0x1f8] sm:$0xff] }
 0x4f7   :  { %v1441_v39 = vld [vmem:[#allocation13 + $0x108] sm:$0xff] }
 0x4f8   :  { %7860 = vmatpush1.bf16.msra.mxu1 %v7859_v7  ;;  %7988 = vmatpush1.bf16.msra.mxu0 %v7987_v8  ;;  %v8001_v7 = vpack.c.bf16 %v1421_v61, %v1417_v58  ;;  %v8129_v8 = vpack.c.bf16 %v1423_v63, %v1419_v62  ;;  %v1444_v58 = vld [vmem:[#allocation13 + $0x120] sm:$0xff]  ;;  %v1442_v61 = vld [vmem:[#allocation13 + $0x110] sm:$0xff] }
 0x4f9   :  { %7862 = vmatprep.subr.bf16.mxu1 %v7861_v14  ;;  %7990 = vmatprep.subr.bf16.mxu0 %v7989_v15  ;;  %v1425_v14 = vld [vmem:[#allocation13 + $0x88] sm:$0xff]  ;;  %v1446_v63 = vld [vmem:[#allocation13 + $0x130] sm:$0xff] }
 0x4fa   :  { %v1429_v15 = vld [vmem:[#allocation13 + $0xa8] sm:$0xff] }
 0x4fc   :  { %7864 = vmatpush1.bf16.msra.mxu1 %v7863_v25  ;;  %7992 = vmatpush1.bf16.msra.mxu0 %v7991_v20  ;;  %v1426_v25 = vld [vmem:[#allocation13 + $0x90] sm:$0xff]  ;;  %v8005_v20 = vpack.c.bf16 %v1429_v15, %v1425_v14  ;;  %v1452_v14 = vld [vmem:[#allocation13 + $0x160] sm:$0xff] }
 0x4fd   :  { %7866 = vmatprep.subr.bf16.mxu1 %v7865_v29  ;;  %7994 = vmatprep.subr.bf16.mxu0 %v7993_v5  ;;  %v1437_v29 = vld [vmem:[#allocation13 + $0xe8] sm:$0xff]  ;;  %v1435_v5 = vld [vmem:[#allocation13 + $0xd8] sm:$0xff]  ;;  %v8135_v32 = vpack.c.bf16 %v1430_v28, %v1426_v25  ;;  %v1450_v15 = vld [vmem:[#allocation13 + $0x150] sm:$0xff]  ;;  %v8019_v25 = vpack.c.bf16 %v1452_v14, %v1448_v11 }
 0x4fe   :  { %v1456_v28 = vld [vmem:[#allocation13 + $0x180] sm:$0xff]  ;;  %v1487_v11 = vld [vmem:[#allocation13 + $0x278] sm:$0xff] }
 0x500   :  { %7868 = vmatpush1.bf16.msra.mxu1 %v7867_v36  ;;  %7996 = vmatpush1.bf16.msra.mxu0 %v7995_v38  ;;  %v8137_v36 = vpack.c.bf16 %v1439_v30, %v1435_v5  ;;  %v1438_v38 = vld [vmem:[#allocation13 + $0xf0] sm:$0xff] }
 0x501   :  { %7998 = vmatprep.subr.bf16.mxu1 %v7997_v40  ;;  %8126 = vmatprep.subr.bf16.mxu0 %v8125_v41  ;;  %v1443_v40 = vld [vmem:[#allocation13 + $0x118] sm:$0xff]  ;;  %v8139_v42 = vpack.c.bf16 %v1438_v38, %v1434_v35  ;;  %v1462_v30 = vld [vmem:[#allocation13 + $0x1b0] sm:$0xff]  ;;  %v1464_v38 = vld [vmem:[#allocation13 + $0x1c0] sm:$0xff] }
 0x502   :  { %v1447_v41 = vld [vmem:[#allocation13 + $0x138] sm:$0xff] }
 0x503   :  { %2225 = vmatmul.mubr.f32.vlgmr.msra.gmra.mrb[24].mxu1 %v10589_v13  ;;  %2379 = vmatmul.mubr.f32.vlgmr.msra.gmra.mrb[20].mxu0 %v10589_v13  ;;  %v1433_v13 = vld [vmem:[#allocation13 + $0xc8] sm:$0xff]  ;;  %v8141_v62 = vpack.c.bf16 %v1447_v41, %v1443_v40  ;;  %v1470_v41 = vld [vmem:[#allocation13 + $0x1f0] sm:$0xff] }
 0x504   :  { %8000 = vmatpush1.bf16.msra.mxu1 %v7999_v1  ;;  %8128 = vmatpush1.bf16.msra.mxu0 %v8127_v2  ;;  %v8009_v33 = vpack.c.bf16 %v1437_v29, %v1433_v13  ;;  %v1449_v1 = vld [vmem:[#allocation13 + $0x148] sm:$0xff]  ;;  %v1460_v13 = vld [vmem:[#allocation13 + $0x1a0] sm:$0xff]  ;;  %v1458_v29 = vld [vmem:[#allocation13 + $0x190] sm:$0xff] }
 0x505   :  { %2230 = vmatprep.mubr.f32.mxu1 %v10593_v37  ;;  %2384 = vmatprep.mubr.f32.mxu0 %v10593_v37  ;;  %v8007_v37 = vpack.c.bf16 %v1428_v22, %v1424_v21  ;;  %v1453_v2 = vld [vmem:[#allocation13 + $0x168] sm:$0xff]  ;;  %v1459_v21 = vld [vmem:[#allocation13 + $0x198] sm:$0xff]  ;;  %v8023_v9 = vpack.c.bf16 %v1460_v13, %v1456_v28  ;;  %v8151_v35 = vpack.c.bf16 %v1462_v30, %v1458_v29  ;;  %v1488_v30 = vld [vmem:[#allocation13 + $0x280] sm:$0xff] }
 0x506   :  { %8002 = vmatprep.subr.bf16.mxu1 %v8001_v7  ;;  %8130 = vmatprep.subr.bf16.mxu0 %v8129_v8  ;;  %v8143_v8 = vpack.c.bf16 %v1446_v63, %v1442_v61  ;;  %v8017_v10 = vpack.c.bf16 %v1453_v2, %v1449_v1  ;;  %v1463_v22 = vld [vmem:[#allocation13 + $0x1b8] sm:$0xff]  ;;  %v1472_v63 = vld [vmem:[#allocation13 + $0x200] sm:$0xff]  ;;  %v1474_v2 = vld [vmem:[#allocation13 + $0x210] sm:$0xff] }
 0x507   :  { %2231 = vmatmul.mubr.f32.gmra.mrb[26].mxu1 %v10591_v31  ;;  %2385 = vmatmul.mubr.f32.gmra.mrb[22].mxu0 %v10591_v31  ;;  %v1445_v31 = vld [vmem:[#allocation13 + $0x128] sm:$0xff]  ;;  %v8149_v5 = vpack.c.bf16 %v1463_v22, %v1459_v21  ;;  %v1476_v1 = vld [vmem:[#allocation13 + $0x220] sm:$0xff]  ;;  %v1486_v22 = vld [vmem:[#allocation13 + $0x270] sm:$0xff] }
 0x508   :  { %8004 = vmatpush1.bf16.msra.mxu1 %v8003_v18  ;;  %2455 = vmatprep.mubr.f32.mxu1 %v10577_v54  ;;  %v8013_v57 = vpack.c.bf16 %v1445_v31, %v1441_v39  ;;  %v1457_v18 = vld [vmem:[#allocation13 + $0x188] sm:$0xff]  ;;  %v1468_v39 = vld [vmem:[#allocation13 + $0x1e0] sm:$0xff]  ;;  %v1466_v31 = vld [vmem:[#allocation13 + $0x1d0] sm:$0xff]  ;;  %v8031_v14 = vpack.c.bf16 %v1476_v1, %v1472_v63 }
 0x509   :  { %8132 = vmatpush1.bf16.msra.mxu0 %v8131_v19  ;;  %2609 = vmatprep.mubr.f32.mxu0 %v10577_v54  ;;  %v1440_v54 = vld [vmem:[#allocation13 + $0x100] sm:$0xff]  ;;  %v1461_v19 = vld [vmem:[#allocation13 + $0x1a8] sm:$0xff]  ;;  %v8155_v61 = vpack.c.bf16 %v1470_v41, %v1466_v31  ;;  %v1495_v28 = vld [vmem:[#allocation13 + $0x2b8] sm:$0xff] }
 0x50a   :  { %8006 = vmatprep.subr.bf16.mxu1 %v8005_v20  ;;  %8134 = vmatprep.subr.bf16.mxu0 %v8133_v26  ;;  %v8015_v7 = vpack.c.bf16 %v1444_v58, %v1440_v54  ;;  %v8147_v20 = vpack.c.bf16 %v1454_v17, %v1450_v15  ;;  %v8021_v26 = vpack.c.bf16 %v1461_v19, %v1457_v18  ;;  %v1479_v54 = vld [vmem:[#allocation13 + $0x238] sm:$0xff]  ;;  %v1480_v17 = vld [vmem:[#allocation13 + $0x240] sm:$0xff]  ;;  %v1482_v19 = vld [vmem:[#allocation13 + $0x250] sm:$0xff] }
 0x50b   :  { %v8027_v58 = vpack.c.bf16 %v1468_v39, %v1464_v38  ;;  %v8159_v15 = vpack.c.bf16 %v1478_v6, %v1474_v2  ;;  %v1484_v18 = vld [vmem:[#allocation13 + $0x260] sm:$0xff]  ;;  %v8163_v29 = vpack.c.bf16 %v1486_v22, %v1482_v19  ;;  %v1503_v38 = vld [vmem:[#allocation13 + $0x2f8] sm:$0xff] }
 0x50c   :  { %8008 = vmatpush1.bf16.msra.mxu1 %v8007_v37  ;;  %v1465_v37 = vld [vmem:[#allocation13 + $0x1c8] sm:$0xff]  ;;  %v8035_v13 = vpack.c.bf16 %v1484_v18, %v1480_v17  ;;  %v1496_v41 = vld [vmem:[#allocation13 + $0x2c0] sm:$0xff]  ;;  %v1511_v63 = vld [vmem:[#allocation13 + $0x338] sm:$0xff] }
 0x50d   :  { %8136 = vmatpush1.bf16.msra.mxu0 %v8135_v32  ;;  %8010 = vmatprep.subr.bf16.mxu1 %v8009_v33  ;;  %v1469_v32 = vld [vmem:[#allocation13 + $0x1e8] sm:$0xff]  ;;  %v1467_v33 = vld [vmem:[#allocation13 + $0x1d8] sm:$0xff]  ;;  %v1504_v6 = vld [vmem:[#allocation13 + $0x300] sm:$0xff] }
 0x50e   :  { %8138 = vmatprep.subr.bf16.mxu0 %v8137_v36  ;;  %v8025_v36 = vpack.c.bf16 %v1469_v32, %v1465_v37  ;;  %v8153_v40 = vpack.c.bf16 %v1471_v34, %v1467_v33  ;;  %v1492_v37 = vld [vmem:[#allocation13 + $0x2a0] sm:$0xff]  ;;  %v1490_v32 = vld [vmem:[#allocation13 + $0x290] sm:$0xff]  ;;  %v1519_v17 = vld [vmem:[#allocation13 + $0x378] sm:$0xff] }
 0x50f   :  { %v1494_v34 = vld [vmem:[#allocation13 + $0x2b0] sm:$0xff]  ;;  %v8039_v39 = vpack.c.bf16 %v1492_v37, %v1488_v30  ;;  %v1512_v22 = vld [vmem:[#allocation13 + $0x340] sm:$0xff]  ;;  %v1527_v30 = vld [vmem:[#allocation13 + $0x3b8] sm:$0xff] }
 0x510   :  { %8012 = vmatpush1.bf16.msra.mxu1 %v8011_v12  ;;  %v1473_v12 = vld [vmem:[#allocation13 + $0x208] sm:$0xff]  ;;  %v8167_v31 = vpack.c.bf16 %v1494_v34, %v1490_v32  ;;  %v1520_v34 = vld [vmem:[#allocation13 + $0x380] sm:$0xff] }
 0x511   :  { %8140 = vmatpush1.bf16.msra.mxu0 %v8139_v42  ;;  %8014 = vmatprep.subr.bf16.mxu1 %v8013_v57  ;;  %v1477_v42 = vld [vmem:[#allocation13 + $0x228] sm:$0xff]  ;;  %v1475_v57 = vld [vmem:[#allocation13 + $0x218] sm:$0xff] }
 0x512   :  { %8142 = vmatprep.subr.bf16.mxu0 %v8141_v62  ;;  %v8029_v62 = vpack.c.bf16 %v1477_v42, %v1473_v12  ;;  %v8157_v4 = vpack.c.bf16 %v1479_v54, %v1475_v57  ;;  %v1500_v12 = vld [vmem:[#allocation13 + $0x2e0] sm:$0xff]  ;;  %v1498_v42 = vld [vmem:[#allocation13 + $0x2d0] sm:$0xff] }
 0x513   :  { %v1502_v54 = vld [vmem:[#allocation13 + $0x2f0] sm:$0xff]  ;;  %v8043_v1 = vpack.c.bf16 %v1500_v12, %v1496_v41  ;;  %v1535_v41 = vld [vmem:[#allocation13 + $0x3f8] sm:$0xff] }
 0x514   :  { %8016 = vmatpush1.bf16.msra.mxu1 %v8015_v7  ;;  %v1481_v7 = vld [vmem:[#allocation13 + $0x248] sm:$0xff]  ;;  %v8171_v2 = vpack.c.bf16 %v1502_v54, %v1498_v42  ;;  %v1528_v54 = vld [vmem:[#allocation13 + $0x3c0] sm:$0xff] }
 0x515   :  { %8144 = vmatpush1.bf16.msra.mxu0 %v8143_v8  ;;  %8018 = vmatprep.subr.bf16.mxu1 %v8017_v10  ;;  %v1485_v8 = vld [vmem:[#allocation13 + $0x268] sm:$0xff]  ;;  %v1483_v10 = vld [vmem:[#allocation13 + $0x258] sm:$0xff] }
 0x516   :  { %8146 = vmatprep.subr.bf16.mxu0 %v8145_v16  ;;  %v8033_v16 = vpack.c.bf16 %v1485_v8, %v1481_v7  ;;  %v8161_v21 = vpack.c.bf16 %v1487_v11, %v1483_v10  ;;  %v1508_v7 = vld [vmem:[#allocation13 + $0x320] sm:$0xff]  ;;  %v1506_v8 = vld [vmem:[#allocation13 + $0x310] sm:$0xff] }
 0x517   :  { %v1510_v11 = vld [vmem:[#allocation13 + $0x330] sm:$0xff]  ;;  %v8047_v18 = vpack.c.bf16 %v1508_v7, %v1504_v6  ;;  %v1543_v6 = vld [vmem:[#allocation13 + $0x438] sm:$0xff] }
 0x518   :  { %8020 = vmatpush1.bf16.msra.mxu1 %v8019_v25  ;;  %v1489_v25 = vld [vmem:[#allocation13 + $0x288] sm:$0xff]  ;;  %v8175_v19 = vpack.c.bf16 %v1510_v11, %v1506_v8 }
 0x519   :  { %8148 = vmatpush1.bf16.msra.mxu0 %v8147_v20  ;;  %8022 = vmatprep.subr.bf16.mxu1 %v8021_v26  ;;  %v1493_v20 = vld [vmem:[#allocation13 + $0x2a8] sm:$0xff]  ;;  %v1491_v26 = vld [vmem:[#allocation13 + $0x298] sm:$0xff] }
 0x51a   :  { %8150 = vmatprep.subr.bf16.mxu0 %v8149_v5  ;;  %v8037_v5 = vpack.c.bf16 %v1493_v20, %v1489_v25  ;;  %v8165_v33 = vpack.c.bf16 %v1495_v28, %v1491_v26  ;;  %v1516_v25 = vld [vmem:[#allocation13 + $0x360] sm:$0xff]  ;;  %v1514_v20 = vld [vmem:[#allocation13 + $0x350] sm:$0xff] }
 0x51b   :  { %v1518_v28 = vld [vmem:[#allocation13 + $0x370] sm:$0xff]  ;;  %v8051_v37 = vpack.c.bf16 %v1516_v25, %v1512_v22  ;;  %v1551_v22 = vld [vmem:[#allocation13 + $0x478] sm:$0xff] }
 0x51c   :  { %8024 = vmatpush1.bf16.msra.mxu1 %v8023_v9  ;;  %v1497_v9 = vld [vmem:[#allocation13 + $0x2c8] sm:$0xff]  ;;  %v8179_v32 = vpack.c.bf16 %v1518_v28, %v1514_v20  ;;  %v1544_v28 = vld [vmem:[#allocation13 + $0x440] sm:$0xff] }
 0x51d   :  { %8152 = vmatpush1.bf16.msra.mxu0 %v8151_v35  ;;  %8026 = vmatprep.subr.bf16.mxu1 %v8025_v36  ;;  %v1501_v35 = vld [vmem:[#allocation13 + $0x2e8] sm:$0xff]  ;;  %v1499_v36 = vld [vmem:[#allocation13 + $0x2d8] sm:$0xff] }
 0x51e   :  { %8154 = vmatprep.subr.bf16.mxu0 %v8153_v40  ;;  %v8041_v40 = vpack.c.bf16 %v1501_v35, %v1497_v9  ;;  %v8169_v57 = vpack.c.bf16 %v1503_v38, %v1499_v36  ;;  %v1524_v9 = vld [vmem:[#allocation13 + $0x3a0] sm:$0xff]  ;;  %v1522_v35 = vld [vmem:[#allocation13 + $0x390] sm:$0xff] }
 0x51f   :  { %v1526_v38 = vld [vmem:[#allocation13 + $0x3b0] sm:$0xff]  ;;  %v8055_v12 = vpack.c.bf16 %v1524_v9, %v1520_v34  ;;  %v1559_v34 = vld [vmem:[#allocation13 + $0x4b8] sm:$0xff] }
 0x520   :  { %8028 = vmatpush1.bf16.msra.mxu1 %v8027_v58  ;;  %v1505_v58 = vld [vmem:[#allocation13 + $0x308] sm:$0xff]  ;;  %v8183_v42 = vpack.c.bf16 %v1526_v38, %v1522_v35  ;;  %v1552_v38 = vld [vmem:[#allocation13 + $0x480] sm:$0xff] }
 0x521   :  { %8156 = vmatpush1.bf16.msra.mxu0 %v8155_v61  ;;  %8030 = vmatprep.subr.bf16.mxu1 %v8029_v62  ;;  %v1509_v61 = vld [vmem:[#allocation13 + $0x328] sm:$0xff]  ;;  %v1507_v62 = vld [vmem:[#allocation13 + $0x318] sm:$0xff] }
 0x522   :  { %8158 = vmatprep.subr.bf16.mxu0 %v8157_v4  ;;  %v8045_v4 = vpack.c.bf16 %v1509_v61, %v1505_v58  ;;  %v8173_v10 = vpack.c.bf16 %v1511_v63, %v1507_v62  ;;  %v1532_v58 = vld [vmem:[#allocation13 + $0x3e0] sm:$0xff]  ;;  %v1530_v61 = vld [vmem:[#allocation13 + $0x3d0] sm:$0xff] }
 0x523   :  { %v1534_v63 = vld [vmem:[#allocation13 + $0x3f0] sm:$0xff]  ;;  %v8059_v7 = vpack.c.bf16 %v1532_v58, %v1528_v54 }
 0x524   :  { %8032 = vmatpush1.bf16.msra.mxu1 %v8031_v14  ;;  %v1513_v14 = vld [vmem:[#allocation13 + $0x348] sm:$0xff]  ;;  %v8187_v8 = vpack.c.bf16 %v1534_v63, %v1530_v61  ;;  %v1560_v61 = vld [vmem:[#allocation13 + $0x4c0] sm:$0xff]  ;;  %v1562_v63 = vld [vmem:[#allocation13 + $0x4d0] sm:$0xff] }
 0x525   :  { %8160 = vmatpush1.bf16.msra.mxu0 %v8159_v15  ;;  %8034 = vmatprep.subr.bf16.mxu1 %v8033_v16  ;;  %v1517_v15 = vld [vmem:[#allocation13 + $0x368] sm:$0xff]  ;;  %v1515_v16 = vld [vmem:[#allocation13 + $0x358] sm:$0xff] }
 0x526   :  { %8162 = vmatprep.subr.bf16.mxu0 %v8161_v21  ;;  %v8049_v21 = vpack.c.bf16 %v1517_v15, %v1513_v14  ;;  %v8177_v26 = vpack.c.bf16 %v1519_v17, %v1515_v16  ;;  %v1536_v14 = vld [vmem:[#allocation13 + $0x400] sm:$0xff]  ;;  %v1538_v16 = vld [vmem:[#allocation13 + $0x410] sm:$0xff] }
 0x527   :  { %v1540_v15 = vld [vmem:[#allocation13 + $0x420] sm:$0xff]  ;;  %v1542_v17 = vld [vmem:[#allocation13 + $0x430] sm:$0xff] }
 0x528   :  { %8036 = vmatpush1.bf16.msra.mxu1 %v8035_v13  ;;  %v1521_v13 = vld [vmem:[#allocation13 + $0x388] sm:$0xff]  ;;  %v8063_v25 = vpack.c.bf16 %v1540_v15, %v1536_v14  ;;  %v8191_v20 = vpack.c.bf16 %v1542_v17, %v1538_v16  ;;  %v1572_v14 = vld [vmem:[#allocation13 + $0x520] sm:$0xff]  ;;  %v1570_v15 = vld [vmem:[#allocation13 + $0x510] sm:$0xff] }
 0x529   :  { %8164 = vmatpush1.bf16.msra.mxu0 %v8163_v29  ;;  %8038 = vmatprep.subr.bf16.mxu1 %v8037_v5  ;;  %v1525_v29 = vld [vmem:[#allocation13 + $0x3a8] sm:$0xff]  ;;  %v1523_v5 = vld [vmem:[#allocation13 + $0x398] sm:$0xff]  ;;  %v1574_v17 = vld [vmem:[#allocation13 + $0x530] sm:$0xff] }
 0x52a   :  { %8166 = vmatprep.subr.bf16.mxu0 %v8165_v33  ;;  %v8053_v33 = vpack.c.bf16 %v1525_v29, %v1521_v13  ;;  %v8181_v36 = vpack.c.bf16 %v1527_v30, %v1523_v5  ;;  %v1548_v13 = vld [vmem:[#allocation13 + $0x460] sm:$0xff]  ;;  %v1546_v29 = vld [vmem:[#allocation13 + $0x450] sm:$0xff] }
 0x52b   :  { %v1550_v30 = vld [vmem:[#allocation13 + $0x470] sm:$0xff]  ;;  %v8067_v9 = vpack.c.bf16 %v1548_v13, %v1544_v28  ;;  %v1576_v28 = vld [vmem:[#allocation13 + $0x540] sm:$0xff] }
 0x52c   :  { %8040 = vmatpush1.bf16.msra.mxu1 %v8039_v39  ;;  %v1529_v39 = vld [vmem:[#allocation13 + $0x3c8] sm:$0xff]  ;;  %v8195_v35 = vpack.c.bf16 %v1550_v30, %v1546_v29  ;;  %v1580_v13 = vld [vmem:[#allocation13 + $0x560] sm:$0xff]  ;;  %v1578_v29 = vld [vmem:[#allocation13 + $0x550] sm:$0xff] }
 0x52d   :  { %8168 = vmatpush1.bf16.msra.mxu0 %v8167_v31  ;;  %8042 = vmatprep.subr.bf16.mxu1 %v8041_v40  ;;  %v1533_v31 = vld [vmem:[#allocation13 + $0x3e8] sm:$0xff]  ;;  %v1531_v40 = vld [vmem:[#allocation13 + $0x3d8] sm:$0xff]  ;;  %v1582_v30 = vld [vmem:[#allocation13 + $0x570] sm:$0xff] }
 0x52e   :  { %8170 = vmatprep.subr.bf16.mxu0 %v8169_v57  ;;  %v8057_v57 = vpack.c.bf16 %v1533_v31, %v1529_v39  ;;  %v8185_v62 = vpack.c.bf16 %v1535_v41, %v1531_v40  ;;  %v1556_v39 = vld [vmem:[#allocation13 + $0x4a0] sm:$0xff]  ;;  %v1554_v31 = vld [vmem:[#allocation13 + $0x490] sm:$0xff]  ;;  %v1561_v41 = vld [vmem:[#allocation13 + $0x4c8] sm:$0xff] }
 0x530   :  { %8044 = vmatpush1.bf16.msra.mxu1 %v8043_v1  ;;  %v1537_v1 = vld [vmem:[#allocation13 + $0x408] sm:$0xff] }
 0x531   :  { %8172 = vmatpush1.bf16.msra.mxu0 %v8171_v2  ;;  %8046 = vmatprep.subr.bf16.mxu1 %v8045_v4  ;;  %v1541_v2 = vld [vmem:[#allocation13 + $0x428] sm:$0xff]  ;;  %v1539_v4 = vld [vmem:[#allocation13 + $0x418] sm:$0xff] }
 0x532   :  { %8174 = vmatprep.subr.bf16.mxu0 %v8173_v10  ;;  %v8061_v10 = vpack.c.bf16 %v1541_v2, %v1537_v1  ;;  %v8189_v11 = vpack.c.bf16 %v1543_v6, %v1539_v4  ;;  %v1566_v2 = vld [vmem:[#allocation13 + $0x4f0] sm:$0xff]  ;;  %v1569_v4 = vld [vmem:[#allocation13 + $0x508] sm:$0xff]  ;;  %v1571_v6 = vld [vmem:[#allocation13 + $0x518] sm:$0xff] }
 0x534   :  { %8048 = vmatpush1.bf16.msra.mxu1 %v8047_v18  ;;  %v1545_v18 = vld [vmem:[#allocation13 + $0x448] sm:$0xff] }
 0x535   :  { %8176 = vmatpush1.bf16.msra.mxu0 %v8175_v19  ;;  %8050 = vmatprep.subr.bf16.mxu1 %v8049_v21  ;;  %v1549_v19 = vld [vmem:[#allocation13 + $0x468] sm:$0xff]  ;;  %v1547_v21 = vld [vmem:[#allocation13 + $0x458] sm:$0xff] }
 0x536   :  { %8178 = vmatprep.subr.bf16.mxu0 %v8177_v26  ;;  %v8065_v26 = vpack.c.bf16 %v1549_v19, %v1545_v18  ;;  %v8193_v5 = vpack.c.bf16 %v1551_v22, %v1547_v21  ;;  %v1577_v18 = vld [vmem:[#allocation13 + $0x548] sm:$0xff]  ;;  %v1579_v21 = vld [vmem:[#allocation13 + $0x558] sm:$0xff] }
 0x537   :  { %v1581_v19 = vld [vmem:[#allocation13 + $0x568] sm:$0xff]  ;;  %v1583_v22 = vld [vmem:[#allocation13 + $0x578] sm:$0xff] }
 0x538   :  { %8052 = vmatpush1.bf16.msra.mxu1 %v8051_v37  ;;  %v1553_v37 = vld [vmem:[#allocation13 + $0x488] sm:$0xff] }
 0x539   :  { %8180 = vmatpush1.bf16.msra.mxu0 %v8179_v32  ;;  %8054 = vmatprep.subr.bf16.mxu1 %v8053_v33  ;;  %v1557_v32 = vld [vmem:[#allocation13 + $0x4a8] sm:$0xff]  ;;  %v1555_v33 = vld [vmem:[#allocation13 + $0x498] sm:$0xff] }
 0x53a   :  { %8182 = vmatprep.subr.bf16.mxu0 %v8181_v36  ;;  %v8069_v36 = vpack.c.bf16 %v1557_v32, %v1553_v37  ;;  %v8197_v40 = vpack.c.bf16 %v1559_v34, %v1555_v33  ;;  %v1585_v37 = vld [vmem:[#allocation13 + $0x588] sm:$0xff]  ;;  %v1587_v33 = vld [vmem:[#allocation13 + $0x598] sm:$0xff] }
 0x53b   :  { %v1589_v32 = vld [vmem:[#allocation13 + $0x5a8] sm:$0xff]  ;;  %v1591_v34 = vld [vmem:[#allocation13 + $0x5b8] sm:$0xff] }
 0x53c   :  { %8056 = vmatpush1.bf16.msra.mxu1 %v8055_v12  ;;  %v1565_v12 = vld [vmem:[#allocation13 + $0x4e8] sm:$0xff] }
 0x53d   :  { %8184 = vmatpush1.bf16.msra.mxu0 %v8183_v42  ;;  %8058 = vmatprep.subr.bf16.mxu1 %v8057_v57  ;;  %v1567_v42 = vld [vmem:[#allocation13 + $0x4f8] sm:$0xff]  ;;  %v8071_v57 = vpack.c.bf16 %v1556_v39, %v1552_v38  ;;  %v8073_v58 = vpack.c.bf16 %v1565_v12, %v1561_v41  ;;  %v1584_v38 = vld [vmem:[#allocation13 + $0x580] sm:$0xff]  ;;  %v1593_v41 = vld [vmem:[#allocation13 + $0x5c8] sm:$0xff] }
 0x53e   :  { %8186 = vmatprep.subr.bf16.mxu0 %v8185_v62  ;;  %v1564_v62 = vld [vmem:[#allocation13 + $0x4e0] sm:$0xff]  ;;  %v1597_v12 = vld [vmem:[#allocation13 + $0x5e8] sm:$0xff] }
 0x53f   :  { %v1588_v39 = vld [vmem:[#allocation13 + $0x5a0] sm:$0xff] }
 0x540   :  { %8060 = vmatpush1.bf16.msra.mxu1 %v8059_v7  ;;  %v1575_v7 = vld [vmem:[#allocation13 + $0x538] sm:$0xff] }
 0x541   :  { %8188 = vmatpush1.bf16.msra.mxu0 %v8187_v8  ;;  %8062 = vmatprep.subr.bf16.mxu1 %v8061_v10  ;;  %v8075_v8 = vpack.c.bf16 %v1564_v62, %v1560_v61  ;;  %v8205_v16 = vpack.c.bf16 %v1575_v7, %v1571_v6  ;;  %v1592_v61 = vld [vmem:[#allocation13 + $0x5c0] sm:$0xff]  ;;  %v1603_v6 = vld [vmem:[#allocation13 + $0x618] sm:$0xff] }
 0x542   :  { %8190 = vmatprep.subr.bf16.mxu0 %v8189_v11  ;;  %v1568_v11 = vld [vmem:[#allocation13 + $0x500] sm:$0xff]  ;;  %v1607_v7 = vld [vmem:[#allocation13 + $0x638] sm:$0xff] }
 0x543   :  { %2456 = vmatmul.mubr.f32.vlgmr.msra.gmra.mrb[24].mxu1 %v10573_v43  ;;  %v1596_v62 = vld [vmem:[#allocation13 + $0x5e0] sm:$0xff] }
 0x544   :  { %2610 = vmatmul.mubr.f32.vlgmr.msra.gmra.mrb[20].mxu0 %v10573_v43  ;;  %2461 = vmatprep.mubr.f32.mxu1 %v10585_v60  ;;  %v1558_v43 = vld [vmem:[#allocation13 + $0x4b0] sm:$0xff] }
 0x545   :  { %8064 = vmatpush1.bf16.msra.mxu1 %v8063_v25  ;;  %2615 = vmatprep.mubr.f32.mxu0 %v10585_v60  ;;  %v1563_v60 = vld [vmem:[#allocation13 + $0x4d8] sm:$0xff]  ;;  %v8199_v54 = vpack.c.bf16 %v1558_v43, %v1554_v31  ;;  %v8079_v25 = vpack.c.bf16 %v1572_v14, %v1568_v11  ;;  %v1586_v31 = vld [vmem:[#allocation13 + $0x590] sm:$0xff]  ;;  %v1600_v11 = vld [vmem:[#allocation13 + $0x600] sm:$0xff] }
 0x546   :  { %8192 = vmatpush1.bf16.msra.mxu0 %v8191_v20  ;;  %8066 = vmatprep.subr.bf16.mxu1 %v8065_v26  ;;  %v8201_v1 = vpack.c.bf16 %v1567_v42, %v1563_v60  ;;  %v8207_v20 = vpack.c.bf16 %v1574_v17, %v1570_v15  ;;  %v8081_v26 = vpack.c.bf16 %v1581_v19, %v1577_v18  ;;  %v1590_v43 = vld [vmem:[#allocation13 + $0x5b0] sm:$0xff]  ;;  %v1595_v60 = vld [vmem:[#allocation13 + $0x5d8] sm:$0xff]  ;;  %v1604_v14 = vld [vmem:[#allocation13 + $0x620] sm:$0xff] }
 0x547   :  { %2462 = vmatmul.mubr.f32.gmra.mrb[26].mxu1 %v10581_v56  ;;  %8194 = vmatprep.subr.bf16.mxu0 %v8193_v5  ;;  %v8209_v5 = vpack.c.bf16 %v1583_v22, %v1579_v21  ;;  %v1599_v42 = vld [vmem:[#allocation13 + $0x5f8] sm:$0xff]  ;;  %v1602_v15 = vld [vmem:[#allocation13 + $0x610] sm:$0xff]  ;;  %v1609_v18 = vld [vmem:[#allocation13 + $0x648] sm:$0xff] }
 0x548   :  { %2616 = vmatmul.mubr.f32.gmra.mrb[22].mxu0 %v10581_v56  ;;  %2532 = vmatprep.mubr.f32.mxu1 %v10579_v55  ;;  %v1573_v56 = vld [vmem:[#allocation13 + $0x528] sm:$0xff]  ;;  %v1606_v17 = vld [vmem:[#allocation13 + $0x630] sm:$0xff]  ;;  %v1611_v21 = vld [vmem:[#allocation13 + $0x658] sm:$0xff] }
 0x549   :  { %8068 = vmatpush1.bf16.msra.mxu1 %v8067_v9  ;;  %2686 = vmatprep.mubr.f32.mxu0 %v10579_v55  ;;  %v8203_v55 = vpack.c.bf16 %v1566_v2, %v1562_v63  ;;  %v8077_v10 = vpack.c.bf16 %v1573_v56, %v1569_v4  ;;  %v8083_v9 = vpack.c.bf16 %v1580_v13, %v1576_v28  ;;  %v1594_v63 = vld [vmem:[#allocation13 + $0x5d0] sm:$0xff]  ;;  %v1601_v4 = vld [vmem:[#allocation13 + $0x608] sm:$0xff]  ;;  %v1615_v22 = vld [vmem:[#allocation13 + $0x678] sm:$0xff] }
 0x54a   :  { %8196 = vmatpush1.bf16.msra.mxu0 %v8195_v35  ;;  %8070 = vmatprep.subr.bf16.mxu1 %v8069_v36  ;;  %v8211_v35 = vpack.c.bf16 %v1582_v30, %v1578_v29  ;;  %v8085_v36 = vpack.c.bf16 %v1589_v32, %v1585_v37  ;;  %v1598_v2 = vld [vmem:[#allocation13 + $0x5f0] sm:$0xff]  ;;  %v1605_v56 = vld [vmem:[#allocation13 + $0x628] sm:$0xff]  ;;  %v1608_v28 = vld [vmem:[#allocation13 + $0x640] sm:$0xff] }
 0x54b   :  { %8198 = vmatprep.subr.bf16.mxu0 %v8197_v40  ;;  %v8213_v40 = vpack.c.bf16 %v1591_v34, %v1587_v33  ;;  %v1613_v19 = vld [vmem:[#allocation13 + $0x668] sm:$0xff]  ;;  %v1612_v13 = vld [vmem:[#allocation13 + $0x660] sm:$0xff]  ;;  %v1610_v29 = vld [vmem:[#allocation13 + $0x650] sm:$0xff] }
 0x54c   :  { %v1614_v30 = vld [vmem:[#allocation13 + $0x670] sm:$0xff]  ;;  %v1617_v37 = vld [vmem:[#allocation13 + $0x688] sm:$0xff]  ;;  %v1619_v33 = vld [vmem:[#allocation13 + $0x698] sm:$0xff] }
 0x54d   :  { %8072 = vmatpush1.bf16.msra.mxu1 %v8071_v57  ;;  %v8087_v57 = vpack.c.bf16 %v1588_v39, %v1584_v38  ;;  %v1621_v32 = vld [vmem:[#allocation13 + $0x6a8] sm:$0xff]  ;;  %v1623_v34 = vld [vmem:[#allocation13 + $0x6b8] sm:$0xff]  ;;  %v1616_v38 = vld [vmem:[#allocation13 + $0x680] sm:$0xff] }
 0x54e   :  { %8200 = vmatpush1.bf16.msra.mxu0 %v8199_v54  ;;  %8074 = vmatprep.subr.bf16.mxu1 %v8073_v58  ;;  %v8215_v54 = vpack.c.bf16 %v1590_v43, %v1586_v31  ;;  %v8089_v58 = vpack.c.bf16 %v1597_v12, %v1593_v41  ;;  %v1620_v39 = vld [vmem:[#allocation13 + $0x6a0] sm:$0xff]  ;;  %v1618_v31 = vld [vmem:[#allocation13 + $0x690] sm:$0xff]  ;;  %v1625_v41 = vld [vmem:[#allocation13 + $0x6c8] sm:$0xff] }
 0x54f   :  { %8202 = vmatprep.subr.bf16.mxu0 %v8201_v1  ;;  %v8217_v1 = vpack.c.bf16 %v1599_v42, %v1595_v60  ;;  %v1622_v43 = vld [vmem:[#allocation13 + $0x6b0] sm:$0xff]  ;;  %v1629_v12 = vld [vmem:[#allocation13 + $0x6e8] sm:$0xff]  ;;  %v1627_v60 = vld [vmem:[#allocation13 + $0x6d8] sm:$0xff] }
 0x550   :  { %v1631_v42 = vld [vmem:[#allocation13 + $0x6f8] sm:$0xff] }
 0x551   :  { %8076 = vmatpush1.bf16.msra.mxu1 %v8075_v8  ;;  %v8091_v8 = vpack.c.bf16 %v1596_v62, %v1592_v61  ;;  %v1624_v61 = vld [vmem:[#allocation13 + $0x6c0] sm:$0xff] }
 0x552   :  { %8204 = vmatpush1.bf16.msra.mxu0 %v8203_v55  ;;  %8078 = vmatprep.subr.bf16.mxu1 %v8077_v10  ;;  %v8219_v55 = vpack.c.bf16 %v1598_v2, %v1594_v63  ;;  %v8093_v10 = vpack.c.bf16 %v1605_v56, %v1601_v4  ;;  %v1628_v62 = vld [vmem:[#allocation13 + $0x6e0] sm:$0xff]  ;;  %v1626_v63 = vld [vmem:[#allocation13 + $0x6d0] sm:$0xff]  ;;  %v1633_v4 = vld [vmem:[#allocation13 + $0x708] sm:$0xff] }
 0x553   :  { %8206 = vmatprep.subr.bf16.mxu0 %v8205_v16  ;;  %v8221_v16 = vpack.c.bf16 %v1607_v7, %v1603_v6  ;;  %v1630_v2 = vld [vmem:[#allocation13 + $0x6f0] sm:$0xff]  ;;  %v1637_v56 = vld [vmem:[#allocation13 + $0x728] sm:$0xff]  ;;  %v1635_v6 = vld [vmem:[#allocation13 + $0x718] sm:$0xff] }
 0x554   :  { %v1639_v7 = vld [vmem:[#allocation13 + $0x738] sm:$0xff] }
 0x555   :  { %8080 = vmatpush1.bf16.msra.mxu1 %v8079_v25  ;;  %v8095_v25 = vpack.c.bf16 %v1604_v14, %v1600_v11  ;;  %v1632_v11 = vld [vmem:[#allocation13 + $0x700] sm:$0xff] }
 0x556   :  { %8208 = vmatpush1.bf16.msra.mxu0 %v8207_v20  ;;  %8082 = vmatprep.subr.bf16.mxu1 %v8081_v26  ;;  %v8223_v20 = vpack.c.bf16 %v1606_v17, %v1602_v15  ;;  %v8097_v26 = vpack.c.bf16 %v1613_v19, %v1609_v18  ;;  %v1636_v14 = vld [vmem:[#allocation13 + $0x720] sm:$0xff]  ;;  %v1634_v15 = vld [vmem:[#allocation13 + $0x710] sm:$0xff]  ;;  %v1641_v18 = vld [vmem:[#allocation13 + $0x748] sm:$0xff] }
 0x557   :  { %8210 = vmatprep.subr.bf16.mxu0 %v8209_v5  ;;  %v8225_v5 = vpack.c.bf16 %v1615_v22, %v1611_v21  ;;  %v1638_v17 = vld [vmem:[#allocation13 + $0x730] sm:$0xff]  ;;  %v1645_v19 = vld [vmem:[#allocation13 + $0x768] sm:$0xff]  ;;  %v1643_v21 = vld [vmem:[#allocation13 + $0x758] sm:$0xff] }
 0x558   :  { %v1647_v22 = vld [vmem:[#allocation13 + $0x778] sm:$0xff] }
 0x559   :  { %8084 = vmatpush1.bf16.msra.mxu1 %v8083_v9  ;;  %v8099_v9 = vpack.c.bf16 %v1612_v13, %v1608_v28  ;;  %v1640_v28 = vld [vmem:[#allocation13 + $0x740] sm:$0xff] }
 0x55a   :  { %8212 = vmatpush1.bf16.msra.mxu0 %v8211_v35  ;;  %8086 = vmatprep.subr.bf16.mxu1 %v8085_v36  ;;  %v8227_v35 = vpack.c.bf16 %v1614_v30, %v1610_v29  ;;  %v8101_v36 = vpack.c.bf16 %v1621_v32, %v1617_v37  ;;  %v1644_v13 = vld [vmem:[#allocation13 + $0x760] sm:$0xff]  ;;  %v1642_v29 = vld [vmem:[#allocation13 + $0x750] sm:$0xff]  ;;  %v1649_v37 = vld [vmem:[#allocation13 + $0x788] sm:$0xff] }
 0x55b   :  { %8214 = vmatprep.subr.bf16.mxu0 %v8213_v40  ;;  %v8229_v40 = vpack.c.bf16 %v1623_v34, %v1619_v33  ;;  %v1646_v30 = vld [vmem:[#allocation13 + $0x770] sm:$0xff]  ;;  %v1653_v32 = vld [vmem:[#allocation13 + $0x7a8] sm:$0xff]  ;;  %v1651_v33 = vld [vmem:[#allocation13 + $0x798] sm:$0xff] }
 0x55c   :  { %v1655_v34 = vld [vmem:[#allocation13 + $0x7b8] sm:$0xff] }
 0x55d   :  { %8088 = vmatpush1.bf16.msra.mxu1 %v8087_v57  ;;  %v8103_v57 = vpack.c.bf16 %v1620_v39, %v1616_v38  ;;  %v1648_v38 = vld [vmem:[#allocation13 + $0x780] sm:$0xff] }
 0x55e   :  { %8216 = vmatpush1.bf16.msra.mxu0 %v8215_v54  ;;  %8090 = vmatprep.subr.bf16.mxu1 %v8089_v58  ;;  %v8231_v54 = vpack.c.bf16 %v1622_v43, %v1618_v31  ;;  %v8105_v58 = vpack.c.bf16 %v1629_v12, %v1625_v41  ;;  %v1652_v39 = vld [vmem:[#allocation13 + $0x7a0] sm:$0xff]  ;;  %v1650_v31 = vld [vmem:[#allocation13 + $0x790] sm:$0xff]  ;;  %v1657_v41 = vld [vmem:[#allocation13 + $0x7c8] sm:$0xff] }
 0x55f   :  { %8218 = vmatprep.subr.bf16.mxu0 %v8217_v1  ;;  %v8233_v1 = vpack.c.bf16 %v1631_v42, %v1627_v60  ;;  %v1654_v43 = vld [vmem:[#allocation13 + $0x7b0] sm:$0xff]  ;;  %v1661_v12 = vld [vmem:[#allocation13 + $0x7e8] sm:$0xff]  ;;  %v1659_v60 = vld [vmem:[#allocation13 + $0x7d8] sm:$0xff] }
 0x560   :  { %v1663_v42 = vld [vmem:[#allocation13 + $0x7f8] sm:$0xff] }
 0x561   :  { %8092 = vmatpush1.bf16.msra.mxu1 %v8091_v8  ;;  %v8107_v8 = vpack.c.bf16 %v1628_v62, %v1624_v61  ;;  %v1656_v61 = vld [vmem:[#allocation13 + $0x7c0] sm:$0xff] }
 0x562   :  { %8220 = vmatpush1.bf16.msra.mxu0 %v8219_v55  ;;  %8094 = vmatprep.subr.bf16.mxu1 %v8093_v10  ;;  %v8235_v55 = vpack.c.bf16 %v1630_v2, %v1626_v63  ;;  %v8109_v10 = vpack.c.bf16 %v1637_v56, %v1633_v4  ;;  %v1660_v62 = vld [vmem:[#allocation13 + $0x7e0] sm:$0xff]  ;;  %v8249_v63 = vpack.c.bf16 %v1663_v42, %v1659_v60  ;;  %v1662_v2 = vld [vmem:[#allocation13 + $0x7f0] sm:$0xff]  ;;  %v2895_v42 = vld [vmem:[#allocation16 + $0x108] sm:$0xff] }
 0x563   :  { %8222 = vmatprep.subr.bf16.mxu0 %v8221_v16  ;;  %v8237_v16 = vpack.c.bf16 %v1639_v7, %v1635_v6  ;;  %v8123_v4 = vpack.c.bf16 %v1660_v62, %v1656_v61  ;;  %v2863_v6 = vld [vmem:[#allocation16 + $0x8] sm:$0xff]  ;;  %v2892_v60 = vld [vmem:[#allocation16 + $0xf0] sm:$0xff] }
 0x564   :  { %v2867_v7 = vld [vmem:[#allocation16 + $0x28] sm:$0xff] }
 0x565   :  { %8096 = vmatpush1.bf16.msra.mxu1 %v8095_v25  ;;  %v8111_v25 = vpack.c.bf16 %v1636_v14, %v1632_v11  ;;  %v2864_v11 = vld [vmem:[#allocation16 + $0x10] sm:$0xff]  ;;  %v2871_v14 = vld [vmem:[#allocation16 + $0x48] sm:$0xff] }
 0x566   :  { %8224 = vmatpush1.bf16.msra.mxu0 %v8223_v20  ;;  %8098 = vmatprep.subr.bf16.mxu1 %v8097_v26  ;;  %v8239_v20 = vpack.c.bf16 %v1638_v17, %v1634_v15  ;;  %v8113_v26 = vpack.c.bf16 %v1645_v19, %v1641_v18  ;;  %v2874_v18 = vld [vmem:[#allocation16 + $0x60] sm:$0xff]  ;;  %v2872_v19 = vld [vmem:[#allocation16 + $0x50] sm:$0xff] }
 0x567   :  { %8226 = vmatprep.subr.bf16.mxu0 %v8225_v5  ;;  %v8241_v5 = vpack.c.bf16 %v1647_v22, %v1643_v21  ;;  %v2876_v22 = vld [vmem:[#allocation16 + $0x70] sm:$0xff] }
 0x569   :  { %8100 = vmatpush1.bf16.msra.mxu1 %v8099_v9  ;;  %v8115_v9 = vpack.c.bf16 %v1644_v13, %v1640_v28  ;;  %v8403_v13 = vpack.c.bf16 %v2876_v22, %v2872_v19  ;;  %v2910_v19 = vld [vmem:[#allocation16 + $0x180] sm:$0xff]  ;;  %v2912_v22 = vld [vmem:[#allocation16 + $0x190] sm:$0xff] }
 0x56a   :  { %8228 = vmatpush1.bf16.msra.mxu0 %v8227_v35  ;;  %8102 = vmatprep.subr.bf16.mxu1 %v8101_v36  ;;  %v8243_v35 = vpack.c.bf16 %v1646_v30, %v1642_v29  ;;  %v8117_v36 = vpack.c.bf16 %v1653_v32, %v1649_v37  ;;  %v2882_v30 = vld [vmem:[#allocation16 + $0xa0] sm:$0xff]  ;;  %v2880_v37 = vld [vmem:[#allocation16 + $0x90] sm:$0xff] }
 0x56b   :  { %8230 = vmatprep.subr.bf16.mxu0 %v8229_v40  ;;  %v8245_v40 = vpack.c.bf16 %v1655_v34, %v1651_v33  ;;  %v2884_v33 = vld [vmem:[#allocation16 + $0xb0] sm:$0xff]  ;;  %v2887_v34 = vld [vmem:[#allocation16 + $0xc8] sm:$0xff] }
 0x56d   :  { %8104 = vmatpush1.bf16.msra.mxu1 %v8103_v57  ;;  %v8119_v57 = vpack.c.bf16 %v1652_v39, %v1648_v38  ;;  %v8407_v39 = vpack.c.bf16 %v2884_v33, %v2880_v37  ;;  %v2922_v37 = vld [vmem:[#allocation16 + $0x1e0] sm:$0xff] }
 0x56e   :  { %8232 = vmatpush1.bf16.msra.mxu0 %v8231_v54  ;;  %8106 = vmatprep.subr.bf16.mxu1 %v8105_v58  ;;  %v8247_v54 = vpack.c.bf16 %v1654_v43, %v1650_v31  ;;  %v8121_v58 = vpack.c.bf16 %v1661_v12, %v1657_v41  ;;  %v2890_v43 = vld [vmem:[#allocation16 + $0xe0] sm:$0xff]  ;;  %v2888_v41 = vld [vmem:[#allocation16 + $0xd0] sm:$0xff] }
 0x56f   :  { %8234 = vmatprep.subr.bf16.mxu0 %v8233_v1  ;;  %v1658_v1 = vld [vmem:[#allocation13 + $0x7d0] sm:$0xff]  ;;  %v8411_v62 = vpack.c.bf16 %v2892_v60, %v2888_v41  ;;  %v2930_v41 = vld [vmem:[#allocation16 + $0x220] sm:$0xff] }
 0x570   :  { %v8251_v56 = vpack.c.bf16 %v1662_v2, %v1658_v1  ;;  %v2894_v1 = vld [vmem:[#allocation16 + $0x100] sm:$0xff] }
 0x571   :  { %8108 = vmatpush1.bf16.msra.mxu1 %v8107_v8  ;;  %v2865_v8 = vld [vmem:[#allocation16 + $0x18] sm:$0xff]  ;;  %v2898_v2 = vld [vmem:[#allocation16 + $0x120] sm:$0xff] }
 0x572   :  { %8236 = vmatpush1.bf16.msra.mxu0 %v8235_v55  ;;  %8110 = vmatprep.subr.bf16.mxu1 %v8109_v10  ;;  %v2869_v55 = vld [vmem:[#allocation16 + $0x38] sm:$0xff]  ;;  %v2862_v10 = vld [vmem:[#allocation16] sm:$0xff] }
 0x573   :  { %8238 = vmatprep.subr.bf16.mxu0 %v8237_v16 }
 0x575   :  { %8112 = vmatpush1.bf16.msra.mxu1 %v8111_v25  ;;  %v2883_v25 = vld [vmem:[#allocation16 + $0xa8] sm:$0xff] }
 0x576   :  { %8240 = vmatpush1.bf16.msra.mxu0 %v8239_v20  ;;  %8114 = vmatprep.subr.bf16.mxu1 %v8113_v26  ;;  %v2701_v20 = vld [vmem:[#allocation11 + $0x28] sm:$0xff] }
 0x577   :  { %8242 = vmatprep.subr.bf16.mxu0 %v8241_v5  ;;  %v2885_v26 = vld [vmem:[#allocation16 + $0xb8] sm:$0xff]  ;;  %v2878_v5 = vld [vmem:[#allocation16 + $0x80] sm:$0xff] }
 0x578   :  { %v8279_v38 = vpack.c.bf16 %v2882_v30, %v2878_v5  ;;  %v2918_v30 = vld [vmem:[#allocation16 + $0x1c0] sm:$0xff] }
 0x579   :  { %8116 = vmatpush1.bf16.msra.mxu1 %v8115_v9  ;;  %v2891_v9 = vld [vmem:[#allocation16 + $0xe8] sm:$0xff] }
 0x57a   :  { %8244 = vmatpush1.bf16.msra.mxu0 %v8243_v35  ;;  %8118 = vmatprep.subr.bf16.mxu1 %v8117_v36  ;;  %v2889_v35 = vld [vmem:[#allocation16 + $0xd8] sm:$0xff]  ;;  %v8281_v31 = vpack.c.bf16 %v2891_v9, %v2887_v34  ;;  %v2924_v34 = vld [vmem:[#allocation16 + $0x1f0] sm:$0xff]  ;;  %v2927_v9 = vld [vmem:[#allocation16 + $0x208] sm:$0xff] }
 0x57b   :  { %8246 = vmatprep.subr.bf16.mxu0 %v8245_v40  ;;  %v2893_v36 = vld [vmem:[#allocation16 + $0xf8] sm:$0xff]  ;;  %v2886_v40 = vld [vmem:[#allocation16 + $0xc0] sm:$0xff] }
 0x57c   :  { %v8409_v12 = vpack.c.bf16 %v2893_v36, %v2889_v35  ;;  %v8283_v61 = vpack.c.bf16 %v2890_v43, %v2886_v40  ;;  %v2931_v35 = vld [vmem:[#allocation16 + $0x228] sm:$0xff]  ;;  %v2929_v36 = vld [vmem:[#allocation16 + $0x218] sm:$0xff]  ;;  %v2926_v43 = vld [vmem:[#allocation16 + $0x200] sm:$0xff] }
 0x57d   :  { %8120 = vmatpush1.bf16.msra.mxu1 %v8119_v57  ;;  %v2899_v57 = vld [vmem:[#allocation16 + $0x128] sm:$0xff]  ;;  %v8301_v40 = vpack.c.bf16 %v2931_v35, %v2927_v9  ;;  %v2964_v9 = vld [vmem:[#allocation16 + $0x330] sm:$0xff] }
 0x57e   :  { %8248 = vmatpush1.bf16.msra.mxu0 %v8247_v54  ;;  %8122 = vmatprep.subr.bf16.mxu1 %v8121_v58  ;;  %v2897_v54 = vld [vmem:[#allocation16 + $0x118] sm:$0xff]  ;;  %v2967_v35 = vld [vmem:[#allocation16 + $0x348] sm:$0xff] }
 0x57f   :  { %8250 = vmatprep.subr.bf16.mxu0 %v8249_v63  ;;  %v2901_v58 = vld [vmem:[#allocation16 + $0x138] sm:$0xff]  ;;  %v8285_v63 = vpack.c.bf16 %v2899_v57, %v2895_v42  ;;  %v2932_v42 = vld [vmem:[#allocation16 + $0x230] sm:$0xff]  ;;  %v2935_v57 = vld [vmem:[#allocation16 + $0x248] sm:$0xff] }
 0x581   :  { %8124 = vmatpush1.bf16.msra.mxu1 %v8123_v4  ;;  %v2896_v4 = vld [vmem:[#allocation16 + $0x110] sm:$0xff] }
 0x582   :  { %8252 = vmatpush1.bf16.msra.mxu0 %v8251_v56  ;;  %8254 = vmatprep.subr.bf16.mxu1 %v10531_v27  ;;  %v8269_v27 = vpack.c.bf16 %v2867_v7, %v2863_v6  ;;  %v8413_v56 = vpack.c.bf16 %v2901_v58, %v2897_v54  ;;  %v2900_v6 = vld [vmem:[#allocation16 + $0x130] sm:$0xff]  ;;  %v2903_v7 = vld [vmem:[#allocation16 + $0x148] sm:$0xff]  ;;  %v2937_v58 = vld [vmem:[#allocation16 + $0x258] sm:$0xff] }
 0x583   :  { %8262 = vmatprep.subr.bf16.mxu0 %v10533_v3  ;;  %v8397_v3 = vpack.c.bf16 %v2869_v55, %v2865_v8  ;;  %v2907_v8 = vld [vmem:[#allocation16 + $0x168] sm:$0xff]  ;;  %v2905_v55 = vld [vmem:[#allocation16 + $0x158] sm:$0xff] }
 0x584   :  { %2533 = vmatmul.mubr.f32.vlgmr.msra.gmra.mrb[24].mxu1 %v10575_v45  ;;  %v2939_v54 = vld [vmem:[#allocation16 + $0x268] sm:$0xff] }
 0x585   :  { %2687 = vmatmul.mubr.f32.vlgmr.msra.gmra.mrb[20].mxu0 %v10575_v45  ;;  %2538 = vmatprep.mubr.f32.mxu1 %v10587_v0  ;;  %v2866_v45 = vld [vmem:[#allocation16 + $0x20] sm:$0xff] }
 0x586   :  { %2692 = vmatprep.mubr.f32.mxu0 %v10587_v0  ;;  %8256 = vmatpush1.bf16.msra.mxu1 %v10527_v23  ;;  %v2868_v0 = vld [vmem:[#allocation16 + $0x30] sm:$0xff]  ;;  %v2875_v23 = vld [vmem:[#allocation16 + $0x68] sm:$0xff]  ;;  %v8271_v15 = vpack.c.bf16 %v2866_v45, %v2862_v10  ;;  %v8415_v10 = vpack.c.bf16 %v2900_v6, %v2896_v4  ;;  %v8289_v45 = vpack.c.bf16 %v2907_v8, %v2903_v7  ;;  %v2938_v4 = vld [vmem:[#allocation16 + $0x260] sm:$0xff] }
 0x587   :  { %8264 = vmatpush1.bf16.msra.mxu0 %v10529_v24  ;;  %8258 = vmatprep.subr.bf16.mxu1 %v10543_v50  ;;  %v2700_v24 = vld [vmem:[#allocation11 + $0x20] sm:$0xff]  ;;  %v2873_v50 = vld [vmem:[#allocation16 + $0x58] sm:$0xff]  ;;  %v8399_v16 = vpack.c.bf16 %v2868_v0, %v2864_v11  ;;  %v8273_v17 = vpack.c.bf16 %v2875_v23, %v2871_v14  ;;  %v2902_v11 = vld [vmem:[#allocation16 + $0x140] sm:$0xff] }
 0x588   :  { %8266 = vmatprep.subr.bf16.mxu0 %v10545_v53  ;;  %2539 = vmatmul.mubr.f32.gmra.mrb[26].mxu1 %v10583_v59  ;;  %v2877_v53 = vld [vmem:[#allocation16 + $0x78] sm:$0xff]  ;;  %v2906_v0 = vld [vmem:[#allocation16 + $0x160] sm:$0xff]  ;;  %v2904_v14 = vld [vmem:[#allocation16 + $0x150] sm:$0xff] }
 0x589   :  { %2693 = vmatmul.mubr.f32.gmra.mrb[22].mxu0 %v10583_v59  ;;  %2772 = vmatprep.mubr.f32.mxu1 %v10055_v44  ;;  %v2870_v59 = vld [vmem:[#allocation16 + $0x40] sm:$0xff]  ;;  %v8401_v21 = vpack.c.bf16 %v2877_v53, %v2873_v50  ;;  %v2911_v50 = vld [vmem:[#allocation16 + $0x188] sm:$0xff]  ;;  %v2940_v7 = vld [vmem:[#allocation16 + $0x270] sm:$0xff] }
 0x58a   :  { %8260 = vmatpush1.bf16.msra.mxu1 %v10539_v46  ;;  %2849 = vmatprep.mubr.f32.mxu0 %v10055_v44  ;;  %v2879_v46 = vld [vmem:[#allocation16 + $0x88] sm:$0xff]  ;;  %v8275_v28 = vpack.c.bf16 %v2874_v18, %v2870_v59 }
 0x58b   :  { %8268 = vmatpush1.bf16.msra.mxu0 %v10541_v47  ;;  %8270 = vmatprep.subr.bf16.mxu1 %v8269_v27  ;;  %v2881_v47 = vld [vmem:[#allocation16 + $0x98] sm:$0xff]  ;;  %v8277_v29 = vpack.c.bf16 %v2883_v25, %v2879_v46  ;;  %v2915_v53 = vld [vmem:[#allocation16 + $0x1a8] sm:$0xff]  ;;  %v2916_v25 = vld [vmem:[#allocation16 + $0x1b0] sm:$0xff] }
 0x58c   :  { %8398 = vmatprep.subr.bf16.mxu0 %v8397_v3  ;;  %v8405_v32 = vpack.c.bf16 %v2885_v26, %v2881_v47  ;;  %v2909_v27 = vld [vmem:[#allocation16 + $0x178] sm:$0xff]  ;;  %v8287_v3 = vpack.c.bf16 %v2898_v2, %v2894_v1  ;;  %v8293_v18 = vpack.c.bf16 %v2915_v53, %v2911_v50  ;;  %v2923_v47 = vld [vmem:[#allocation16 + $0x1e8] sm:$0xff]  ;;  %v8305_v1 = vpack.c.bf16 %v2939_v54, %v2935_v57  ;;  %v2934_v2 = vld [vmem:[#allocation16 + $0x240] sm:$0xff] }
 0x58d   :  { %7154 = vmatmul.mubr.msk.f32.vlgmr.msra.gmra.mrb[28].mxu1 %vm487_vm1, %v2700_v24  ;;  %v8417_v23 = vpack.c.bf16 %v2909_v27, %v2905_v55  ;;  %v2921_v26 = vld [vmem:[#allocation16 + $0x1d8] sm:$0xff]  ;;  %v2943_v8 = vld [vmem:[#allocation16 + $0x288] sm:$0xff]  ;;  %v2948_v50 = vld [vmem:[#allocation16 + $0x2b0] sm:$0xff] }
 0x58e   :  { %2778 = vmatprep.mubr.f32.mxu1 %v10055_v44  ;;  %7156 = vmatmul.mubr.msk.f32.vlgmr.msra.gmra.mrb[24].mxu0 %vm487_vm1, %v2700_v24  ;;  %v2908_v24 = vld [vmem:[#allocation16 + $0x170] sm:$0xff]  ;;  %v2947_v55 = vld [vmem:[#allocation16 + $0x2a8] sm:$0xff]  ;;  %v2945_v27 = vld [vmem:[#allocation16 + $0x298] sm:$0xff] }
 0x58f   :  { %2855 = vmatprep.mubr.f32.mxu0 %v10055_v44  ;;  %8272 = vmatpush1.bf16.msra.mxu1 %v8271_v15  ;;  %v2913_v15 = vld [vmem:[#allocation16 + $0x198] sm:$0xff]  ;;  %v8419_v59 = vpack.c.bf16 %v2908_v24, %v2904_v14  ;;  %v2946_v14 = vld [vmem:[#allocation16 + $0x2a0] sm:$0xff]  ;;  %v2951_v53 = vld [vmem:[#allocation16 + $0x2c8] sm:$0xff] }
 0x590   :  { %8400 = vmatpush1.bf16.msra.mxu0 %v8399_v16  ;;  %8274 = vmatprep.subr.bf16.mxu1 %v8273_v17  ;;  %v2917_v16 = vld [vmem:[#allocation16 + $0x1b8] sm:$0xff]  ;;  %v8291_v17 = vpack.c.bf16 %v2906_v0, %v2902_v11  ;;  %v8309_v11 = vpack.c.bf16 %v2947_v55, %v2943_v8  ;;  %v2942_v0 = vld [vmem:[#allocation16 + $0x280] sm:$0xff]  ;;  %v2972_v57 = vld [vmem:[#allocation16 + $0x370] sm:$0xff] }
 0x591   :  { %7155 = vmatmul.mubr.msk.f32.gmra.mrb[30].mxu1 %vm487_vm1, %v2701_v20  ;;  %8402 = vmatprep.subr.bf16.mxu0 %v8401_v21  ;;  %v2914_v21 = vld [vmem:[#allocation16 + $0x1a0] sm:$0xff]  ;;  %v8421_v46 = vpack.c.bf16 %v2917_v16, %v2913_v15  ;;  %v2955_v15 = vld [vmem:[#allocation16 + $0x2e8] sm:$0xff]  ;;  %v2953_v16 = vld [vmem:[#allocation16 + $0x2d8] sm:$0xff] }
 0x592   :  { %7157 = vmatmul.mubr.msk.f32.gmra.mrb[26].mxu0 %vm487_vm1, %v2701_v20  ;;  %v2919_v20 = vld [vmem:[#allocation16 + $0x1c8] sm:$0xff]  ;;  %v2980_v8 = vld [vmem:[#allocation16 + $0x3b0] sm:$0xff] }
 0x593   :  { %8276 = vmatpush1.bf16.msra.mxu1 %v8275_v28  ;;  %v2925_v28 = vld [vmem:[#allocation16 + $0x1f8] sm:$0xff]  ;;  %v8297_v5 = vpack.c.bf16 %v2923_v47, %v2919_v20  ;;  %v2956_v20 = vld [vmem:[#allocation16 + $0x2f0] sm:$0xff]  ;;  %v2959_v47 = vld [vmem:[#allocation16 + $0x308] sm:$0xff] }
 0x594   :  { %8404 = vmatpush1.bf16.msra.mxu0 %v8403_v13  ;;  %8278 = vmatprep.subr.bf16.mxu1 %v8277_v29  ;;  %v8295_v13 = vpack.c.bf16 %v2914_v21, %v2910_v19  ;;  %v8423_v29 = vpack.c.bf16 %v2916_v25, %v2912_v22  ;;  %v8425_v33 = vpack.c.bf16 %v2925_v28, %v2921_v26  ;;  %v2950_v21 = vld [vmem:[#allocation16 + $0x2c0] sm:$0xff]  ;;  %v2963_v26 = vld [vmem:[#allocation16 + $0x328] sm:$0xff]  ;;  %v2961_v28 = vld [vmem:[#allocation16 + $0x318] sm:$0xff] }
 0x595   :  { %8406 = vmatprep.subr.bf16.mxu0 %v8405_v32  ;;  %v2920_v32 = vld [vmem:[#allocation16 + $0x1d0] sm:$0xff]  ;;  %v8313_v19 = vpack.c.bf16 %v2955_v15, %v2951_v53  ;;  %v2954_v22 = vld [vmem:[#allocation16 + $0x2e0] sm:$0xff]  ;;  %v2975_v54 = vld [vmem:[#allocation16 + $0x388] sm:$0xff] }
 0x596   :  { %v2983_v55 = vld [vmem:[#allocation16 + $0x3c8] sm:$0xff]  ;;  %v2988_v53 = vld [vmem:[#allocation16 + $0x3f0] sm:$0xff] }
 0x597   :  { %8280 = vmatpush1.bf16.msra.mxu1 %v8279_v38  ;;  %v2933_v38 = vld [vmem:[#allocation16 + $0x238] sm:$0xff] }
 0x598   :  { %8408 = vmatpush1.bf16.msra.mxu0 %v8407_v39  ;;  %8282 = vmatprep.subr.bf16.mxu1 %v8281_v31  ;;  %v8299_v39 = vpack.c.bf16 %v2922_v37, %v2918_v30  ;;  %v8427_v31 = vpack.c.bf16 %v2924_v34, %v2920_v32  ;;  %v8429_v60 = vpack.c.bf16 %v2933_v38, %v2929_v36  ;;  %v2958_v37 = vld [vmem:[#allocation16 + $0x300] sm:$0xff]  ;;  %v2971_v36 = vld [vmem:[#allocation16 + $0x368] sm:$0xff]  ;;  %v2969_v38 = vld [vmem:[#allocation16 + $0x358] sm:$0xff] }
 0x599   :  { %8410 = vmatprep.subr.bf16.mxu0 %v8409_v12  ;;  %v2928_v12 = vld [vmem:[#allocation16 + $0x210] sm:$0xff]  ;;  %v8317_v30 = vpack.c.bf16 %v2963_v26, %v2959_v47  ;;  %v2962_v32 = vld [vmem:[#allocation16 + $0x320] sm:$0xff]  ;;  %v2999_v26 = vld [vmem:[#allocation16 + $0x448] sm:$0xff] }
 0x59a   :  { %v2996_v47 = vld [vmem:[#allocation16 + $0x430] sm:$0xff] }
 0x59b   :  { %8284 = vmatpush1.bf16.msra.mxu1 %v8283_v61  ;;  %v2941_v61 = vld [vmem:[#allocation16 + $0x278] sm:$0xff] }
 0x59c   :  { %8412 = vmatpush1.bf16.msra.mxu0 %v8411_v62  ;;  %8286 = vmatprep.subr.bf16.mxu1 %v8285_v63  ;;  %v8303_v62 = vpack.c.bf16 %v2930_v41, %v2926_v43  ;;  %v8431_v63 = vpack.c.bf16 %v2932_v42, %v2928_v12  ;;  %v8433_v6 = vpack.c.bf16 %v2941_v61, %v2937_v58  ;;  %v2966_v41 = vld [vmem:[#allocation16 + $0x340] sm:$0xff]  ;;  %v2979_v58 = vld [vmem:[#allocation16 + $0x3a8] sm:$0xff]  ;;  %v2977_v61 = vld [vmem:[#allocation16 + $0x398] sm:$0xff] }
 0x59d   :  { %8414 = vmatprep.subr.bf16.mxu0 %v8413_v56  ;;  %v2936_v56 = vld [vmem:[#allocation16 + $0x250] sm:$0xff]  ;;  %v8321_v43 = vpack.c.bf16 %v2971_v36, %v2967_v35  ;;  %v2970_v12 = vld [vmem:[#allocation16 + $0x360] sm:$0xff] }
 0x59e   :  { %v3000_v36 = vld [vmem:[#allocation16 + $0x450] sm:$0xff] }
 0x59f   :  { %8288 = vmatpush1.bf16.msra.mxu1 %v8287_v3  ;;  %v2949_v3 = vld [vmem:[#allocation16 + $0x2b8] sm:$0xff] }
 0x5a0   :  { %8416 = vmatpush1.bf16.msra.mxu0 %v8415_v10  ;;  %8290 = vmatprep.subr.bf16.mxu1 %v8289_v45  ;;  %v8307_v10 = vpack.c.bf16 %v2938_v4, %v2934_v2  ;;  %v8435_v45 = vpack.c.bf16 %v2940_v7, %v2936_v56  ;;  %v8437_v24 = vpack.c.bf16 %v2949_v3, %v2945_v27  ;;  %v2974_v4 = vld [vmem:[#allocation16 + $0x380] sm:$0xff]  ;;  %v2987_v27 = vld [vmem:[#allocation16 + $0x3e8] sm:$0xff]  ;;  %v2985_v3 = vld [vmem:[#allocation16 + $0x3d8] sm:$0xff] }
 0x5a1   :  { %8418 = vmatprep.subr.bf16.mxu0 %v8417_v23  ;;  %v2944_v23 = vld [vmem:[#allocation16 + $0x290] sm:$0xff]  ;;  %v8325_v2 = vpack.c.bf16 %v2979_v58, %v2975_v54  ;;  %v2978_v56 = vld [vmem:[#allocation16 + $0x3a0] sm:$0xff] }
 0x5a2   :  { %v3010_v54 = vld [vmem:[#allocation16 + $0x4a0] sm:$0xff] }
 0x5a3   :  { %8292 = vmatpush1.bf16.msra.mxu1 %v8291_v17  ;;  %v2957_v17 = vld [vmem:[#allocation16 + $0x2f8] sm:$0xff] }
 0x5a4   :  { %8420 = vmatpush1.bf16.msra.mxu0 %v8419_v59  ;;  %8294 = vmatprep.subr.bf16.mxu1 %v8293_v18  ;;  %v8311_v59 = vpack.c.bf16 %v2946_v14, %v2942_v0  ;;  %v8439_v18 = vpack.c.bf16 %v2948_v50, %v2944_v23  ;;  %v8441_v25 = vpack.c.bf16 %v2957_v17, %v2953_v16  ;;  %v2982_v14 = vld [vmem:[#allocation16 + $0x3c0] sm:$0xff]  ;;  %v2984_v50 = vld [vmem:[#allocation16 + $0x3d0] sm:$0xff]  ;;  %v2991_v17 = vld [vmem:[#allocation16 + $0x408] sm:$0xff] }
 0x5a5   :  { %8422 = vmatprep.subr.bf16.mxu0 %v8421_v46  ;;  %v2952_v46 = vld [vmem:[#allocation16 + $0x2d0] sm:$0xff]  ;;  %v8329_v0 = vpack.c.bf16 %v2987_v27, %v2983_v55  ;;  %v2986_v23 = vld [vmem:[#allocation16 + $0x3e0] sm:$0xff]  ;;  %v8459_v16 = vpack.c.bf16 %v2988_v53, %v2984_v50  ;;  %v3027_v50 = vld [vmem:[#allocation16 + $0x528] sm:$0xff] }
 0x5a6   :  { %v8331_v15 = vpack.c.bf16 %v2986_v23, %v2982_v14  ;;  %v3016_v14 = vld [vmem:[#allocation16 + $0x4d0] sm:$0xff]  ;;  %v3025_v53 = vld [vmem:[#allocation16 + $0x518] sm:$0xff] }
 0x5a7   :  { %8296 = vmatpush1.bf16.msra.mxu1 %v8295_v13  ;;  %v2965_v13 = vld [vmem:[#allocation16 + $0x338] sm:$0xff]  ;;  %v3020_v23 = vld [vmem:[#allocation16 + $0x4f0] sm:$0xff] }
 0x5a8   :  { %8424 = vmatpush1.bf16.msra.mxu0 %v8423_v29  ;;  %8298 = vmatprep.subr.bf16.mxu1 %v8297_v5  ;;  %v8315_v29 = vpack.c.bf16 %v2954_v22, %v2950_v21  ;;  %v8443_v5 = vpack.c.bf16 %v2956_v20, %v2952_v46  ;;  %v8445_v34 = vpack.c.bf16 %v2965_v13, %v2961_v28  ;;  %v2997_v21 = vld [vmem:[#allocation16 + $0x438] sm:$0xff]  ;;  %v2990_v46 = vld [vmem:[#allocation16 + $0x400] sm:$0xff]  ;;  %v2992_v20 = vld [vmem:[#allocation16 + $0x410] sm:$0xff] }
 0x5a9   :  { %8426 = vmatprep.subr.bf16.mxu0 %v8425_v33  ;;  %v2960_v33 = vld [vmem:[#allocation16 + $0x310] sm:$0xff]  ;;  %v3003_v28 = vld [vmem:[#allocation16 + $0x468] sm:$0xff]  ;;  %v3001_v13 = vld [vmem:[#allocation16 + $0x458] sm:$0xff] }
 0x5ab   :  { %8300 = vmatpush1.bf16.msra.mxu1 %v8299_v39  ;;  %v2973_v39 = vld [vmem:[#allocation16 + $0x378] sm:$0xff] }
 0x5ac   :  { %8428 = vmatpush1.bf16.msra.mxu0 %v8427_v31  ;;  %8302 = vmatprep.subr.bf16.mxu1 %v8301_v40  ;;  %v8319_v31 = vpack.c.bf16 %v2962_v32, %v2958_v37  ;;  %v8447_v40 = vpack.c.bf16 %v2964_v9, %v2960_v33  ;;  %v8449_v42 = vpack.c.bf16 %v2973_v39, %v2969_v38  ;;  %v2998_v32 = vld [vmem:[#allocation16 + $0x440] sm:$0xff]  ;;  %v3004_v38 = vld [vmem:[#allocation16 + $0x470] sm:$0xff]  ;;  %v3007_v39 = vld [vmem:[#allocation16 + $0x488] sm:$0xff] }
 0x5ad   :  { %8430 = vmatprep.subr.bf16.mxu0 %v8429_v60  ;;  %v2968_v60 = vld [vmem:[#allocation16 + $0x350] sm:$0xff]  ;;  %v8463_v37 = vpack.c.bf16 %v2996_v47, %v2992_v20  ;;  %v3002_v33 = vld [vmem:[#allocation16 + $0x460] sm:$0xff]  ;;  %v8337_v9 = vpack.c.bf16 %v3003_v28, %v2999_v26  ;;  %v3035_v20 = vld [vmem:[#allocation16 + $0x568] sm:$0xff] }
 0x5ae   :  { %v3033_v47 = vld [vmem:[#allocation16 + $0x558] sm:$0xff] }
 0x5af   :  { %8304 = vmatpush1.bf16.msra.mxu1 %v8303_v62  ;;  %v2981_v62 = vld [vmem:[#allocation16 + $0x3b8] sm:$0xff] }
 0x5b0   :  { %8432 = vmatpush1.bf16.msra.mxu0 %v8431_v63  ;;  %8306 = vmatprep.subr.bf16.mxu1 %v8305_v1  ;;  %v8323_v63 = vpack.c.bf16 %v2970_v12, %v2966_v41  ;;  %v8451_v1 = vpack.c.bf16 %v2972_v57, %v2968_v60  ;;  %v8453_v7 = vpack.c.bf16 %v2981_v62, %v2977_v61  ;;  %v3013_v41 = vld [vmem:[#allocation16 + $0x4b8] sm:$0xff]  ;;  %v3006_v57 = vld [vmem:[#allocation16 + $0x480] sm:$0xff] }
 0x5b1   :  { %8434 = vmatprep.subr.bf16.mxu0 %v8433_v6  ;;  %v2976_v6 = vld [vmem:[#allocation16 + $0x390] sm:$0xff]  ;;  %v8339_v60 = vpack.c.bf16 %v3002_v33, %v2998_v32  ;;  %v8343_v27 = vpack.c.bf16 %v3010_v54, %v3006_v57  ;;  %v3037_v26 = vld [vmem:[#allocation16 + $0x578] sm:$0xff]  ;;  %v3047_v57 = vld [vmem:[#allocation16 + $0x5c8] sm:$0xff] }
 0x5b2   :  { %v3032_v32 = vld [vmem:[#allocation16 + $0x550] sm:$0xff]  ;;  %v3051_v54 = vld [vmem:[#allocation16 + $0x5e8] sm:$0xff] }
 0x5b3   :  { %8308 = vmatpush1.bf16.msra.mxu1 %v8307_v10  ;;  %v2989_v10 = vld [vmem:[#allocation16 + $0x3f8] sm:$0xff]  ;;  %v3036_v33 = vld [vmem:[#allocation16 + $0x570] sm:$0xff] }
 0x5b4   :  { %8436 = vmatpush1.bf16.msra.mxu0 %v8435_v45  ;;  %8310 = vmatprep.subr.bf16.mxu1 %v8309_v11  ;;  %v8327_v45 = vpack.c.bf16 %v2978_v56, %v2974_v4  ;;  %v8455_v11 = vpack.c.bf16 %v2980_v8, %v2976_v6  ;;  %v3019_v6 = vld [vmem:[#allocation16 + $0x4e8] sm:$0xff]  ;;  %v3021_v8 = vld [vmem:[#allocation16 + $0x4f8] sm:$0xff] }
 0x5b5   :  { %8438 = vmatprep.subr.bf16.mxu0 %v8437_v24  ;;  %v8457_v24 = vpack.c.bf16 %v2989_v10, %v2985_v3  ;;  %v3014_v10 = vld [vmem:[#allocation16 + $0x4c0] sm:$0xff] }
 0x5b7   :  { %8312 = vmatpush1.bf16.msra.mxu1 %v8311_v59  ;;  %v2995_v59 = vld [vmem:[#allocation16 + $0x428] sm:$0xff] }
 0x5b8   :  { %8440 = vmatpush1.bf16.msra.mxu0 %v8439_v18  ;;  %8314 = vmatprep.subr.bf16.mxu1 %v8313_v19  ;;  %v2993_v18 = vld [vmem:[#allocation16 + $0x418] sm:$0xff]  ;;  %v8333_v19 = vpack.c.bf16 %v2995_v59, %v2991_v17  ;;  %v8475_v17 = vpack.c.bf16 %v3020_v23, %v3016_v14  ;;  %v3022_v59 = vld [vmem:[#allocation16 + $0x500] sm:$0xff] }
 0x5b9   :  { %8442 = vmatprep.subr.bf16.mxu0 %v8441_v25  ;;  %v8461_v22 = vpack.c.bf16 %v2997_v21, %v2993_v18  ;;  %v2994_v25 = vld [vmem:[#allocation16 + $0x420] sm:$0xff] }
 0x5ba   :  { %v3026_v18 = vld [vmem:[#allocation16 + $0x520] sm:$0xff] }
 0x5bb   :  { %8316 = vmatpush1.bf16.msra.mxu1 %v8315_v29  ;;  %v3005_v29 = vld [vmem:[#allocation16 + $0x478] sm:$0xff]  ;;  %v8351_v28 = vpack.c.bf16 %v3026_v18, %v3022_v59  ;;  %v3054_v14 = vld [vmem:[#allocation16 + $0x600] sm:$0xff] }
 0x5bc   :  { %8444 = vmatpush1.bf16.msra.mxu0 %v8443_v5  ;;  %8318 = vmatprep.subr.bf16.mxu1 %v8317_v30  ;;  %v8335_v30 = vpack.c.bf16 %v2994_v25, %v2990_v46  ;;  %v8465_v35 = vpack.c.bf16 %v3005_v29, %v3001_v13  ;;  %v3028_v46 = vld [vmem:[#allocation16 + $0x530] sm:$0xff]  ;;  %v3031_v25 = vld [vmem:[#allocation16 + $0x548] sm:$0xff]  ;;  %v3030_v29 = vld [vmem:[#allocation16 + $0x540] sm:$0xff] }
 0x5bd   :  { %8446 = vmatprep.subr.bf16.mxu0 %v8445_v34  ;;  %v3058_v23 = vld [vmem:[#allocation16 + $0x620] sm:$0xff]  ;;  %v3065_v59 = vld [vmem:[#allocation16 + $0x658] sm:$0xff] }
 0x5be   :  { %v3069_v18 = vld [vmem:[#allocation16 + $0x678] sm:$0xff] }
 0x5bf   :  { %8320 = vmatpush1.bf16.msra.mxu1 %v8319_v31 }
 0x5c0   :  { %8448 = vmatpush1.bf16.msra.mxu0 %v8447_v40  ;;  %8322 = vmatprep.subr.bf16.mxu1 %v8321_v43  ;;  %v3011_v40 = vld [vmem:[#allocation16 + $0x4a8] sm:$0xff]  ;;  %v3009_v43 = vld [vmem:[#allocation16 + $0x498] sm:$0xff] }
 0x5c1   :  { %8450 = vmatprep.subr.bf16.mxu0 %v8449_v42  ;;  %v8467_v42 = vpack.c.bf16 %v3004_v38, %v3000_v36  ;;  %v8341_v61 = vpack.c.bf16 %v3011_v40, %v3007_v39  ;;  %v8469_v62 = vpack.c.bf16 %v3013_v41, %v3009_v43  ;;  %v3045_v36 = vld [vmem:[#allocation16 + $0x5b8] sm:$0xff]  ;;  %v8483_v39 = vpack.c.bf16 %v3036_v33, %v3032_v32  ;;  %v3038_v40 = vld [vmem:[#allocation16 + $0x580] sm:$0xff] }
 0x5c2   :  { %v3042_v43 = vld [vmem:[#allocation16 + $0x5a0] sm:$0xff] }
 0x5c3   :  { %8324 = vmatpush1.bf16.msra.mxu1 %v8323_v63  ;;  %v3008_v63 = vld [vmem:[#allocation16 + $0x490] sm:$0xff]  ;;  %v3070_v32 = vld [vmem:[#allocation16 + $0x680] sm:$0xff] }
 0x5c4   :  { %8452 = vmatpush1.bf16.msra.mxu0 %v8451_v1  ;;  %8326 = vmatprep.subr.bf16.mxu1 %v8325_v2  ;;  %v3012_v1 = vld [vmem:[#allocation16 + $0x4b0] sm:$0xff]  ;;  %v3015_v2 = vld [vmem:[#allocation16 + $0x4c8] sm:$0xff]  ;;  %v3074_v33 = vld [vmem:[#allocation16 + $0x6a0] sm:$0xff] }
 0x5c5   :  { %8454 = vmatprep.subr.bf16.mxu0 %v8453_v7  ;;  %v3017_v7 = vld [vmem:[#allocation16 + $0x4d8] sm:$0xff]  ;;  %v8471_v3 = vpack.c.bf16 %v3012_v1, %v3008_v63  ;;  %v3046_v1 = vld [vmem:[#allocation16 + $0x5c0] sm:$0xff] }
 0x5c7   :  { %8328 = vmatpush1.bf16.msra.mxu1 %v8327_v45  ;;  %v3018_v45 = vld [vmem:[#allocation16 + $0x4e0] sm:$0xff] }
 0x5c8   :  { %8456 = vmatpush1.bf16.msra.mxu0 %v8455_v11  ;;  %8330 = vmatprep.subr.bf16.mxu1 %v8329_v0  ;;  %v8345_v11 = vpack.c.bf16 %v3019_v6, %v3015_v2  ;;  %v8473_v0 = vpack.c.bf16 %v3021_v8, %v3017_v7  ;;  %v3050_v2 = vld [vmem:[#allocation16 + $0x5e0] sm:$0xff]  ;;  %v3048_v7 = vld [vmem:[#allocation16 + $0x5d0] sm:$0xff] }
 0x5c9   :  { %8458 = vmatprep.subr.bf16.mxu0 %v8457_v24  ;;  %v3023_v24 = vld [vmem:[#allocation16 + $0x508] sm:$0xff]  ;;  %v3052_v8 = vld [vmem:[#allocation16 + $0x5f0] sm:$0xff] }
 0x5cb   :  { %8332 = vmatpush1.bf16.msra.mxu1 %v8331_v15  ;;  %v3029_v15 = vld [vmem:[#allocation16 + $0x538] sm:$0xff] }
 0x5cc   :  { %8460 = vmatpush1.bf16.msra.mxu0 %v8459_v16  ;;  %8334 = vmatprep.subr.bf16.mxu1 %v8333_v19  ;;  %v8347_v16 = vpack.c.bf16 %v3018_v45, %v3014_v10  ;;  %v8349_v19 = vpack.c.bf16 %v3027_v50, %v3023_v24  ;;  %v8477_v21 = vpack.c.bf16 %v3029_v15, %v3025_v53  ;;  %v3057_v10 = vld [vmem:[#allocation16 + $0x618] sm:$0xff]  ;;  %v3056_v53 = vld [vmem:[#allocation16 + $0x610] sm:$0xff] }
 0x5cd   :  { %8462 = vmatprep.subr.bf16.mxu0 %v8461_v22  ;;  %v3024_v22 = vld [vmem:[#allocation16 + $0x510] sm:$0xff]  ;;  %v3061_v45 = vld [vmem:[#allocation16 + $0x638] sm:$0xff] }
 0x5ce   :  { %v8479_v13 = vpack.c.bf16 %v3028_v46, %v3024_v22  ;;  %v8493_v50 = vpack.c.bf16 %v3061_v45, %v3057_v10  ;;  %v3060_v15 = vld [vmem:[#allocation16 + $0x630] sm:$0xff]  ;;  %v3062_v22 = vld [vmem:[#allocation16 + $0x640] sm:$0xff] }
 0x5cf   :  { %v3066_v46 = vld [vmem:[#allocation16 + $0x660] sm:$0xff]  ;;  %v3088_v10 = vld [vmem:[#allocation16 + $0x710] sm:$0xff] }
 0x5d0   :  { %v3092_v45 = vld [vmem:[#allocation16 + $0x730] sm:$0xff] }
 0x660   :  { %v2774_v5 = vpop.f32.mrb[28].mxu1 }
 0x661   :  { %v2776_v34 = vpop.f32.mrb[29].mxu1  ;;  %v10633_v31 = vpop.f32.mrb[24].mxu0 }
 0x662   :  { %3182 = vmatprep.mubr.f32.mxu1 %v2776_v34  ;;  %3336 = vmatprep.mubr.f32.mxu0 %v2776_v34  ;;  %v2853_v12 = vpop.f32.mrb[25].mxu0  ;;  %v3039_v34 = vld [vmem:[#allocation16 + $0x588] sm:$0xff] }
 0x663   :  { %3183 = vmatmul.mubr.f32.vlgmr.msra.gmra.mrb[24].mxu1 %v2774_v5  ;;  %3337 = vmatmul.mubr.f32.vlgmr.msra.gmra.mrb[20].mxu0 %v2774_v5  ;;  %v3034_v5 = vld [vmem:[#allocation16 + $0x560] sm:$0xff] }
 0x664   :  { %8336 = vmatpush1.bf16.msra.mxu1 %v8335_v30  ;;  %8464 = vmatpush1.bf16.msra.mxu0 %v8463_v37  ;;  %v2780_v58 = vpop.f32.mrb[30].mxu1  ;;  %v8353_v30 = vpack.c.bf16 %v3035_v20, %v3031_v25  ;;  %v8481_v37 = vpack.c.bf16 %v3037_v26, %v3033_v47  ;;  %v8355_v38 = vpack.c.bf16 %v3034_v5, %v3030_v29  ;;  %v3064_v47 = vld [vmem:[#allocation16 + $0x650] sm:$0xff]  ;;  %v3073_v29 = vld [vmem:[#allocation16 + $0x698] sm:$0xff] }
 0x665   :  { %8338 = vmatprep.subr.bf16.mxu1 %v8337_v9  ;;  %8466 = vmatprep.subr.bf16.mxu0 %v8465_v35  ;;  %v2782_v4 = vpop.f32.mrb[31].mxu1  ;;  %v10635_v56 = vpop.f32.mrb[26].mxu0  ;;  %v3043_v9 = vld [vmem:[#allocation16 + $0x5a8] sm:$0xff]  ;;  %v3041_v35 = vld [vmem:[#allocation16 + $0x598] sm:$0xff]  ;;  %v8497_v20 = vpack.c.bf16 %v3069_v18, %v3065_v59  ;;  %v3068_v26 = vld [vmem:[#allocation16 + $0x670] sm:$0xff] }
 0x666   :  { %3188 = vmatprep.mubr.f32.mxu1 %v2782_v4  ;;  %3342 = vmatprep.mubr.f32.mxu0 %v2782_v4  ;;  %v10637_v55 = vpop.f32.mrb[27].mxu0  ;;  %v8357_v41 = vpack.c.bf16 %v3043_v9, %v3039_v34  ;;  %v8361_v4 = vpack.c.bf16 %v3051_v54, %v3047_v57  ;;  %v3077_v5 = vld [vmem:[#allocation16 + $0x6b8] sm:$0xff]  ;;  %v3096_v59 = vld [vmem:[#allocation16 + $0x750] sm:$0xff] }
 0x667   :  { %3189 = vmatmul.mubr.f32.gmra.mrb[26].mxu1 %v2780_v58  ;;  %3343 = vmatmul.mubr.f32.gmra.mrb[22].mxu0 %v2780_v58  ;;  %v3049_v58 = vld [vmem:[#allocation16 + $0x5d8] sm:$0xff]  ;;  %v8501_v9 = vpack.c.bf16 %v3077_v5, %v3073_v29  ;;  %v3100_v18 = vld [vmem:[#allocation16 + $0x770] sm:$0xff] }
 0x668   :  { %8340 = vmatpush1.bf16.msra.mxu1 %v8339_v60  ;;  %8468 = vmatpush1.bf16.msra.mxu0 %v8467_v42  ;;  %v3040_v60 = vld [vmem:[#allocation16 + $0x590] sm:$0xff] }
 0x669   :  { %8342 = vmatprep.subr.bf16.mxu1 %v8341_v61  ;;  %8470 = vmatprep.subr.bf16.mxu0 %v8469_v62  ;;  %v3044_v42 = vld [vmem:[#allocation16 + $0x5b0] sm:$0xff]  ;;  %v3053_v61 = vld [vmem:[#allocation16 + $0x5f8] sm:$0xff]  ;;  %v8359_v62 = vpack.c.bf16 %v3042_v43, %v3038_v40 }
 0x66a   :  { %3259 = vmatprep.mubr.f32.mxu1 %v2853_v12  ;;  %3413 = vmatprep.mubr.f32.mxu0 %v2853_v12  ;;  %v8485_v12 = vpack.c.bf16 %v3045_v36, %v3041_v35  ;;  %v8487_v63 = vpack.c.bf16 %v3044_v42, %v3040_v60  ;;  %v8489_v6 = vpack.c.bf16 %v3053_v61, %v3049_v58  ;;  %v3072_v35 = vld [vmem:[#allocation16 + $0x690] sm:$0xff]  ;;  %v3081_v40 = vld [vmem:[#allocation16 + $0x6d8] sm:$0xff]  ;;  %v3078_v60 = vld [vmem:[#allocation16 + $0x6c0] sm:$0xff] }
 0x66b   :  { %v3076_v36 = vld [vmem:[#allocation16 + $0x6b0] sm:$0xff]  ;;  %v3085_v43 = vld [vmem:[#allocation16 + $0x6f8] sm:$0xff]  ;;  %v3082_v42 = vld [vmem:[#allocation16 + $0x6e0] sm:$0xff] }
 0x66c   :  { %8344 = vmatpush1.bf16.msra.mxu1 %v8343_v27  ;;  %8472 = vmatpush1.bf16.msra.mxu0 %v8471_v3  ;;  %v3055_v27 = vld [vmem:[#allocation16 + $0x608] sm:$0xff]  ;;  %v8505_v54 = vpack.c.bf16 %v3085_v43, %v3081_v40  ;;  %v3080_v58 = vld [vmem:[#allocation16 + $0x6d0] sm:$0xff] }
 0x66d   :  { %8346 = vmatprep.subr.bf16.mxu1 %v8345_v11  ;;  %8474 = vmatprep.subr.bf16.mxu0 %v8473_v0  ;;  %v3059_v3 = vld [vmem:[#allocation16 + $0x628] sm:$0xff]  ;;  %v8363_v11 = vpack.c.bf16 %v3050_v2, %v3046_v1  ;;  %v8491_v0 = vpack.c.bf16 %v3052_v8, %v3048_v7  ;;  %v3084_v61 = vld [vmem:[#allocation16 + $0x6f0] sm:$0xff]  ;;  %v3089_v1 = vld [vmem:[#allocation16 + $0x718] sm:$0xff] }
 0x66e   :  { %v8365_v24 = vpack.c.bf16 %v3059_v3, %v3055_v27  ;;  %v3093_v2 = vld [vmem:[#allocation16 + $0x738] sm:$0xff]  ;;  %v3086_v7 = vld [vmem:[#allocation16 + $0x700] sm:$0xff]  ;;  %v3104_v29 = vld [vmem:[#allocation16 + $0x790] sm:$0xff] }
 0x66f   :  { %v3090_v8 = vld [vmem:[#allocation16 + $0x720] sm:$0xff]  ;;  %v8509_v3 = vpack.c.bf16 %v3093_v2, %v3089_v1  ;;  %v3108_v5 = vld [vmem:[#allocation16 + $0x7b0] sm:$0xff] }
 0x670   :  { %8348 = vmatpush1.bf16.msra.mxu1 %v8347_v16  ;;  %8476 = vmatpush1.bf16.msra.mxu0 %v8475_v17  ;;  %v3063_v16 = vld [vmem:[#allocation16 + $0x648] sm:$0xff]  ;;  %v3112_v40 = vld [vmem:[#allocation16 + $0x7d0] sm:$0xff] }
 0x671   :  { %8350 = vmatprep.subr.bf16.mxu1 %v8349_v19  ;;  %8478 = vmatprep.subr.bf16.mxu0 %v8477_v21  ;;  %v3067_v17 = vld [vmem:[#allocation16 + $0x668] sm:$0xff]  ;;  %v8367_v19 = vpack.c.bf16 %v3058_v23, %v3054_v14  ;;  %v8495_v21 = vpack.c.bf16 %v3060_v15, %v3056_v53  ;;  %v3097_v14 = vld [vmem:[#allocation16 + $0x758] sm:$0xff]  ;;  %v3094_v53 = vld [vmem:[#allocation16 + $0x740] sm:$0xff] }
 0x672   :  { %v8369_v25 = vpack.c.bf16 %v3067_v17, %v3063_v16  ;;  %v3101_v23 = vld [vmem:[#allocation16 + $0x778] sm:$0xff]  ;;  %v3098_v15 = vld [vmem:[#allocation16 + $0x760] sm:$0xff]  ;;  %v3116_v43 = vld [vmem:[#allocation16 + $0x7f0] sm:$0xff] }
 0x673   :  { %v8513_v17 = vpack.c.bf16 %v3101_v23, %v3097_v14 }
 0x674   :  { %8352 = vmatpush1.bf16.msra.mxu1 %v8351_v28  ;;  %8480 = vmatpush1.bf16.msra.mxu0 %v8479_v13  ;;  %v3071_v28 = vld [vmem:[#allocation16 + $0x688] sm:$0xff] }
 0x675   :  { %8354 = vmatprep.subr.bf16.mxu1 %v8353_v30  ;;  %8482 = vmatprep.subr.bf16.mxu0 %v8481_v37  ;;  %v3075_v13 = vld [vmem:[#allocation16 + $0x6a8] sm:$0xff]  ;;  %v8371_v30 = vpack.c.bf16 %v3066_v46, %v3062_v22  ;;  %v8499_v37 = vpack.c.bf16 %v3068_v26, %v3064_v47  ;;  %v3105_v22 = vld [vmem:[#allocation16 + $0x798] sm:$0xff]  ;;  %v3102_v47 = vld [vmem:[#allocation16 + $0x780] sm:$0xff] }
 0x676   :  { %v8373_v34 = vpack.c.bf16 %v3075_v13, %v3071_v28  ;;  %v3109_v46 = vld [vmem:[#allocation16 + $0x7b8] sm:$0xff]  ;;  %v3106_v26 = vld [vmem:[#allocation16 + $0x7a0] sm:$0xff] }
 0x677   :  { %v8517_v13 = vpack.c.bf16 %v3109_v46, %v3105_v22  ;;  %v4022_v46 = vld [vmem:[#allocation19] sm:$0xff] }
 0x678   :  { %8356 = vmatpush1.bf16.msra.mxu1 %v8355_v38  ;;  %8484 = vmatpush1.bf16.msra.mxu0 %v8483_v39  ;;  %v3079_v38 = vld [vmem:[#allocation16 + $0x6c8] sm:$0xff] }
 0x679   :  { %8358 = vmatprep.subr.bf16.mxu1 %v8357_v41  ;;  %8486 = vmatprep.subr.bf16.mxu0 %v8485_v12  ;;  %v3083_v39 = vld [vmem:[#allocation16 + $0x6e8] sm:$0xff]  ;;  %v8375_v41 = vpack.c.bf16 %v3074_v33, %v3070_v32  ;;  %v8503_v12 = vpack.c.bf16 %v3076_v36, %v3072_v35  ;;  %v3113_v32 = vld [vmem:[#allocation16 + $0x7d8] sm:$0xff]  ;;  %v3110_v35 = vld [vmem:[#allocation16 + $0x7c0] sm:$0xff] }
 0x67a   :  { %v8377_v57 = vpack.c.bf16 %v3083_v39, %v3079_v38  ;;  %v3117_v33 = vld [vmem:[#allocation16 + $0x7f8] sm:$0xff]  ;;  %v3114_v39 = vld [vmem:[#allocation16 + $0x7e0] sm:$0xff] }
 0x67b   :  { %v8521_v38 = vpack.c.bf16 %v3117_v33, %v3113_v32  ;;  %v4034_v32 = vld [vmem:[#allocation19 + $0x60] sm:$0xff]  ;;  %v4039_v33 = vld [vmem:[#allocation19 + $0x88] sm:$0xff] }
 0x67c   :  { %8360 = vmatpush1.bf16.msra.mxu1 %v8359_v62  ;;  %8488 = vmatpush1.bf16.msra.mxu0 %v8487_v63  ;;  %v3087_v62 = vld [vmem:[#allocation16 + $0x708] sm:$0xff] }
 0x67d   :  { %8362 = vmatprep.subr.bf16.mxu1 %v8361_v4  ;;  %8490 = vmatprep.subr.bf16.mxu0 %v8489_v6  ;;  %v3091_v63 = vld [vmem:[#allocation16 + $0x728] sm:$0xff]  ;;  %v8379_v4 = vpack.c.bf16 %v3082_v42, %v3078_v60  ;;  %v8507_v6 = vpack.c.bf16 %v3084_v61, %v3080_v58 }
 0x67e   :  { %v8381_v27 = vpack.c.bf16 %v3091_v63, %v3087_v62  ;;  %v3434_v60 = vld [vmem:[%s10865_s10] sm:$0xf] }
 0x67f   :  { %v3439_v42 = vrot.slane %v3434_v60, %v10515_v48  ;;  %v3451_v58 = vrot.slane %v3434_v60, %v10521_v52 }
 0x680   :  { %8364 = vmatpush1.bf16.msra.mxu1 %v8363_v11  ;;  %8492 = vmatpush1.bf16.msra.mxu0 %v8491_v0  ;;  %v3095_v11 = vld [vmem:[#allocation16 + $0x748] sm:$0xff] }
 0x681   :  { %8366 = vmatprep.subr.bf16.mxu1 %v8365_v24  ;;  %8494 = vmatprep.subr.bf16.mxu0 %v8493_v50  ;;  %v3099_v0 = vld [vmem:[#allocation16 + $0x768] sm:$0xff]  ;;  %v8383_v24 = vpack.c.bf16 %v3090_v8, %v3086_v7  ;;  %v8511_v50 = vpack.c.bf16 %v3092_v45, %v3088_v10 }
 0x682   :  { %v8385_v16 = vpack.c.bf16 %v3099_v0, %v3095_v11 }
 0x684   :  { %8368 = vmatpush1.bf16.msra.mxu1 %v8367_v19  ;;  %8496 = vmatpush1.bf16.msra.mxu0 %v8495_v21  ;;  %v3103_v19 = vld [vmem:[#allocation16 + $0x788] sm:$0xff] }
 0x685   :  { %8370 = vmatprep.subr.bf16.mxu1 %v8369_v25  ;;  %8498 = vmatprep.subr.bf16.mxu0 %v8497_v20  ;;  %v3107_v21 = vld [vmem:[#allocation16 + $0x7a8] sm:$0xff]  ;;  %v8387_v25 = vpack.c.bf16 %v3098_v15, %v3094_v53  ;;  %v8515_v20 = vpack.c.bf16 %v3100_v18, %v3096_v59 }
 0x686   :  { %v8389_v28 = vpack.c.bf16 %v3107_v21, %v3103_v19 }
 0x688   :  { %8372 = vmatpush1.bf16.msra.mxu1 %v8371_v30  ;;  %8500 = vmatpush1.bf16.msra.mxu0 %v8499_v37  ;;  %v3111_v30 = vld [vmem:[#allocation16 + $0x7c8] sm:$0xff] }
 0x689   :  { %8374 = vmatprep.subr.bf16.mxu1 %v8373_v34  ;;  %8502 = vmatprep.subr.bf16.mxu0 %v8501_v9  ;;  %v3115_v37 = vld [vmem:[#allocation16 + $0x7e8] sm:$0xff]  ;;  %v8391_v34 = vpack.c.bf16 %v3106_v26, %v3102_v47  ;;  %v8519_v9 = vpack.c.bf16 %v3108_v5, %v3104_v29  ;;  %v7160_v26 = vld [vmem:[%s10866_s11 + $0x8] sm:$0xff] }
 0x68a   :  { %v8393_v36 = vpack.c.bf16 %v3115_v37, %v3111_v30  ;;  %v4035_v47 = vld [vmem:[#allocation19 + $0x68] sm:$0xff]  ;;  %v4029_v5 = vld [vmem:[#allocation19 + $0x38] sm:$0xff]  ;;  %v4030_v37 = vld [vmem:[#allocation19 + $0x40] sm:$0xff] }
 0x68c   :  { %8376 = vmatpush1.bf16.msra.mxu1 %v8375_v41  ;;  %8504 = vmatpush1.bf16.msra.mxu0 %v8503_v12  ;;  %v8395_v41 = vpack.c.bf16 %v3114_v39, %v3110_v35  ;;  %v8523_v12 = vpack.c.bf16 %v3116_v43, %v3112_v40  ;;  %v4024_v35 = vld [vmem:[#allocation19 + $0x10] sm:$0xff]  ;;  %v8547_v39 = vpack.c.bf16 %v4034_v32, %v4030_v37  ;;  %v4037_v40 = vld [vmem:[#allocation19 + $0x78] sm:$0xff] }
 0x68d   :  { %8378 = vmatprep.subr.bf16.mxu1 %v8377_v57  ;;  %8506 = vmatprep.subr.bf16.mxu0 %v8505_v54  ;;  %v4065_v37 = vld [vmem:[#allocation19 + $0x158] sm:$0xff] }
 0x690   :  { %8380 = vmatpush1.bf16.msra.mxu1 %v8379_v4  ;;  %8508 = vmatpush1.bf16.msra.mxu0 %v8507_v6 }
 0x691   :  { %8382 = vmatprep.subr.bf16.mxu1 %v8381_v27  ;;  %8510 = vmatprep.subr.bf16.mxu0 %v8509_v3 }
 0x694   :  { %8384 = vmatpush1.bf16.msra.mxu1 %v8383_v24  ;;  %8512 = vmatpush1.bf16.msra.mxu0 %v8511_v50  ;;  %v4023_v24 = vld [vmem:[#allocation19 + $0x8] sm:$0xff] }
 0x695   :  { %8386 = vmatprep.subr.bf16.mxu1 %v8385_v16  ;;  %8514 = vmatprep.subr.bf16.mxu0 %v8513_v17  ;;  %v4027_v50 = vld [vmem:[#allocation19 + $0x28] sm:$0xff] }
 0x696   :  { %v8541_v22 = vpack.c.bf16 %v4027_v50, %v4023_v24  ;;  %v4067_v24 = vld [vmem:[#allocation19 + $0x168] sm:$0xff] }
 0x698   :  { %8388 = vmatpush1.bf16.msra.mxu1 %v8387_v25  ;;  %8516 = vmatpush1.bf16.msra.mxu0 %v8515_v20  ;;  %v4026_v25 = vld [vmem:[#allocation19 + $0x20] sm:$0xff]  ;;  %v4031_v20 = vld [vmem:[#allocation19 + $0x48] sm:$0xff] }
 0x699   :  { %8390 = vmatprep.subr.bf16.mxu1 %v8389_v28  ;;  %8518 = vmatprep.subr.bf16.mxu0 %v8517_v13  ;;  %v3472_v28 = vld [vmem:[%s10866_s11] sm:$0xff]  ;;  %v4025_v13 = vld [vmem:[#allocation19 + $0x18] sm:$0xff]  ;;  %v8543_v29 = vpack.c.bf16 %v4026_v25, %v4022_v46  ;;  %v8545_v30 = vpack.c.bf16 %v4035_v47, %v4031_v20  ;;  %v4062_v20 = vld [vmem:[#allocation19 + $0x140] sm:$0xff] }
 0x69a   :  { %v4061_v46 = vld [vmem:[#allocation19 + $0x138] sm:$0xff]  ;;  %v4066_v47 = vld [vmem:[#allocation19 + $0x160] sm:$0xff] }
 0x69b   :  { %v8563_v32 = vpack.c.bf16 %v4066_v47, %v4062_v20  ;;  %v4092_v20 = vld [vmem:[#allocation19 + $0x230] sm:$0xff]  ;;  %v4097_v47 = vld [vmem:[#allocation19 + $0x258] sm:$0xff] }
 0x69c   :  { %8392 = vmatpush1.bf16.msra.mxu1 %v8391_v34  ;;  %8520 = vmatpush1.bf16.msra.mxu0 %v8519_v9  ;;  %v4043_v34 = vld [vmem:[#allocation19 + $0xa8] sm:$0xff]  ;;  %v8669_v9 = vpack.c.bf16 %v4029_v5, %v4025_v13  ;;  %v4056_v5 = vld [vmem:[#allocation19 + $0x110] sm:$0xff] }
 0x69d   :  { %8394 = vmatprep.subr.bf16.mxu1 %v8393_v36  ;;  %8522 = vmatprep.subr.bf16.mxu0 %v8521_v38  ;;  %v4028_v36 = vld [vmem:[#allocation19 + $0x30] sm:$0xff]  ;;  %v4033_v38 = vld [vmem:[#allocation19 + $0x58] sm:$0xff]  ;;  %v8549_v43 = vpack.c.bf16 %v4043_v34, %v4039_v33 }
 0x69e   :  { %v4069_v33 = vld [vmem:[#allocation19 + $0x178] sm:$0xff] }
 0x6a0   :  { %8396 = vmatpush1.bf16.msra.mxu1 %v8395_v41  ;;  %8524 = vmatpush1.bf16.msra.mxu0 %v8523_v12  ;;  %v4038_v41 = vld [vmem:[#allocation19 + $0x80] sm:$0xff] }
 0x6a1   :  { %v4042_v12 = vld [vmem:[#allocation19 + $0xa0] sm:$0xff] }
 0x6a3   :  { %3260 = vmatmul.mubr.f32.vlgmr.msra.gmra.mrb[24].mxu1 %v10633_v31  ;;  %3414 = vmatmul.mubr.f32.vlgmr.msra.gmra.mrb[20].mxu0 %v10633_v31  ;;  %v3447_v31 = vrot.slane %v3434_v60, %v10517_v49 }
 0x6a4   :  { %3265 = vmatprep.mubr.f32.mxu1 %v10637_v55  ;;  %3419 = vmatprep.mubr.f32.mxu0 %v10637_v55  ;;  %v3443_v55 = vrot.slane %v3434_v60, %v10519_v51  ;;  %v4047_v60 = vld [vmem:[#allocation19 + $0xc8] sm:$0xff] }
 0x6a7   :  { %3266 = vmatmul.mubr.f32.gmra.mrb[26].mxu1 %v10635_v56  ;;  %3420 = vmatmul.mubr.f32.gmra.mrb[22].mxu0 %v10635_v56 }
 0x6a8   :  { %3944 = vmatprep.mubr.f32.mxu0 %v10055_v44  ;;  %3541 = vmatprep.mubr.f32.mxu1 %v10055_v44 }
 0x776   :  { %v3261_v57 = vpop.f32.mrb[24].mxu1  ;;  %v3415_v54 = vpop.f32.mrb[20].mxu0 }
 0x777   :  { %v3263_v61 = vpop.f32.mrb[25].mxu1  ;;  %v3417_v56 = vpop.f32.mrb[21].mxu0  ;;  %v3456_v62 = vadd.f32 %v3439_v42, %v3261_v57  ;;  %v3458_v63 = vadd.f32 %v3447_v31, %v3415_v54  ;;  %v8673_v57 = vpack.c.bf16 %v4037_v40, %v4033_v38  ;;  %v4032_v54 = vld [vmem:[#allocation19 + $0x50] sm:$0xff]  ;;  %v4083_v38 = vld [vmem:[#allocation19 + $0x1e8] sm:$0xff]  ;;  %v8689_v40 = vpack.c.bf16 %v4069_v33, %v4065_v37 }
 0x778   :  { %v3457_v1 = vadd.f32 %v3443_v55, %v3263_v61  ;;  %v3459_v2 = vadd.f32 %v3451_v58, %v3417_v56  ;;  %v8551_v61 = vpack.c.bf16 %v4042_v12, %v4038_v41  ;;  %v4045_v56 = vld [vmem:[#allocation19 + $0xb8] sm:$0xff]  ;;  %v4068_v41 = vld [vmem:[#allocation19 + $0x170] sm:$0xff]  ;;  %v4115_v37 = vld [vmem:[#allocation19 + $0x2e8] sm:$0xff] }
 0x779   :  { %v3464_v11 = vmax.f32 %v3456_v62, 0.0  ;;  %v3466_v0 = vmax.f32 %v3458_v63, 0.0  ;;  %v4046_v63 = vld [vmem:[#allocation19 + $0xc0] sm:$0xff]  ;;  %v4073_v12 = vld [vmem:[#allocation19 + $0x198] sm:$0xff] }
 0x77a   :  { %v3267_v4 = vpop.f32.mrb[26].mxu1  ;;  %v3421_v6 = vpop.f32.mrb[22].mxu0  ;;  %v3465_v53 = vmax.f32 %v3457_v1, 0.0  ;;  %v3467_v15 = vmax.f32 %v3459_v2, 0.0  ;;  %v4050_v1 = vld [vmem:[#allocation19 + $0xe0] sm:$0xff]  ;;  %v4055_v2 = vld [vmem:[#allocation19 + $0x108] sm:$0xff] }
 0x77b   :  { %v3460_v7 = vadd.f32 %v3439_v42, %v3267_v4  ;;  %v3462_v8 = vadd.f32 %v3447_v31, %v3421_v6  ;;  %v3269_v27 = vpop.f32.mrb[27].mxu1  ;;  %v3423_v3 = vpop.f32.mrb[23].mxu0  ;;  %v4051_v42 = vld [vmem:[#allocation19 + $0xe8] sm:$0xff]  ;;  %v8671_v31 = vpack.c.bf16 %v4028_v36, %v4024_v35  ;;  %v4074_v35 = vld [vmem:[#allocation19 + $0x1a0] sm:$0xff] }
 0x77c   :  { %v3461_v10 = vadd.f32 %v3443_v55, %v3269_v27  ;;  %v3463_v45 = vadd.f32 %v3451_v58, %v3423_v3  ;;  %v4036_v55 = vld [vmem:[#allocation19 + $0x70] sm:$0xff]  ;;  %v4041_v58 = vld [vmem:[#allocation19 + $0x98] sm:$0xff]  ;;  %v8553_v62 = vpack.c.bf16 %v4051_v42, %v4047_v60  ;;  %v4059_v4 = vld [vmem:[#allocation19 + $0x128] sm:$0xff] }
 0x77d   :  { %v3468_v14 = vmax.f32 %v3460_v7, 0.0  ;;  %v3470_v23 = vmax.f32 %v3462_v8, 0.0  ;;  %v8675_v6 = vpack.c.bf16 %v4036_v55, %v4032_v54  ;;  %v8677_v7 = vpack.c.bf16 %v4045_v56, %v4041_v58  ;;  %v4040_v8 = vld [vmem:[#allocation19 + $0x90] sm:$0xff]  ;;  %v4049_v3 = vld [vmem:[#allocation19 + $0xd8] sm:$0xff]  ;;  %v4079_v36 = vld [vmem:[#allocation19 + $0x1c8] sm:$0xff] }
 0x77e   :  { %v3469_v16 = vmax.f32 %v3461_v10, 0.0  ;;  %v3471_v17 = vmax.f32 %v3463_v45, 0.0  ;;  %v4044_v27 = vld [vmem:[#allocation19 + $0xb0] sm:$0xff]  ;;  %v8555_v10 = vpack.c.bf16 %v4050_v1, %v4046_v63  ;;  %v4053_v45 = vld [vmem:[#allocation19 + $0xf8] sm:$0xff]  ;;  %v4082_v54 = vld [vmem:[#allocation19 + $0x1e0] sm:$0xff] }
 0x77f   :  { %v10654_v59 = vpack.c.bf16 %v3468_v14, %v3464_v11  ;;  %v10656_v18 = vpack.c.bf16 %v3470_v23, %v3466_v0  ;;  %v8557_v11 = vpack.c.bf16 %v4059_v4, %v4055_v2  ;;  %v4054_v0 = vld [vmem:[#allocation19 + $0x100] sm:$0xff]  ;;  %v4063_v23 = vld [vmem:[#allocation19 + $0x148] sm:$0xff]  ;;  %v8679_v50 = vpack.c.bf16 %v4044_v27, %v4040_v8  ;;  %v4077_v42 = vld [vmem:[#allocation19 + $0x1b8] sm:$0xff] }
 0x780   :  { %v10658_v19 = vpack.c.bf16 %v3469_v16, %v3465_v53  ;;  %v10660_v21 = vpack.c.bf16 %v3471_v17, %v3467_v15  ;;  %v4058_v14 = vld [vmem:[#allocation19 + $0x120] sm:$0xff]  ;;  %v8681_v53 = vpack.c.bf16 %v4053_v45, %v4049_v3  ;;  %v4048_v15 = vld [vmem:[#allocation19 + $0xd0] sm:$0xff]  ;;  %v4057_v17 = vld [vmem:[#allocation19 + $0x118] sm:$0xff]  ;;  %v8561_v25 = vpack.c.bf16 %v4067_v24, %v4063_v23 }
 0x781   :  { %v4052_v16 = vld [vmem:[#allocation19 + $0xf0] sm:$0xff]  ;;  %v4087_v55 = vld [vmem:[#allocation19 + $0x208] sm:$0xff]  ;;  %v8693_v56 = vpack.c.bf16 %v4077_v42, %v4073_v12  ;;  %v4081_v1 = vld [vmem:[#allocation19 + $0x1d8] sm:$0xff] }
 0x782   :  { %8526 = vmatprep.subr.bf16.mxu1 %v10658_v19  ;;  %8534 = vmatprep.subr.bf16.mxu0 %v10658_v19  ;;  %v8683_v13 = vpack.c.bf16 %v4052_v16, %v4048_v15  ;;  %v4091_v58 = vld [vmem:[#allocation19 + $0x228] sm:$0xff]  ;;  %v4076_v63 = vld [vmem:[#allocation19 + $0x1b0] sm:$0xff]  ;;  %v4085_v4 = vld [vmem:[#allocation19 + $0x1f8] sm:$0xff] }
 0x783   :  { %8528 = vmatpush1.bf16.msra.mxu1 %v10654_v59  ;;  %8536 = vmatpush1.bf16.msra.mxu0 %v10654_v59  ;;  %v4090_v8 = vld [vmem:[#allocation19 + $0x220] sm:$0xff]  ;;  %v4095_v27 = vld [vmem:[#allocation19 + $0x248] sm:$0xff]  ;;  %v8697_v45 = vpack.c.bf16 %v4085_v4, %v4081_v1  ;;  %v4093_v24 = vld [vmem:[#allocation19 + $0x238] sm:$0xff] }
 0x784   :  { %8530 = vmatprep.subr.bf16.mxu1 %v10660_v21  ;;  %8542 = vmatprep.subr.bf16.mxu0 %v8541_v22  ;;  %v8559_v22 = vpack.c.bf16 %v4058_v14, %v4054_v0  ;;  %v4099_v3 = vld [vmem:[#allocation19 + $0x268] sm:$0xff]  ;;  %v4084_v0 = vld [vmem:[#allocation19 + $0x1f0] sm:$0xff]  ;;  %v4089_v14 = vld [vmem:[#allocation19 + $0x218] sm:$0xff] }
 0x785   :  { %v4098_v15 = vld [vmem:[#allocation19 + $0x260] sm:$0xff]  ;;  %v4103_v16 = vld [vmem:[#allocation19 + $0x288] sm:$0xff] }
 0x786   :  { %7161 = vmatmul.mubr.msk.f32.vlgmr.msra.gmra.mrb[28].mxu0 %vm3473_vm2, %v7160_v26  ;;  %7158 = vmatmul.mubr.msk.f32.vlgmr.msra.gmra.mrb[32].mxu1 %vm3473_vm2, %v3472_v28  ;;  %v4123_v12 = vld [vmem:[#allocation19 + $0x328] sm:$0xff] }
 0x787   :  { %8532 = vmatpush1.bf16.msra.mxu1 %v10656_v18  ;;  %3612 = vmatprep.mubr.f32.mxu1 %v10055_v44  ;;  %v4131_v1 = vld [vmem:[#allocation19 + $0x368] sm:$0xff] }
 0x788   :  { %8538 = vmatprep.subr.bf16.mxu1 %v10660_v21  ;;  %8544 = vmatpush1.bf16.msra.mxu0 %v8543_v29  ;;  %v8685_v29 = vpack.c.bf16 %v4061_v46, %v4057_v17  ;;  %v4107_v17 = vld [vmem:[#allocation19 + $0x2a8] sm:$0xff]  ;;  %v8701_v46 = vpack.c.bf16 %v4093_v24, %v4089_v14 }
 0x789   :  { %8546 = vmatprep.subr.bf16.mxu0 %v8545_v30  ;;  %v4060_v30 = vld [vmem:[#allocation19 + $0x130] sm:$0xff]  ;;  %v4139_v14 = vld [vmem:[#allocation19 + $0x3a8] sm:$0xff] }
 0x78a   :  { %7159 = vmatmul.mubr.msk.f32.vlgmr.msra.gmra.mrb[34].mxu1 %vm3473_vm2, %v3472_v28  ;;  %v4075_v28 = vld [vmem:[#allocation19 + $0x1a8] sm:$0xff] }
 0x78b   :  { %8540 = vmatpush1.bf16.msra.mxu1 %v10656_v18  ;;  %4015 = vmatprep.mubr.f32.mxu1 %v10055_v44 }
 0x78c   :  { %8670 = vmatprep.subr.bf16.mxu1 %v8669_v9  ;;  %8548 = vmatpush1.bf16.msra.mxu0 %v8547_v39  ;;  %v4070_v9 = vld [vmem:[#allocation19 + $0x180] sm:$0xff]  ;;  %v8687_v39 = vpack.c.bf16 %v4060_v30, %v4056_v5  ;;  %v4111_v30 = vld [vmem:[#allocation19 + $0x2c8] sm:$0xff] }
 0x78d   :  { %8550 = vmatprep.subr.bf16.mxu0 %v8549_v43  ;;  %v4064_v43 = vld [vmem:[#allocation19 + $0x150] sm:$0xff]  ;;  %v8567_v60 = vpack.c.bf16 %v4074_v35, %v4070_v9  ;;  %v4106_v5 = vld [vmem:[#allocation19 + $0x2a0] sm:$0xff]  ;;  %v4105_v35 = vld [vmem:[#allocation19 + $0x298] sm:$0xff] }
 0x78e   :  { %7162 = vmatmul.mubr.msk.f32.vlgmr.msra.gmra.mrb[36].mxu1 %vm3473_vm2, %v7160_v26  ;;  %v4071_v26 = vld [vmem:[#allocation19 + $0x188] sm:$0xff]  ;;  %v4100_v9 = vld [vmem:[#allocation19 + $0x270] sm:$0xff] }
 0x78f   :  { %8672 = vmatpush1.bf16.msra.mxu1 %v8671_v31  ;;  %v8565_v34 = vpack.c.bf16 %v4075_v28, %v4071_v26  ;;  %v8569_v31 = vpack.c.bf16 %v4083_v38, %v4079_v36  ;;  %v4101_v28 = vld [vmem:[#allocation19 + $0x278] sm:$0xff] }
 0x790   :  { %8674 = vmatprep.subr.bf16.mxu1 %v8673_v57  ;;  %8552 = vmatpush1.bf16.msra.mxu0 %v8551_v61  ;;  %v4078_v57 = vld [vmem:[#allocation19 + $0x1c0] sm:$0xff]  ;;  %v8691_v61 = vpack.c.bf16 %v4068_v41, %v4064_v43  ;;  %v8705_v33 = vpack.c.bf16 %v4101_v28, %v4097_v47  ;;  %v4109_v38 = vld [vmem:[#allocation19 + $0x2b8] sm:$0xff]  ;;  %v4119_v41 = vld [vmem:[#allocation19 + $0x308] sm:$0xff] }
 0x791   :  { %8554 = vmatprep.subr.bf16.mxu0 %v8553_v62  ;;  %v4072_v62 = vld [vmem:[#allocation19 + $0x190] sm:$0xff]  ;;  %v8571_v2 = vpack.c.bf16 %v4082_v54, %v4078_v57  ;;  %v4114_v43 = vld [vmem:[#allocation19 + $0x2e0] sm:$0xff]  ;;  %v8709_v42 = vpack.c.bf16 %v4109_v38, %v4105_v35  ;;  %v4113_v54 = vld [vmem:[#allocation19 + $0x2d8] sm:$0xff] }
 0x792   :  { %v4108_v57 = vld [vmem:[#allocation19 + $0x2b0] sm:$0xff]  ;;  %v4147_v47 = vld [vmem:[#allocation19 + $0x3e8] sm:$0xff] }
 0x793   :  { %8676 = vmatpush1.bf16.msra.mxu1 %v8675_v6  ;;  %v8573_v6 = vpack.c.bf16 %v4091_v58, %v4087_v55  ;;  %v4117_v58 = vld [vmem:[#allocation19 + $0x2f8] sm:$0xff]  ;;  %v4140_v38 = vld [vmem:[#allocation19 + $0x3b0] sm:$0xff] }
 0x794   :  { %8678 = vmatprep.subr.bf16.mxu1 %v8677_v7  ;;  %8556 = vmatpush1.bf16.msra.mxu0 %v8555_v10  ;;  %v4086_v7 = vld [vmem:[#allocation19 + $0x200] sm:$0xff]  ;;  %v8695_v10 = vpack.c.bf16 %v4076_v63, %v4072_v62  ;;  %v4127_v63 = vld [vmem:[#allocation19 + $0x348] sm:$0xff]  ;;  %v8713_v4 = vpack.c.bf16 %v4117_v58, %v4113_v54 }
 0x795   :  { %8558 = vmatprep.subr.bf16.mxu0 %v8557_v11  ;;  %v4080_v11 = vld [vmem:[#allocation19 + $0x1d0] sm:$0xff]  ;;  %v8575_v23 = vpack.c.bf16 %v4090_v8, %v4086_v7  ;;  %v4122_v62 = vld [vmem:[#allocation19 + $0x320] sm:$0xff]  ;;  %v4121_v8 = vld [vmem:[#allocation19 + $0x318] sm:$0xff] }
 0x796   :  { %v4116_v7 = vld [vmem:[#allocation19 + $0x2f0] sm:$0xff]  ;;  %v4155_v54 = vld [vmem:[#allocation19 + $0x428] sm:$0xff] }
 0x797   :  { %8680 = vmatpush1.bf16.msra.mxu1 %v8679_v50  ;;  %v8577_v50 = vpack.c.bf16 %v4099_v3, %v4095_v27  ;;  %v4125_v3 = vld [vmem:[#allocation19 + $0x338] sm:$0xff] }
 0x798   :  { %8682 = vmatprep.subr.bf16.mxu1 %v8681_v53  ;;  %8560 = vmatpush1.bf16.msra.mxu0 %v8559_v22  ;;  %v4094_v53 = vld [vmem:[#allocation19 + $0x240] sm:$0xff]  ;;  %v8699_v22 = vpack.c.bf16 %v4084_v0, %v4080_v11  ;;  %v4135_v0 = vld [vmem:[#allocation19 + $0x388] sm:$0xff]  ;;  %v8717_v24 = vpack.c.bf16 %v4125_v3, %v4121_v8  ;;  %v4165_v8 = vld [vmem:[#allocation19 + $0x478] sm:$0xff] }
 0x799   :  { %8562 = vmatprep.subr.bf16.mxu0 %v8561_v25  ;;  %v4088_v25 = vld [vmem:[#allocation19 + $0x210] sm:$0xff]  ;;  %v8579_v26 = vpack.c.bf16 %v4098_v15, %v4094_v53  ;;  %v4130_v11 = vld [vmem:[#allocation19 + $0x360] sm:$0xff]  ;;  %v4129_v15 = vld [vmem:[#allocation19 + $0x358] sm:$0xff] }
 0x79a   :  { %v4124_v53 = vld [vmem:[#allocation19 + $0x330] sm:$0xff] }
 0x79b   :  { %8684 = vmatpush1.bf16.msra.mxu1 %v8683_v13  ;;  %v8581_v13 = vpack.c.bf16 %v4107_v17, %v4103_v16  ;;  %v4133_v17 = vld [vmem:[#allocation19 + $0x378] sm:$0xff] }
 0x79c   :  { %8686 = vmatprep.subr.bf16.mxu1 %v8685_v29  ;;  %8564 = vmatpush1.bf16.msra.mxu0 %v8563_v32  ;;  %v4102_v29 = vld [vmem:[#allocation19 + $0x280] sm:$0xff]  ;;  %v8703_v32 = vpack.c.bf16 %v4092_v20, %v4088_v25  ;;  %v4143_v20 = vld [vmem:[#allocation19 + $0x3c8] sm:$0xff]  ;;  %v8721_v28 = vpack.c.bf16 %v4133_v17, %v4129_v15 }
 0x79d   :  { %8566 = vmatprep.subr.bf16.mxu0 %v8565_v34  ;;  %v4096_v34 = vld [vmem:[#allocation19 + $0x250] sm:$0xff]  ;;  %v8583_v36 = vpack.c.bf16 %v4106_v5, %v4102_v29  ;;  %v4138_v25 = vld [vmem:[#allocation19 + $0x3a0] sm:$0xff]  ;;  %v4137_v5 = vld [vmem:[#allocation19 + $0x398] sm:$0xff] }
 0x79e   :  { %v4132_v29 = vld [vmem:[#allocation19 + $0x370] sm:$0xff]  ;;  %v4167_v15 = vld [vmem:[#allocation19 + $0x488] sm:$0xff] }
 0x79f   :  { %8688 = vmatpush1.bf16.msra.mxu1 %v8687_v39  ;;  %v8585_v39 = vpack.c.bf16 %v4115_v37, %v4111_v30  ;;  %v4141_v37 = vld [vmem:[#allocation19 + $0x3b8] sm:$0xff]  ;;  %v4171_v17 = vld [vmem:[#allocation19 + $0x4a8] sm:$0xff] }
 0x7a0   :  { %8690 = vmatprep.subr.bf16.mxu1 %v8689_v40  ;;  %8568 = vmatpush1.bf16.msra.mxu0 %v8567_v60  ;;  %v4110_v40 = vld [vmem:[#allocation19 + $0x2c0] sm:$0xff]  ;;  %v8707_v60 = vpack.c.bf16 %v4100_v9, %v4096_v34  ;;  %v8725_v35 = vpack.c.bf16 %v4141_v37, %v4137_v5  ;;  %v4168_v5 = vld [vmem:[#allocation19 + $0x490] sm:$0xff]  ;;  %v4175_v37 = vld [vmem:[#allocation19 + $0x4c8] sm:$0xff] }
 0x7a1   :  { %8570 = vmatprep.subr.bf16.mxu0 %v8569_v31  ;;  %v4104_v31 = vld [vmem:[#allocation19 + $0x290] sm:$0xff]  ;;  %v8587_v55 = vpack.c.bf16 %v4114_v43, %v4110_v40  ;;  %v4146_v34 = vld [vmem:[#allocation19 + $0x3e0] sm:$0xff]  ;;  %v4145_v40 = vld [vmem:[#allocation19 + $0x3d8] sm:$0xff] }
 0x7a2   :  { %v4149_v43 = vld [vmem:[#allocation19 + $0x3f8] sm:$0xff] }
 0x7a3   :  { %8692 = vmatpush1.bf16.msra.mxu1 %v8691_v61  ;;  %v8589_v61 = vpack.c.bf16 %v4123_v12, %v4119_v41  ;;  %v8729_v12 = vpack.c.bf16 %v4149_v43, %v4145_v40 }
 0x7a4   :  { %8694 = vmatprep.subr.bf16.mxu1 %v8693_v56  ;;  %8572 = vmatpush1.bf16.msra.mxu0 %v8571_v2  ;;  %v4118_v56 = vld [vmem:[#allocation19 + $0x300] sm:$0xff]  ;;  %v8711_v2 = vpack.c.bf16 %v4108_v57, %v4104_v31  ;;  %v4151_v57 = vld [vmem:[#allocation19 + $0x408] sm:$0xff] }
 0x7a5   :  { %8574 = vmatprep.subr.bf16.mxu0 %v8573_v6  ;;  %v4112_v6 = vld [vmem:[#allocation19 + $0x2d0] sm:$0xff]  ;;  %v8591_v27 = vpack.c.bf16 %v4122_v62, %v4118_v56  ;;  %v8605_v58 = vpack.c.bf16 %v4155_v54, %v4151_v57  ;;  %v4150_v62 = vld [vmem:[#allocation19 + $0x400] sm:$0xff]  ;;  %v4187_v57 = vld [vmem:[#allocation19 + $0x528] sm:$0xff] }
 0x7a6   :  { %v4185_v54 = vld [vmem:[#allocation19 + $0x518] sm:$0xff] }
 0x7a7   :  { %8696 = vmatpush1.bf16.msra.mxu1 %v8695_v10  ;;  %v8593_v10 = vpack.c.bf16 %v4131_v1, %v4127_v63  ;;  %v4154_v63 = vld [vmem:[#allocation19 + $0x420] sm:$0xff]  ;;  %v4152_v1 = vld [vmem:[#allocation19 + $0x410] sm:$0xff] }
 0x7a8   :  { %8698 = vmatprep.subr.bf16.mxu1 %v8697_v45  ;;  %8576 = vmatpush1.bf16.msra.mxu0 %v8575_v23  ;;  %v4126_v45 = vld [vmem:[#allocation19 + $0x340] sm:$0xff]  ;;  %v8715_v23 = vpack.c.bf16 %v4116_v7, %v4112_v6  ;;  %v4163_v6 = vld [vmem:[#allocation19 + $0x468] sm:$0xff]  ;;  %v4161_v7 = vld [vmem:[#allocation19 + $0x458] sm:$0xff]  ;;  %v8607_v3 = vpack.c.bf16 %v4154_v63, %v4150_v62 }
 0x7a9   :  { %8578 = vmatprep.subr.bf16.mxu0 %v8577_v50  ;;  %v4120_v50 = vld [vmem:[#allocation19 + $0x310] sm:$0xff]  ;;  %v8595_v16 = vpack.c.bf16 %v4130_v11, %v4126_v45  ;;  %v4158_v45 = vld [vmem:[#allocation19 + $0x440] sm:$0xff] }
 0x7aa   :  { %v4162_v11 = vld [vmem:[#allocation19 + $0x460] sm:$0xff] }
 0x7ab   :  { %8700 = vmatpush1.bf16.msra.mxu1 %v8699_v22  ;;  %v8597_v22 = vpack.c.bf16 %v4139_v14, %v4135_v0  ;;  %v4186_v62 = vld [vmem:[#allocation19 + $0x520] sm:$0xff] }
 0x7ac   :  { %8702 = vmatprep.subr.bf16.mxu1 %v8701_v46  ;;  %8580 = vmatpush1.bf16.msra.mxu0 %v8579_v26  ;;  %v4134_v46 = vld [vmem:[#allocation19 + $0x380] sm:$0xff]  ;;  %v8719_v26 = vpack.c.bf16 %v4124_v53, %v4120_v50  ;;  %v4160_v50 = vld [vmem:[#allocation19 + $0x450] sm:$0xff] }
 0x7ad   :  { %8582 = vmatprep.subr.bf16.mxu0 %v8581_v13  ;;  %v4128_v13 = vld [vmem:[#allocation19 + $0x350] sm:$0xff]  ;;  %v8599_v30 = vpack.c.bf16 %v4138_v25, %v4134_v46  ;;  %v4173_v46 = vld [vmem:[#allocation19 + $0x4b8] sm:$0xff]  ;;  %v8611_v25 = vpack.c.bf16 %v4162_v11, %v4158_v45  ;;  %v4190_v45 = vld [vmem:[#allocation19 + $0x540] sm:$0xff] }
 0x7ae   :  { %v8723_v9 = vpack.c.bf16 %v4132_v29, %v4128_v13  ;;  %v4164_v53 = vld [vmem:[#allocation19 + $0x470] sm:$0xff]  ;;  %v8613_v13 = vpack.c.bf16 %v4171_v17, %v4167_v15  ;;  %v4194_v11 = vld [vmem:[#allocation19 + $0x560] sm:$0xff]  ;;  %v4203_v15 = vld [vmem:[#allocation19 + $0x5a8] sm:$0xff] }
 0x7af   :  { %8704 = vmatpush1.bf16.msra.mxu1 %v8703_v32  ;;  %v8601_v32 = vpack.c.bf16 %v4147_v47, %v4143_v20  ;;  %v8739_v20 = vpack.c.bf16 %v4164_v53, %v4160_v50  ;;  %v4166_v47 = vld [vmem:[#allocation19 + $0x480] sm:$0xff]  ;;  %v4196_v50 = vld [vmem:[#allocation19 + $0x570] sm:$0xff]  ;;  %v4199_v53 = vld [vmem:[#allocation19 + $0x588] sm:$0xff] }
 0x7b0   :  { %8706 = vmatprep.subr.bf16.mxu1 %v8705_v33  ;;  %8584 = vmatpush1.bf16.msra.mxu0 %v8583_v36  ;;  %v4142_v33 = vld [vmem:[#allocation19 + $0x3c0] sm:$0xff]  ;;  %v4136_v36 = vld [vmem:[#allocation19 + $0x390] sm:$0xff]  ;;  %v4201_v17 = vld [vmem:[#allocation19 + $0x598] sm:$0xff] }
 0x7b1   :  { %8586 = vmatprep.subr.bf16.mxu0 %v8585_v39  ;;  %v8603_v39 = vpack.c.bf16 %v4146_v34, %v4142_v33  ;;  %v8727_v41 = vpack.c.bf16 %v4140_v38, %v4136_v36  ;;  %v4179_v33 = vld [vmem:[#allocation19 + $0x4e8] sm:$0xff]  ;;  %v4177_v34 = vld [vmem:[#allocation19 + $0x4d8] sm:$0xff]  ;;  %v4174_v38 = vld [vmem:[#allocation19 + $0x4c0] sm:$0xff] }
 0x7b2   :  { %v8617_v43 = vpack.c.bf16 %v4179_v33, %v4175_v37  ;;  %v4211_v37 = vld [vmem:[#allocation19 + $0x5e8] sm:$0xff]  ;;  %v4209_v33 = vld [vmem:[#allocation19 + $0x5d8] sm:$0xff] }
 0x7b3   :  { %8708 = vmatpush1.bf16.msra.mxu1 %v8707_v60  ;;  %v4144_v60 = vld [vmem:[#allocation19 + $0x3d0] sm:$0xff] }
 0x7b4   :  { %8710 = vmatprep.subr.bf16.mxu1 %v8709_v42  ;;  %8588 = vmatpush1.bf16.msra.mxu0 %v8587_v55  ;;  %v4148_v42 = vld [vmem:[#allocation19 + $0x3f0] sm:$0xff]  ;;  %v4153_v55 = vld [vmem:[#allocation19 + $0x418] sm:$0xff] }
 0x7b5   :  { %8590 = vmatprep.subr.bf16.mxu0 %v8589_v61  ;;  %v8731_v31 = vpack.c.bf16 %v4148_v42, %v4144_v60  ;;  %v4157_v61 = vld [vmem:[#allocation19 + $0x438] sm:$0xff]  ;;  %v4180_v60 = vld [vmem:[#allocation19 + $0x4f0] sm:$0xff]  ;;  %v4183_v42 = vld [vmem:[#allocation19 + $0x508] sm:$0xff] }
 0x7b6   :  { %v8733_v56 = vpack.c.bf16 %v4157_v61, %v4153_v55  ;;  %v4189_v55 = vld [vmem:[#allocation19 + $0x538] sm:$0xff]  ;;  %v8621_v63 = vpack.c.bf16 %v4187_v57, %v4183_v42  ;;  %v4219_v42 = vld [vmem:[#allocation19 + $0x628] sm:$0xff] }
 0x7b7   :  { %8712 = vmatpush1.bf16.msra.mxu1 %v8711_v2  ;;  %v4156_v2 = vld [vmem:[#allocation19 + $0x430] sm:$0xff]  ;;  %v4221_v57 = vld [vmem:[#allocation19 + $0x638] sm:$0xff] }
 0x7b8   :  { %8714 = vmatprep.subr.bf16.mxu1 %v8713_v4  ;;  %8592 = vmatpush1.bf16.msra.mxu0 %v8591_v27  ;;  %v4159_v4 = vld [vmem:[#allocation19 + $0x448] sm:$0xff] }
 0x7b9   :  { %8594 = vmatprep.subr.bf16.mxu0 %v8593_v10  ;;  %v8735_v10 = vpack.c.bf16 %v4156_v2, %v4152_v1  ;;  %v8749_v1 = vpack.c.bf16 %v4189_v55, %v4185_v54  ;;  %v4184_v2 = vld [vmem:[#allocation19 + $0x510] sm:$0xff] }
 0x7bb   :  { %8716 = vmatpush1.bf16.msra.mxu1 %v8715_v23  ;;  %v8609_v23 = vpack.c.bf16 %v4163_v6, %v4159_v4  ;;  %v4188_v4 = vld [vmem:[#allocation19 + $0x530] sm:$0xff]  ;;  %v4191_v6 = vld [vmem:[#allocation19 + $0x548] sm:$0xff] }
 0x7bc   :  { %8718 = vmatprep.subr.bf16.mxu1 %v8717_v24  ;;  %8596 = vmatpush1.bf16.msra.mxu0 %v8595_v16  ;;  %v8737_v24 = vpack.c.bf16 %v4165_v8, %v4161_v7  ;;  %v4195_v7 = vld [vmem:[#allocation19 + $0x568] sm:$0xff]  ;;  %v4193_v8 = vld [vmem:[#allocation19 + $0x558] sm:$0xff] }
 0x7bd   :  { %8598 = vmatprep.subr.bf16.mxu0 %v8597_v22  ;;  %v4169_v22 = vld [vmem:[#allocation19 + $0x498] sm:$0xff] }
 0x7be   :  { %v8741_v29 = vpack.c.bf16 %v4173_v46, %v4169_v22  ;;  %v4205_v22 = vld [vmem:[#allocation19 + $0x5b8] sm:$0xff]  ;;  %v8627_v46 = vpack.c.bf16 %v4194_v11, %v4190_v45 }
 0x7bf   :  { %8720 = vmatpush1.bf16.msra.mxu1 %v8719_v26  ;;  %v4170_v26 = vld [vmem:[#allocation19 + $0x4a0] sm:$0xff] }
 0x7c0   :  { %8722 = vmatprep.subr.bf16.mxu1 %v8721_v28  ;;  %8600 = vmatpush1.bf16.msra.mxu0 %v8599_v30  ;;  %v4172_v30 = vld [vmem:[#allocation19 + $0x4b0] sm:$0xff] }
 0x7c1   :  { %8602 = vmatprep.subr.bf16.mxu0 %v8601_v32  ;;  %v8743_v36 = vpack.c.bf16 %v4172_v30, %v4168_v5  ;;  %v4204_v5 = vld [vmem:[#allocation19 + $0x5b0] sm:$0xff]  ;;  %v4207_v30 = vld [vmem:[#allocation19 + $0x5c8] sm:$0xff] }
 0x7c3   :  { %8724 = vmatpush1.bf16.msra.mxu1 %v8723_v9  ;;  %v4181_v9 = vld [vmem:[#allocation19 + $0x4f8] sm:$0xff] }
 0x7c4   :  { %8726 = vmatprep.subr.bf16.mxu1 %v8725_v35  ;;  %8604 = vmatpush1.bf16.msra.mxu0 %v8603_v39  ;;  %v8615_v35 = vpack.c.bf16 %v4170_v26, %v4166_v47  ;;  %v4178_v39 = vld [vmem:[#allocation19 + $0x4e0] sm:$0xff]  ;;  %v8629_v26 = vpack.c.bf16 %v4203_v15, %v4199_v53  ;;  %v4233_v53 = vld [vmem:[#allocation19 + $0x698] sm:$0xff] }
 0x7c5   :  { %8606 = vmatprep.subr.bf16.mxu0 %v8605_v58  ;;  %v8619_v58 = vpack.c.bf16 %v4178_v39, %v4174_v38  ;;  %v4202_v47 = vld [vmem:[#allocation19 + $0x5a0] sm:$0xff]  ;;  %v8633_v39 = vpack.c.bf16 %v4211_v37, %v4207_v30  ;;  %v4237_v15 = vld [vmem:[#allocation19 + $0x6b8] sm:$0xff] }
 0x7c6   :  { %v4210_v38 = vld [vmem:[#allocation19 + $0x5e0] sm:$0xff]  ;;  %v4241_v30 = vld [vmem:[#allocation19 + $0x6d8] sm:$0xff] }
 0x7c7   :  { %8728 = vmatpush1.bf16.msra.mxu1 %v8727_v41  ;;  %v8745_v41 = vpack.c.bf16 %v4181_v9, %v4177_v34  ;;  %v4213_v34 = vld [vmem:[#allocation19 + $0x5f8] sm:$0xff] }
 0x7c8   :  { %8730 = vmatprep.subr.bf16.mxu1 %v8729_v12  ;;  %v4176_v12 = vld [vmem:[#allocation19 + $0x4d0] sm:$0xff]  ;;  %v4245_v37 = vld [vmem:[#allocation19 + $0x6f8] sm:$0xff] }
 0x7c9   :  { %v8747_v61 = vpack.c.bf16 %v4180_v60, %v4176_v12  ;;  %v4212_v12 = vld [vmem:[#allocation19 + $0x5f0] sm:$0xff]  ;;  %v4215_v60 = vld [vmem:[#allocation19 + $0x608] sm:$0xff] }
 0x7cb   :  { %8732 = vmatpush1.bf16.msra.mxu1 %v8731_v31 }
 0x7cc   :  { %8734 = vmatprep.subr.bf16.mxu1 %v8733_v56  ;;  %v4182_v56 = vld [vmem:[#allocation19 + $0x500] sm:$0xff] }
 0x859   :  { %v3946_v27 = vpop.f32.mrb[28].mxu0  ;;  %v10682_v0 = vpop.f32.mrb[32].mxu1 }
 0x85a   :  { %v3948_v14 = vpop.f32.mrb[29].mxu0  ;;  %v10684_v16 = vpop.f32.mrb[33].mxu1 }
 0x85b   :  { %4342 = vmatprep.mubr.f32.mxu0 %v3948_v14  ;;  %4484 = vmatprep.mubr.f32.mxu1 %v3948_v14  ;;  %v8625_v14 = vpack.c.bf16 %v4195_v7, %v4191_v6  ;;  %v4225_v6 = vld [vmem:[#allocation19 + $0x658] sm:$0xff] }
 0x85c   :  { %4343 = vmatmul.mubr.f32.vlgmr.msra.gmra.mrb[30].mxu0 %v3946_v27  ;;  %4485 = vmatmul.mubr.f32.vlgmr.msra.gmra.mrb[38].mxu1 %v3946_v27  ;;  %v4197_v27 = vld [vmem:[#allocation19 + $0x578] sm:$0xff] }
 0x85d   :  { %8608 = vmatpush1.bf16.msra.mxu0 %v8607_v3  ;;  %8736 = vmatpush1.bf16.msra.mxu1 %v8735_v10  ;;  %v10686_v28 = vpop.f32.mrb[34].mxu1  ;;  %v8623_v3 = vpack.c.bf16 %v4186_v62, %v4182_v56  ;;  %v8751_v10 = vpack.c.bf16 %v4188_v4, %v4184_v2  ;;  %v8637_v56 = vpack.c.bf16 %v4219_v42, %v4215_v60  ;;  %v4223_v2 = vld [vmem:[#allocation19 + $0x648] sm:$0xff]  ;;  %v4229_v7 = vld [vmem:[#allocation19 + $0x678] sm:$0xff] }
 0x85e   :  { %8610 = vmatprep.subr.bf16.mxu0 %v8609_v23  ;;  %8738 = vmatprep.subr.bf16.mxu1 %v8737_v24  ;;  %v10688_v32 = vpop.f32.mrb[35].mxu1  ;;  %v8753_v23 = vpack.c.bf16 %v4197_v27, %v4193_v8  ;;  %v4192_v24 = vld [vmem:[#allocation19 + $0x550] sm:$0xff]  ;;  %v4227_v4 = vld [vmem:[#allocation19 + $0x668] sm:$0xff]  ;;  %v8769_v11 = vpack.c.bf16 %v4229_v7, %v4225_v6  ;;  %v4249_v60 = vld [vmem:[#allocation19 + $0x718] sm:$0xff] }
 0x85f   :  { %v8641_v45 = vpack.c.bf16 %v4227_v4, %v4223_v2  ;;  %v4253_v42 = vld [vmem:[#allocation19 + $0x738] sm:$0xff] }
 0x860   :  { %v4257_v2 = vld [vmem:[#allocation19 + $0x758] sm:$0xff] }
 0x861   :  { %8612 = vmatpush1.bf16.msra.mxu0 %v8611_v25  ;;  %8740 = vmatpush1.bf16.msra.mxu1 %v8739_v20  ;;  %v10690_v40 = vpop.f32.mrb[36].mxu1  ;;  %v8755_v25 = vpack.c.bf16 %v4196_v50, %v4192_v24  ;;  %v4198_v20 = vld [vmem:[#allocation19 + $0x580] sm:$0xff]  ;;  %v4231_v24 = vld [vmem:[#allocation19 + $0x688] sm:$0xff]  ;;  %v4261_v4 = vld [vmem:[#allocation19 + $0x778] sm:$0xff] }
 0x862   :  { %8614 = vmatprep.subr.bf16.mxu0 %v8613_v13  ;;  %8742 = vmatprep.subr.bf16.mxu1 %v8741_v29  ;;  %v4019_v31 = vpop.f32.mrb[37].mxu1  ;;  %v8757_v13 = vpack.c.bf16 %v4205_v22, %v4201_v17  ;;  %v4200_v29 = vld [vmem:[#allocation19 + $0x590] sm:$0xff]  ;;  %v8631_v9 = vpack.c.bf16 %v4202_v47, %v4198_v20  ;;  %v4235_v50 = vld [vmem:[#allocation19 + $0x6a8] sm:$0xff]  ;;  %v8773_v47 = vpack.c.bf16 %v4237_v15, %v4233_v53 }
 0x863   :  { %4413 = vmatprep.mubr.f32.mxu0 %v4019_v31  ;;  %4555 = vmatprep.mubr.f32.mxu1 %v4019_v31  ;;  %v4217_v31 = vld [vmem:[#allocation19 + $0x618] sm:$0xff]  ;;  %v8645_v20 = vpack.c.bf16 %v4235_v50, %v4231_v24 }
 0x864   :  { %v8765_v62 = vpack.c.bf16 %v4221_v57, %v4217_v31  ;;  %v4265_v24 = vld [vmem:[#allocation19 + $0x798] sm:$0xff] }
 0x865   :  { %8616 = vmatpush1.bf16.msra.mxu0 %v8615_v35  ;;  %8744 = vmatpush1.bf16.msra.mxu1 %v8743_v36  ;;  %v8759_v35 = vpack.c.bf16 %v4204_v5, %v4200_v29  ;;  %v4206_v36 = vld [vmem:[#allocation19 + $0x5c0] sm:$0xff]  ;;  %v4239_v29 = vld [vmem:[#allocation19 + $0x6c8] sm:$0xff]  ;;  %v4269_v50 = vld [vmem:[#allocation19 + $0x7b8] sm:$0xff] }
 0x866   :  { %8618 = vmatprep.subr.bf16.mxu0 %v8617_v43  ;;  %8746 = vmatprep.subr.bf16.mxu1 %v8745_v41  ;;  %v8761_v43 = vpack.c.bf16 %v4213_v34, %v4209_v33  ;;  %v4208_v41 = vld [vmem:[#allocation19 + $0x5d0] sm:$0xff]  ;;  %v8635_v54 = vpack.c.bf16 %v4210_v38, %v4206_v36  ;;  %v4243_v5 = vld [vmem:[#allocation19 + $0x6e8] sm:$0xff]  ;;  %v8777_v38 = vpack.c.bf16 %v4245_v37, %v4241_v30 }
 0x867   :  { %v8763_v55 = vpack.c.bf16 %v4212_v12, %v4208_v41  ;;  %v8649_v36 = vpack.c.bf16 %v4243_v5, %v4239_v29  ;;  %v4247_v41 = vld [vmem:[#allocation19 + $0x708] sm:$0xff]  ;;  %v4273_v29 = vld [vmem:[#allocation19 + $0x7d8] sm:$0xff] }
 0x868   :  { %v4251_v12 = vld [vmem:[#allocation19 + $0x728] sm:$0xff]  ;;  %v4277_v5 = vld [vmem:[#allocation19 + $0x7f8] sm:$0xff] }
 0x869   :  { %8620 = vmatpush1.bf16.msra.mxu0 %v8619_v58  ;;  %8748 = vmatpush1.bf16.msra.mxu1 %v8747_v61  ;;  %v4214_v58 = vld [vmem:[#allocation19 + $0x600] sm:$0xff] }
 0x86a   :  { %8622 = vmatprep.subr.bf16.mxu0 %v8621_v63  ;;  %8750 = vmatprep.subr.bf16.mxu1 %v8749_v1  ;;  %v4218_v61 = vld [vmem:[#allocation19 + $0x620] sm:$0xff]  ;;  %v4216_v63 = vld [vmem:[#allocation19 + $0x610] sm:$0xff] }
 0x86b   :  { %v4220_v1 = vld [vmem:[#allocation19 + $0x630] sm:$0xff]  ;;  %v8639_v8 = vpack.c.bf16 %v4218_v61, %v4214_v58  ;;  %v8653_v58 = vpack.c.bf16 %v4251_v12, %v4247_v41  ;;  %v8781_v61 = vpack.c.bf16 %v4253_v42, %v4249_v60  ;;  %v3622_v41 = vld [vmem:[#allocation17 + $0x18] sm:$0xff] }
 0x86c   :  { %v8767_v27 = vpack.c.bf16 %v4220_v1, %v4216_v63  ;;  %v4255_v63 = vld [vmem:[#allocation19 + $0x748] sm:$0xff]  ;;  %v3626_v12 = vld [vmem:[#allocation17 + $0x38] sm:$0xff] }
 0x86d   :  { %8624 = vmatpush1.bf16.msra.mxu0 %v8623_v3  ;;  %8752 = vmatpush1.bf16.msra.mxu1 %v8751_v10  ;;  %v4222_v3 = vld [vmem:[#allocation19 + $0x640] sm:$0xff]  ;;  %v4259_v1 = vld [vmem:[#allocation19 + $0x768] sm:$0xff] }
 0x86e   :  { %8626 = vmatprep.subr.bf16.mxu0 %v8625_v14  ;;  %8754 = vmatprep.subr.bf16.mxu1 %v8753_v23  ;;  %v4226_v10 = vld [vmem:[#allocation19 + $0x660] sm:$0xff]  ;;  %v4224_v14 = vld [vmem:[#allocation19 + $0x650] sm:$0xff] }
 0x86f   :  { %v4228_v23 = vld [vmem:[#allocation19 + $0x670] sm:$0xff]  ;;  %v8643_v17 = vpack.c.bf16 %v4226_v10, %v4222_v3  ;;  %v8657_v3 = vpack.c.bf16 %v4259_v1, %v4255_v63  ;;  %v8785_v10 = vpack.c.bf16 %v4261_v4, %v4257_v2  ;;  %v3630_v63 = vld [vmem:[#allocation17 + $0x58] sm:$0xff] }
 0x870   :  { %v8771_v22 = vpack.c.bf16 %v4228_v23, %v4224_v14  ;;  %v4263_v14 = vld [vmem:[#allocation19 + $0x788] sm:$0xff]  ;;  %v3634_v1 = vld [vmem:[#allocation17 + $0x78] sm:$0xff] }
 0x871   :  { %8628 = vmatpush1.bf16.msra.mxu0 %v8627_v46  ;;  %8756 = vmatpush1.bf16.msra.mxu1 %v8755_v25  ;;  %v4230_v46 = vld [vmem:[#allocation19 + $0x680] sm:$0xff]  ;;  %v4267_v23 = vld [vmem:[#allocation19 + $0x7a8] sm:$0xff] }
 0x872   :  { %8630 = vmatprep.subr.bf16.mxu0 %v8629_v26  ;;  %8758 = vmatprep.subr.bf16.mxu1 %v8757_v13  ;;  %v4234_v25 = vld [vmem:[#allocation19 + $0x6a0] sm:$0xff]  ;;  %v4232_v26 = vld [vmem:[#allocation19 + $0x690] sm:$0xff] }
 0x873   :  { %v4236_v13 = vld [vmem:[#allocation19 + $0x6b0] sm:$0xff]  ;;  %v8647_v33 = vpack.c.bf16 %v4234_v25, %v4230_v46  ;;  %v8661_v46 = vpack.c.bf16 %v4267_v23, %v4263_v14  ;;  %v8789_v25 = vpack.c.bf16 %v4269_v50, %v4265_v24  ;;  %v3638_v14 = vld [vmem:[#allocation17 + $0x98] sm:$0xff] }
 0x874   :  { %v8775_v34 = vpack.c.bf16 %v4236_v13, %v4232_v26  ;;  %v4271_v26 = vld [vmem:[#allocation19 + $0x7c8] sm:$0xff]  ;;  %v3642_v23 = vld [vmem:[#allocation17 + $0xb8] sm:$0xff] }
 0x875   :  { %8632 = vmatpush1.bf16.msra.mxu0 %v8631_v9  ;;  %8760 = vmatpush1.bf16.msra.mxu1 %v8759_v35  ;;  %v4238_v9 = vld [vmem:[#allocation19 + $0x6c0] sm:$0xff]  ;;  %v4275_v13 = vld [vmem:[#allocation19 + $0x7e8] sm:$0xff] }
 0x876   :  { %8634 = vmatprep.subr.bf16.mxu0 %v8633_v39  ;;  %8762 = vmatprep.subr.bf16.mxu1 %v8761_v43  ;;  %v4242_v35 = vld [vmem:[#allocation19 + $0x6e0] sm:$0xff]  ;;  %v4240_v39 = vld [vmem:[#allocation19 + $0x6d0] sm:$0xff] }
 0x877   :  { %v4244_v43 = vld [vmem:[#allocation19 + $0x6f0] sm:$0xff]  ;;  %v8651_v31 = vpack.c.bf16 %v4242_v35, %v4238_v9  ;;  %v8665_v9 = vpack.c.bf16 %v4275_v13, %v4271_v26  ;;  %v8793_v35 = vpack.c.bf16 %v4277_v5, %v4273_v29  ;;  %v3650_v26 = vld [vmem:[#allocation17 + $0xf8] sm:$0xff] }
 0x878   :  { %v8779_v57 = vpack.c.bf16 %v4244_v43, %v4240_v39  ;;  %v3620_v39 = vld [vmem:[#allocation17 + $0x8] sm:$0xff] }
 0x879   :  { %8636 = vmatpush1.bf16.msra.mxu0 %v8635_v54  ;;  %8764 = vmatpush1.bf16.msra.mxu1 %v8763_v55  ;;  %v4246_v54 = vld [vmem:[#allocation19 + $0x700] sm:$0xff]  ;;  %v3624_v43 = vld [vmem:[#allocation17 + $0x28] sm:$0xff] }
 0x87a   :  { %8638 = vmatprep.subr.bf16.mxu0 %v8637_v56  ;;  %8766 = vmatprep.subr.bf16.mxu1 %v8765_v62  ;;  %v4250_v55 = vld [vmem:[#allocation19 + $0x720] sm:$0xff]  ;;  %v4248_v56 = vld [vmem:[#allocation19 + $0x710] sm:$0xff] }
 0x87b   :  { %v4252_v62 = vld [vmem:[#allocation19 + $0x730] sm:$0xff]  ;;  %v8655_v6 = vpack.c.bf16 %v4250_v55, %v4246_v54  ;;  %v3619_v54 = vld [vmem:[#allocation17] sm:$0xff] }
 0x87c   :  { %v8783_v7 = vpack.c.bf16 %v4252_v62, %v4248_v56  ;;  %v3623_v55 = vld [vmem:[#allocation17 + $0x20] sm:$0xff]  ;;  %v3628_v56 = vld [vmem:[#allocation17 + $0x48] sm:$0xff] }
 0x87d   :  { %8640 = vmatpush1.bf16.msra.mxu0 %v8639_v8  ;;  %8768 = vmatpush1.bf16.msra.mxu1 %v8767_v27  ;;  %v4254_v8 = vld [vmem:[#allocation19 + $0x740] sm:$0xff]  ;;  %v3632_v62 = vld [vmem:[#allocation17 + $0x68] sm:$0xff]  ;;  %v8799_v2 = vpack.c.bf16 %v3623_v55, %v3619_v54 }
 0x87e   :  { %8642 = vmatprep.subr.bf16.mxu0 %v8641_v45  ;;  %8770 = vmatprep.subr.bf16.mxu1 %v8769_v11  ;;  %v4258_v27 = vld [vmem:[#allocation19 + $0x760] sm:$0xff]  ;;  %v4256_v45 = vld [vmem:[#allocation19 + $0x750] sm:$0xff]  ;;  %v3660_v54 = vld [vmem:[#allocation17 + $0x148] sm:$0xff] }
 0x87f   :  { %v4260_v11 = vld [vmem:[#allocation19 + $0x770] sm:$0xff]  ;;  %v8659_v53 = vpack.c.bf16 %v4258_v27, %v4254_v8  ;;  %v8801_v27 = vpack.c.bf16 %v3632_v62, %v3628_v56  ;;  %v3664_v55 = vld [vmem:[#allocation17 + $0x168] sm:$0xff] }
 0x880   :  { %v8787_v15 = vpack.c.bf16 %v4260_v11, %v4256_v45  ;;  %v3629_v8 = vld [vmem:[#allocation17 + $0x50] sm:$0xff]  ;;  %v3636_v45 = vld [vmem:[#allocation17 + $0x88] sm:$0xff] }
 0x881   :  { %8644 = vmatpush1.bf16.msra.mxu0 %v8643_v17  ;;  %8772 = vmatpush1.bf16.msra.mxu1 %v8771_v22  ;;  %v4262_v17 = vld [vmem:[#allocation19 + $0x780] sm:$0xff]  ;;  %v3640_v11 = vld [vmem:[#allocation17 + $0xa8] sm:$0xff] }
 0x882   :  { %8646 = vmatprep.subr.bf16.mxu0 %v8645_v20  ;;  %8774 = vmatprep.subr.bf16.mxu1 %v8773_v47  ;;  %v4266_v22 = vld [vmem:[#allocation19 + $0x7a0] sm:$0xff]  ;;  %v4264_v20 = vld [vmem:[#allocation19 + $0x790] sm:$0xff] }
 0x883   :  { %v4268_v47 = vld [vmem:[#allocation19 + $0x7b0] sm:$0xff]  ;;  %v8663_v30 = vpack.c.bf16 %v4266_v22, %v4262_v17  ;;  %v3639_v17 = vld [vmem:[#allocation17 + $0xa0] sm:$0xff] }
 0x884   :  { %v8791_v37 = vpack.c.bf16 %v4268_v47, %v4264_v20  ;;  %v3637_v22 = vld [vmem:[#allocation17 + $0x90] sm:$0xff]  ;;  %v3644_v20 = vld [vmem:[#allocation17 + $0xc8] sm:$0xff]  ;;  %v3646_v47 = vld [vmem:[#allocation17 + $0xd8] sm:$0xff] }
 0x885   :  { %8648 = vmatpush1.bf16.msra.mxu0 %v8647_v33  ;;  %8776 = vmatpush1.bf16.msra.mxu1 %v8775_v34  ;;  %v4270_v33 = vld [vmem:[#allocation19 + $0x7c0] sm:$0xff] }
 0x886   :  { %8650 = vmatprep.subr.bf16.mxu0 %v8649_v36  ;;  %8778 = vmatprep.subr.bf16.mxu1 %v8777_v38  ;;  %v4274_v34 = vld [vmem:[#allocation19 + $0x7e0] sm:$0xff]  ;;  %v4272_v36 = vld [vmem:[#allocation19 + $0x7d0] sm:$0xff] }
 0x887   :  { %v4276_v38 = vld [vmem:[#allocation19 + $0x7f0] sm:$0xff]  ;;  %v8667_v60 = vpack.c.bf16 %v4274_v34, %v4270_v33  ;;  %v8937_v33 = vpack.c.bf16 %v3650_v26, %v3646_v47  ;;  %v3675_v26 = vld [vmem:[#allocation17 + $0x1c0] sm:$0xff] }
 0x888   :  { %v8795_v42 = vpack.c.bf16 %v4276_v38, %v4272_v36  ;;  %v3649_v34 = vld [vmem:[#allocation17 + $0xf0] sm:$0xff]  ;;  %v3654_v36 = vld [vmem:[#allocation17 + $0x118] sm:$0xff] }
 0x889   :  { %8652 = vmatpush1.bf16.msra.mxu0 %v8651_v31  ;;  %8780 = vmatpush1.bf16.msra.mxu1 %v8779_v57  ;;  %v8797_v31 = vpack.c.bf16 %v3624_v43, %v3620_v39  ;;  %v8925_v57 = vpack.c.bf16 %v3626_v12, %v3622_v41  ;;  %v3658_v38 = vld [vmem:[#allocation17 + $0x138] sm:$0xff]  ;;  %v3651_v12 = vld [vmem:[#allocation17 + $0x100] sm:$0xff] }
 0x88a   :  { %8654 = vmatprep.subr.bf16.mxu0 %v8653_v58  ;;  %8782 = vmatprep.subr.bf16.mxu1 %v8781_v61  ;;  %v3621_v58 = vld [vmem:[#allocation17 + $0x10] sm:$0xff] }
 0x88b   :  { %v3625_v61 = vld [vmem:[#allocation17 + $0x30] sm:$0xff] }
 0x88c   :  { %v8927_v4 = vpack.c.bf16 %v3625_v61, %v3621_v58  ;;  %v3662_v58 = vld [vmem:[#allocation17 + $0x158] sm:$0xff] }
 0x88d   :  { %8656 = vmatpush1.bf16.msra.mxu0 %v8655_v6  ;;  %8784 = vmatpush1.bf16.msra.mxu1 %v8783_v7  ;;  %v3627_v6 = vld [vmem:[#allocation17 + $0x40] sm:$0xff]  ;;  %v3666_v61 = vld [vmem:[#allocation17 + $0x178] sm:$0xff] }
 0x88e   :  { %8658 = vmatprep.subr.bf16.mxu0 %v8657_v3  ;;  %8786 = vmatprep.subr.bf16.mxu1 %v8785_v10  ;;  %v3631_v7 = vld [vmem:[#allocation17 + $0x60] sm:$0xff]  ;;  %v8929_v3 = vpack.c.bf16 %v3634_v1, %v3630_v63  ;;  %v3633_v10 = vld [vmem:[#allocation17 + $0x70] sm:$0xff]  ;;  %v8817_v63 = vpack.c.bf16 %v3664_v55, %v3660_v54 }
 0x88f   :  { %v8803_v24 = vpack.c.bf16 %v3631_v7, %v3627_v6  ;;  %v8931_v50 = vpack.c.bf16 %v3633_v10, %v3629_v8  ;;  %v3659_v1 = vld [vmem:[#allocation17 + $0x140] sm:$0xff]  ;;  %v8945_v6 = vpack.c.bf16 %v3666_v61, %v3662_v58  ;;  %v3665_v7 = vld [vmem:[#allocation17 + $0x170] sm:$0xff]  ;;  %v3668_v8 = vld [vmem:[#allocation17 + $0x188] sm:$0xff] }
 0x890   :  { %v3674_v10 = vld [vmem:[#allocation17 + $0x1b8] sm:$0xff]  ;;  %v3691_v61 = vld [vmem:[#allocation17 + $0x240] sm:$0xff] }
 0x891   :  { %8660 = vmatpush1.bf16.msra.mxu0 %v8659_v53  ;;  %8788 = vmatpush1.bf16.msra.mxu1 %v8787_v15  ;;  %v8805_v53 = vpack.c.bf16 %v3640_v11, %v3636_v45  ;;  %v3635_v15 = vld [vmem:[#allocation17 + $0x80] sm:$0xff] }
 0x892   :  { %8662 = vmatprep.subr.bf16.mxu0 %v8661_v46  ;;  %8790 = vmatprep.subr.bf16.mxu1 %v8789_v25  ;;  %v8933_v46 = vpack.c.bf16 %v3642_v23, %v3638_v14  ;;  %v3641_v25 = vld [vmem:[#allocation17 + $0xb0] sm:$0xff]  ;;  %v8807_v13 = vpack.c.bf16 %v3639_v17, %v3635_v15  ;;  %v3667_v23 = vld [vmem:[#allocation17 + $0x180] sm:$0xff]  ;;  %v3676_v17 = vld [vmem:[#allocation17 + $0x1c8] sm:$0xff] }
 0x893   :  { %v8935_v29 = vpack.c.bf16 %v3641_v25, %v3637_v22  ;;  %v3673_v15 = vld [vmem:[#allocation17 + $0x1b0] sm:$0xff]  ;;  %v3680_v22 = vld [vmem:[#allocation17 + $0x1e8] sm:$0xff]  ;;  %v3682_v25 = vld [vmem:[#allocation17 + $0x1f8] sm:$0xff] }
 0x894   :  { %v8825_v47 = vpack.c.bf16 %v3680_v22, %v3676_v17 }
 0x895   :  { %8664 = vmatpush1.bf16.msra.mxu0 %v8663_v30  ;;  %8792 = vmatpush1.bf16.msra.mxu1 %v8791_v37  ;;  %v3647_v30 = vld [vmem:[#allocation17 + $0xe0] sm:$0xff]  ;;  %v3645_v37 = vld [vmem:[#allocation17 + $0xd0] sm:$0xff] }
 0x896   :  { %8666 = vmatprep.subr.bf16.mxu0 %v8665_v9  ;;  %8794 = vmatprep.subr.bf16.mxu1 %v8793_v35  ;;  %v3652_v9 = vld [vmem:[#allocation17 + $0x108] sm:$0xff]  ;;  %v8939_v43 = vpack.c.bf16 %v3649_v34, %v3645_v37  ;;  %v3690_v34 = vld [vmem:[#allocation17 + $0x238] sm:$0xff] }
 0x897   :  { %v3656_v35 = vld [vmem:[#allocation17 + $0x128] sm:$0xff] }
 0x898   :  { %v8813_v41 = vpack.c.bf16 %v3656_v35, %v3652_v9  ;;  %v3688_v37 = vld [vmem:[#allocation17 + $0x228] sm:$0xff] }
 0x899   :  { %8668 = vmatpush1.bf16.msra.mxu0 %v8667_v60  ;;  %8796 = vmatpush1.bf16.msra.mxu1 %v8795_v42  ;;  %v3655_v60 = vld [vmem:[#allocation17 + $0x120] sm:$0xff]  ;;  %v3653_v42 = vld [vmem:[#allocation17 + $0x110] sm:$0xff] }
 0x89a   :  { %8798 = vmatprep.subr.bf16.mxu0 %v8797_v31  ;;  %8926 = vmatprep.subr.bf16.mxu1 %v8925_v57  ;;  %v8941_v31 = vpack.c.bf16 %v3658_v38, %v3654_v36  ;;  %v3657_v57 = vld [vmem:[#allocation17 + $0x130] sm:$0xff]  ;;  %v8815_v56 = vpack.c.bf16 %v3655_v60, %v3651_v12  ;;  %v3683_v38 = vld [vmem:[#allocation17 + $0x200] sm:$0xff]  ;;  %v3692_v60 = vld [vmem:[#allocation17 + $0x248] sm:$0xff] }
 0x89b   :  { %v8943_v62 = vpack.c.bf16 %v3657_v57, %v3653_v42  ;;  %v3689_v12 = vld [vmem:[#allocation17 + $0x230] sm:$0xff]  ;;  %v3696_v42 = vld [vmem:[#allocation17 + $0x268] sm:$0xff]  ;;  %v3698_v57 = vld [vmem:[#allocation17 + $0x278] sm:$0xff] }
 0x89c   :  { %4414 = vmatmul.mubr.f32.vlgmr.msra.gmra.mrb[30].mxu0 %v10690_v40  ;;  %4556 = vmatmul.mubr.f32.vlgmr.msra.gmra.mrb[38].mxu1 %v10690_v40  ;;  %v3648_v40 = vld [vmem:[#allocation17 + $0xe8] sm:$0xff]  ;;  %v8833_v58 = vpack.c.bf16 %v3696_v42, %v3692_v60 }
 0x89d   :  { %8800 = vmatpush1.bf16.msra.mxu0 %v8799_v2  ;;  %4626 = vmatprep.mubr.f32.mxu0 %v10684_v16  ;;  %v8809_v5 = vpack.c.bf16 %v3648_v40, %v3644_v20  ;;  %v3663_v2 = vld [vmem:[#allocation17 + $0x160] sm:$0xff] }
 0x89e   :  { %8928 = vmatpush1.bf16.msra.mxu1 %v8927_v4  ;;  %4768 = vmatprep.mubr.f32.mxu1 %v10684_v16  ;;  %v3643_v16 = vld [vmem:[#allocation17 + $0xc0] sm:$0xff]  ;;  %v3661_v4 = vld [vmem:[#allocation17 + $0x150] sm:$0xff]  ;;  %v8819_v45 = vpack.c.bf16 %v3663_v2, %v3659_v1  ;;  %v3700_v2 = vld [vmem:[#allocation17 + $0x288] sm:$0xff] }
 0x89f   :  { %8802 = vmatprep.subr.bf16.mxu0 %v8801_v27  ;;  %8930 = vmatprep.subr.bf16.mxu1 %v8929_v3  ;;  %v8811_v39 = vpack.c.bf16 %v3647_v30, %v3643_v16  ;;  %v3672_v27 = vld [vmem:[#allocation17 + $0x1a8] sm:$0xff]  ;;  %v3670_v3 = vld [vmem:[#allocation17 + $0x198] sm:$0xff]  ;;  %v8947_v11 = vpack.c.bf16 %v3665_v7, %v3661_v4  ;;  %v3681_v16 = vld [vmem:[#allocation17 + $0x1f0] sm:$0xff] }
 0x8a0   :  { %v8821_v14 = vpack.c.bf16 %v3672_v27, %v3668_v8  ;;  %v3684_v30 = vld [vmem:[#allocation17 + $0x208] sm:$0xff]  ;;  %v3697_v1 = vld [vmem:[#allocation17 + $0x270] sm:$0xff]  ;;  %v3706_v7 = vld [vmem:[#allocation17 + $0x2b8] sm:$0xff] }
 0x8a1   :  { %8804 = vmatpush1.bf16.msra.mxu0 %v8803_v24  ;;  %v3671_v24 = vld [vmem:[#allocation17 + $0x1a0] sm:$0xff]  ;;  %v8829_v36 = vpack.c.bf16 %v3688_v37, %v3684_v30  ;;  %v3704_v4 = vld [vmem:[#allocation17 + $0x2a8] sm:$0xff] }
 0x8a2   :  { %8932 = vmatpush1.bf16.msra.mxu1 %v8931_v50  ;;  %8806 = vmatprep.subr.bf16.mxu0 %v8805_v53  ;;  %v3669_v50 = vld [vmem:[#allocation17 + $0x190] sm:$0xff]  ;;  %v8949_v53 = vpack.c.bf16 %v3674_v10, %v3670_v3  ;;  %v8823_v20 = vpack.c.bf16 %v3671_v24, %v3667_v23  ;;  %v8837_v3 = vpack.c.bf16 %v3704_v4, %v3700_v2  ;;  %v3699_v10 = vld [vmem:[#allocation17 + $0x280] sm:$0xff]  ;;  %v3708_v24 = vld [vmem:[#allocation17 + $0x2c8] sm:$0xff] }
 0x8a3   :  { %8934 = vmatprep.subr.bf16.mxu1 %v8933_v46  ;;  %v3678_v46 = vld [vmem:[#allocation17 + $0x1d8] sm:$0xff]  ;;  %v8951_v40 = vpack.c.bf16 %v3673_v15, %v3669_v50  ;;  %v3705_v23 = vld [vmem:[#allocation17 + $0x2b0] sm:$0xff]  ;;  %v3712_v50 = vld [vmem:[#allocation17 + $0x2e8] sm:$0xff] }
 0x8a4   :  { %v3714_v15 = vld [vmem:[#allocation17 + $0x2f8] sm:$0xff] }
 0x8a5   :  { %8808 = vmatpush1.bf16.msra.mxu0 %v8807_v13  ;;  %v3679_v13 = vld [vmem:[#allocation17 + $0x1e0] sm:$0xff] }
 0x8a6   :  { %8936 = vmatpush1.bf16.msra.mxu1 %v8935_v29  ;;  %8810 = vmatprep.subr.bf16.mxu0 %v8809_v5  ;;  %v3677_v29 = vld [vmem:[#allocation17 + $0x1d0] sm:$0xff]  ;;  %v8953_v5 = vpack.c.bf16 %v3682_v25, %v3678_v46  ;;  %v8827_v9 = vpack.c.bf16 %v3679_v13, %v3675_v26  ;;  %v8841_v46 = vpack.c.bf16 %v3712_v50, %v3708_v24  ;;  %v3707_v25 = vld [vmem:[#allocation17 + $0x2c0] sm:$0xff]  ;;  %v3716_v13 = vld [vmem:[#allocation17 + $0x308] sm:$0xff] }
 0x8a7   :  { %8938 = vmatprep.subr.bf16.mxu1 %v8937_v33  ;;  %v3686_v33 = vld [vmem:[#allocation17 + $0x218] sm:$0xff]  ;;  %v8955_v35 = vpack.c.bf16 %v3681_v16, %v3677_v29  ;;  %v3713_v26 = vld [vmem:[#allocation17 + $0x2f0] sm:$0xff]  ;;  %v3720_v29 = vld [vmem:[#allocation17 + $0x328] sm:$0xff] }
 0x8a8   :  { %v3722_v16 = vld [vmem:[#allocation17 + $0x338] sm:$0xff] }
 0x8a9   :  { %8812 = vmatpush1.bf16.msra.mxu0 %v8811_v39  ;;  %v3687_v39 = vld [vmem:[#allocation17 + $0x220] sm:$0xff] }
 0x8aa   :  { %8940 = vmatpush1.bf16.msra.mxu1 %v8939_v43  ;;  %8814 = vmatprep.subr.bf16.mxu0 %v8813_v41  ;;  %v3685_v43 = vld [vmem:[#allocation17 + $0x210] sm:$0xff]  ;;  %v8957_v41 = vpack.c.bf16 %v3690_v34, %v3686_v33  ;;  %v8831_v54 = vpack.c.bf16 %v3687_v39, %v3683_v38  ;;  %v8845_v33 = vpack.c.bf16 %v3720_v29, %v3716_v13  ;;  %v3715_v34 = vld [vmem:[#allocation17 + $0x300] sm:$0xff]  ;;  %v3724_v39 = vld [vmem:[#allocation17 + $0x348] sm:$0xff] }
 0x8ab   :  { %8942 = vmatprep.subr.bf16.mxu1 %v8941_v31  ;;  %v3694_v31 = vld [vmem:[#allocation17 + $0x258] sm:$0xff]  ;;  %v8959_v55 = vpack.c.bf16 %v3689_v12, %v3685_v43  ;;  %v3721_v38 = vld [vmem:[#allocation17 + $0x330] sm:$0xff]  ;;  %v3728_v43 = vld [vmem:[#allocation17 + $0x368] sm:$0xff] }
 0x8ac   :  { %v3730_v12 = vld [vmem:[#allocation17 + $0x378] sm:$0xff] }
 0x8ad   :  { %8816 = vmatpush1.bf16.msra.mxu0 %v8815_v56  ;;  %v3695_v56 = vld [vmem:[#allocation17 + $0x260] sm:$0xff] }
 0x8ae   :  { %8944 = vmatpush1.bf16.msra.mxu1 %v8943_v62  ;;  %8818 = vmatprep.subr.bf16.mxu0 %v8817_v63  ;;  %v3693_v62 = vld [vmem:[#allocation17 + $0x250] sm:$0xff]  ;;  %v8961_v63 = vpack.c.bf16 %v3698_v57, %v3694_v31  ;;  %v8835_v8 = vpack.c.bf16 %v3695_v56, %v3691_v61  ;;  %v8849_v31 = vpack.c.bf16 %v3728_v43, %v3724_v39  ;;  %v3723_v57 = vld [vmem:[#allocation17 + $0x340] sm:$0xff]  ;;  %v3732_v56 = vld [vmem:[#allocation17 + $0x388] sm:$0xff] }
 0x8af   :  { %8946 = vmatprep.subr.bf16.mxu1 %v8945_v6  ;;  %v3702_v6 = vld [vmem:[#allocation17 + $0x298] sm:$0xff]  ;;  %v8963_v27 = vpack.c.bf16 %v3697_v1, %v3693_v62  ;;  %v3729_v61 = vld [vmem:[#allocation17 + $0x370] sm:$0xff]  ;;  %v3736_v62 = vld [vmem:[#allocation17 + $0x3a8] sm:$0xff] }
 0x8b0   :  { %v3738_v1 = vld [vmem:[#allocation17 + $0x3b8] sm:$0xff] }
 0x8b1   :  { %8820 = vmatpush1.bf16.msra.mxu0 %v8819_v45  ;;  %v3703_v45 = vld [vmem:[#allocation17 + $0x2a0] sm:$0xff]  ;;  %v3762_v39 = vld [vmem:[#allocation17 + $0x478] sm:$0xff] }
 0x8b2   :  { %8948 = vmatpush1.bf16.msra.mxu1 %v8947_v11  ;;  %8822 = vmatprep.subr.bf16.mxu0 %v8821_v14  ;;  %v3701_v11 = vld [vmem:[#allocation17 + $0x290] sm:$0xff]  ;;  %v8965_v14 = vpack.c.bf16 %v3706_v7, %v3702_v6  ;;  %v8839_v17 = vpack.c.bf16 %v3703_v45, %v3699_v10  ;;  %v8853_v6 = vpack.c.bf16 %v3736_v62, %v3732_v56  ;;  %v3731_v7 = vld [vmem:[#allocation17 + $0x380] sm:$0xff]  ;;  %v3740_v45 = vld [vmem:[#allocation17 + $0x3c8] sm:$0xff] }
 0x8b3   :  { %8950 = vmatprep.subr.bf16.mxu1 %v8949_v53  ;;  %v3710_v53 = vld [vmem:[#allocation17 + $0x2d8] sm:$0xff]  ;;  %v8967_v22 = vpack.c.bf16 %v3705_v23, %v3701_v11  ;;  %v3737_v10 = vld [vmem:[#allocation17 + $0x3b0] sm:$0xff]  ;;  %v3744_v11 = vld [vmem:[#allocation17 + $0x3e8] sm:$0xff] }
 0x8b4   :  { %v3746_v23 = vld [vmem:[#allocation17 + $0x3f8] sm:$0xff] }
 0x8b5   :  { %8824 = vmatpush1.bf16.msra.mxu0 %v8823_v20  ;;  %v3711_v20 = vld [vmem:[#allocation17 + $0x2e0] sm:$0xff] }
 0x8b6   :  { %8952 = vmatpush1.bf16.msra.mxu1 %v8951_v40  ;;  %8826 = vmatprep.subr.bf16.mxu0 %v8825_v47  ;;  %v3709_v40 = vld [vmem:[#allocation17 + $0x2d0] sm:$0xff]  ;;  %v8969_v47 = vpack.c.bf16 %v3714_v15, %v3710_v53  ;;  %v8843_v30 = vpack.c.bf16 %v3711_v20, %v3707_v25  ;;  %v8857_v53 = vpack.c.bf16 %v3744_v11, %v3740_v45  ;;  %v3739_v15 = vld [vmem:[#allocation17 + $0x3c0] sm:$0xff]  ;;  %v3748_v20 = vld [vmem:[#allocation17 + $0x408] sm:$0xff] }
 0x8b7   :  { %8954 = vmatprep.subr.bf16.mxu1 %v8953_v5  ;;  %v3718_v5 = vld [vmem:[#allocation17 + $0x318] sm:$0xff]  ;;  %v8971_v37 = vpack.c.bf16 %v3713_v26, %v3709_v40  ;;  %v3745_v25 = vld [vmem:[#allocation17 + $0x3f0] sm:$0xff]  ;;  %v3752_v40 = vld [vmem:[#allocation17 + $0x428] sm:$0xff] }
 0x8b8   :  { %v3754_v26 = vld [vmem:[#allocation17 + $0x438] sm:$0xff] }
 0x8b9   :  { %8828 = vmatpush1.bf16.msra.mxu0 %v8827_v9  ;;  %v3719_v9 = vld [vmem:[#allocation17 + $0x320] sm:$0xff] }
 0x8ba   :  { %8956 = vmatpush1.bf16.msra.mxu1 %v8955_v35  ;;  %8830 = vmatprep.subr.bf16.mxu0 %v8829_v36  ;;  %v3717_v35 = vld [vmem:[#allocation17 + $0x310] sm:$0xff]  ;;  %v8973_v36 = vpack.c.bf16 %v3722_v16, %v3718_v5  ;;  %v8847_v60 = vpack.c.bf16 %v3719_v9, %v3715_v34  ;;  %v8861_v5 = vpack.c.bf16 %v3752_v40, %v3748_v20  ;;  %v3747_v16 = vld [vmem:[#allocation17 + $0x400] sm:$0xff]  ;;  %v3756_v9 = vld [vmem:[#allocation17 + $0x448] sm:$0xff] }
 0x8bb   :  { %8958 = vmatprep.subr.bf16.mxu1 %v8957_v41  ;;  %v3726_v41 = vld [vmem:[#allocation17 + $0x358] sm:$0xff]  ;;  %v8975_v42 = vpack.c.bf16 %v3721_v38, %v3717_v35  ;;  %v3753_v34 = vld [vmem:[#allocation17 + $0x430] sm:$0xff]  ;;  %v3760_v35 = vld [vmem:[#allocation17 + $0x468] sm:$0xff] }
 0x8bc   :  { %v3758_v38 = vld [vmem:[#allocation17 + $0x458] sm:$0xff]  ;;  %v3779_v40 = vld [vmem:[#allocation17 + $0x500] sm:$0xff] }
 0x8bd   :  { %8832 = vmatpush1.bf16.msra.mxu0 %v8831_v54  ;;  %v3727_v54 = vld [vmem:[#allocation17 + $0x360] sm:$0xff] }
 0x8be   :  { %8960 = vmatpush1.bf16.msra.mxu1 %v8959_v55  ;;  %8834 = vmatprep.subr.bf16.mxu0 %v8833_v58  ;;  %v3725_v55 = vld [vmem:[#allocation17 + $0x350] sm:$0xff]  ;;  %v8977_v58 = vpack.c.bf16 %v3730_v12, %v3726_v41  ;;  %v8851_v2 = vpack.c.bf16 %v3727_v54, %v3723_v57  ;;  %v3755_v41 = vld [vmem:[#allocation17 + $0x440] sm:$0xff]  ;;  %v3764_v57 = vld [vmem:[#allocation17 + $0x488] sm:$0xff] }
 0x8bf   :  { %8962 = vmatprep.subr.bf16.mxu1 %v8961_v63  ;;  %v3734_v63 = vld [vmem:[#allocation17 + $0x398] sm:$0xff]  ;;  %v8979_v4 = vpack.c.bf16 %v3729_v61, %v3725_v55  ;;  %v3759_v12 = vld [vmem:[#allocation17 + $0x460] sm:$0xff]  ;;  %v3768_v54 = vld [vmem:[#allocation17 + $0x4a8] sm:$0xff]  ;;  %v8993_v55 = vpack.c.bf16 %v3762_v39, %v3758_v38 }
 0x8c0   :  { %v3770_v61 = vld [vmem:[#allocation17 + $0x4b8] sm:$0xff]  ;;  %v8867_v56 = vpack.c.bf16 %v3759_v12, %v3755_v41  ;;  %v3789_v38 = vld [vmem:[#allocation17 + $0x550] sm:$0xff]  ;;  %v3796_v41 = vld [vmem:[#allocation17 + $0x588] sm:$0xff] }
 0x8c1   :  { %8836 = vmatpush1.bf16.msra.mxu0 %v8835_v8  ;;  %v3735_v8 = vld [vmem:[#allocation17 + $0x3a0] sm:$0xff]  ;;  %v3800_v12 = vld [vmem:[#allocation17 + $0x5a8] sm:$0xff] }
 0x8c2   :  { %8964 = vmatpush1.bf16.msra.mxu1 %v8963_v27  ;;  %8838 = vmatprep.subr.bf16.mxu0 %v8837_v3  ;;  %v3733_v27 = vld [vmem:[#allocation17 + $0x390] sm:$0xff]  ;;  %v8981_v3 = vpack.c.bf16 %v3738_v1, %v3734_v63  ;;  %v8855_v24 = vpack.c.bf16 %v3735_v8, %v3731_v7  ;;  %v8869_v63 = vpack.c.bf16 %v3768_v54, %v3764_v57  ;;  %v3763_v1 = vld [vmem:[#allocation17 + $0x480] sm:$0xff]  ;;  %v3772_v8 = vld [vmem:[#allocation17 + $0x4c8] sm:$0xff] }
 0x8c3   :  { %8966 = vmatprep.subr.bf16.mxu1 %v8965_v14  ;;  %v3742_v14 = vld [vmem:[#allocation17 + $0x3d8] sm:$0xff]  ;;  %v8983_v50 = vpack.c.bf16 %v3737_v10, %v3733_v27  ;;  %v3769_v7 = vld [vmem:[#allocation17 + $0x4b0] sm:$0xff]  ;;  %v3776_v27 = vld [vmem:[#allocation17 + $0x4e8] sm:$0xff]  ;;  %v8885_v54 = vpack.c.bf16 %v3800_v12, %v3796_v41 }
 0x8c4   :  { %v8873_v11 = vpack.c.bf16 %v3776_v27, %v3772_v8  ;;  %v3803_v27 = vld [vmem:[#allocation17 + $0x5c0] sm:$0xff] }
 0x8c5   :  { %8840 = vmatpush1.bf16.msra.mxu0 %v8839_v17  ;;  %v3743_v17 = vld [vmem:[#allocation17 + $0x3e0] sm:$0xff] }
 0x8c6   :  { %8968 = vmatpush1.bf16.msra.mxu1 %v8967_v22  ;;  %8842 = vmatprep.subr.bf16.mxu0 %v8841_v46  ;;  %v3741_v22 = vld [vmem:[#allocation17 + $0x3d0] sm:$0xff]  ;;  %v8985_v46 = vpack.c.bf16 %v3746_v23, %v3742_v14  ;;  %v8859_v13 = vpack.c.bf16 %v3743_v17, %v3739_v15  ;;  %v3771_v14 = vld [vmem:[#allocation17 + $0x4c0] sm:$0xff]  ;;  %v3784_v15 = vld [vmem:[#allocation17 + $0x528] sm:$0xff] }
 0x8c7   :  { %8970 = vmatprep.subr.bf16.mxu1 %v8969_v47  ;;  %v3750_v47 = vld [vmem:[#allocation17 + $0x418] sm:$0xff]  ;;  %v8987_v29 = vpack.c.bf16 %v3745_v25, %v3741_v22  ;;  %v3775_v23 = vld [vmem:[#allocation17 + $0x4e0] sm:$0xff] }
 0x8c8   :  { %v3782_v17 = vld [vmem:[#allocation17 + $0x518] sm:$0xff]  ;;  %v3827_v12 = vld [vmem:[#allocation17 + $0x680] sm:$0xff] }
 0x8c9   :  { %8844 = vmatpush1.bf16.msra.mxu0 %v8843_v30  ;;  %v3751_v30 = vld [vmem:[#allocation17 + $0x420] sm:$0xff]  ;;  %v3786_v22 = vld [vmem:[#allocation17 + $0x538] sm:$0xff] }
 0x8ca   :  { %8972 = vmatpush1.bf16.msra.mxu1 %v8971_v37  ;;  %8846 = vmatprep.subr.bf16.mxu0 %v8845_v33  ;;  %v8989_v37 = vpack.c.bf16 %v3754_v26, %v3750_v47  ;;  %v3749_v33 = vld [vmem:[#allocation17 + $0x410] sm:$0xff]  ;;  %v3783_v47 = vld [vmem:[#allocation17 + $0x520] sm:$0xff] }
 0x8cb   :  { %8974 = vmatprep.subr.bf16.mxu1 %v8973_v36  ;;  %v8863_v36 = vpack.c.bf16 %v3751_v30, %v3747_v16  ;;  %v8991_v43 = vpack.c.bf16 %v3753_v34, %v3749_v33  ;;  %v3781_v26 = vld [vmem:[#allocation17 + $0x510] sm:$0xff]  ;;  %v3792_v16 = vld [vmem:[#allocation17 + $0x568] sm:$0xff]  ;;  %v3790_v30 = vld [vmem:[#allocation17 + $0x558] sm:$0xff]  ;;  %v8879_v33 = vpack.c.bf16 %v3783_v47, %v3779_v40 }
 0x8cc   :  { %v3824_v40 = vld [vmem:[#allocation17 + $0x668] sm:$0xff]  ;;  %v3822_v47 = vld [vmem:[#allocation17 + $0x658] sm:$0xff] }
 0x8cd   :  { %8848 = vmatpush1.bf16.msra.mxu0 %v8847_v60  ;;  %v3757_v60 = vld [vmem:[#allocation17 + $0x450] sm:$0xff] }
 0x8ce   :  { %8976 = vmatpush1.bf16.msra.mxu1 %v8975_v42  ;;  %8850 = vmatprep.subr.bf16.mxu0 %v8849_v31  ;;  %v8865_v42 = vpack.c.bf16 %v3760_v35, %v3756_v9  ;;  %v3761_v31 = vld [vmem:[#allocation17 + $0x470] sm:$0xff]  ;;  %v3787_v35 = vld [vmem:[#allocation17 + $0x540] sm:$0xff] }
 0x8cf   :  { %8978 = vmatprep.subr.bf16.mxu1 %v8977_v58  ;;  %v3766_v58 = vld [vmem:[#allocation17 + $0x498] sm:$0xff]  ;;  %v8995_v62 = vpack.c.bf16 %v3761_v31, %v3757_v60 }
 0x8d0   :  { %v3798_v60 = vld [vmem:[#allocation17 + $0x598] sm:$0xff] }
 0x8d1   :  { %8852 = vmatpush1.bf16.msra.mxu0 %v8851_v2  ;;  %v3767_v2 = vld [vmem:[#allocation17 + $0x4a0] sm:$0xff] }
 0x8d2   :  { %8980 = vmatpush1.bf16.msra.mxu1 %v8979_v4  ;;  %8854 = vmatprep.subr.bf16.mxu0 %v8853_v6  ;;  %v3765_v4 = vld [vmem:[#allocation17 + $0x490] sm:$0xff]  ;;  %v8997_v6 = vpack.c.bf16 %v3770_v61, %v3766_v58  ;;  %v8871_v10 = vpack.c.bf16 %v3767_v2, %v3763_v1  ;;  %v3799_v58 = vld [vmem:[#allocation17 + $0x5a0] sm:$0xff]  ;;  %v3808_v1 = vld [vmem:[#allocation17 + $0x5e8] sm:$0xff] }
 0x8d3   :  { %8982 = vmatprep.subr.bf16.mxu1 %v8981_v3  ;;  %v3774_v3 = vld [vmem:[#allocation17 + $0x4d8] sm:$0xff]  ;;  %v8999_v45 = vpack.c.bf16 %v3769_v7, %v3765_v4  ;;  %v3797_v61 = vld [vmem:[#allocation17 + $0x590] sm:$0xff] }
 0x8d4   :  { %v3806_v2 = vld [vmem:[#allocation17 + $0x5d8] sm:$0xff] }
 0x8d5   :  { %8856 = vmatpush1.bf16.msra.mxu0 %v8855_v24  ;;  %v3773_v24 = vld [vmem:[#allocation17 + $0x4d0] sm:$0xff]  ;;  %v3810_v4 = vld [vmem:[#allocation17 + $0x5f8] sm:$0xff] }
 0x8d6   :  { %8984 = vmatpush1.bf16.msra.mxu1 %v8983_v50  ;;  %8858 = vmatprep.subr.bf16.mxu0 %v8857_v53  ;;  %v3780_v53 = vld [vmem:[#allocation17 + $0x508] sm:$0xff] }
 0x8d7   :  { %8986 = vmatprep.subr.bf16.mxu1 %v8985_v46  ;;  %v8875_v46 = vpack.c.bf16 %v3775_v23, %v3771_v14  ;;  %v8877_v20 = vpack.c.bf16 %v3784_v15, %v3780_v53  ;;  %v3816_v14 = vld [vmem:[#allocation17 + $0x628] sm:$0xff]  ;;  %v3814_v23 = vld [vmem:[#allocation17 + $0x618] sm:$0xff]  ;;  %v3811_v15 = vld [vmem:[#allocation17 + $0x600] sm:$0xff] }
 0x8d9   :  { %8860 = vmatpush1.bf16.msra.mxu0 %v8859_v13  ;;  %v9005_v13 = vpack.c.bf16 %v3786_v22, %v3782_v17  ;;  %v3815_v17 = vld [vmem:[#allocation17 + $0x620] sm:$0xff]  ;;  %v3813_v22 = vld [vmem:[#allocation17 + $0x610] sm:$0xff] }
 0x8da   :  { %8988 = vmatpush1.bf16.msra.mxu1 %v8987_v29  ;;  %8862 = vmatprep.subr.bf16.mxu0 %v8861_v5  ;;  %v3785_v29 = vld [vmem:[#allocation17 + $0x530] sm:$0xff]  ;;  %v3788_v5 = vld [vmem:[#allocation17 + $0x548] sm:$0xff] }
 0x8db   :  { %8990 = vmatprep.subr.bf16.mxu1 %v8989_v37  ;;  %v3794_v37 = vld [vmem:[#allocation17 + $0x578] sm:$0xff]  ;;  %v9007_v34 = vpack.c.bf16 %v3785_v29, %v3781_v26  ;;  %v8881_v9 = vpack.c.bf16 %v3792_v16, %v3788_v5  ;;  %v3819_v16 = vld [vmem:[#allocation17 + $0x640] sm:$0xff] }
 0x8dc   :  { %4627 = vmatmul.mubr.f32.vlgmr.msra.gmra.mrb[30].mxu0 %v10682_v0  ;;  %v9009_v39 = vpack.c.bf16 %v3794_v37, %v3790_v30  ;;  %v3826_v26 = vld [vmem:[#allocation17 + $0x678] sm:$0xff]  ;;  %v3823_v30 = vld [vmem:[#allocation17 + $0x660] sm:$0xff]  ;;  %v3821_v37 = vld [vmem:[#allocation17 + $0x650] sm:$0xff] }
 0x8dd   :  { %4769 = vmatmul.mubr.f32.vlgmr.msra.gmra.mrb[38].mxu1 %v10682_v0  ;;  %8864 = vmatpush1.bf16.msra.mxu0 %v8863_v36  ;;  %v3778_v0 = vld [vmem:[#allocation17 + $0x4f8] sm:$0xff]  ;;  %v3791_v36 = vld [vmem:[#allocation17 + $0x560] sm:$0xff] }
 0x8de   :  { %4697 = vmatprep.mubr.f32.mxu0 %v10688_v32  ;;  %8992 = vmatpush1.bf16.msra.mxu1 %v8991_v43  ;;  %v9001_v50 = vpack.c.bf16 %v3778_v0, %v3774_v3  ;;  %v3793_v43 = vld [vmem:[#allocation17 + $0x570] sm:$0xff]  ;;  %v8883_v31 = vpack.c.bf16 %v3791_v36, %v3787_v35  ;;  %v3807_v3 = vld [vmem:[#allocation17 + $0x5e0] sm:$0xff]  ;;  %v3832_v35 = vld [vmem:[#allocation17 + $0x6a8] sm:$0xff] }
 0x8df   :  { %4839 = vmatprep.mubr.f32.mxu1 %v10688_v32  ;;  %8866 = vmatprep.subr.bf16.mxu0 %v8865_v42  ;;  %v3777_v32 = vld [vmem:[#allocation17 + $0x4f0] sm:$0xff]  ;;  %v3802_v42 = vld [vmem:[#allocation17 + $0x5b8] sm:$0xff]  ;;  %v9011_v57 = vpack.c.bf16 %v3793_v43, %v3789_v38 }
 0x8e0   :  { %8994 = vmatprep.subr.bf16.mxu1 %v8993_v55  ;;  %v9003_v25 = vpack.c.bf16 %v3777_v32, %v3773_v24  ;;  %v3795_v55 = vld [vmem:[#allocation17 + $0x580] sm:$0xff]  ;;  %v3805_v0 = vld [vmem:[#allocation17 + $0x5d0] sm:$0xff]  ;;  %v3818_v24 = vld [vmem:[#allocation17 + $0x638] sm:$0xff] }
 0x8e1   :  { %8868 = vmatpush1.bf16.msra.mxu0 %v8867_v56  ;;  %v9013_v56 = vpack.c.bf16 %v3802_v42, %v3798_v60  ;;  %v3830_v36 = vld [vmem:[#allocation17 + $0x698] sm:$0xff]  ;;  %v3831_v60 = vld [vmem:[#allocation17 + $0x6a0] sm:$0xff]  ;;  %v3829_v42 = vld [vmem:[#allocation17 + $0x690] sm:$0xff] }
 0x8e2   :  { %8996 = vmatpush1.bf16.msra.mxu1 %v8995_v62  ;;  %8870 = vmatprep.subr.bf16.mxu0 %v8869_v63  ;;  %v3801_v62 = vld [vmem:[#allocation17 + $0x5b0] sm:$0xff]  ;;  %v3804_v63 = vld [vmem:[#allocation17 + $0x5c8] sm:$0xff]  ;;  %v3834_v38 = vld [vmem:[#allocation17 + $0x6b8] sm:$0xff] }
 0x8e3   :  { %8998 = vmatprep.subr.bf16.mxu1 %v8997_v6  ;;  %v8887_v6 = vpack.c.bf16 %v3799_v58, %v3795_v55  ;;  %v9015_v7 = vpack.c.bf16 %v3801_v62, %v3797_v61  ;;  %v8889_v8 = vpack.c.bf16 %v3808_v1, %v3804_v63  ;;  %v3840_v55 = vld [vmem:[#allocation17 + $0x6e8] sm:$0xff]  ;;  %v3838_v58 = vld [vmem:[#allocation17 + $0x6d8] sm:$0xff]  ;;  %v3835_v1 = vld [vmem:[#allocation17 + $0x6c0] sm:$0xff] }
 0x8e4   :  { %v3842_v61 = vld [vmem:[#allocation17 + $0x6f8] sm:$0xff] }
 0x8e5   :  { %8872 = vmatpush1.bf16.msra.mxu0 %v8871_v10  ;;  %v9017_v10 = vpack.c.bf16 %v3810_v4, %v3806_v2  ;;  %v3839_v2 = vld [vmem:[#allocation17 + $0x6e0] sm:$0xff]  ;;  %v3837_v4 = vld [vmem:[#allocation17 + $0x6d0] sm:$0xff] }
 0x8e6   :  { %9000 = vmatpush1.bf16.msra.mxu1 %v8999_v45  ;;  %8874 = vmatprep.subr.bf16.mxu0 %v8873_v11  ;;  %v3809_v45 = vld [vmem:[#allocation17 + $0x5f0] sm:$0xff]  ;;  %v3812_v11 = vld [vmem:[#allocation17 + $0x608] sm:$0xff] }
 0x8e7   :  { %9002 = vmatprep.subr.bf16.mxu1 %v9001_v50  ;;  %v8891_v50 = vpack.c.bf16 %v3807_v3, %v3803_v27  ;;  %v9019_v32 = vpack.c.bf16 %v3809_v45, %v3805_v0  ;;  %v8893_v53 = vpack.c.bf16 %v3816_v14, %v3812_v11  ;;  %v3848_v27 = vld [vmem:[#allocation17 + $0x728] sm:$0xff]  ;;  %v3846_v3 = vld [vmem:[#allocation17 + $0x718] sm:$0xff]  ;;  %v3843_v14 = vld [vmem:[#allocation17 + $0x700] sm:$0xff] }
 0x8e8   :  { %v3850_v0 = vld [vmem:[#allocation17 + $0x738] sm:$0xff] }
 0x8e9   :  { %8876 = vmatpush1.bf16.msra.mxu0 %v8875_v46  ;;  %v9021_v46 = vpack.c.bf16 %v3818_v24, %v3814_v23  ;;  %v3847_v23 = vld [vmem:[#allocation17 + $0x720] sm:$0xff]  ;;  %v3845_v24 = vld [vmem:[#allocation17 + $0x710] sm:$0xff] }
 0x8ea   :  { %9004 = vmatpush1.bf16.msra.mxu1 %v9003_v25  ;;  %8878 = vmatprep.subr.bf16.mxu0 %v8877_v20  ;;  %v3817_v25 = vld [vmem:[#allocation17 + $0x630] sm:$0xff]  ;;  %v3820_v20 = vld [vmem:[#allocation17 + $0x648] sm:$0xff] }
 0x8eb   :  { %9006 = vmatprep.subr.bf16.mxu1 %v9005_v13  ;;  %v8895_v13 = vpack.c.bf16 %v3815_v17, %v3811_v15  ;;  %v9023_v29 = vpack.c.bf16 %v3817_v25, %v3813_v22  ;;  %v8897_v5 = vpack.c.bf16 %v3824_v40, %v3820_v20  ;;  %v3856_v15 = vld [vmem:[#allocation17 + $0x768] sm:$0xff]  ;;  %v3854_v17 = vld [vmem:[#allocation17 + $0x758] sm:$0xff]  ;;  %v3851_v40 = vld [vmem:[#allocation17 + $0x740] sm:$0xff] }
 0x8ec   :  { %v3858_v22 = vld [vmem:[#allocation17 + $0x778] sm:$0xff] }
 0x8ed   :  { %8880 = vmatpush1.bf16.msra.mxu0 %v8879_v33  ;;  %v9025_v33 = vpack.c.bf16 %v3826_v26, %v3822_v47  ;;  %v3855_v47 = vld [vmem:[#allocation17 + $0x760] sm:$0xff]  ;;  %v3853_v26 = vld [vmem:[#allocation17 + $0x750] sm:$0xff] }
 0x8ee   :  { %9008 = vmatpush1.bf16.msra.mxu1 %v9007_v34  ;;  %8882 = vmatprep.subr.bf16.mxu0 %v8881_v9  ;;  %v3825_v34 = vld [vmem:[#allocation17 + $0x670] sm:$0xff]  ;;  %v3828_v9 = vld [vmem:[#allocation17 + $0x688] sm:$0xff] }
 0x8ef   :  { %9010 = vmatprep.subr.bf16.mxu1 %v9009_v39  ;;  %v8899_v39 = vpack.c.bf16 %v3823_v30, %v3819_v16  ;;  %v9027_v43 = vpack.c.bf16 %v3825_v34, %v3821_v37  ;;  %v8901_v41 = vpack.c.bf16 %v3832_v35, %v3828_v9  ;;  %v3864_v16 = vld [vmem:[#allocation17 + $0x7a8] sm:$0xff]  ;;  %v3862_v30 = vld [vmem:[#allocation17 + $0x798] sm:$0xff]  ;;  %v3859_v35 = vld [vmem:[#allocation17 + $0x780] sm:$0xff] }
 0x8f0   :  { %v3866_v37 = vld [vmem:[#allocation17 + $0x7b8] sm:$0xff] }
 0x8f1   :  { %8884 = vmatpush1.bf16.msra.mxu0 %v8883_v31  ;;  %v9029_v31 = vpack.c.bf16 %v3834_v38, %v3830_v36  ;;  %v3863_v36 = vld [vmem:[#allocation17 + $0x7a0] sm:$0xff]  ;;  %v3861_v38 = vld [vmem:[#allocation17 + $0x790] sm:$0xff] }
 0x8f2   :  { %9012 = vmatpush1.bf16.msra.mxu1 %v9011_v57  ;;  %8886 = vmatprep.subr.bf16.mxu0 %v8885_v54  ;;  %v3833_v57 = vld [vmem:[#allocation17 + $0x6b0] sm:$0xff]  ;;  %v3836_v54 = vld [vmem:[#allocation17 + $0x6c8] sm:$0xff] }
 0x8f3   :  { %9014 = vmatprep.subr.bf16.mxu1 %v9013_v56  ;;  %v8903_v56 = vpack.c.bf16 %v3831_v60, %v3827_v12  ;;  %v9031_v62 = vpack.c.bf16 %v3833_v57, %v3829_v42  ;;  %v8905_v63 = vpack.c.bf16 %v3840_v55, %v3836_v54  ;;  %v3872_v12 = vld [vmem:[#allocation17 + $0x7e8] sm:$0xff]  ;;  %v3870_v60 = vld [vmem:[#allocation17 + $0x7d8] sm:$0xff]  ;;  %v3867_v55 = vld [vmem:[#allocation17 + $0x7c0] sm:$0xff] }
 0x8f4   :  { %v3874_v42 = vld [vmem:[#allocation17 + $0x7f8] sm:$0xff] }
 0x8f5   :  { %8888 = vmatpush1.bf16.msra.mxu0 %v8887_v6  ;;  %v9033_v6 = vpack.c.bf16 %v3842_v61, %v3838_v58  ;;  %v3871_v58 = vld [vmem:[#allocation17 + $0x7e0] sm:$0xff]  ;;  %v9049_v61 = vpack.c.bf16 %v3874_v42, %v3870_v60  ;;  %v5026_v60 = vld [vmem:[#allocation20 + $0x108] sm:$0xff] }
 0x8f6   :  { %9016 = vmatpush1.bf16.msra.mxu1 %v9015_v7  ;;  %8890 = vmatprep.subr.bf16.mxu0 %v8889_v8  ;;  %v3841_v7 = vld [vmem:[#allocation17 + $0x6f0] sm:$0xff]  ;;  %v3844_v8 = vld [vmem:[#allocation17 + $0x708] sm:$0xff] }
 0x8f7   :  { %9018 = vmatprep.subr.bf16.mxu1 %v9017_v10  ;;  %v8907_v10 = vpack.c.bf16 %v3839_v2, %v3835_v1  ;;  %v9035_v45 = vpack.c.bf16 %v3841_v7, %v3837_v4  ;;  %v8909_v11 = vpack.c.bf16 %v3848_v27, %v3844_v8  ;;  %v4994_v2 = vld [vmem:[#allocation20 + $0x8] sm:$0xff]  ;;  %v5000_v7 = vld [vmem:[#allocation20 + $0x38] sm:$0xff]  ;;  %v4993_v8 = vld [vmem:[#allocation20] sm:$0xff] }
 0x8f8   :  { %v4998_v4 = vld [vmem:[#allocation20 + $0x28] sm:$0xff]  ;;  %v4997_v27 = vld [vmem:[#allocation20 + $0x20] sm:$0xff] }
 0x8f9   :  { %8892 = vmatpush1.bf16.msra.mxu0 %v8891_v50  ;;  %v9037_v50 = vpack.c.bf16 %v3850_v0, %v3846_v3  ;;  %v4995_v3 = vld [vmem:[#allocation20 + $0x10] sm:$0xff]  ;;  %v9061_v0 = vpack.c.bf16 %v4998_v4, %v4994_v2  ;;  %v5030_v42 = vld [vmem:[#allocation20 + $0x128] sm:$0xff] }
 0x8fa   :  { %9020 = vmatpush1.bf16.msra.mxu1 %v9019_v32  ;;  %8894 = vmatprep.subr.bf16.mxu0 %v8893_v53  ;;  %v3849_v32 = vld [vmem:[#allocation17 + $0x730] sm:$0xff]  ;;  %v3852_v53 = vld [vmem:[#allocation17 + $0x748] sm:$0xff] }
 0x8fb   :  { %9022 = vmatprep.subr.bf16.mxu1 %v9021_v46  ;;  %v8911_v46 = vpack.c.bf16 %v3847_v23, %v3843_v14  ;;  %v9039_v25 = vpack.c.bf16 %v3849_v32, %v3845_v24  ;;  %v8913_v20 = vpack.c.bf16 %v3856_v15, %v3852_v53  ;;  %v5004_v23 = vld [vmem:[#allocation20 + $0x58] sm:$0xff]  ;;  %v5001_v53 = vld [vmem:[#allocation20 + $0x40] sm:$0xff]  ;;  %v5034_v2 = vld [vmem:[#allocation20 + $0x148] sm:$0xff] }
 0x8fc   :  { %v5008_v24 = vld [vmem:[#allocation20 + $0x78] sm:$0xff]  ;;  %v5005_v15 = vld [vmem:[#allocation20 + $0x60] sm:$0xff]  ;;  %v5038_v4 = vld [vmem:[#allocation20 + $0x168] sm:$0xff] }
 0x8fd   :  { %8896 = vmatpush1.bf16.msra.mxu0 %v8895_v13  ;;  %v9041_v13 = vpack.c.bf16 %v3858_v22, %v3854_v17  ;;  %v5003_v17 = vld [vmem:[#allocation20 + $0x50] sm:$0xff] }
 0x8fe   :  { %9024 = vmatpush1.bf16.msra.mxu1 %v9023_v29  ;;  %8898 = vmatprep.subr.bf16.mxu0 %v8897_v5  ;;  %v3857_v29 = vld [vmem:[#allocation17 + $0x770] sm:$0xff]  ;;  %v3860_v5 = vld [vmem:[#allocation17 + $0x788] sm:$0xff] }
 0x8ff   :  { %9026 = vmatprep.subr.bf16.mxu1 %v9025_v33  ;;  %v8915_v33 = vpack.c.bf16 %v3855_v47, %v3851_v40  ;;  %v9043_v34 = vpack.c.bf16 %v3857_v29, %v3853_v26  ;;  %v8917_v9 = vpack.c.bf16 %v3864_v16, %v3860_v5  ;;  %v5007_v22 = vld [vmem:[#allocation20 + $0x70] sm:$0xff]  ;;  %v5009_v26 = vld [vmem:[#allocation20 + $0x80] sm:$0xff] }
 0x900   :  { %v9195_v40 = vpack.c.bf16 %v5007_v22, %v5003_v17  ;;  %v5011_v29 = vld [vmem:[#allocation20 + $0x90] sm:$0xff]  ;;  %v5045_v17 = vld [vmem:[#allocation20 + $0x1a0] sm:$0xff] }
 0x901   :  { %8900 = vmatpush1.bf16.msra.mxu0 %v8899_v39  ;;  %v9045_v39 = vpack.c.bf16 %v3866_v37, %v3862_v30  ;;  %v5015_v16 = vld [vmem:[#allocation20 + $0xb0] sm:$0xff]  ;;  %v5018_v30 = vld [vmem:[#allocation20 + $0xc8] sm:$0xff] }
 0x902   :  { %9028 = vmatpush1.bf16.msra.mxu1 %v9027_v43  ;;  %8902 = vmatprep.subr.bf16.mxu0 %v8901_v41  ;;  %v3865_v43 = vld [vmem:[#allocation17 + $0x7b0] sm:$0xff]  ;;  %v3868_v41 = vld [vmem:[#allocation17 + $0x7c8] sm:$0xff] }
 0x903   :  { %9030 = vmatprep.subr.bf16.mxu1 %v9029_v31  ;;  %v8919_v31 = vpack.c.bf16 %v3863_v36, %v3859_v35  ;;  %v9047_v57 = vpack.c.bf16 %v3865_v43, %v3861_v38  ;;  %v8921_v54 = vpack.c.bf16 %v3872_v12, %v3868_v41  ;;  %v5022_v37 = vld [vmem:[#allocation20 + $0xe8] sm:$0xff]  ;;  %v9199_v35 = vpack.c.bf16 %v5015_v16, %v5011_v29  ;;  %v5017_v38 = vld [vmem:[#allocation20 + $0xc0] sm:$0xff]  ;;  %v5019_v43 = vld [vmem:[#allocation20 + $0xd0] sm:$0xff] }
 0x904   :  { %v9073_v36 = vpack.c.bf16 %v5022_v37, %v5018_v30  ;;  %v5023_v12 = vld [vmem:[#allocation20 + $0xf0] sm:$0xff]  ;;  %v5053_v29 = vld [vmem:[#allocation20 + $0x1e0] sm:$0xff]  ;;  %v5058_v37 = vld [vmem:[#allocation20 + $0x208] sm:$0xff] }
 0x905   :  { %8904 = vmatpush1.bf16.msra.mxu0 %v8903_v56  ;;  %v3869_v56 = vld [vmem:[#allocation17 + $0x7d0] sm:$0xff] }
 0x906   :  { %9032 = vmatpush1.bf16.msra.mxu1 %v9031_v62  ;;  %8906 = vmatprep.subr.bf16.mxu0 %v8905_v63  ;;  %v3873_v62 = vld [vmem:[#allocation17 + $0x7f0] sm:$0xff]  ;;  %v8923_v63 = vpack.c.bf16 %v3871_v58, %v3867_v55  ;;  %v9203_v55 = vpack.c.bf16 %v5023_v12, %v5019_v43  ;;  %v9077_v58 = vpack.c.bf16 %v5030_v42, %v5026_v60  ;;  %v5061_v43 = vld [vmem:[#allocation20 + $0x220] sm:$0xff]  ;;  %v5066_v42 = vld [vmem:[#allocation20 + $0x248] sm:$0xff] }
 0x907   :  { %9034 = vmatprep.subr.bf16.mxu1 %v9033_v6  ;;  %v9051_v1 = vpack.c.bf16 %v3873_v62, %v3869_v56  ;;  %v4996_v6 = vld [vmem:[#allocation20 + $0x18] sm:$0xff]  ;;  %v5029_v56 = vld [vmem:[#allocation20 + $0x120] sm:$0xff]  ;;  %v5027_v62 = vld [vmem:[#allocation20 + $0x110] sm:$0xff] }
 0x908   :  { %v9189_v14 = vpack.c.bf16 %v5000_v7, %v4996_v6  ;;  %v5036_v6 = vld [vmem:[#allocation20 + $0x158] sm:$0xff]  ;;  %v5055_v30 = vld [vmem:[#allocation20 + $0x1f0] sm:$0xff] }
 0x909   :  { %8908 = vmatpush1.bf16.msra.mxu0 %v8907_v10  ;;  %v4999_v10 = vld [vmem:[#allocation20 + $0x30] sm:$0xff]  ;;  %v5040_v7 = vld [vmem:[#allocation20 + $0x178] sm:$0xff] }
 0x90a   :  { %9036 = vmatpush1.bf16.msra.mxu1 %v9035_v45  ;;  %8910 = vmatprep.subr.bf16.mxu0 %v8909_v11  ;;  %v5002_v45 = vld [vmem:[#allocation20 + $0x48] sm:$0xff]  ;;  %v5063_v60 = vld [vmem:[#allocation20 + $0x230] sm:$0xff] }
 0x90b   :  { %9038 = vmatprep.subr.bf16.mxu1 %v9037_v50  ;;  %v5006_v11 = vld [vmem:[#allocation20 + $0x68] sm:$0xff]  ;;  %v9063_v50 = vpack.c.bf16 %v4997_v27, %v4993_v8 }
 0x90c   :  { %v9065_v32 = vpack.c.bf16 %v5006_v11, %v5002_v45  ;;  %v5035_v45 = vld [vmem:[#allocation20 + $0x150] sm:$0xff]  ;;  %v9209_v11 = vpack.c.bf16 %v5040_v7, %v5036_v6  ;;  %v5078_v6 = vld [vmem:[#allocation20 + $0x2a8] sm:$0xff]  ;;  %v5076_v7 = vld [vmem:[#allocation20 + $0x298] sm:$0xff] }
 0x90d   :  { %8912 = vmatpush1.bf16.msra.mxu0 %v8911_v46  ;;  %v5014_v46 = vld [vmem:[#allocation20 + $0xa8] sm:$0xff] }
 0x90e   :  { %9040 = vmatpush1.bf16.msra.mxu1 %v9039_v25  ;;  %8914 = vmatprep.subr.bf16.mxu0 %v8913_v20  ;;  %v5012_v25 = vld [vmem:[#allocation20 + $0x98] sm:$0xff] }
 0x90f   :  { %9042 = vmatprep.subr.bf16.mxu1 %v9041_v13  ;;  %v5016_v20 = vld [vmem:[#allocation20 + $0xb8] sm:$0xff]  ;;  %v5013_v13 = vld [vmem:[#allocation20 + $0xa0] sm:$0xff] }
 0x910   :  { %v9197_v5 = vpack.c.bf16 %v5016_v20, %v5012_v25  ;;  %v5054_v25 = vld [vmem:[#allocation20 + $0x1e8] sm:$0xff]  ;;  %v5052_v20 = vld [vmem:[#allocation20 + $0x1d8] sm:$0xff] }
 0x911   :  { %8916 = vmatpush1.bf16.msra.mxu0 %v8915_v33  ;;  %v5020_v33 = vld [vmem:[#allocation20 + $0xd8] sm:$0xff] }
 0x912   :  { %9044 = vmatpush1.bf16.msra.mxu1 %v9043_v34  ;;  %8918 = vmatprep.subr.bf16.mxu0 %v8917_v9  ;;  %v5024_v34 = vld [vmem:[#allocation20 + $0xf8] sm:$0xff]  ;;  %v9071_v9 = vpack.c.bf16 %v5013_v13, %v5009_v26  ;;  %v5049_v13 = vld [vmem:[#allocation20 + $0x1c0] sm:$0xff] }
 0x913   :  { %9046 = vmatprep.subr.bf16.mxu1 %v9045_v39  ;;  %v5021_v39 = vld [vmem:[#allocation20 + $0xe0] sm:$0xff]  ;;  %v9201_v41 = vpack.c.bf16 %v5024_v34, %v5020_v33  ;;  %v5062_v33 = vld [vmem:[#allocation20 + $0x228] sm:$0xff]  ;;  %v5060_v34 = vld [vmem:[#allocation20 + $0x218] sm:$0xff] }
 0x915   :  { %8920 = vmatpush1.bf16.msra.mxu0 %v8919_v31  ;;  %v5028_v31 = vld [vmem:[#allocation20 + $0x118] sm:$0xff] }
 0x916   :  { %9048 = vmatpush1.bf16.msra.mxu1 %v9047_v57  ;;  %8922 = vmatprep.subr.bf16.mxu0 %v8921_v54  ;;  %v5032_v57 = vld [vmem:[#allocation20 + $0x138] sm:$0xff]  ;;  %v9075_v54 = vpack.c.bf16 %v5021_v39, %v5017_v38  ;;  %v9093_v38 = vpack.c.bf16 %v5062_v33, %v5058_v37  ;;  %v5057_v39 = vld [vmem:[#allocation20 + $0x200] sm:$0xff]  ;;  %v5095_v37 = vld [vmem:[#allocation20 + $0x330] sm:$0xff] }
 0x917   :  { %9050 = vmatprep.subr.bf16.mxu1 %v9049_v61  ;;  %v5025_v61 = vld [vmem:[#allocation20 + $0x100] sm:$0xff]  ;;  %v5098_v33 = vld [vmem:[#allocation20 + $0x348] sm:$0xff] }
 0x918   :  { %v9079_v8 = vpack.c.bf16 %v5029_v56, %v5025_v61  ;;  %v5065_v56 = vld [vmem:[#allocation20 + $0x240] sm:$0xff] }
 0x919   :  { %8924 = vmatpush1.bf16.msra.mxu0 %v8923_v63  ;;  %v9205_v63 = vpack.c.bf16 %v5032_v57, %v5028_v31  ;;  %v5070_v31 = vld [vmem:[#allocation20 + $0x268] sm:$0xff]  ;;  %v5068_v57 = vld [vmem:[#allocation20 + $0x258] sm:$0xff] }
 0x91a   :  { %9052 = vmatpush1.bf16.msra.mxu1 %v9051_v1  ;;  %9054 = vmatprep.subr.bf16.mxu0 %v10658_v19  ;;  %v7163_v19 = vld [vmem:[%s10866_s11 + $0x10] sm:$0xff]  ;;  %v5031_v1 = vld [vmem:[#allocation20 + $0x130] sm:$0xff]  ;;  %v9097_v61 = vpack.c.bf16 %v5070_v31, %v5066_v42  ;;  %v5106_v31 = vld [vmem:[#allocation20 + $0x388] sm:$0xff] }
 0x91b   :  { %9058 = vmatprep.subr.bf16.mxu1 %v10660_v21  ;;  %v9191_v21 = vpack.c.bf16 %v4999_v10, %v4995_v3  ;;  %v9207_v27 = vpack.c.bf16 %v5031_v1, %v5027_v62  ;;  %v9081_v3 = vpack.c.bf16 %v5038_v4, %v5034_v2  ;;  %v5037_v10 = vld [vmem:[#allocation20 + $0x160] sm:$0xff]  ;;  %v5071_v2 = vld [vmem:[#allocation20 + $0x270] sm:$0xff]  ;;  %v5074_v4 = vld [vmem:[#allocation20 + $0x288] sm:$0xff] }
 0x91c   :  { %4698 = vmatmul.mubr.f32.vlgmr.msra.gmra.mrb[30].mxu0 %v10686_v28  ;;  %v5069_v62 = vld [vmem:[#allocation20 + $0x260] sm:$0xff]  ;;  %v5103_v42 = vld [vmem:[#allocation20 + $0x370] sm:$0xff] }
 0x91d   :  { %4840 = vmatmul.mubr.f32.vlgmr.msra.gmra.mrb[38].mxu1 %v10686_v28  ;;  %9056 = vmatpush1.bf16.msra.mxu0 %v10654_v59  ;;  %v9193_v28 = vpack.c.bf16 %v5008_v24, %v5004_v23  ;;  %v5010_v59 = vld [vmem:[#allocation20 + $0x88] sm:$0xff] }
 0x91e   :  { %9060 = vmatpush1.bf16.msra.mxu1 %v10656_v18  ;;  %4915 = vmatprep.mubr.f32.mxu0 %v10055_v44  ;;  %v9067_v18 = vpack.c.bf16 %v5005_v15, %v5001_v53  ;;  %v9069_v47 = vpack.c.bf16 %v5014_v46, %v5010_v59  ;;  %v5042_v23 = vld [vmem:[#allocation20 + $0x188] sm:$0xff]  ;;  %v5041_v15 = vld [vmem:[#allocation20 + $0x180] sm:$0xff]  ;;  %v5047_v59 = vld [vmem:[#allocation20 + $0x1b0] sm:$0xff] }
 0x91f   :  { %4986 = vmatprep.mubr.f32.mxu1 %v10055_v44  ;;  %9062 = vmatprep.subr.bf16.mxu0 %v9061_v0  ;;  %v5033_v0 = vld [vmem:[#allocation20 + $0x140] sm:$0xff]  ;;  %v5046_v24 = vld [vmem:[#allocation20 + $0x1a8] sm:$0xff] }
 0x920   :  { %7164 = vmatmul.mubr.msk.f32.vlgmr.msra.gmra.mrb[32].mxu0 %vm3473_vm2, %v7163_v19  ;;  %9190 = vmatprep.subr.bf16.mxu1 %v9189_v14  ;;  %v5039_v14 = vld [vmem:[#allocation20 + $0x170] sm:$0xff]  ;;  %v9085_v53 = vpack.c.bf16 %v5046_v24, %v5042_v23  ;;  %v5050_v46 = vld [vmem:[#allocation20 + $0x1c8] sm:$0xff] }
 0x921   :  { %7165 = vmatmul.mubr.msk.f32.vlgmr.msra.gmra.mrb[40].mxu1 %vm3473_vm2, %v7163_v19  ;;  %9064 = vmatpush1.bf16.msra.mxu0 %v9063_v50  ;;  %v5044_v19 = vld [vmem:[#allocation20 + $0x198] sm:$0xff]  ;;  %v9089_v26 = vpack.c.bf16 %v5054_v25, %v5050_v46  ;;  %v5079_v23 = vld [vmem:[#allocation20 + $0x2b0] sm:$0xff]  ;;  %v5082_v24 = vld [vmem:[#allocation20 + $0x2c8] sm:$0xff] }
 0x922   :  { %9192 = vmatpush1.bf16.msra.mxu1 %v9191_v21  ;;  %9066 = vmatprep.subr.bf16.mxu0 %v9065_v32  ;;  %v5048_v50 = vld [vmem:[#allocation20 + $0x1b8] sm:$0xff]  ;;  %v9083_v21 = vpack.c.bf16 %v5037_v10, %v5033_v0  ;;  %v9211_v32 = vpack.c.bf16 %v5039_v14, %v5035_v45  ;;  %v9101_v0 = vpack.c.bf16 %v5078_v6, %v5074_v4  ;;  %v5073_v10 = vld [vmem:[#allocation20 + $0x280] sm:$0xff]  ;;  %v5087_v46 = vld [vmem:[#allocation20 + $0x2f0] sm:$0xff] }
 0x923   :  { %9194 = vmatprep.subr.bf16.mxu1 %v9193_v28  ;;  %v5043_v28 = vld [vmem:[#allocation20 + $0x190] sm:$0xff]  ;;  %v9213_v22 = vpack.c.bf16 %v5048_v50, %v5044_v19  ;;  %v5077_v45 = vld [vmem:[#allocation20 + $0x2a0] sm:$0xff]  ;;  %v5086_v19 = vld [vmem:[#allocation20 + $0x2e8] sm:$0xff] }
 0x924   :  { %v5084_v50 = vld [vmem:[#allocation20 + $0x2d8] sm:$0xff]  ;;  %v5090_v25 = vld [vmem:[#allocation20 + $0x308] sm:$0xff]  ;;  %v5111_v4 = vld [vmem:[#allocation20 + $0x3b0] sm:$0xff] }
 0x925   :  { %9068 = vmatpush1.bf16.msra.mxu0 %v9067_v18  ;;  %v5056_v18 = vld [vmem:[#allocation20 + $0x1f8] sm:$0xff]  ;;  %v5114_v6 = vld [vmem:[#allocation20 + $0x3c8] sm:$0xff] }
 0x926   :  { %9196 = vmatpush1.bf16.msra.mxu1 %v9195_v40  ;;  %9070 = vmatprep.subr.bf16.mxu0 %v9069_v47  ;;  %v9087_v40 = vpack.c.bf16 %v5045_v17, %v5041_v15  ;;  %v9215_v47 = vpack.c.bf16 %v5047_v59, %v5043_v28  ;;  %v9217_v16 = vpack.c.bf16 %v5056_v18, %v5052_v20  ;;  %v5081_v17 = vld [vmem:[#allocation20 + $0x2c0] sm:$0xff]  ;;  %v5094_v20 = vld [vmem:[#allocation20 + $0x328] sm:$0xff]  ;;  %v5092_v18 = vld [vmem:[#allocation20 + $0x318] sm:$0xff] }
 0x927   :  { %9198 = vmatprep.subr.bf16.mxu1 %v9197_v5  ;;  %v5051_v5 = vld [vmem:[#allocation20 + $0x1d0] sm:$0xff]  ;;  %v9105_v15 = vpack.c.bf16 %v5086_v19, %v5082_v24  ;;  %v5085_v28 = vld [vmem:[#allocation20 + $0x2e0] sm:$0xff] }
 0x928   :  { %v5119_v24 = vld [vmem:[#allocation20 + $0x3f0] sm:$0xff] }
 0x929   :  { %9072 = vmatpush1.bf16.msra.mxu0 %v9071_v9  ;;  %v5064_v9 = vld [vmem:[#allocation20 + $0x238] sm:$0xff] }
 0x92a   :  { %9200 = vmatpush1.bf16.msra.mxu1 %v9199_v35  ;;  %9074 = vmatprep.subr.bf16.mxu0 %v9073_v36  ;;  %v9091_v35 = vpack.c.bf16 %v5053_v29, %v5049_v13  ;;  %v9219_v36 = vpack.c.bf16 %v5055_v30, %v5051_v5  ;;  %v9221_v12 = vpack.c.bf16 %v5064_v9, %v5060_v34  ;;  %v5089_v29 = vld [vmem:[#allocation20 + $0x300] sm:$0xff]  ;;  %v5102_v34 = vld [vmem:[#allocation20 + $0x368] sm:$0xff]  ;;  %v5100_v9 = vld [vmem:[#allocation20 + $0x358] sm:$0xff] }
 0x92b   :  { %9202 = vmatprep.subr.bf16.mxu1 %v9201_v41  ;;  %v5059_v41 = vld [vmem:[#allocation20 + $0x210] sm:$0xff]  ;;  %v9109_v13 = vpack.c.bf16 %v5094_v20, %v5090_v25  ;;  %v5093_v5 = vld [vmem:[#allocation20 + $0x320] sm:$0xff]  ;;  %v5130_v20 = vld [vmem:[#allocation20 + $0x448] sm:$0xff] }
 0x92c   :  { %v5127_v25 = vld [vmem:[#allocation20 + $0x430] sm:$0xff] }
 0x92d   :  { %9076 = vmatpush1.bf16.msra.mxu0 %v9075_v54  ;;  %v5072_v54 = vld [vmem:[#allocation20 + $0x278] sm:$0xff] }
 0x92e   :  { %9204 = vmatpush1.bf16.msra.mxu1 %v9203_v55  ;;  %9078 = vmatprep.subr.bf16.mxu0 %v9077_v58  ;;  %v9095_v55 = vpack.c.bf16 %v5061_v43, %v5057_v39  ;;  %v9223_v58 = vpack.c.bf16 %v5063_v60, %v5059_v41  ;;  %v9225_v1 = vpack.c.bf16 %v5072_v54, %v5068_v57  ;;  %v5097_v43 = vld [vmem:[#allocation20 + $0x340] sm:$0xff]  ;;  %v5110_v57 = vld [vmem:[#allocation20 + $0x3a8] sm:$0xff]  ;;  %v5108_v54 = vld [vmem:[#allocation20 + $0x398] sm:$0xff] }
 0x92f   :  { %9206 = vmatprep.subr.bf16.mxu1 %v9205_v63  ;;  %v5067_v63 = vld [vmem:[#allocation20 + $0x250] sm:$0xff]  ;;  %v9113_v39 = vpack.c.bf16 %v5102_v34, %v5098_v33  ;;  %v5101_v41 = vld [vmem:[#allocation20 + $0x360] sm:$0xff] }
 0x930   :  { %v5131_v34 = vld [vmem:[#allocation20 + $0x450] sm:$0xff] }
 0x931   :  { %9080 = vmatpush1.bf16.msra.mxu0 %v9079_v8  ;;  %v5080_v8 = vld [vmem:[#allocation20 + $0x2b8] sm:$0xff] }
 0x932   :  { %9208 = vmatpush1.bf16.msra.mxu1 %v9207_v27  ;;  %9082 = vmatprep.subr.bf16.mxu0 %v9081_v3  ;;  %v9099_v27 = vpack.c.bf16 %v5069_v62, %v5065_v56  ;;  %v9227_v3 = vpack.c.bf16 %v5071_v2, %v5067_v63  ;;  %v9229_v14 = vpack.c.bf16 %v5080_v8, %v5076_v7  ;;  %v5105_v62 = vld [vmem:[#allocation20 + $0x380] sm:$0xff]  ;;  %v5118_v7 = vld [vmem:[#allocation20 + $0x3e8] sm:$0xff]  ;;  %v5116_v8 = vld [vmem:[#allocation20 + $0x3d8] sm:$0xff] }
 0x933   :  { %9210 = vmatprep.subr.bf16.mxu1 %v9209_v11  ;;  %v5075_v11 = vld [vmem:[#allocation20 + $0x290] sm:$0xff]  ;;  %v9117_v56 = vpack.c.bf16 %v5110_v57, %v5106_v31  ;;  %v5109_v63 = vld [vmem:[#allocation20 + $0x3a0] sm:$0xff] }
 0x934   :  { %v5141_v31 = vld [vmem:[#allocation20 + $0x4a0] sm:$0xff] }
 0x935   :  { %9084 = vmatpush1.bf16.msra.mxu0 %v9083_v21  ;;  %v5088_v21 = vld [vmem:[#allocation20 + $0x2f8] sm:$0xff] }
 0x936   :  { %9212 = vmatpush1.bf16.msra.mxu1 %v9211_v32  ;;  %9086 = vmatprep.subr.bf16.mxu0 %v9085_v53  ;;  %v9103_v32 = vpack.c.bf16 %v5077_v45, %v5073_v10  ;;  %v9231_v53 = vpack.c.bf16 %v5079_v23, %v5075_v11  ;;  %v9233_v59 = vpack.c.bf16 %v5088_v21, %v5084_v50  ;;  %v5113_v45 = vld [vmem:[#allocation20 + $0x3c0] sm:$0xff]  ;;  %v5115_v23 = vld [vmem:[#allocation20 + $0x3d0] sm:$0xff]  ;;  %v5122_v21 = vld [vmem:[#allocation20 + $0x408] sm:$0xff] }
 0x937   :  { %9214 = vmatprep.subr.bf16.mxu1 %v9213_v22  ;;  %v5083_v22 = vld [vmem:[#allocation20 + $0x2d0] sm:$0xff]  ;;  %v9121_v10 = vpack.c.bf16 %v5118_v7, %v5114_v6  ;;  %v5117_v11 = vld [vmem:[#allocation20 + $0x3e0] sm:$0xff]  ;;  %v9251_v50 = vpack.c.bf16 %v5119_v24, %v5115_v23 }
 0x938   :  { %v9123_v19 = vpack.c.bf16 %v5117_v11, %v5113_v45  ;;  %v5149_v6 = vld [vmem:[#allocation20 + $0x4e0] sm:$0xff]  ;;  %v5156_v45 = vld [vmem:[#allocation20 + $0x518] sm:$0xff] }
 0x939   :  { %9088 = vmatpush1.bf16.msra.mxu0 %v9087_v40  ;;  %v5096_v40 = vld [vmem:[#allocation20 + $0x338] sm:$0xff]  ;;  %v5153_v24 = vld [vmem:[#allocation20 + $0x500] sm:$0xff] }
 0x93a   :  { %9216 = vmatpush1.bf16.msra.mxu1 %v9215_v47  ;;  %9090 = vmatprep.subr.bf16.mxu0 %v9089_v26  ;;  %v9107_v47 = vpack.c.bf16 %v5085_v28, %v5081_v17  ;;  %v9235_v26 = vpack.c.bf16 %v5087_v46, %v5083_v22  ;;  %v9237_v30 = vpack.c.bf16 %v5096_v40, %v5092_v18  ;;  %v5128_v17 = vld [vmem:[#allocation20 + $0x438] sm:$0xff]  ;;  %v5121_v22 = vld [vmem:[#allocation20 + $0x400] sm:$0xff]  ;;  %v5123_v46 = vld [vmem:[#allocation20 + $0x410] sm:$0xff] }
 0x93b   :  { %9218 = vmatprep.subr.bf16.mxu1 %v9217_v16  ;;  %v5091_v16 = vld [vmem:[#allocation20 + $0x310] sm:$0xff]  ;;  %v5134_v18 = vld [vmem:[#allocation20 + $0x468] sm:$0xff]  ;;  %v5132_v40 = vld [vmem:[#allocation20 + $0x458] sm:$0xff] }
 0x93c   :  { %v5160_v11 = vld [vmem:[#allocation20 + $0x538] sm:$0xff] }
 0x93d   :  { %9092 = vmatpush1.bf16.msra.mxu0 %v9091_v35  ;;  %v5104_v35 = vld [vmem:[#allocation20 + $0x378] sm:$0xff] }
 0x93e   :  { %9220 = vmatpush1.bf16.msra.mxu1 %v9219_v36  ;;  %9094 = vmatprep.subr.bf16.mxu0 %v9093_v38  ;;  %v9111_v36 = vpack.c.bf16 %v5093_v5, %v5089_v29  ;;  %v9239_v38 = vpack.c.bf16 %v5095_v37, %v5091_v16  ;;  %v9241_v60 = vpack.c.bf16 %v5104_v35, %v5100_v9  ;;  %v5129_v5 = vld [vmem:[#allocation20 + $0x440] sm:$0xff]  ;;  %v5135_v9 = vld [vmem:[#allocation20 + $0x470] sm:$0xff]  ;;  %v5138_v35 = vld [vmem:[#allocation20 + $0x488] sm:$0xff] }
 0x93f   :  { %9222 = vmatprep.subr.bf16.mxu1 %v9221_v12  ;;  %v5099_v12 = vld [vmem:[#allocation20 + $0x350] sm:$0xff]  ;;  %v9255_v29 = vpack.c.bf16 %v5127_v25, %v5123_v46  ;;  %v5133_v16 = vld [vmem:[#allocation20 + $0x460] sm:$0xff]  ;;  %v9129_v37 = vpack.c.bf16 %v5134_v18, %v5130_v20 }
 0x940   :  { %v5161_v25 = vld [vmem:[#allocation20 + $0x540] sm:$0xff] }
 0x941   :  { %9096 = vmatpush1.bf16.msra.mxu0 %v9095_v55  ;;  %v5112_v55 = vld [vmem:[#allocation20 + $0x3b8] sm:$0xff]  ;;  %v5165_v20 = vld [vmem:[#allocation20 + $0x560] sm:$0xff] }
 0x942   :  { %9224 = vmatpush1.bf16.msra.mxu1 %v9223_v58  ;;  %9098 = vmatprep.subr.bf16.mxu0 %v9097_v61  ;;  %v9115_v58 = vpack.c.bf16 %v5101_v41, %v5097_v43  ;;  %v9243_v61 = vpack.c.bf16 %v5103_v42, %v5099_v12  ;;  %v9245_v2 = vpack.c.bf16 %v5112_v55, %v5108_v54  ;;  %v5144_v43 = vld [vmem:[#allocation20 + $0x4b8] sm:$0xff]  ;;  %v5137_v42 = vld [vmem:[#allocation20 + $0x480] sm:$0xff]  ;;  %v5139_v55 = vld [vmem:[#allocation20 + $0x490] sm:$0xff] }
 0x943   :  { %9226 = vmatprep.subr.bf16.mxu1 %v9225_v1  ;;  %v5107_v1 = vld [vmem:[#allocation20 + $0x390] sm:$0xff]  ;;  %v9131_v12 = vpack.c.bf16 %v5133_v16, %v5129_v5  ;;  %v5172_v5 = vld [vmem:[#allocation20 + $0x598] sm:$0xff] }
 0x944   :  { %v5176_v16 = vld [vmem:[#allocation20 + $0x5b8] sm:$0xff] }
 0x945   :  { %9100 = vmatpush1.bf16.msra.mxu0 %v9099_v27  ;;  %v5120_v27 = vld [vmem:[#allocation20 + $0x3f8] sm:$0xff] }
 0x946   :  { %9228 = vmatpush1.bf16.msra.mxu1 %v9227_v3  ;;  %9102 = vmatprep.subr.bf16.mxu0 %v9101_v0  ;;  %v9119_v3 = vpack.c.bf16 %v5109_v63, %v5105_v62  ;;  %v9247_v0 = vpack.c.bf16 %v5111_v4, %v5107_v1  ;;  %v5148_v62 = vld [vmem:[#allocation20 + $0x4d8] sm:$0xff]  ;;  %v9135_v1 = vpack.c.bf16 %v5141_v31, %v5137_v42  ;;  %v5145_v4 = vld [vmem:[#allocation20 + $0x4c0] sm:$0xff] }
 0x947   :  { %9230 = vmatprep.subr.bf16.mxu1 %v9229_v14  ;;  %v9249_v14 = vpack.c.bf16 %v5120_v27, %v5116_v8  ;;  %v5152_v63 = vld [vmem:[#allocation20 + $0x4f8] sm:$0xff]  ;;  %v5147_v27 = vld [vmem:[#allocation20 + $0x4d0] sm:$0xff] }
 0x948   :  { %v9265_v8 = vpack.c.bf16 %v5152_v63, %v5148_v62  ;;  %v5186_v62 = vld [vmem:[#allocation20 + $0x608] sm:$0xff] }
 0x949   :  { %9104 = vmatpush1.bf16.msra.mxu0 %v9103_v32  ;;  %v5126_v32 = vld [vmem:[#allocation20 + $0x428] sm:$0xff] }
 0x94a   :  { %9232 = vmatpush1.bf16.msra.mxu1 %v9231_v53  ;;  %9106 = vmatprep.subr.bf16.mxu0 %v9105_v15  ;;  %v5124_v53 = vld [vmem:[#allocation20 + $0x418] sm:$0xff]  ;;  %v9125_v15 = vpack.c.bf16 %v5126_v32, %v5122_v21  ;;  %v9269_v21 = vpack.c.bf16 %v5160_v11, %v5156_v45  ;;  %v5155_v32 = vld [vmem:[#allocation20 + $0x510] sm:$0xff]  ;;  %v5190_v63 = vld [vmem:[#allocation20 + $0x628] sm:$0xff] }
 0x94b   :  { %9234 = vmatprep.subr.bf16.mxu1 %v9233_v59  ;;  %v9253_v28 = vpack.c.bf16 %v5128_v17, %v5124_v53  ;;  %v5125_v59 = vld [vmem:[#allocation20 + $0x420] sm:$0xff]  ;;  %v5159_v53 = vld [vmem:[#allocation20 + $0x530] sm:$0xff]  ;;  %v5166_v17 = vld [vmem:[#allocation20 + $0x568] sm:$0xff] }
 0x94c   :  { %v9271_v46 = vpack.c.bf16 %v5159_v53, %v5155_v32  ;;  %v5194_v45 = vld [vmem:[#allocation20 + $0x648] sm:$0xff] }
 0x94d   :  { %9108 = vmatpush1.bf16.msra.mxu0 %v9107_v47  ;;  %v5136_v47 = vld [vmem:[#allocation20 + $0x478] sm:$0xff]  ;;  %v5198_v11 = vld [vmem:[#allocation20 + $0x668] sm:$0xff] }
 0x94e   :  { %9236 = vmatpush1.bf16.msra.mxu1 %v9235_v26  ;;  %9110 = vmatprep.subr.bf16.mxu0 %v9109_v13  ;;  %v9127_v13 = vpack.c.bf16 %v5125_v59, %v5121_v22  ;;  %v9257_v33 = vpack.c.bf16 %v5136_v47, %v5132_v40  ;;  %v5168_v22 = vld [vmem:[#allocation20 + $0x578] sm:$0xff]  ;;  %v5163_v47 = vld [vmem:[#allocation20 + $0x550] sm:$0xff]  ;;  %v9161_v32 = vpack.c.bf16 %v5198_v11, %v5194_v45 }
 0x94f   :  { %9238 = vmatprep.subr.bf16.mxu1 %v9237_v30  ;;  %v5227_v45 = vld [vmem:[#allocation20 + $0x750] sm:$0xff] }
 0x950   :  { %v5231_v11 = vld [vmem:[#allocation20 + $0x770] sm:$0xff] }
 0x951   :  { %9112 = vmatpush1.bf16.msra.mxu0 %v9111_v36 }
 0x952   :  { %9240 = vmatpush1.bf16.msra.mxu1 %v9239_v38  ;;  %9114 = vmatprep.subr.bf16.mxu0 %v9113_v39  ;;  %v5142_v38 = vld [vmem:[#allocation20 + $0x4a8] sm:$0xff]  ;;  %v5140_v39 = vld [vmem:[#allocation20 + $0x498] sm:$0xff] }
 0x953   :  { %9242 = vmatprep.subr.bf16.mxu1 %v9241_v60  ;;  %v9259_v60 = vpack.c.bf16 %v5135_v9, %v5131_v34  ;;  %v9133_v57 = vpack.c.bf16 %v5142_v38, %v5138_v35  ;;  %v9261_v54 = vpack.c.bf16 %v5144_v43, %v5140_v39  ;;  %v5173_v34 = vld [vmem:[#allocation20 + $0x5a0] sm:$0xff]  ;;  %v9277_v35 = vpack.c.bf16 %v5176_v16, %v5172_v5  ;;  %v5171_v38 = vld [vmem:[#allocation20 + $0x590] sm:$0xff]  ;;  %v5178_v43 = vld [vmem:[#allocation20 + $0x5c8] sm:$0xff] }
 0x954   :  { %v5175_v39 = vld [vmem:[#allocation20 + $0x5b0] sm:$0xff]  ;;  %v5210_v5 = vld [vmem:[#allocation20 + $0x6c8] sm:$0xff] }
 0x955   :  { %9116 = vmatpush1.bf16.msra.mxu0 %v9115_v58  ;;  %v5143_v58 = vld [vmem:[#allocation20 + $0x4b0] sm:$0xff]  ;;  %v9279_v31 = vpack.c.bf16 %v5175_v39, %v5171_v38  ;;  %v5214_v16 = vld [vmem:[#allocation20 + $0x6e8] sm:$0xff] }
 0x956   :  { %9244 = vmatpush1.bf16.msra.mxu1 %v9243_v61  ;;  %9118 = vmatprep.subr.bf16.mxu0 %v9117_v56  ;;  %v5146_v61 = vld [vmem:[#allocation20 + $0x4c8] sm:$0xff]  ;;  %v9169_v38 = vpack.c.bf16 %v5214_v16, %v5210_v5  ;;  %v5243_v5 = vld [vmem:[#allocation20 + $0x7d0] sm:$0xff] }
 0x957   :  { %9246 = vmatprep.subr.bf16.mxu1 %v9245_v2  ;;  %v5150_v56 = vld [vmem:[#allocation20 + $0x4e8] sm:$0xff]  ;;  %v9263_v2 = vpack.c.bf16 %v5143_v58, %v5139_v55  ;;  %v5247_v16 = vld [vmem:[#allocation20 + $0x7f0] sm:$0xff] }
 0x958   :  { %v9137_v7 = vpack.c.bf16 %v5150_v56, %v5146_v61  ;;  %v5179_v61 = vld [vmem:[#allocation20 + $0x5d0] sm:$0xff] }
 0x959   :  { %9120 = vmatpush1.bf16.msra.mxu0 %v9119_v3  ;;  %v5151_v3 = vld [vmem:[#allocation20 + $0x4f0] sm:$0xff] }
 0x95a   :  { %9248 = vmatpush1.bf16.msra.mxu1 %v9247_v0  ;;  %9122 = vmatprep.subr.bf16.mxu0 %v9121_v10  ;;  %v5154_v0 = vld [vmem:[#allocation20 + $0x508] sm:$0xff]  ;;  %v9267_v23 = vpack.c.bf16 %v5151_v3, %v5147_v27  ;;  %v5183_v56 = vld [vmem:[#allocation20 + $0x5f0] sm:$0xff]  ;;  %v9157_v27 = vpack.c.bf16 %v5190_v63, %v5186_v62 }
 0x95b   :  { %9250 = vmatprep.subr.bf16.mxu1 %v9249_v14  ;;  %v5158_v10 = vld [vmem:[#allocation20 + $0x528] sm:$0xff]  ;;  %v9139_v14 = vpack.c.bf16 %v5149_v6, %v5145_v4  ;;  %v9283_v6 = vpack.c.bf16 %v5183_v56, %v5179_v61  ;;  %v5219_v62 = vld [vmem:[#allocation20 + $0x710] sm:$0xff] }
 0x95c   :  { %v5223_v63 = vld [vmem:[#allocation20 + $0x730] sm:$0xff] }
 0x95d   :  { %9124 = vmatpush1.bf16.msra.mxu0 %v9123_v19  ;;  %v5157_v19 = vld [vmem:[#allocation20 + $0x520] sm:$0xff] }
 0x95e   :  { %9252 = vmatpush1.bf16.msra.mxu1 %v9251_v50  ;;  %9126 = vmatprep.subr.bf16.mxu0 %v9125_v15  ;;  %v9141_v50 = vpack.c.bf16 %v5158_v10, %v5154_v0  ;;  %v5162_v15 = vld [vmem:[#allocation20 + $0x548] sm:$0xff]  ;;  %v9143_v59 = vpack.c.bf16 %v5157_v19, %v5153_v24  ;;  %v5187_v0 = vld [vmem:[#allocation20 + $0x610] sm:$0xff] }
 0x95f   :  { %9254 = vmatprep.subr.bf16.mxu1 %v9253_v28  ;;  %v5164_v28 = vld [vmem:[#allocation20 + $0x558] sm:$0xff]  ;;  %v9145_v18 = vpack.c.bf16 %v5166_v17, %v5162_v15  ;;  %v5191_v10 = vld [vmem:[#allocation20 + $0x630] sm:$0xff] }
 0x960   :  { %v9273_v40 = vpack.c.bf16 %v5168_v22, %v5164_v28  ;;  %v9287_v19 = vpack.c.bf16 %v5191_v10, %v5187_v0  ;;  %v5195_v15 = vld [vmem:[#allocation20 + $0x650] sm:$0xff]  ;;  %v5202_v28 = vld [vmem:[#allocation20 + $0x688] sm:$0xff] }
 0x961   :  { %v5199_v17 = vld [vmem:[#allocation20 + $0x670] sm:$0xff]  ;;  %v5206_v22 = vld [vmem:[#allocation20 + $0x6a8] sm:$0xff] }
 0x9f3   :  { %v4917_v26 = vpop.f32.mrb[32].mxu0 }
 0x9f4   :  { %v4919_v30 = vpop.f32.mrb[33].mxu0  ;;  %v10713_v36 = vpop.f32.mrb[40].mxu1 }
 0x9f5   :  { %5313 = vmatprep.mubr.f32.mxu0 %v4919_v30  ;;  %5455 = vmatprep.mubr.f32.mxu1 %v4919_v30  ;;  %v4990_v41 = vpop.f32.mrb[41].mxu1  ;;  %v9147_v30 = vpack.c.bf16 %v5165_v20, %v5161_v25  ;;  %v9291_v20 = vpack.c.bf16 %v5199_v17, %v5195_v15 }
 0x9f6   :  { %5314 = vmatmul.mubr.f32.vlgmr.msra.gmra.mrb[30].mxu0 %v4917_v26  ;;  %5456 = vmatmul.mubr.f32.vlgmr.msra.gmra.mrb[38].mxu1 %v4917_v26  ;;  %v5167_v26 = vld [vmem:[#allocation20 + $0x570] sm:$0xff] }
 0x9f7   :  { %9128 = vmatpush1.bf16.msra.mxu0 %v9127_v13  ;;  %9256 = vmatpush1.bf16.msra.mxu1 %v9255_v29  ;;  %v5170_v13 = vld [vmem:[#allocation20 + $0x588] sm:$0xff] }
 0x9f8   :  { %9130 = vmatprep.subr.bf16.mxu0 %v9129_v37  ;;  %9258 = vmatprep.subr.bf16.mxu1 %v9257_v33  ;;  %v5174_v29 = vld [vmem:[#allocation20 + $0x5a8] sm:$0xff]  ;;  %v9275_v37 = vpack.c.bf16 %v5167_v26, %v5163_v47  ;;  %v5169_v33 = vld [vmem:[#allocation20 + $0x580] sm:$0xff]  ;;  %v9165_v47 = vpack.c.bf16 %v5206_v22, %v5202_v28  ;;  %v5235_v28 = vld [vmem:[#allocation20 + $0x790] sm:$0xff] }
 0x9f9   :  { %5384 = vmatprep.mubr.f32.mxu0 %v4990_v41  ;;  %5526 = vmatprep.mubr.f32.mxu1 %v4990_v41  ;;  %v9149_v9 = vpack.c.bf16 %v5174_v29, %v5170_v13  ;;  %v5182_v41 = vld [vmem:[#allocation20 + $0x5e8] sm:$0xff]  ;;  %v9151_v42 = vpack.c.bf16 %v5173_v34, %v5169_v33  ;;  %v5203_v13 = vld [vmem:[#allocation20 + $0x690] sm:$0xff] }
 0x9fa   :  { %v9153_v55 = vpack.c.bf16 %v5182_v41, %v5178_v43  ;;  %v5207_v29 = vld [vmem:[#allocation20 + $0x6b0] sm:$0xff] }
 0x9fb   :  { %9132 = vmatpush1.bf16.msra.mxu0 %v9131_v12  ;;  %9260 = vmatpush1.bf16.msra.mxu1 %v9259_v60  ;;  %v5180_v12 = vld [vmem:[#allocation20 + $0x5d8] sm:$0xff]  ;;  %v9295_v34 = vpack.c.bf16 %v5207_v29, %v5203_v13  ;;  %v5211_v43 = vld [vmem:[#allocation20 + $0x6d0] sm:$0xff]  ;;  %v5245_v29 = vld [vmem:[#allocation20 + $0x7e0] sm:$0xff] }
 0x9fc   :  { %9134 = vmatprep.subr.bf16.mxu0 %v9133_v57  ;;  %9262 = vmatprep.subr.bf16.mxu1 %v9261_v54  ;;  %v5184_v60 = vld [vmem:[#allocation20 + $0x5f8] sm:$0xff]  ;;  %v5177_v57 = vld [vmem:[#allocation20 + $0x5c0] sm:$0xff]  ;;  %v5215_v41 = vld [vmem:[#allocation20 + $0x6f0] sm:$0xff] }
 0x9fd   :  { %v5181_v54 = vld [vmem:[#allocation20 + $0x5e0] sm:$0xff]  ;;  %v9281_v58 = vpack.c.bf16 %v5184_v60, %v5180_v12  ;;  %v5218_v12 = vld [vmem:[#allocation20 + $0x708] sm:$0xff]  ;;  %v5239_v22 = vld [vmem:[#allocation20 + $0x7b0] sm:$0xff] }
 0x9fe   :  { %v9155_v4 = vpack.c.bf16 %v5181_v54, %v5177_v57  ;;  %v5222_v60 = vld [vmem:[#allocation20 + $0x728] sm:$0xff]  ;;  %v9299_v54 = vpack.c.bf16 %v5215_v41, %v5211_v43 }
 0x9ff   :  { %9136 = vmatpush1.bf16.msra.mxu0 %v9135_v1  ;;  %9264 = vmatpush1.bf16.msra.mxu1 %v9263_v2  ;;  %v5188_v1 = vld [vmem:[#allocation20 + $0x618] sm:$0xff]  ;;  %v9173_v61 = vpack.c.bf16 %v5222_v60, %v5218_v12 }
 0xa00   :  { %9138 = vmatprep.subr.bf16.mxu0 %v9137_v7  ;;  %9266 = vmatprep.subr.bf16.mxu1 %v9265_v8  ;;  %v5192_v2 = vld [vmem:[#allocation20 + $0x638] sm:$0xff]  ;;  %v5185_v7 = vld [vmem:[#allocation20 + $0x600] sm:$0xff] }
 0xa01   :  { %v5189_v8 = vld [vmem:[#allocation20 + $0x620] sm:$0xff]  ;;  %v9285_v3 = vpack.c.bf16 %v5192_v2, %v5188_v1  ;;  %v5226_v1 = vld [vmem:[#allocation20 + $0x748] sm:$0xff] }
 0xa02   :  { %v9159_v24 = vpack.c.bf16 %v5189_v8, %v5185_v7  ;;  %v5230_v2 = vld [vmem:[#allocation20 + $0x768] sm:$0xff]  ;;  %v9303_v8 = vpack.c.bf16 %v5223_v63, %v5219_v62  ;;  %v5957_v63 = vld [vmem:[#allocation22 + $0x300] sm:$0xff] }
 0xa03   :  { %9140 = vmatpush1.bf16.msra.mxu0 %v9139_v14  ;;  %9268 = vmatpush1.bf16.msra.mxu1 %v9267_v23  ;;  %v5196_v14 = vld [vmem:[#allocation20 + $0x658] sm:$0xff]  ;;  %v9177_v0 = vpack.c.bf16 %v5230_v2, %v5226_v1  ;;  %v5926_v62 = vld [vmem:[#allocation22 + $0x208] sm:$0xff]  ;;  %v5943_v2 = vld [vmem:[#allocation22 + $0x290] sm:$0xff] }
 0xa04   :  { %9142 = vmatprep.subr.bf16.mxu0 %v9141_v50  ;;  %9270 = vmatprep.subr.bf16.mxu1 %v9269_v21  ;;  %v5200_v23 = vld [vmem:[#allocation20 + $0x678] sm:$0xff]  ;;  %v5193_v50 = vld [vmem:[#allocation20 + $0x640] sm:$0xff]  ;;  %v5958_v1 = vld [vmem:[#allocation22 + $0x308] sm:$0xff] }
 0xa05   :  { %v5197_v21 = vld [vmem:[#allocation20 + $0x660] sm:$0xff]  ;;  %v9289_v53 = vpack.c.bf16 %v5200_v23, %v5196_v14  ;;  %v5234_v14 = vld [vmem:[#allocation20 + $0x788] sm:$0xff] }
 0xa06   :  { %v9163_v25 = vpack.c.bf16 %v5197_v21, %v5193_v50  ;;  %v5238_v23 = vld [vmem:[#allocation20 + $0x7a8] sm:$0xff]  ;;  %v9307_v21 = vpack.c.bf16 %v5231_v11, %v5227_v45  ;;  %v5927_v45 = vld [vmem:[#allocation22 + $0x210] sm:$0xff]  ;;  %v5928_v11 = vld [vmem:[#allocation22 + $0x218] sm:$0xff] }
 0xa07   :  { %9144 = vmatpush1.bf16.msra.mxu0 %v9143_v59  ;;  %9272 = vmatpush1.bf16.msra.mxu1 %v9271_v46  ;;  %v5204_v59 = vld [vmem:[#allocation20 + $0x698] sm:$0xff]  ;;  %v9181_v15 = vpack.c.bf16 %v5238_v23, %v5234_v14 }
 0xa08   :  { %9146 = vmatprep.subr.bf16.mxu0 %v9145_v18  ;;  %9274 = vmatprep.subr.bf16.mxu1 %v9273_v40  ;;  %v5208_v46 = vld [vmem:[#allocation20 + $0x6b8] sm:$0xff]  ;;  %v5201_v18 = vld [vmem:[#allocation20 + $0x680] sm:$0xff] }
 0xa09   :  { %v5205_v40 = vld [vmem:[#allocation20 + $0x6a0] sm:$0xff]  ;;  %v9293_v26 = vpack.c.bf16 %v5208_v46, %v5204_v59  ;;  %v5242_v59 = vld [vmem:[#allocation20 + $0x7c8] sm:$0xff] }
 0xa0a   :  { %v9167_v33 = vpack.c.bf16 %v5205_v40, %v5201_v18  ;;  %v5246_v46 = vld [vmem:[#allocation20 + $0x7e8] sm:$0xff]  ;;  %v9311_v40 = vpack.c.bf16 %v5239_v22, %v5235_v28  ;;  %v5929_v28 = vld [vmem:[#allocation22 + $0x220] sm:$0xff] }
 0xa0b   :  { %9148 = vmatpush1.bf16.msra.mxu0 %v9147_v30  ;;  %9276 = vmatpush1.bf16.msra.mxu1 %v9275_v37  ;;  %v5212_v30 = vld [vmem:[#allocation20 + $0x6d8] sm:$0xff]  ;;  %v5930_v22 = vld [vmem:[#allocation22 + $0x228] sm:$0xff] }
 0xa0c   :  { %9150 = vmatprep.subr.bf16.mxu0 %v9149_v9  ;;  %9278 = vmatprep.subr.bf16.mxu1 %v9277_v35  ;;  %v5216_v37 = vld [vmem:[#allocation20 + $0x6f8] sm:$0xff]  ;;  %v5209_v9 = vld [vmem:[#allocation20 + $0x6c0] sm:$0xff] }
 0xa0d   :  { %v5213_v35 = vld [vmem:[#allocation20 + $0x6e0] sm:$0xff]  ;;  %v9297_v39 = vpack.c.bf16 %v5216_v37, %v5212_v30  ;;  %v9315_v37 = vpack.c.bf16 %v5247_v16, %v5243_v5  ;;  %v5931_v5 = vld [vmem:[#allocation22 + $0x230] sm:$0xff]  ;;  %v5932_v16 = vld [vmem:[#allocation22 + $0x238] sm:$0xff] }
 0xa0e   :  { %v9171_v57 = vpack.c.bf16 %v5213_v35, %v5209_v9 }
 0xa0f   :  { %9152 = vmatpush1.bf16.msra.mxu0 %v9151_v42  ;;  %9280 = vmatpush1.bf16.msra.mxu1 %v9279_v31  ;;  %v5220_v42 = vld [vmem:[#allocation20 + $0x718] sm:$0xff] }
 0xa10   :  { %9154 = vmatprep.subr.bf16.mxu0 %v9153_v55  ;;  %9282 = vmatprep.subr.bf16.mxu1 %v9281_v58  ;;  %v5224_v31 = vld [vmem:[#allocation20 + $0x738] sm:$0xff]  ;;  %v5217_v55 = vld [vmem:[#allocation20 + $0x700] sm:$0xff] }
 0xa11   :  { %v5221_v58 = vld [vmem:[#allocation20 + $0x720] sm:$0xff]  ;;  %v9301_v56 = vpack.c.bf16 %v5224_v31, %v5220_v42 }
 0xa12   :  { %v9175_v7 = vpack.c.bf16 %v5221_v58, %v5217_v55  ;;  %v5942_v55 = vld [vmem:[#allocation22 + $0x288] sm:$0xff]  ;;  %v5973_v58 = vld [vmem:[#allocation22 + $0x380] sm:$0xff] }
 0xa13   :  { %9156 = vmatpush1.bf16.msra.mxu0 %v9155_v4  ;;  %9284 = vmatpush1.bf16.msra.mxu1 %v9283_v6  ;;  %v5228_v4 = vld [vmem:[#allocation20 + $0x758] sm:$0xff] }
 0xa14   :  { %9158 = vmatprep.subr.bf16.mxu0 %v9157_v27  ;;  %9286 = vmatprep.subr.bf16.mxu1 %v9285_v3  ;;  %v5232_v6 = vld [vmem:[#allocation20 + $0x778] sm:$0xff]  ;;  %v5225_v27 = vld [vmem:[#allocation20 + $0x740] sm:$0xff] }
 0xa15   :  { %v5229_v3 = vld [vmem:[#allocation20 + $0x760] sm:$0xff]  ;;  %v9305_v10 = vpack.c.bf16 %v5232_v6, %v5228_v4  ;;  %v5944_v4 = vld [vmem:[#allocation22 + $0x298] sm:$0xff]  ;;  %v5975_v6 = vld [vmem:[#allocation22 + $0x390] sm:$0xff] }
 0xa16   :  { %v9179_v50 = vpack.c.bf16 %v5229_v3, %v5225_v27  ;;  %v9321_v14 = vpack.c.bf16 %v5944_v4, %v5943_v2 }
 0xa17   :  { %9160 = vmatpush1.bf16.msra.mxu0 %v9159_v24  ;;  %9288 = vmatpush1.bf16.msra.mxu1 %v9287_v19  ;;  %v5236_v24 = vld [vmem:[#allocation20 + $0x798] sm:$0xff] }
 0xa18   :  { %9162 = vmatprep.subr.bf16.mxu0 %v9161_v32  ;;  %9290 = vmatprep.subr.bf16.mxu1 %v9289_v53  ;;  %v5240_v19 = vld [vmem:[#allocation20 + $0x7b8] sm:$0xff]  ;;  %v5233_v32 = vld [vmem:[#allocation20 + $0x780] sm:$0xff] }
 0xa19   :  { %v5237_v53 = vld [vmem:[#allocation20 + $0x7a0] sm:$0xff]  ;;  %v9309_v17 = vpack.c.bf16 %v5240_v19, %v5236_v24  ;;  %v5959_v24 = vld [vmem:[#allocation22 + $0x310] sm:$0xff]  ;;  %v5960_v19 = vld [vmem:[#allocation22 + $0x318] sm:$0xff] }
 0xa1a   :  { %v9183_v18 = vpack.c.bf16 %v5237_v53, %v5233_v32  ;;  %v5977_v32 = vld [vmem:[#allocation22 + $0x3a0] sm:$0xff]  ;;  %v5978_v53 = vld [vmem:[#allocation22 + $0x3a8] sm:$0xff] }
 0xa1b   :  { %9164 = vmatpush1.bf16.msra.mxu0 %v9163_v25  ;;  %9292 = vmatpush1.bf16.msra.mxu1 %v9291_v20  ;;  %v5244_v25 = vld [vmem:[#allocation20 + $0x7d8] sm:$0xff] }
 0xa1c   :  { %9166 = vmatprep.subr.bf16.mxu0 %v9165_v47  ;;  %9294 = vmatprep.subr.bf16.mxu1 %v9293_v26  ;;  %v5248_v20 = vld [vmem:[#allocation20 + $0x7f8] sm:$0xff]  ;;  %v5241_v47 = vld [vmem:[#allocation20 + $0x7c0] sm:$0xff]  ;;  %v9185_v26 = vpack.c.bf16 %v5246_v46, %v5242_v59  ;;  %v9357_v46 = vpack.c.bf16 %v5978_v53, %v5977_v32  ;;  %v5955_v53 = vld [vmem:[#allocation22 + $0x2f0] sm:$0xff] }
 0xa1d   :  { %v9313_v13 = vpack.c.bf16 %v5248_v20, %v5244_v25  ;;  %v9187_v30 = vpack.c.bf16 %v5245_v29, %v5241_v47  ;;  %v5961_v25 = vld [vmem:[#allocation22 + $0x320] sm:$0xff]  ;;  %v5962_v20 = vld [vmem:[#allocation22 + $0x328] sm:$0xff]  ;;  %v5979_v47 = vld [vmem:[#allocation22 + $0x3b0] sm:$0xff] }
 0xa1e   :  { %v9359_v29 = vpack.c.bf16 %v5962_v20, %v5961_v25 }
 0xa1f   :  { %9168 = vmatpush1.bf16.msra.mxu0 %v9167_v33  ;;  %9296 = vmatpush1.bf16.msra.mxu1 %v9295_v34  ;;  %v5537_v33 = vld [vmem:[%s10870_s15] sm:$0xf] }
 0xa20   :  { %9170 = vmatprep.subr.bf16.mxu0 %v9169_v38  ;;  %9298 = vmatprep.subr.bf16.mxu1 %v9297_v39  ;;  %v5542_v34 = vrot.slane %v5537_v33, %v10515_v48  ;;  %v5550_v9 = vrot.slane %v5537_v33, %v10517_v49  ;;  %v5546_v35 = vrot.slane %v5537_v33, %v10519_v51  ;;  %v5567_v48 = vld [vmem:[%s10871_s16] sm:$0x3] }
 0xa21   :  { %v5554_v38 = vrot.slane %v5537_v33, %v10521_v52  ;;  %v5941_v52 = vld [vmem:[#allocation22 + $0x280] sm:$0xff]  ;;  %v5963_v33 = vld [vmem:[#allocation22 + $0x330] sm:$0xff] }
 0xa22   :  { %v9317_v27 = vpack.c.bf16 %v5942_v55, %v5941_v52  ;;  %v5951_v52 = vld [vmem:[#allocation22 + $0x2d0] sm:$0xff]  ;;  %v5952_v55 = vld [vmem:[#allocation22 + $0x2d8] sm:$0xff] }
 0xa23   :  { %9172 = vmatpush1.bf16.msra.mxu0 %v9171_v57  ;;  %9300 = vmatpush1.bf16.msra.mxu1 %v9299_v54  ;;  %v9337_v2 = vpack.c.bf16 %v5952_v55, %v5951_v52  ;;  %v5716_v55 = vld [vmem:[#allocation22 + $0x10] sm:$0xff] }
 0xa24   :  { %9174 = vmatprep.subr.bf16.mxu0 %v9173_v61  ;;  %9302 = vmatprep.subr.bf16.mxu1 %v9301_v56  ;;  %v5974_v61 = vld [vmem:[#allocation22 + $0x388] sm:$0xff]  ;;  %v5925_v56 = vld [vmem:[#allocation22 + $0x200] sm:$0xff] }
 0xa25   :  { %v9349_v3 = vpack.c.bf16 %v5974_v61, %v5973_v58  ;;  %v5983_v58 = vld [vmem:[#allocation22 + $0x3d0] sm:$0xff]  ;;  %v5984_v61 = vld [vmem:[#allocation22 + $0x3d8] sm:$0xff] }
 0xa26   :  { %v9369_v4 = vpack.c.bf16 %v5984_v61, %v5983_v58  ;;  %v5717_v58 = vld [vmem:[#allocation22 + $0x18] sm:$0xff] }
 0xa27   :  { %9176 = vmatpush1.bf16.msra.mxu0 %v9175_v7  ;;  %9304 = vmatpush1.bf16.msra.mxu1 %v9303_v8  ;;  %v5976_v7 = vld [vmem:[#allocation22 + $0x398] sm:$0xff]  ;;  %v7168_v8 = vld [vmem:[%s10871_s16 + $0x2] sm:$0x3] }
 0xa28   :  { %9178 = vmatprep.subr.bf16.mxu0 %v9177_v0  ;;  %9306 = vmatprep.subr.bf16.mxu1 %v9305_v10  ;;  %v9319_v0 = vpack.c.bf16 %v5926_v62, %v5925_v56  ;;  %v9351_v10 = vpack.c.bf16 %v5958_v1, %v5957_v63  ;;  %v9353_v23 = vpack.c.bf16 %v5976_v7, %v5975_v6  ;;  %v5935_v63 = vld [vmem:[#allocation22 + $0x250] sm:$0xff]  ;;  %v5936_v1 = vld [vmem:[#allocation22 + $0x258] sm:$0xff] }
 0xa29   :  { %v5967_v6 = vld [vmem:[#allocation22 + $0x350] sm:$0xff]  ;;  %v5968_v7 = vld [vmem:[#allocation22 + $0x358] sm:$0xff] }
 0xa2b   :  { %9180 = vmatpush1.bf16.msra.mxu0 %v9179_v50  ;;  %9308 = vmatpush1.bf16.msra.mxu1 %v9307_v21  ;;  %v5945_v50 = vld [vmem:[#allocation22 + $0x2a0] sm:$0xff]  ;;  %v5946_v21 = vld [vmem:[#allocation22 + $0x2a8] sm:$0xff] }
 0xa2c   :  { %9182 = vmatprep.subr.bf16.mxu0 %v9181_v15  ;;  %9310 = vmatprep.subr.bf16.mxu1 %v9309_v17  ;;  %v9323_v15 = vpack.c.bf16 %v5928_v11, %v5927_v45  ;;  %v9355_v17 = vpack.c.bf16 %v5960_v19, %v5959_v24  ;;  %v9325_v59 = vpack.c.bf16 %v5946_v21, %v5945_v50  ;;  %v5937_v11 = vld [vmem:[#allocation22 + $0x260] sm:$0xff]  ;;  %v5938_v24 = vld [vmem:[#allocation22 + $0x268] sm:$0xff] }
 0xa2d   :  { %v9371_v45 = vpack.c.bf16 %v5968_v7, %v5967_v6  ;;  %v5969_v19 = vld [vmem:[#allocation22 + $0x360] sm:$0xff]  ;;  %v5970_v50 = vld [vmem:[#allocation22 + $0x368] sm:$0xff]  ;;  %v9343_v21 = vpack.c.bf16 %v5938_v24, %v5937_v11  ;;  %v5736_v24 = vld [vmem:[#allocation22 + $0xb0] sm:$0xff] }
 0xa2e   :  { %v9375_v32 = vpack.c.bf16 %v5970_v50, %v5969_v19  ;;  %v5735_v6 = vld [vmem:[#allocation22 + $0xa8] sm:$0xff]  ;;  %v5766_v7 = vld [vmem:[#allocation22 + $0x1a0] sm:$0xff]  ;;  %v5737_v19 = vld [vmem:[#allocation22 + $0xb8] sm:$0xff] }
 0xa2f   :  { %9184 = vmatpush1.bf16.msra.mxu0 %v9183_v18  ;;  %9312 = vmatpush1.bf16.msra.mxu1 %v9311_v40  ;;  %v5947_v18 = vld [vmem:[#allocation22 + $0x2b0] sm:$0xff]  ;;  %v5948_v40 = vld [vmem:[#allocation22 + $0x2b8] sm:$0xff] }
 0xa30   :  { %9186 = vmatprep.subr.bf16.mxu0 %v9185_v26  ;;  %9314 = vmatprep.subr.bf16.mxu1 %v9313_v13  ;;  %v5980_v26 = vld [vmem:[#allocation22 + $0x3b8] sm:$0xff]  ;;  %v9327_v13 = vpack.c.bf16 %v5930_v22, %v5929_v28  ;;  %v5768_v50 = vld [vmem:[#allocation22 + $0x1b0] sm:$0xff] }
 0xa31   :  { %v5988_v22 = vld [vmem:[#allocation22 + $0x3f8] sm:$0xff] }
 0xa33   :  { %9188 = vmatpush1.bf16.msra.mxu0 %v9187_v30  ;;  %9316 = vmatpush1.bf16.msra.mxu1 %v9315_v37  ;;  %v9329_v30 = vpack.c.bf16 %v5948_v40, %v5947_v18  ;;  %v9361_v37 = vpack.c.bf16 %v5980_v26, %v5979_v47  ;;  %v5971_v18 = vld [vmem:[#allocation22 + $0x370] sm:$0xff]  ;;  %v5972_v40 = vld [vmem:[#allocation22 + $0x378] sm:$0xff]  ;;  %v5730_v26 = vld [vmem:[#allocation22 + $0x80] sm:$0xff] }
 0xa34   :  { %v9379_v47 = vpack.c.bf16 %v5972_v40, %v5971_v18  ;;  %v5770_v18 = vld [vmem:[#allocation22 + $0x1c0] sm:$0xff]  ;;  %v5771_v40 = vld [vmem:[#allocation22 + $0x1c8] sm:$0xff] }
 0xa36   :  { %5385 = vmatmul.mubr.f32.vlgmr.msra.gmra.mrb[30].mxu0 %v10713_v36  ;;  %5527 = vmatmul.mubr.f32.vlgmr.msra.gmra.mrb[38].mxu1 %v10713_v36 }
 0xa37   :  { %5636 = vmatprep.mubr.f32.mxu0 %v10055_v44  ;;  %5707 = vmatprep.mubr.f32.mxu1 %v10055_v44 }
 0xb09   :  { %v5386_v39 = vpop.f32.mrb[30].mxu0  ;;  %v5528_v43 = vpop.f32.mrb[38].mxu1 }
 0xb0a   :  { %v5559_v41 = vadd.f32 %v5542_v34, %v5386_v39  ;;  %v5561_v36 = vadd.f32 %v5550_v9, %v5528_v43  ;;  %v5388_v12 = vpop.f32.mrb[31].mxu0  ;;  %v5530_v60 = vpop.f32.mrb[39].mxu1  ;;  %v5964_v34 = vld [vmem:[#allocation22 + $0x338] sm:$0xff]  ;;  %v5949_v9 = vld [vmem:[#allocation22 + $0x2c0] sm:$0xff]  ;;  %v5982_v39 = vld [vmem:[#allocation22 + $0x3c8] sm:$0xff]  ;;  %v9331_v43 = vpack.c.bf16 %v5932_v16, %v5931_v5 }
 0xb0b   :  { %v5560_v42 = vadd.f32 %v5546_v35, %v5388_v12  ;;  %v5562_v31 = vadd.f32 %v5554_v38, %v5530_v60  ;;  %v5950_v35 = vld [vmem:[#allocation22 + $0x2c8] sm:$0xff]  ;;  %v5981_v38 = vld [vmem:[#allocation22 + $0x3c0] sm:$0xff] }
 0xb0c   :  { %v10733_v49 = vmax.f32 %v5559_v41, 0.0  ;;  %v10735_v51 = vmax.f32 %v5561_v36, 0.0  ;;  %v9363_v41 = vpack.c.bf16 %v5964_v34, %v5963_v33  ;;  %v5933_v36 = vld [vmem:[#allocation22 + $0x240] sm:$0xff]  ;;  %v5934_v12 = vld [vmem:[#allocation22 + $0x248] sm:$0xff]  ;;  %v9333_v60 = vpack.c.bf16 %v5950_v35, %v5949_v9 }
 0xb0d   :  { %v10726_v57 = vmax.f32 %v5560_v42, 0.0  ;;  %v10728_v54 = vmax.f32 %v5562_v31, 0.0  ;;  %v9365_v42 = vpack.c.bf16 %v5982_v39, %v5981_v38  ;;  %v5965_v31 = vld [vmem:[#allocation22 + $0x340] sm:$0xff]  ;;  %v9335_v56 = vpack.c.bf16 %v5934_v12, %v5933_v36  ;;  %v5763_v16 = vld [vmem:[#allocation22 + $0x188] sm:$0xff]  ;;  %v5733_v36 = vld [vmem:[#allocation22 + $0x98] sm:$0xff] }
 0xb0e   :  { %v5714_v34 = vld [vmem:[#allocation22] sm:$0xff]  ;;  %v5715_v38 = vld [vmem:[#allocation22 + $0x8] sm:$0xff]  ;;  %v5764_v12 = vld [vmem:[#allocation22 + $0x190] sm:$0xff] }
 0xb0f   :  { %5572 = vmatprep.subr.mxu0 %v10726_v57  ;;  %5643 = vmatprep.subr.mxu1 %v10728_v54  ;;  %v5746_v39 = vld [vmem:[#allocation22 + $0x100] sm:$0xff] }
 0xb10   :  { %5573 = vmatpush1.msra.mxu0 %v10733_v49  ;;  %5644 = vmatpush1.msra.mxu1 %v10735_v51 }
 0xb11   :  { %7166 = vmatmul.mubr.msk.f32.vlgmr.msra.gmra.mrb[34].mxu0 %vm5568_vm3, %v5567_v48  ;;  %7167 = vmatmul.mubr.msk.f32.vlgmr.msra.gmra.mrb[42].mxu1 %vm5568_vm3, %v5567_v48  ;;  %v5966_v48 = vld [vmem:[#allocation22 + $0x348] sm:$0xff] }
 0xb12   :  { %5783 = vmatprep.subr.mxu0 %v10726_v57  ;;  %5854 = vmatprep.subr.mxu1 %v10728_v54  ;;  %v9367_v62 = vpack.c.bf16 %v5966_v48, %v5965_v31  ;;  %v9383_v48 = vpack.c.bf16 %v5715_v38, %v5714_v34  ;;  %v5755_v34 = vld [vmem:[#allocation22 + $0x148] sm:$0xff]  ;;  %v5772_v38 = vld [vmem:[#allocation22 + $0x1d0] sm:$0xff] }
 0xb13   :  { %5784 = vmatpush1.msra.mxu0 %v10733_v49  ;;  %5855 = vmatpush1.msra.mxu1 %v10735_v51 }
 0xb14   :  { %5847 = vmatprep.mubr.f32.mxu0 %v10055_v44  ;;  %5918 = vmatprep.mubr.f32.mxu1 %v10055_v44 }
 0xb15   :  { %7169 = vmatmul.mubr.msk.f32.vlgmr.msra.gmra.mrb[36].mxu0 %vm5568_vm3, %v7168_v8  ;;  %7170 = vmatmul.mubr.msk.f32.vlgmr.msra.gmra.mrb[44].mxu1 %vm5568_vm3, %v7168_v8  ;;  %v5953_v8 = vld [vmem:[#allocation22 + $0x2e0] sm:$0xff] }
 0xb16   :  { %9318 = vmatprep.subr.bf16.mxu0 %v9317_v27  ;;  %9350 = vmatprep.subr.bf16.mxu1 %v9349_v3  ;;  %v5954_v27 = vld [vmem:[#allocation22 + $0x2e8] sm:$0xff]  ;;  %v5985_v3 = vld [vmem:[#allocation22 + $0x3e0] sm:$0xff] }
 0xb17   :  { %9320 = vmatpush3.bf16.msra.mxu0 %v9319_v0  ;;  %9352 = vmatpush3.bf16.msra.mxu1 %v9351_v10  ;;  %v5986_v0 = vld [vmem:[#allocation22 + $0x3e8] sm:$0xff]  ;;  %v9339_v10 = vpack.c.bf16 %v5936_v1, %v5935_v63  ;;  %v5749_v63 = vld [vmem:[#allocation22 + $0x118] sm:$0xff]  ;;  %v5734_v1 = vld [vmem:[#allocation22 + $0xa0] sm:$0xff] }
 0xb18   :  { %9322 = vmatprep.subr.bf16.mxu0 %v9321_v14  ;;  %9354 = vmatprep.subr.bf16.mxu1 %v9353_v23  ;;  %v9341_v14 = vpack.c.bf16 %v5954_v27, %v5953_v8  ;;  %v9373_v23 = vpack.c.bf16 %v5986_v0, %v5985_v3  ;;  %v5767_v8 = vld [vmem:[#allocation22 + $0x1a8] sm:$0xff]  ;;  %v9387_v27 = vpack.c.bf16 %v5717_v58, %v5716_v55  ;;  %v5718_v0 = vld [vmem:[#allocation22 + $0x20] sm:$0xff] }
 0xb19   :  { %v9421_v11 = vpack.c.bf16 %v5767_v8, %v5766_v7  ;;  %v5743_v55 = vld [vmem:[#allocation22 + $0xe8] sm:$0xff]  ;;  %v5774_v58 = vld [vmem:[#allocation22 + $0x1e0] sm:$0xff]  ;;  %v5744_v8 = vld [vmem:[#allocation22 + $0xf0] sm:$0xff] }
 0xb1a   :  { %v5759_v7 = vld [vmem:[#allocation22 + $0x168] sm:$0xff] }
 0xb1b   :  { %9324 = vmatpush3.bf16.msra.mxu0 %v9323_v15  ;;  %9356 = vmatpush3.bf16.msra.mxu1 %v9355_v17  ;;  %v5956_v15 = vld [vmem:[#allocation22 + $0x2f8] sm:$0xff]  ;;  %v5987_v17 = vld [vmem:[#allocation22 + $0x3f0] sm:$0xff] }
 0xb1c   :  { %9326 = vmatprep.subr.bf16.mxu0 %v9325_v59  ;;  %9358 = vmatprep.subr.bf16.mxu1 %v9357_v46  ;;  %v9345_v28 = vpack.c.bf16 %v5956_v15, %v5955_v53  ;;  %v5939_v59 = vld [vmem:[#allocation22 + $0x270] sm:$0xff]  ;;  %v5940_v46 = vld [vmem:[#allocation22 + $0x278] sm:$0xff]  ;;  %v9377_v25 = vpack.c.bf16 %v5988_v22, %v5987_v17 }
 0xb1d   :  { %v9347_v20 = vpack.c.bf16 %v5940_v46, %v5939_v59  ;;  %v5720_v15 = vld [vmem:[#allocation22 + $0x30] sm:$0xff]  ;;  %v5721_v17 = vld [vmem:[#allocation22 + $0x38] sm:$0xff] }
 0xb1e   :  { %v5752_v59 = vld [vmem:[#allocation22 + $0x130] sm:$0xff]  ;;  %v5753_v46 = vld [vmem:[#allocation22 + $0x138] sm:$0xff] }
 0xb1f   :  { %9328 = vmatpush3.bf16.msra.mxu0 %v9327_v13  ;;  %9360 = vmatpush3.bf16.msra.mxu1 %v9359_v29  ;;  %v5731_v13 = vld [vmem:[#allocation22 + $0x88] sm:$0xff]  ;;  %v5762_v29 = vld [vmem:[#allocation22 + $0x180] sm:$0xff] }
 0xb20   :  { %9330 = vmatprep.subr.bf16.mxu0 %v9329_v30  ;;  %9362 = vmatprep.subr.bf16.mxu1 %v9361_v37  ;;  %v9381_v5 = vpack.c.bf16 %v5731_v13, %v5730_v26  ;;  %v9413_v30 = vpack.c.bf16 %v5763_v16, %v5762_v29  ;;  %v9427_v26 = vpack.c.bf16 %v5753_v46, %v5752_v59  ;;  %v5722_v13 = vld [vmem:[#allocation22 + $0x40] sm:$0xff]  ;;  %v5723_v29 = vld [vmem:[#allocation22 + $0x48] sm:$0xff] }
 0xb21   :  { %v9429_v16 = vpack.c.bf16 %v5771_v40, %v5770_v18  ;;  %v6417_v59 = vld [vmem:[#allocation22 + $0x408] sm:$0xff]  ;;  %v6448_v46 = vld [vmem:[#allocation22 + $0x500] sm:$0xff] }
 0xb23   :  { %9332 = vmatpush3.bf16.msra.mxu0 %v9331_v43  ;;  %9364 = vmatpush3.bf16.msra.mxu1 %v9363_v41  ;;  %v5747_v43 = vld [vmem:[#allocation22 + $0x108] sm:$0xff]  ;;  %v5732_v41 = vld [vmem:[#allocation22 + $0x90] sm:$0xff] }
 0xb24   :  { %9334 = vmatprep.subr.bf16.mxu0 %v9333_v60  ;;  %9366 = vmatprep.subr.bf16.mxu1 %v9365_v42  ;;  %v5765_v60 = vld [vmem:[#allocation22 + $0x198] sm:$0xff]  ;;  %v9415_v52 = vpack.c.bf16 %v5747_v43, %v5746_v39  ;;  %v9399_v43 = vpack.c.bf16 %v5723_v29, %v5722_v13  ;;  %v7171_v29 = vld [vmem:[%s10871_s16 + $0x4] sm:$0x3] }
 0xb25   :  { %v5773_v39 = vld [vmem:[#allocation22 + $0x1d8] sm:$0xff] }
 0xb26   :  { %v6467_v13 = vld [vmem:[#allocation22 + $0x598] sm:$0xff] }
 0xb27   :  { %9336 = vmatpush3.bf16.msra.mxu0 %v9335_v56  ;;  %9368 = vmatpush3.bf16.msra.mxu1 %v9367_v62  ;;  %v5748_v62 = vld [vmem:[#allocation22 + $0x110] sm:$0xff] }
 0xb28   :  { %9338 = vmatprep.subr.bf16.mxu0 %v9337_v2  ;;  %9370 = vmatprep.subr.bf16.mxu1 %v9369_v4  ;;  %v9385_v2 = vpack.c.bf16 %v5733_v36, %v5732_v41  ;;  %v9417_v4 = vpack.c.bf16 %v5765_v60, %v5764_v12  ;;  %v9419_v3 = vpack.c.bf16 %v5749_v63, %v5748_v62  ;;  %v5724_v36 = vld [vmem:[#allocation22 + $0x50] sm:$0xff]  ;;  %v5725_v12 = vld [vmem:[#allocation22 + $0x58] sm:$0xff]  ;;  %v5726_v63 = vld [vmem:[#allocation22 + $0x60] sm:$0xff] }
 0xb2b   :  { %9340 = vmatpush3.bf16.msra.mxu0 %v9339_v10  ;;  %9372 = vmatpush3.bf16.msra.mxu1 %v9371_v45  ;;  %v5719_v10 = vld [vmem:[#allocation22 + $0x28] sm:$0xff]  ;;  %v9389_v45 = vpack.c.bf16 %v5735_v6, %v5734_v1  ;;  %v5758_v6 = vld [vmem:[#allocation22 + $0x160] sm:$0xff] }
 0xb2c   :  { %9342 = vmatprep.subr.bf16.mxu0 %v9341_v14  ;;  %9374 = vmatprep.subr.bf16.mxu1 %v9373_v23  ;;  %v5750_v14 = vld [vmem:[#allocation22 + $0x120] sm:$0xff]  ;;  %v5751_v23 = vld [vmem:[#allocation22 + $0x128] sm:$0xff] }
 0xb2d   :  { %v9423_v53 = vpack.c.bf16 %v5751_v23, %v5750_v14  ;;  %v5727_v1 = vld [vmem:[#allocation22 + $0x68] sm:$0xff] }
 0xb2f   :  { %9344 = vmatpush3.bf16.msra.mxu0 %v9343_v21  ;;  %9376 = vmatpush3.bf16.msra.mxu1 %v9375_v32  ;;  %v5769_v21 = vld [vmem:[#allocation22 + $0x1b8] sm:$0xff]  ;;  %v9391_v32 = vpack.c.bf16 %v5719_v10, %v5718_v0  ;;  %v9407_v10 = vpack.c.bf16 %v5727_v1, %v5726_v63 }
 0xb30   :  { %9346 = vmatprep.subr.bf16.mxu0 %v9345_v28  ;;  %9378 = vmatprep.subr.bf16.mxu1 %v9377_v25  ;;  %v9393_v28 = vpack.c.bf16 %v5737_v19, %v5736_v24  ;;  %v9425_v22 = vpack.c.bf16 %v5769_v21, %v5768_v50  ;;  %v5738_v25 = vld [vmem:[#allocation22 + $0xc0] sm:$0xff]  ;;  %v5777_v0 = vld [vmem:[#allocation22 + $0x1f8] sm:$0xff]  ;;  %v5760_v19 = vld [vmem:[#allocation22 + $0x170] sm:$0xff] }
 0xb31   :  { %v5729_v24 = vld [vmem:[#allocation22 + $0x78] sm:$0xff] }
 0xb32   :  { %v5761_v50 = vld [vmem:[#allocation22 + $0x178] sm:$0xff] }
 0xb33   :  { %9348 = vmatpush3.bf16.msra.mxu0 %v9347_v20  ;;  %9380 = vmatpush3.bf16.msra.mxu1 %v9379_v47  ;;  %v5739_v20 = vld [vmem:[#allocation22 + $0xc8] sm:$0xff]  ;;  %v9395_v47 = vpack.c.bf16 %v5721_v17, %v5720_v15  ;;  %v6464_v17 = vld [vmem:[#allocation22 + $0x580] sm:$0xff] }
 0xb34   :  { %9382 = vmatprep.subr.bf16.mxu0 %v9381_v5  ;;  %9414 = vmatprep.subr.bf16.mxu1 %v9413_v30  ;;  %v9397_v5 = vpack.c.bf16 %v5739_v20, %v5738_v25  ;;  %v5754_v30 = vld [vmem:[#allocation22 + $0x140] sm:$0xff]  ;;  %v6433_v15 = vld [vmem:[#allocation22 + $0x488] sm:$0xff]  ;;  %v6434_v20 = vld [vmem:[#allocation22 + $0x490] sm:$0xff] }
 0xb35   :  { %v9431_v41 = vpack.c.bf16 %v5755_v34, %v5754_v30  ;;  %v6449_v25 = vld [vmem:[#allocation22 + $0x508] sm:$0xff]  ;;  %v6418_v30 = vld [vmem:[#allocation22 + $0x410] sm:$0xff]  ;;  %v6419_v34 = vld [vmem:[#allocation22 + $0x418] sm:$0xff] }
 0xbe4   :  { %v10754_v37 = vpop.f32.mrb[34].mxu0  ;;  %v10756_v33 = vpop.f32.mrb[42].mxu1 }
 0xbe5   :  { %v5640_v9 = vpop.f32.mrb[35].mxu0  ;;  %v5711_v35 = vpop.f32.mrb[43].mxu1 }
 0xbe8   :  { %v5849_v42 = vpop.f32.mrb[36].mxu0  ;;  %v5920_v31 = vpop.f32.mrb[44].mxu1 }
 0xbe9   :  { %v5851_v61 = vpop.f32.mrb[37].mxu0  ;;  %v5922_v56 = vpop.f32.mrb[45].mxu1 }
 0xbea   :  { %6053 = vmatprep.mubr.f32.mxu0 %v5851_v61  ;;  %6123 = vmatprep.mubr.f32.mxu1 %v5922_v56  ;;  %v5775_v61 = vld [vmem:[#allocation22 + $0x1e8] sm:$0xff]  ;;  %v9403_v56 = vpack.c.bf16 %v5725_v12, %v5724_v36  ;;  %v9451_v36 = vpack.c.bf16 %v6419_v34, %v6418_v30  ;;  %v6428_v34 = vld [vmem:[#allocation22 + $0x460] sm:$0xff] }
 0xbeb   :  { %6054 = vmatmul.mubr.f32.vlgmr.msra.gmra.mrb[38].mxu0 %v5849_v42  ;;  %6124 = vmatmul.mubr.f32.vlgmr.msra.gmra.mrb[46].mxu1 %v5920_v31  ;;  %v9433_v42 = vpack.c.bf16 %v5773_v39, %v5772_v38  ;;  %v5756_v31 = vld [vmem:[#allocation22 + $0x150] sm:$0xff]  ;;  %v6436_v38 = vld [vmem:[#allocation22 + $0x4a0] sm:$0xff]  ;;  %v6437_v39 = vld [vmem:[#allocation22 + $0x4a8] sm:$0xff] }
 0xbec   :  { %9384 = vmatpush3.bf16.msra.mxu0 %v9383_v48  ;;  %9416 = vmatpush3.bf16.msra.mxu1 %v9415_v52  ;;  %v5757_v48 = vld [vmem:[#allocation22 + $0x158] sm:$0xff]  ;;  %v5742_v52 = vld [vmem:[#allocation22 + $0xe0] sm:$0xff] }
 0xbed   :  { %6193 = vmatprep.mubr.f32.mxu0 %v5640_v9  ;;  %6263 = vmatprep.mubr.f32.mxu1 %v5711_v35  ;;  %v5740_v9 = vld [vmem:[#allocation22 + $0xd0] sm:$0xff]  ;;  %v5741_v35 = vld [vmem:[#allocation22 + $0xd8] sm:$0xff]  ;;  %v9435_v62 = vpack.c.bf16 %v5757_v48, %v5756_v31  ;;  %v9453_v31 = vpack.c.bf16 %v6437_v39, %v6436_v38  ;;  %v6461_v38 = vld [vmem:[#allocation22 + $0x568] sm:$0xff] }
 0xbee   :  { %9386 = vmatprep.subr.bf16.mxu0 %v9385_v2  ;;  %9418 = vmatprep.subr.bf16.mxu1 %v9417_v4  ;;  %v9401_v60 = vpack.c.bf16 %v5741_v35, %v5740_v9  ;;  %v9405_v2 = vpack.c.bf16 %v5743_v55, %v5742_v52  ;;  %v9437_v4 = vpack.c.bf16 %v5775_v61, %v5774_v58  ;;  %v6450_v35 = vld [vmem:[#allocation22 + $0x510] sm:$0xff]  ;;  %v6452_v52 = vld [vmem:[#allocation22 + $0x520] sm:$0xff]  ;;  %v6453_v55 = vld [vmem:[#allocation22 + $0x528] sm:$0xff] }
 0xbef   :  { %v6438_v58 = vld [vmem:[#allocation22 + $0x4b0] sm:$0xff]  ;;  %v6439_v61 = vld [vmem:[#allocation22 + $0x4b8] sm:$0xff]  ;;  %v9487_v1 = vpack.c.bf16 %v6453_v55, %v6452_v52 }
 0xbf0   :  { %9388 = vmatpush3.bf16.msra.mxu0 %v9387_v27  ;;  %9420 = vmatpush3.bf16.msra.mxu1 %v9419_v3  ;;  %v5745_v27 = vld [vmem:[#allocation22 + $0xf8] sm:$0xff]  ;;  %v5776_v3 = vld [vmem:[#allocation22 + $0x1f0] sm:$0xff] }
 0xbf1   :  { %9390 = vmatprep.subr.bf16.mxu0 %v9389_v45  ;;  %9422 = vmatprep.subr.bf16.mxu1 %v9421_v11  ;;  %v9439_v45 = vpack.c.bf16 %v5759_v7, %v5758_v6  ;;  %v5728_v11 = vld [vmem:[#allocation22 + $0x70] sm:$0xff]  ;;  %v9409_v14 = vpack.c.bf16 %v5745_v27, %v5744_v8  ;;  %v9441_v23 = vpack.c.bf16 %v5777_v0, %v5776_v3  ;;  %v6455_v27 = vld [vmem:[#allocation22 + $0x538] sm:$0xff]  ;;  %v6440_v3 = vld [vmem:[#allocation22 + $0x4c0] sm:$0xff] }
 0xbf2   :  { %v9411_v21 = vpack.c.bf16 %v5729_v24, %v5728_v11  ;;  %v9457_v6 = vpack.c.bf16 %v6439_v61, %v6438_v58  ;;  %v6454_v8 = vld [vmem:[#allocation22 + $0x530] sm:$0xff]  ;;  %v6441_v0 = vld [vmem:[#allocation22 + $0x4c8] sm:$0xff]  ;;  %v6431_v52 = vld [vmem:[#allocation22 + $0x478] sm:$0xff] }
 0xbf3   :  { %v6425_v24 = vld [vmem:[#allocation22 + $0x448] sm:$0xff]  ;;  %v6446_v39 = vld [vmem:[#allocation22 + $0x4f0] sm:$0xff]  ;;  %v6463_v58 = vld [vmem:[#allocation22 + $0x578] sm:$0xff] }
 0xbf4   :  { %9392 = vmatpush3.bf16.msra.mxu0 %v9391_v32  ;;  %9424 = vmatpush3.bf16.msra.mxu1 %v9423_v53  ;;  %v9443_v32 = vpack.c.bf16 %v5761_v50, %v5760_v19  ;;  %v6432_v53 = vld [vmem:[#allocation22 + $0x480] sm:$0xff]  ;;  %v9461_v19 = vpack.c.bf16 %v6441_v0, %v6440_v3  ;;  %v6462_v55 = vld [vmem:[#allocation22 + $0x570] sm:$0xff] }
 0xbf5   :  { %9394 = vmatprep.subr.bf16.mxu0 %v9393_v28  ;;  %9426 = vmatprep.subr.bf16.mxu1 %v9425_v22  ;;  %v6465_v28 = vld [vmem:[#allocation22 + $0x588] sm:$0xff]  ;;  %v6416_v22 = vld [vmem:[#allocation22 + $0x400] sm:$0xff]  ;;  %v9445_v18 = vpack.c.bf16 %v6433_v15, %v6432_v53  ;;  %v6442_v53 = vld [vmem:[#allocation22 + $0x4d0] sm:$0xff] }
 0xbf6   :  { %v9477_v40 = vpack.c.bf16 %v6465_v28, %v6464_v17  ;;  %v6443_v15 = vld [vmem:[#allocation22 + $0x4d8] sm:$0xff]  ;;  %v6474_v17 = vld [vmem:[#allocation22 + $0x5d0] sm:$0xff] }
 0xbf7   :  { %v6475_v28 = vld [vmem:[#allocation22 + $0x5d8] sm:$0xff] }
 0xbf8   :  { %9396 = vmatpush3.bf16.msra.mxu0 %v9395_v47  ;;  %9428 = vmatpush3.bf16.msra.mxu1 %v9427_v26  ;;  %v6435_v47 = vld [vmem:[#allocation22 + $0x498] sm:$0xff]  ;;  %v6466_v26 = vld [vmem:[#allocation22 + $0x590] sm:$0xff] }
 0xbf9   :  { %9398 = vmatprep.subr.bf16.mxu0 %v9397_v5  ;;  %9430 = vmatprep.subr.bf16.mxu1 %v9429_v16  ;;  %v9447_v5 = vpack.c.bf16 %v6417_v59, %v6416_v22  ;;  %v9479_v16 = vpack.c.bf16 %v6449_v25, %v6448_v46  ;;  %v9449_v9 = vpack.c.bf16 %v6435_v47, %v6434_v20  ;;  %v6426_v46 = vld [vmem:[#allocation22 + $0x450] sm:$0xff]  ;;  %v6427_v25 = vld [vmem:[#allocation22 + $0x458] sm:$0xff] }
 0xbfa   :  { %v9465_v20 = vpack.c.bf16 %v6443_v15, %v6442_v53  ;;  %v6459_v47 = vld [vmem:[#allocation22 + $0x558] sm:$0xff]  ;;  %v6800_v15 = vld [vmem:[#allocation22 + $0x700] sm:$0xff] }
 0xbfc   :  { %9400 = vmatpush3.bf16.msra.mxu0 %v9399_v43  ;;  %9432 = vmatpush3.bf16.msra.mxu1 %v9431_v41  ;;  %v6468_v43 = vld [vmem:[#allocation22 + $0x5a0] sm:$0xff]  ;;  %v6469_v41 = vld [vmem:[#allocation22 + $0x5a8] sm:$0xff] }
 0xbfd   :  { %9402 = vmatprep.subr.bf16.mxu0 %v9401_v60  ;;  %9434 = vmatprep.subr.bf16.mxu1 %v9433_v42  ;;  %v6420_v60 = vld [vmem:[#allocation22 + $0x420] sm:$0xff]  ;;  %v6421_v42 = vld [vmem:[#allocation22 + $0x428] sm:$0xff]  ;;  %v9485_v48 = vpack.c.bf16 %v6469_v41, %v6468_v43  ;;  %v6447_v43 = vld [vmem:[#allocation22 + $0x4f8] sm:$0xff] }
 0xbfe   :  { %v9455_v63 = vpack.c.bf16 %v6421_v42, %v6420_v60  ;;  %v6478_v41 = vld [vmem:[#allocation22 + $0x5f0] sm:$0xff] }
 0xbff   :  { %v6430_v42 = vld [vmem:[#allocation22 + $0x470] sm:$0xff] }
 0xc00   :  { %9404 = vmatpush3.bf16.msra.mxu0 %v9403_v56  ;;  %9436 = vmatpush3.bf16.msra.mxu1 %v9435_v62  ;;  %v6470_v56 = vld [vmem:[#allocation22 + $0x5b0] sm:$0xff]  ;;  %v6471_v62 = vld [vmem:[#allocation22 + $0x5b8] sm:$0xff]  ;;  %v9475_v61 = vpack.c.bf16 %v6431_v52, %v6430_v42 }
 0xc01   :  { %9406 = vmatprep.subr.bf16.mxu0 %v9405_v2  ;;  %9438 = vmatprep.subr.bf16.mxu1 %v9437_v4  ;;  %v6422_v2 = vld [vmem:[#allocation22 + $0x430] sm:$0xff]  ;;  %v6423_v4 = vld [vmem:[#allocation22 + $0x438] sm:$0xff]  ;;  %v9489_v7 = vpack.c.bf16 %v6471_v62, %v6470_v56  ;;  %v9507_v56 = vpack.c.bf16 %v6463_v58, %v6462_v55 }
 0xc02   :  { %v9459_v11 = vpack.c.bf16 %v6423_v4, %v6422_v2  ;;  %v6791_v42 = vld [vmem:[#allocation22 + $0x6b8] sm:$0xff]  ;;  %v6774_v58 = vld [vmem:[#allocation22 + $0x630] sm:$0xff] }
 0xc04   :  { %9408 = vmatpush3.bf16.msra.mxu0 %v9407_v10  ;;  %9440 = vmatpush3.bf16.msra.mxu1 %v9439_v45  ;;  %v6472_v10 = vld [vmem:[#allocation22 + $0x5c0] sm:$0xff]  ;;  %v6473_v45 = vld [vmem:[#allocation22 + $0x5c8] sm:$0xff] }
 0xc05   :  { %9410 = vmatprep.subr.bf16.mxu0 %v9409_v14  ;;  %9442 = vmatprep.subr.bf16.mxu1 %v9441_v23  ;;  %v9491_v14 = vpack.c.bf16 %v6455_v27, %v6454_v8  ;;  %v6424_v23 = vld [vmem:[#allocation22 + $0x440] sm:$0xff]  ;;  %v9493_v50 = vpack.c.bf16 %v6473_v45, %v6472_v10 }
 0xc06   :  { %v9463_v22 = vpack.c.bf16 %v6425_v24, %v6424_v23  ;;  %v6816_v23 = vld [vmem:[#allocation22 + $0x780] sm:$0xff]  ;;  %v6817_v24 = vld [vmem:[#allocation22 + $0x788] sm:$0xff] }
 0xc08   :  { %9412 = vmatpush3.bf16.msra.mxu0 %v9411_v21  ;;  %9444 = vmatpush3.bf16.msra.mxu1 %v9443_v32  ;;  %v6456_v21 = vld [vmem:[#allocation22 + $0x540] sm:$0xff]  ;;  %v6457_v32 = vld [vmem:[#allocation22 + $0x548] sm:$0xff] }
 0xc09   :  { %6274 = vmatprep.subr.mxu0 %v10726_v57  ;;  %6345 = vmatprep.subr.mxu1 %v10728_v54  ;;  %v9495_v59 = vpack.c.bf16 %v6457_v32, %v6456_v21  ;;  %v6769_v21 = vld [vmem:[#allocation22 + $0x608] sm:$0xff] }
 0xc0b   :  { %6194 = vmatmul.mubr.f32.vlgmr.msra.gmra.mrb[40].mxu0 %v10754_v37  ;;  %6264 = vmatmul.mubr.f32.vlgmr.msra.gmra.mrb[48].mxu1 %v10756_v33  ;;  %v9481_v37 = vpack.c.bf16 %v6467_v13, %v6466_v26  ;;  %v6451_v33 = vld [vmem:[#allocation22 + $0x518] sm:$0xff]  ;;  %v6444_v26 = vld [vmem:[#allocation22 + $0x4e0] sm:$0xff]  ;;  %v6445_v13 = vld [vmem:[#allocation22 + $0x4e8] sm:$0xff] }
 0xc0c   :  { %6275 = vmatpush1.msra.mxu0 %v10733_v49  ;;  %6346 = vmatpush1.msra.mxu1 %v10735_v51  ;;  %v9483_v12 = vpack.c.bf16 %v6451_v33, %v6450_v35  ;;  %v6460_v33 = vld [vmem:[#allocation22 + $0x560] sm:$0xff] }
 0xc0d   :  { %6338 = vmatprep.mubr.f32.mxu0 %v10055_v44  ;;  %6409 = vmatprep.mubr.f32.mxu1 %v10055_v44  ;;  %v9503_v60 = vpack.c.bf16 %v6461_v38, %v6460_v33  ;;  %v6772_v38 = vld [vmem:[#allocation22 + $0x620] sm:$0xff] }
 0xc0e   :  { %9446 = vmatprep.subr.bf16.mxu0 %v9445_v18  ;;  %9478 = vmatprep.subr.bf16.mxu1 %v9477_v40  ;;  %v9497_v18 = vpack.c.bf16 %v6475_v28, %v6474_v17  ;;  %v6458_v40 = vld [vmem:[#allocation22 + $0x550] sm:$0xff]  ;;  %v6801_v17 = vld [vmem:[#allocation22 + $0x708] sm:$0xff] }
 0xc0f   :  { %7172 = vmatmul.mubr.msk.f32.vlgmr.msra.gmra.mrb[42].mxu0 %vm5568_vm3, %v7171_v29  ;;  %7173 = vmatmul.mubr.msk.f32.vlgmr.msra.gmra.mrb[50].mxu1 %vm5568_vm3, %v7171_v29  ;;  %v6476_v29 = vld [vmem:[#allocation22 + $0x5e0] sm:$0xff]  ;;  %v9499_v30 = vpack.c.bf16 %v6459_v47, %v6458_v40  ;;  %v6786_v28 = vld [vmem:[#allocation22 + $0x690] sm:$0xff] }
 0xc10   :  { %9448 = vmatpush3.bf16.msra.mxu0 %v9447_v5  ;;  %9480 = vmatpush3.bf16.msra.mxu1 %v9479_v16  ;;  %v6477_v5 = vld [vmem:[#allocation22 + $0x5e8] sm:$0xff]  ;;  %v9467_v16 = vpack.c.bf16 %v6427_v25, %v6426_v46  ;;  %v9541_v46 = vpack.c.bf16 %v6817_v24, %v6816_v23  ;;  %v6787_v25 = vld [vmem:[#allocation22 + $0x698] sm:$0xff]  ;;  %v7174_v40 = vld [vmem:[%s10871_s16 + $0x6] sm:$0x3] }
 0xc11   :  { %9450 = vmatprep.subr.bf16.mxu0 %v9449_v9  ;;  %9482 = vmatprep.subr.bf16.mxu1 %v9481_v37  ;;  %v6429_v9 = vld [vmem:[#allocation22 + $0x468] sm:$0xff]  ;;  %v9469_v37 = vpack.c.bf16 %v6445_v13, %v6444_v26  ;;  %v9501_v35 = vpack.c.bf16 %v6477_v5, %v6476_v29  ;;  %v9543_v26 = vpack.c.bf16 %v6801_v17, %v6800_v15  ;;  %v6770_v13 = vld [vmem:[#allocation22 + $0x610] sm:$0xff]  ;;  %v6771_v29 = vld [vmem:[#allocation22 + $0x618] sm:$0xff] }
 0xc12   :  { %v9513_v5 = vpack.c.bf16 %v6787_v25, %v6786_v28  ;;  %v6794_v23 = vld [vmem:[#allocation22 + $0x6d0] sm:$0xff]  ;;  %v6795_v24 = vld [vmem:[#allocation22 + $0x6d8] sm:$0xff]  ;;  %v6828_v25 = vld [vmem:[#allocation22 + $0x7e0] sm:$0xff] }
 0xc13   :  { %v6810_v17 = vld [vmem:[#allocation22 + $0x750] sm:$0xff]  ;;  %v6811_v28 = vld [vmem:[#allocation22 + $0x758] sm:$0xff] }
 0xc14   :  { %9452 = vmatpush3.bf16.msra.mxu0 %v9451_v36  ;;  %9484 = vmatpush3.bf16.msra.mxu1 %v9483_v12  ;;  %v6479_v36 = vld [vmem:[#allocation22 + $0x5f8] sm:$0xff]  ;;  %v9471_v12 = vpack.c.bf16 %v6429_v9, %v6428_v34  ;;  %v6788_v9 = vld [vmem:[#allocation22 + $0x6a0] sm:$0xff] }
 0xc15   :  { %9454 = vmatprep.subr.bf16.mxu0 %v9453_v31  ;;  %9486 = vmatprep.subr.bf16.mxu1 %v9485_v48  ;;  %v9473_v31 = vpack.c.bf16 %v6447_v43, %v6446_v39  ;;  %v9505_v48 = vpack.c.bf16 %v6479_v36, %v6478_v41  ;;  %v6803_v34 = vld [vmem:[#allocation22 + $0x718] sm:$0xff]  ;;  %v6773_v39 = vld [vmem:[#allocation22 + $0x628] sm:$0xff]  ;;  %v6804_v36 = vld [vmem:[#allocation22 + $0x720] sm:$0xff] }
 0xc16   :  { %v9519_v52 = vpack.c.bf16 %v6773_v39, %v6772_v38  ;;  %v6783_v38 = vld [vmem:[#allocation22 + $0x678] sm:$0xff] }
 0xc18   :  { %9456 = vmatpush3.bf16.msra.mxu0 %v9455_v63  ;;  %9488 = vmatpush3.bf16.msra.mxu1 %v9487_v1 }
 0xc19   :  { %9458 = vmatprep.subr.bf16.mxu0 %v9457_v6  ;;  %9490 = vmatprep.subr.bf16.mxu1 %v9489_v7 }
 0xc1c   :  { %9460 = vmatpush3.bf16.msra.mxu0 %v9459_v11  ;;  %9492 = vmatpush3.bf16.msra.mxu1 %v9491_v14  ;;  %v6784_v11 = vld [vmem:[#allocation22 + $0x680] sm:$0xff]  ;;  %v6785_v14 = vld [vmem:[#allocation22 + $0x688] sm:$0xff] }
 0xc1d   :  { %9462 = vmatprep.subr.bf16.mxu0 %v9461_v19  ;;  %9494 = vmatprep.subr.bf16.mxu1 %v9493_v50  ;;  %v6768_v50 = vld [vmem:[#allocation22 + $0x600] sm:$0xff] }
 0xc1e   :  { %v9511_v47 = vpack.c.bf16 %v6769_v21, %v6768_v50  ;;  %v6778_v21 = vld [vmem:[#allocation22 + $0x650] sm:$0xff] }
 0xc20   :  { %9464 = vmatpush3.bf16.msra.mxu0 %v9463_v22  ;;  %9496 = vmatpush3.bf16.msra.mxu1 %v9495_v59  ;;  %v9509_v59 = vpack.c.bf16 %v6785_v14, %v6784_v11  ;;  %v6808_v11 = vld [vmem:[#allocation22 + $0x740] sm:$0xff]  ;;  %v6809_v14 = vld [vmem:[#allocation22 + $0x748] sm:$0xff] }
 0xc21   :  { %9466 = vmatprep.subr.bf16.mxu0 %v9465_v20  ;;  %9498 = vmatprep.subr.bf16.mxu1 %v9497_v18  ;;  %v6818_v20 = vld [vmem:[#allocation22 + $0x790] sm:$0xff]  ;;  %v6819_v18 = vld [vmem:[#allocation22 + $0x798] sm:$0xff]  ;;  %v9559_v50 = vpack.c.bf16 %v6809_v14, %v6808_v11  ;;  %v6989_v11 = vld [vmem:[%s10874_s19 + $0x38] sm:$0xff] }
 0xc24   :  { %9468 = vmatpush3.bf16.msra.mxu0 %v9467_v16  ;;  %9500 = vmatpush3.bf16.msra.mxu1 %v9499_v30  ;;  %v9545_v16 = vpack.c.bf16 %v6819_v18, %v6818_v20  ;;  %v6802_v30 = vld [vmem:[#allocation22 + $0x710] sm:$0xff]  ;;  %v6829_v20 = vld [vmem:[#allocation22 + $0x7e8] sm:$0xff] }
 0xc25   :  { %9470 = vmatprep.subr.bf16.mxu0 %v9469_v37  ;;  %9502 = vmatprep.subr.bf16.mxu1 %v9501_v35  ;;  %v6821_v37 = vld [vmem:[#allocation22 + $0x7a8] sm:$0xff]  ;;  %v9515_v35 = vpack.c.bf16 %v6771_v29, %v6770_v13  ;;  %v9547_v33 = vpack.c.bf16 %v6803_v34, %v6802_v30  ;;  %v6780_v13 = vld [vmem:[#allocation22 + $0x660] sm:$0xff] }
 0xc26   :  { %v6781_v29 = vld [vmem:[#allocation22 + $0x668] sm:$0xff] }
 0xc27   :  { %v6813_v30 = vld [vmem:[#allocation22 + $0x768] sm:$0xff] }
 0xc28   :  { %9472 = vmatpush3.bf16.msra.mxu0 %v9471_v12  ;;  %9504 = vmatpush3.bf16.msra.mxu1 %v9503_v60  ;;  %v6805_v12 = vld [vmem:[#allocation22 + $0x728] sm:$0xff]  ;;  %v6790_v60 = vld [vmem:[#allocation22 + $0x6b0] sm:$0xff] }
 0xc29   :  { %9474 = vmatprep.subr.bf16.mxu0 %v9473_v31  ;;  %9506 = vmatprep.subr.bf16.mxu1 %v9505_v48  ;;  %v6822_v31 = vld [vmem:[#allocation22 + $0x7b0] sm:$0xff]  ;;  %v6823_v48 = vld [vmem:[#allocation22 + $0x7b8] sm:$0xff]  ;;  %v9551_v55 = vpack.c.bf16 %v6805_v12, %v6804_v36 }
 0xc2a   :  { %v6815_v36 = vld [vmem:[#allocation22 + $0x778] sm:$0xff] }
 0xc2c   :  { %9476 = vmatpush3.bf16.msra.mxu0 %v9475_v61  ;;  %9508 = vmatpush3.bf16.msra.mxu1 %v9507_v56  ;;  %v6775_v61 = vld [vmem:[#allocation22 + $0x638] sm:$0xff]  ;;  %v9521_v56 = vpack.c.bf16 %v6791_v42, %v6790_v60  ;;  %v10056_v60 = vmov 0.0|0.0  }
 0xc2d   :  { %6626 = vmatprep.subr.mxu0 %v10726_v57  ;;  %6697 = vmatprep.subr.mxu1 %v10728_v54 }
 0xcbe   :  { %v7247_v62 = vpop.f32.mrb[38].mxu0  ;;  %v7282_v63 = vpop.f32.mrb[46].mxu1 }
 0xcbf   :  { %v7248_v1 = vpop.f32.mrb[39].mxu0  ;;  %v7283_v2 = vpop.f32.mrb[47].mxu1 }
 0xcc0   :  { %v7249_v4 = vadd.f32 %v7248_v1, %v7247_v62  ;;  %v7284_v6 = vadd.f32 %v7283_v2, %v7282_v63  ;;  %v9553_v62 = vpack.c.bf16 %v6823_v48, %v6822_v31  ;;  %v6806_v63 = vld [vmem:[#allocation22 + $0x730] sm:$0xff]  ;;  %v6807_v1 = vld [vmem:[#allocation22 + $0x738] sm:$0xff]  ;;  %v6792_v2 = vld [vmem:[#allocation22 + $0x6c0] sm:$0xff] }
 0xcc2   :  { %v6126_v7 = vadd.f32 %v7284_v6, %v7249_v4  ;;  %v6793_v4 = vld [vmem:[#allocation22 + $0x6c8] sm:$0xff]  ;;  %v6824_v6 = vld [vmem:[#allocation22 + $0x7c0] sm:$0xff] }
 0xcde   :  { %v7317_v8 = vpop.f32.mrb[40].mxu0  ;;  %v7352_v27 = vpop.f32.mrb[48].mxu1 }
 0xcdf   :  { %v7318_v3 = vpop.f32.mrb[41].mxu0  ;;  %v7353_v0 = vpop.f32.mrb[49].mxu1 }
 0xce0   :  { %v7319_v10 = vadd.f32 %v7318_v3, %v7317_v8  ;;  %v7354_v45 = vadd.f32 %v7353_v0, %v7352_v27  ;;  %v9523_v8 = vpack.c.bf16 %v6775_v61, %v6774_v58  ;;  %v9555_v27 = vpack.c.bf16 %v6807_v1, %v6806_v63  ;;  %v6776_v3 = vld [vmem:[#allocation22 + $0x640] sm:$0xff]  ;;  %v6777_v0 = vld [vmem:[#allocation22 + $0x648] sm:$0xff]  ;;  %v6983_v58 = vld [vmem:[%s10874_s19 + $0x8] sm:$0xff] }
 0xce2   :  { %v6196_v57 = vadd.f32 %v7319_v10, %v6126_v7  ;;  %v6340_v19 = vpop.f32.mrb[42].mxu0  ;;  %v6411_v54 = vpop.f32.mrb[50].mxu1  ;;  %v6825_v7 = vld [vmem:[#allocation22 + $0x7c8] sm:$0xff]  ;;  %v9525_v10 = vpack.c.bf16 %v6793_v4, %v6792_v2 }
 0xce3   :  { %v6342_v32 = vpop.f32.mrb[43].mxu0  ;;  %v6413_v53 = vpop.f32.mrb[51].mxu1 }
 0xce4   :  { %v10773_v22 = vadd.f32 %v7354_v45, %v6196_v57  ;;  %6544 = vmatprep.mubr.f32.mxu0 %v6342_v32  ;;  %6614 = vmatprep.mubr.f32.mxu1 %v6413_v53  ;;  %v9557_v45 = vpack.c.bf16 %v6825_v7, %v6824_v6  ;;  %v6826_v57 = vld [vmem:[#allocation22 + $0x7d0] sm:$0xff]  ;;  %v6779_v32 = vld [vmem:[#allocation22 + $0x658] sm:$0xff]  ;;  %v9529_v53 = vpack.c.bf16 %v6795_v24, %v6794_v23 }
 0xce5   :  { %6545 = vmatmul.mubr.f32.vlgmr.msra.gmra.mrb[44].mxu0 %v6340_v19  ;;  %6615 = vmatmul.mubr.f32.vlgmr.msra.gmra.mrb[52].mxu1 %v6411_v54  ;;  %v6827_v19 = vld [vmem:[#allocation22 + $0x7d8] sm:$0xff]  ;;  %v9527_v54 = vpack.c.bf16 %v6777_v0, %v6776_v3  ;;  %v9531_v18 = vpack.c.bf16 %v6779_v32, %v6778_v21  ;;  %v6986_v0 = vld [vmem:[%s10874_s19 + $0x20] sm:$0xff] }
 0xce6   :  { %6627 = vmatpush1.msra.mxu0 %v10733_v49  ;;  %6698 = vmatpush1.msra.mxu1 %v10735_v51  ;;  %v6789_v49 = vld [vmem:[#allocation22 + $0x6a8] sm:$0xff]  ;;  %v6820_v51 = vld [vmem:[#allocation22 + $0x7a0] sm:$0xff]  ;;  %v9561_v15 = vpack.c.bf16 %v6827_v19, %v6826_v57  ;;  %v6991_v24 = vld [vmem:[%s10874_s19 + $0x48] sm:$0xff] }
 0xce7   :  { %6690 = vmatprep.mubr.f32.mxu0 %v10055_v44  ;;  %6761 = vmatprep.mubr.f32.mxu1 %v10055_v44  ;;  %v9517_v43 = vpack.c.bf16 %v6789_v49, %v6788_v9  ;;  %v9549_v41 = vpack.c.bf16 %v6821_v37, %v6820_v51  ;;  %v6798_v9 = vld [vmem:[#allocation22 + $0x6f0] sm:$0xff]  ;;  %v6799_v49 = vld [vmem:[#allocation22 + $0x6f8] sm:$0xff] }
 0xce8   :  { %9510 = vmatprep.subr.bf16.mxu0 %v9509_v59  ;;  %9542 = vmatprep.subr.bf16.mxu1 %v9541_v46  ;;  %v6796_v59 = vld [vmem:[#allocation22 + $0x6e0] sm:$0xff]  ;;  %v6797_v46 = vld [vmem:[#allocation22 + $0x6e8] sm:$0xff]  ;;  %v6830_v51 = vld [vmem:[#allocation22 + $0x7f0] sm:$0xff]  ;;  %v9537_v37 = vpack.c.bf16 %v6799_v49, %v6798_v9 }
 0xce9   :  { %7175 = vmatmul.mubr.msk.f32.vlgmr.msra.gmra.mrb[46].mxu0 %vm5568_vm3, %v7174_v40  ;;  %7176 = vmatmul.mubr.msk.f32.vlgmr.msra.gmra.mrb[54].mxu1 %vm5568_vm3, %v7174_v40  ;;  %v9563_v40 = vpack.c.bf16 %v6811_v28, %v6810_v17  ;;  %v6984_v7 = vld [vmem:[%s10874_s19 + $0x10] sm:$0xff]  ;;  %v6990_v23 = vld [vmem:[%s10874_s19 + $0x40] sm:$0xff]  ;;  %v6995_v32 = vld [vmem:[%s10874_s19 + $0x68] sm:$0xff] }
 0xcea   :  { %9512 = vmatpush3.bf16.msra.mxu0 %v9511_v47  ;;  %9544 = vmatpush3.bf16.msra.mxu1 %v9543_v26  ;;  %v9533_v47 = vpack.c.bf16 %v6797_v46, %v6796_v59  ;;  %v9565_v26 = vpack.c.bf16 %v6829_v20, %v6828_v25  ;;  %v9586_v57 = vpack.c.bf16 %v6991_v24, %v6990_v23  ;;  %v6992_v19 = vld [vmem:[%s10874_s19 + $0x50] sm:$0xff]  ;;  %v6994_v21 = vld [vmem:[%s10874_s19 + $0x60] sm:$0xff]  ;;  %v6997_v17 = vld [vmem:[%s10874_s19 + $0x78] sm:$0xff] }
 0xceb   :  { %9514 = vmatprep.subr.bf16.mxu0 %v9513_v5  ;;  %9546 = vmatprep.subr.bf16.mxu1 %v9545_v16  ;;  %v6812_v5 = vld [vmem:[#allocation22 + $0x760] sm:$0xff]  ;;  %v9535_v16 = vpack.c.bf16 %v6781_v29, %v6780_v13 }
 0xcec   :  { %v9567_v34 = vpack.c.bf16 %v6813_v30, %v6812_v5 }
 0xcee   :  { %9516 = vmatpush3.bf16.msra.mxu0 %v9515_v35  ;;  %9548 = vmatpush3.bf16.msra.mxu1 %v9547_v33  ;;  %v6831_v35 = vld [vmem:[#allocation22 + $0x7f8] sm:$0xff]  ;;  %v6782_v33 = vld [vmem:[#allocation22 + $0x670] sm:$0xff] }
 0xcef   :  { %9518 = vmatprep.subr.bf16.mxu0 %v9517_v43  ;;  %9550 = vmatprep.subr.bf16.mxu1 %v9549_v41  ;;  %v9569_v39 = vpack.c.bf16 %v6831_v35, %v6830_v51  ;;  %v9539_v43 = vpack.c.bf16 %v6783_v38, %v6782_v33  ;;  %v6814_v41 = vld [vmem:[#allocation22 + $0x770] sm:$0xff] }
 0xcf0   :  { %v9571_v12 = vpack.c.bf16 %v6815_v36, %v6814_v41 }
 0xcf2   :  { %9520 = vmatpush3.bf16.msra.mxu0 %v9519_v52  ;;  %9552 = vmatpush3.bf16.msra.mxu1 %v9551_v55  ;;  %v6982_v55 = vld [vmem:[%s10874_s19] sm:$0xff] }
 0xcf3   :  { %9522 = vmatprep.subr.bf16.mxu0 %v9521_v56  ;;  %9554 = vmatprep.subr.bf16.mxu1 %v9553_v62  ;;  %v9574_v2 = vpack.c.bf16 %v6983_v58, %v6982_v55 }
 0xcf6   :  { %9524 = vmatpush3.bf16.msra.mxu0 %v9523_v8  ;;  %9556 = vmatpush3.bf16.msra.mxu1 %v9555_v27  ;;  %v6985_v8 = vld [vmem:[%s10874_s19 + $0x18] sm:$0xff] }
 0xcf7   :  { %9526 = vmatprep.subr.bf16.mxu0 %v9525_v10  ;;  %9558 = vmatprep.subr.bf16.mxu1 %v9557_v45  ;;  %v9577_v3 = vpack.c.bf16 %v6985_v8, %v6984_v7  ;;  %v6987_v10 = vld [vmem:[%s10874_s19 + $0x28] sm:$0xff] }
 0xcf8   :  { %v9580_v45 = vpack.c.bf16 %v6987_v10, %v6986_v0 }
 0xcfa   :  { %9528 = vmatpush3.bf16.msra.mxu0 %v9527_v54  ;;  %9560 = vmatpush3.bf16.msra.mxu1 %v9559_v50  ;;  %v6993_v54 = vld [vmem:[%s10874_s19 + $0x58] sm:$0xff] }
 0xcfb   :  { %9530 = vmatprep.subr.bf16.mxu0 %v9529_v53  ;;  %9562 = vmatprep.subr.bf16.mxu1 %v9561_v15  ;;  %v9589_v50 = vpack.c.bf16 %v6993_v54, %v6992_v19  ;;  %v9592_v53 = vpack.c.bf16 %v6995_v32, %v6994_v21  ;;  %v6996_v15 = vld [vmem:[%s10874_s19 + $0x70] sm:$0xff] }
 0xcfc   :  { %v9595_v28 = vpack.c.bf16 %v6997_v17, %v6996_v15 }
 0xcfe   :  { %9532 = vmatpush3.bf16.msra.mxu0 %v9531_v18  ;;  %9564 = vmatpush3.bf16.msra.mxu1 %v9563_v40 }
 0xcff   :  { %9534 = vmatprep.subr.bf16.mxu0 %v9533_v47  ;;  %9566 = vmatprep.subr.bf16.mxu1 %v9565_v26  ;;  %v7177_v26 = vld [vmem:[%s10899_s3] ss:$0 sm:$0xff] }
 0xd02   :  { %9536 = vmatpush3.bf16.msra.mxu0 %v9535_v16  ;;  %9568 = vmatpush3.bf16.msra.mxu1 %v9567_v34  ;;  %v7178_v16 = vld [vmem:[%s10900_s22] ss:$0 sm:$0xff] }
 0xd03   :  { %9538 = vmatprep.subr.bf16.mxu0 %v9537_v37  ;;  %9570 = vmatprep.subr.bf16.mxu1 %v9569_v39 }
 0xd06   :  { %9540 = vmatpush3.bf16.msra.mxu0 %v9539_v43  ;;  %9572 = vmatpush3.bf16.msra.mxu1 %v9571_v12 }
 0xd07   :  { %9573 = vmatprep.subr.bf16.mxu0 %v10056_v60 }
 0xdb8   :  { %v7387_v42 = vpop.f32.mrb[44].mxu0  ;;  %v7422_v31 = vpop.f32.mrb[52].mxu1 }
 0xdb9   :  { %v7388_v48 = vpop.f32.mrb[45].mxu0  ;;  %v7423_v52 = vpop.f32.mrb[53].mxu1 }
 0xdba   :  { %v7389_v61 = vadd.f32 %v7388_v48, %v7387_v42  ;;  %v7424_v56 = vadd.f32 %v7423_v52, %v7422_v31 }
 0xdbc   :  { %v6617_v62 = vadd.f32 %v7424_v56, %v7389_v61  ;;  %v6692_v63 = vpop.f32.mrb[46].mxu0  ;;  %v6763_v1 = vpop.f32.mrb[54].mxu1 }
 0xdbd   :  { %v6694_v4 = vpop.f32.mrb[47].mxu0  ;;  %v6765_v6 = vpop.f32.mrb[55].mxu1 }
 0xdbe   :  { %v6620_v27 = vadd.f32 %v6617_v62, %v10773_v22  ;;  %6896 = vmatprep.mubr.f32.mxu0 %v6694_v4  ;;  %6966 = vmatprep.mubr.f32.mxu1 %v6765_v6  ;;  %v6988_v22 = vld [vmem:[%s10874_s19 + $0x30] sm:$0xff] }
 0xdbf   :  { %6897 = vmatmul.mubr.f32.vlgmr.msra.gmra.mrb[48].mxu0 %v6692_v63  ;;  %6967 = vmatmul.mubr.f32.vlgmr.msra.gmra.mrb[56].mxu1 %v6763_v1  ;;  %v9583_v14 = vpack.c.bf16 %v6989_v11, %v6988_v22 }
 0xdc0   :  { %9575 = vmatpush3.bf16.msra.mxu0 %v9574_v2  ;;  %7610 = vmatprep.mubr.msk.f32.mxu0 %vm10057_vm4, %v10055_v44 }
 0xdc1   :  { %9576 = vmatprep.subr.bf16.mxu0 %v10056_v60 }
 0xdc4   :  { %9578 = vmatpush3.bf16.msra.mxu0 %v9577_v3 }
 0xdc5   :  { %9579 = vmatprep.subr.bf16.mxu0 %v10056_v60 }
 0xdc8   :  { %9581 = vmatpush3.bf16.msra.mxu0 %v9580_v45 }
 0xdc9   :  { %9582 = vmatprep.subr.bf16.mxu0 %v10056_v60 }
 0xdcc   :  { %9584 = vmatpush3.bf16.msra.mxu0 %v9583_v14 }
 0xdcd   :  { %9585 = vmatprep.subr.bf16.mxu0 %v10056_v60 }
 0xdd0   :  { %9587 = vmatpush3.bf16.msra.mxu0 %v9586_v57 }
 0xdd1   :  { %9588 = vmatprep.subr.bf16.mxu0 %v10056_v60 }
 0xdd4   :  { %9590 = vmatpush3.bf16.msra.mxu0 %v9589_v50 }
 0xdd5   :  { %9591 = vmatprep.subr.bf16.mxu0 %v10056_v60 }
 0xdd8   :  { %9593 = vmatpush3.bf16.msra.mxu0 %v9592_v53 }
 0xdd9   :  { %9594 = vmatprep.subr.bf16.mxu0 %v10056_v60 }
 0xddc   :  { %9596 = vmatpush3.bf16.msra.mxu0 %v9595_v28 }
 0xe92   :  { %v7457_v59 = vpop.f32.mrb[48].mxu0  ;;  %v7492_v46 = vpop.f32.mrb[56].mxu1 }
 0xe93   :  { %v7458_v25 = vpop.f32.mrb[49].mxu0  ;;  %v7493_v20 = vpop.f32.mrb[57].mxu1 }
 0xe94   :  { %v7459_v18 = vadd.f32 %v7458_v25, %v7457_v59  ;;  %v7494_v40 = vadd.f32 %v7493_v20, %v7492_v46 }
 0xe96   :  { %v6969_v47 = vadd.f32 %v7494_v40, %v7459_v18 }
 0xe98   :  { %v6972_v13 = vadd.f32 %v6969_v47, %v6620_v27 }
 0xe9a   :  { %v6980_v29 = vadd.f32 %v7177_v26, %v6972_v13 }
 0xe9c   :  { %v6981_v5 = vmax.f32 %v6980_v29, 0.0 }
 0xe9e   :  { %7611 = vmatmul.mubr.f32.vlgmr.msra.gmra.mrb[50].mxu0 %v6981_v5 }
 0xf71   :  { %v7071_v44 = vpop.f32.mrb[50].mxu0 }
 0xf72   :  { %v7072_v30 = vadd.f32 %v7178_v16, %v7071_v44  ;;  %v7612_v34 = vpop.f32.mrb[51].mxu0 }
 0xf74   :  { %v7076_v9 = vsel %vm7075_vm5, %v7072_v30, -inf }
 0xf75   :  { %7077 = vmax.xlane.f32.xlu0 %v7076_v9 }
0x1002   :  { %v7078_v49 = vpop.xlane.xlu0 %7077 }
0x1003   :  { %v7079_v51 = vsub.f32 %v7072_v30, %v7078_v49 }
0x1005   :  { %v7080_v37 = vmul.f32 1.442695, %v7079_v51 }
0x1007   :  { %9710 = vpow2.f32 %v7080_v37 }
0x1011   :  { %v9711_v35 = vpop.eup %9710 }
0x1012   :  { %v7082_v33 = vsel %vm7075_vm5, %v9711_v35, 0.0 }
0x1013   :  { %7083 = vadd.xlane.f32.xlu0 %v7082_v33 }
0x10a0   :  { %v7084_v38 = vpop.xlane.xlu0 %7083 }
0x10a1   :  { %9712 = vlog2.f32 %v7084_v38 }
0x10ab   :  { %v9713_v39 = vpop.eup %9712 }
0x10ac   :  { %v7086_v43 = vmul.f32 0.6931472, %v9713_v39 }
0x10ae   :  { %v7087_v41 = vsub.f32 %v7079_v51, %v7086_v43 }
0x10b0   :  { %7088 = vst.msk [vmem:[#allocation23] sm:$0x3] %vm7075_vm5, %v7087_v41 }
0x10b1   :  { %10011 = shalt.err (!%p10008_p10)
}
0x10b2   :  { %s10901_s23 = sld [smem:[#allocation40_spill]] }
0x10b8   :  { %s10012_s5 = scalar_lea.hbm %s10901_s23, 32 }
0x10b9   :  { %p10013_p11 = scmp.ne.s32.totalorder %s10901_s23, %s10012_s5  ;;  %p10016_p12 = scmp.lt.u32.totalorder %s10012_s5, %s10901_s23 }
0x10bb   :  { %p10018_p13 = pnand %p10016_p12, %p10013_p11 }
0x10bd   :  { %10021 = shalt.err (!%p10018_p13)
}
0x10be   :  { %7098 = dma.vmem_to_hbm [thread:$0]  %s7096_s14, 32, %s10901_s23, [#allocation4]  }
0x10bf   :  { %10036 = dma.done.wait [#allocation4], 32  }
0x10c0   :  { %10037 = vsyncadd [#allocation4], 4294967264 }
0x10c1   :  { %7102 = vsyncpa [#allocation3], 1 }
0x10c2   :  { %7103 = vsyncpa [#allocation6], 1 }
0x10c3   :  { %7104 = vsyncpa [#allocation9], 1 }
0x10c4   :  { %7105 = vsyncpa [#allocation12], 1 }
0x10c5   :  { %7106 = vsyncpa [#allocation15], 1 }
0x10c6   :  { %7107 = vsyncpa [#allocation18], 1 }
0x10c7   :  { %7108 = vsyncpa [#allocation21], 1 }
0x10c8   :  { %7109 = vsyncpa [#allocation4], 1 }

</bundles_post_ra>
